<compile_context>
chip_gen: v6e
topology: v6e:2x2x1
jax: 0.10.0
libtpu: 0.0.40
codegen_flags: <defaults>
</compile_context>

<pallas_src>
import functools
import math

import jax
import jax.numpy as jnp
from jax.experimental import pallas as pl
from jax.experimental.pallas import tpu as pltpu

# ----------------------------- configuration --------------------------------
D_MODEL = 32          # network_config.d_model (TabNet input_dim == output_dim)
N_STEPS = 3           # network_config.num_layers (TabNet n_steps)
OUT_SIZE = 16         # network_config.output_shape[-1]
ACT_FN = "relu"       # network_config.act_fn (last activation of TransformLayer)

N_V = max(OUT_SIZE, 8)      # n_d == n_a
N_D = N_V
N_A = N_V
HID = N_D + N_A             # GLU block width (32)
BN_EPS = 1e-5
SCALE = math.sqrt(0.5)
VBS = 128                   # GhostBatchNorm virtual_batch_size
MAX_VB_PER_BLOCK = 8        # up to 1024 rows per grid step

BATCH = 1024                # demo batch: 2 grid blocks x 4 virtual batches


# ------------------------------- helpers -------------------------------------
def _act(h, name):
    if name == "relu":
        return jnp.maximum(h, 0.0)
    if name == "tanh":
        return jnp.tanh(h)
    if name == "sigmoid":
        return 1.0 / (1.0 + jnp.exp(-h))
    return h  # identity


# ------------------------------- kernel --------------------------------------
def _tabnet_encoder_kernel(x_ref, w32_ref, w96_ref, b_ref, o_ref, *, n_groups):
    """Feature-major fused TabNet encoder.

    x_ref : (D_MODEL, R)        initial_bn already applied, batch in lanes
    w32_ref: (320, 32)          [w_s0^T ; w_s1^T ; w_step0^T(stacked a|b)]
    w96_ref: (208, 96)          [w_step1^T(block-diag a|b) ; w_final lifted]
    b_ref : (OUT_SIZE, 1)       final bias
    o_ref : (OUT_SIZE, R)       lane-dense output
    """
    f32 = jnp.float32

    def gbn(z):
        # Training-mode GhostBatchNorm: per-feature (sublane row) stats over
        # each 128-lane virtual batch.  Two-pass variance, eps=1e-5, identity
        # affine at init.
        def norm(zg):
            m = jnp.mean(zg, axis=1, keepdims=True)
            c = zg - m
            v = jnp.mean(c * c, axis=1, keepdims=True)
            return c * jax.lax.rsqrt(v + BN_EPS)

        if n_groups == 1:
            return norm(z)
        return jnp.concatenate(
            [norm(z[:, g * VBS:(g + 1) * VBS]) for g in range(n_groups)], axis=1)

    def glu(h):
        # rows are arranged [a-half ; b-half]; split is a sublane slice.
        half = h.shape[0] // 2
        a, b = h[:half, :], h[half:, :]
        return a * (1.0 / (1.0 + jnp.exp(-b)))       # exact sigmoid

    def fc_gbn_glu(w, z):
        return glu(gbn(jnp.dot(w, z, preferred_element_type=f32)))

    x = x_ref[...]                                   # (32, R)

    # 8-sublane-aligned slab slices (loaded once per grid step).
    w_s0 = w32_ref[0:2 * HID, :]                     # (64, 32)
    w_s1 = w32_ref[2 * HID:4 * HID, :]               # (64, 32)
    w_st0 = w32_ref[4 * HID:, :]                     # (192, 32)
    w_st1 = w96_ref[0:2 * HID * N_STEPS, :]          # (192, 96)
    w_fin = w96_ref[2 * HID * N_STEPS:, :]           # (16, 96)

    # Shared GLU block (computed once; masked_x == x_bn every step).
    h = fc_gbn_glu(w_s0, x)                                      # (32, R)
    shared = (h + fc_gbn_glu(w_s1, h)) * SCALE                   # (32, R)

    # Step-specific GLU blocks, fused:
    #   layer 0: all steps consume `shared`  -> a/b halves of all steps stacked
    #   layer 1: per-step inputs sit in sublane blocks -> block-diagonal weights
    shared_rep = jnp.concatenate([shared] * N_STEPS, axis=0)     # (96, R)
    t = (shared_rep + fc_gbn_glu(w_st0, shared)) * SCALE         # (96, R) = [t0;t1;t2]
    out_all = (t + fc_gbn_glu(w_st1, t)) * SCALE                 # (96, R) = [o0;o1;o2]

    # d_s = ReLU(out_s[:n_d]); res = sum_s d_s; TransformLayer first relu is
    # the identity on res.  Slice + step-sum + final Linear fold into one
    # matmul: w_fin carries w_final^T at cols [s*HID, s*HID+N_D), zeros else.
    y = jnp.dot(w_fin, jnp.maximum(out_all, 0.0),
                preferred_element_type=f32) + b_ref[...]         # (16, R)
    o_ref[...] = _act(y, ACT_FN)


# ------------------------------ wrapper --------------------------------------
def _choose_blocking(B):
    """rows per grid block, number of blocks, GBN groups per block."""
    if B <= VBS:
        return B, 1, 1
    assert B % VBS == 0, "batch must be <= 128 or a multiple of 128"
    n_vb = B // VBS
    vbb = 1
    for cand in range(min(n_vb, MAX_VB_PER_BLOCK), 0, -1):
        # prefer the largest block that still leaves >= 2 grid blocks (v7x megacore)
        if n_vb % cand == 0 and n_vb // cand >= 2:
            vbb = cand
            break
    return vbb * VBS, n_vb // vbb, vbb


@jax.jit
def encoder_tabnet(x, packed):
    B, D = x.shape
    assert D == D_MODEL
    rows, n_blocks, n_groups = _choose_blocking(B)

    # initial_bn: plain BatchNorm1d over the WHOLE batch (training-mode batch
    # stats, biased two-pass variance).  Done in XLA and fused with the
    # transpose to feature-major layout (batch in lanes).
    mu = jnp.mean(x, axis=0, keepdims=True)
    var = jnp.mean(jnp.square(x - mu), axis=0, keepdims=True)
    x_bn_t = ((x - mu) * jax.lax.rsqrt(var + BN_EPS)).T          # (D, B)

    kernel = functools.partial(_tabnet_encoder_kernel, n_groups=n_groups)

    y_t = pl.pallas_call(
        kernel,
        out_shape=jax.ShapeDtypeStruct((OUT_SIZE, B), jnp.float32),
        grid=(n_blocks,),
        in_specs=[
            pl.BlockSpec((D_MODEL, rows), lambda i: (0, i)),
            pl.BlockSpec(packed["slab32"].shape, lambda i: (0, 0)),   # VMEM-resident
            pl.BlockSpec(packed["slab96"].shape, lambda i: (0, 0)),
            pl.BlockSpec(packed["b_fin"].shape, lambda i: (0, 0)),
        ],
        out_specs=pl.BlockSpec((OUT_SIZE, rows), lambda i: (0, i)),
        compiler_params=pltpu.CompilerParams(
            dimension_semantics=("parallel",)),   # blocks independent; 2 TCs on v7x
    )(x_bn_t, packed["slab32"], packed["slab96"], packed["b_fin"])

    return y_t.T                                                  # (B, OUT_SIZE)


# --------------------------- parameter init ----------------------------------
def _xavier_normal(key, shape, gain):
    fan_in, fan_out = shape[-2], shape[-1]
    std = gain * math.sqrt(2.0 / (fan_in + fan_out))
    return std * jax.random.normal(key, shape, dtype=jnp.float32)


def _glu_gain(fan_in, fan_out):          # pytorch_tabnet.initialize_glu
    return math.sqrt((fan_in + fan_out) / math.sqrt(fan_in))


def _non_glu_gain(fan_in, fan_out):      # pytorch_tabnet.initialize_non_glu
    return math.sqrt((fan_in + fan_out) / math.sqrt(4.0 * fan_in))


def init_params(key):
    """Parameters in the module's native layout (all Linear weights as (in, out))."""
    ks = jax.random.split(key, 7)
    two_hid = 2 * HID
    p = {}
    # two shared GLU fc layers (reused by the initial splitter and every step)
    p["w_s0"] = _xavier_normal(ks[0], (D_MODEL, two_hid), _glu_gain(D_MODEL, two_hid))
    p["w_s1"] = _xavier_normal(ks[1], (HID, two_hid), _glu_gain(HID, two_hid))
    # Initial-splitter-specific GLU layers and the per-step attentive fc exist
    # in the module but are dead code after the sparsemax-over-singleton DCE
    # -> generated for fidelity, never shipped to the kernel.
    p["w_init_spec"] = _xavier_normal(ks[2], (2, HID, two_hid), _glu_gain(HID, two_hid))
    p["w_att"] = _xavier_normal(ks[4], (N_STEPS, N_A, 1), _non_glu_gain(N_A, 1))
    # per-step independent GLU layers
    p["w_step_spec"] = _xavier_normal(ks[3], (N_STEPS, 2, HID, two_hid),
                                      _glu_gain(HID, two_hid))
    # final TransformLayer linear (PyTorch default uniform init)
    lim = 1.0 / math.sqrt(N_V)
    p["w_final"] = jax.random.uniform(ks[5], (N_V, OUT_SIZE), jnp.float32, -lim, lim)
    p["b_final"] = jax.random.uniform(ks[6], (1, OUT_SIZE), jnp.float32, -lim, lim)
    return p


def pack_params(p):
    """One-time, output-preserving re-layout for the fused feature-major kernel."""
    wstp = p["w_step_spec"]                                      # (S, 2, 32, 64)

    ws0_t = p["w_s0"].T                                          # (64, 32) rows [a;b]
    ws1_t = p["w_s1"].T                                          # (64, 32)

    # step layer-0: a-halves of all steps stacked first, then all b-halves.
    w0_t = jnp.concatenate(
        [wstp[s, 0, :, :HID].T for s in range(N_STEPS)]
        + [wstp[s, 0, :, HID:].T for s in range(N_STEPS)], axis=0)   # (192, 32)

    # step layer-1: two stacked block-diagonals (a-blocks then b-blocks).
    w1_t = jnp.zeros((2 * HID * N_STEPS, HID * N_STEPS), jnp.float32)
    for s in range(N_STEPS):
        c = slice(s * HID, (s + 1) * HID)
        w1_t = w1_t.at[s * HID:(s + 1) * HID, c].set(wstp[s, 1, :, :HID].T)
        w1_t = w1_t.at[HID * N_STEPS + s * HID:HID * N_STEPS + (s + 1) * HID,
                       c].set(wstp[s, 1, :, HID:].T)             # (192, 96)

    # final Linear lifted onto the step-concatenated slab: one matmul does the
    # per-step [:n_d] slice, the step-sum and the Linear.
    wf_t = jnp.zeros((OUT_SIZE, HID * N_STEPS), jnp.float32)
    for s in range(N_STEPS):
        wf_t = wf_t.at[:, s * HID:s * HID + N_D].set(p["w_final"].T)   # (16, 96)

    return {
        "slab32": jnp.concatenate([ws0_t, ws1_t, w0_t], axis=0),   # (320, 32)
        "slab96": jnp.concatenate([w1_t, wf_t], axis=0),           # (208, 96)
        "b_fin": p["b_final"].T,                                   # (16, 1)
    }


# --------------------------- pure-JAX reference -------------------------------
def _reference_forward(x, p):
    """Unfused, module-faithful forward (training mode, masked_x == x_bn)."""
    hp = jax.lax.Precision.HIGHEST

    def bn(z):
        m = jnp.mean(z, axis=0, keepdims=True)
        v = jnp.mean(jnp.square(z - m), axis=0, keepdims=True)
        return (z - m) * jax.lax.rsqrt(v + BN_EPS)

    def gbn(z):
        b = z.shape[0]
        if b <= VBS:
            return bn(z)
        return jnp.concatenate(
            [bn(z[i * VBS:(i + 1) * VBS]) for i in range(b // VBS)], axis=0)

    def glu_layer(z, w):
        h = gbn(jnp.dot(z, w, precision=hp))
        return h[:, :HID] * jax.nn.sigmoid(h[:, HID:])

    xb = bn(x)
    h = glu_layer(xb, p["w_s0"])
    shared = (h + glu_layer(h, p["w_s1"])) * SCALE
    res = jnp.zeros((x.shape[0], N_D), jnp.float32)
    for s in range(N_STEPS):
        t = (shared + glu_layer(shared, p["w_step_spec"][s, 0])) * SCALE
        out = (t + glu_layer(t, p["w_step_spec"][s, 1])) * SCALE
        res = res + jnp.maximum(out[:, :N_D], 0.0)
    y = jnp.dot(jnp.maximum(res, 0.0), p["w_final"], precision=hp) + p["b_final"]
    return _act(y, ACT_FN)


# --------------------------------- main ---------------------------------------
if __name__ == "__main__":
    key = jax.random.PRNGKey(0)
    kx, kp = jax.random.split(key)
    params = init_params(kp)
    packed = pack_params(params)

    # 1024 rows == 2 grid blocks of 512 (>=2 blocks for v7x megacore), each
    # containing 4 GhostBatchNorm virtual batches handled inside the kernel.
    x = jax.random.normal(kx, (BATCH, D_MODEL), dtype=jnp.float32)
    y = jax.block_until_ready(encoder_tabnet(x, packed))
    assert y.shape == (BATCH, OUT_SIZE), y.shape
    assert bool(jnp.all(jnp.isfinite(y)))
    y_ref = _reference_forward(x, params)
    err = float(jnp.max(jnp.abs(y - y_ref)))
    assert err < 1e-2, f"mismatch vs reference: {err}"

    # Small-batch path (single GBN chunk, B < 128) also supported.
    x_small = jax.random.normal(kx, (8, D_MODEL), dtype=jnp.float32)
    y_small = jax.block_until_ready(encoder_tabnet(x_small, packed))
    assert y_small.shape == (8, OUT_SIZE), y_small.shape
    assert bool(jnp.all(jnp.isfinite(y_small)))
    err_small = float(jnp.max(jnp.abs(y_small - _reference_forward(x_small, params))))
    assert err_small < 1e-2, f"mismatch vs reference (small batch): {err_small}"

    print("KERNEL_OK")
</pallas_src>

<mosaic_0001>
module attributes {stable_mosaic.version = 11 : i64} {
  func.func @_tabnet_encoder_kernel(%arg0: i32, %arg1: memref<32x512xf32, #tpu.memory_space<vmem>>, %arg2: memref<320x32xf32, #tpu.memory_space<vmem>>, %arg3: memref<208x96xf32, #tpu.memory_space<vmem>>, %arg4: memref<16x1xf32, #tpu.memory_space<vmem>>, %arg5: memref<16x512xf32, #tpu.memory_space<vmem>>) attributes {dimension_semantics = [#tpu.dimension_semantics<parallel>], iteration_bounds = array<i64: 2>, scalar_prefetch = 0 : i64, scratch_operands = 0 : i64, tpu.core_type = #tpu.core_type<tc>, window_params = [{transform_indices = @transform_0, window_bounds = array<i64: 32, 512>}, {pipeline_mode = #tpu.pipeline_mode<synchronous>, transform_indices = @transform_1, window_bounds = array<i64: 320, 32>}, {pipeline_mode = #tpu.pipeline_mode<synchronous>, transform_indices = @transform_2, window_bounds = array<i64: 208, 96>}, {pipeline_mode = #tpu.pipeline_mode<synchronous>, transform_indices = @transform_3, window_bounds = array<i64: 16, 1>}, {transform_indices = @transform_4, window_bounds = array<i64: 16, 512>}]} {
    %c0 = arith.constant 0 : index
    %c0_0 = arith.constant 0 : index
    %0 = vector.load %arg1[%c0, %c0_0] : memref<32x512xf32, #tpu.memory_space<vmem>>, vector<32x512xf32>
    %c0_1 = arith.constant 0 : index
    %c0_2 = arith.constant 0 : index
    %1 = vector.load %arg2[%c0_1, %c0_2] : memref<320x32xf32, #tpu.memory_space<vmem>>, vector<64x32xf32>
    %c64 = arith.constant 64 : index
    %c0_3 = arith.constant 0 : index
    %2 = vector.load %arg2[%c64, %c0_3] : memref<320x32xf32, #tpu.memory_space<vmem>>, vector<64x32xf32>
    %c128 = arith.constant 128 : index
    %c0_4 = arith.constant 0 : index
    %3 = vector.load %arg2[%c128, %c0_4] : memref<320x32xf32, #tpu.memory_space<vmem>>, vector<192x32xf32>
    %c0_5 = arith.constant 0 : index
    %c0_6 = arith.constant 0 : index
    %4 = vector.load %arg3[%c0_5, %c0_6] : memref<208x96xf32, #tpu.memory_space<vmem>>, vector<192x96xf32>
    %c192 = arith.constant 192 : index
    %c0_7 = arith.constant 0 : index
    %5 = vector.load %arg3[%c192, %c0_7] : memref<208x96xf32, #tpu.memory_space<vmem>>, vector<16x96xf32>
    %cst = arith.constant dense<0.000000e+00> : vector<64x512xf32>
    %6 = tpu.matmul %1, %0, %cst {dimension_numbers = #tpu.dot_dimension_numbers<[1], [0], [0], [1], [0, 0, 1, 1], [], []>} : vector<64x32xf32>, vector<32x512xf32>, vector<64x512xf32> -> vector<64x512xf32>
    %7 = vector.extract_strided_slice %6 {offsets = [0, 0], sizes = [64, 128], strides = [1, 1]} : vector<64x512xf32> to vector<64x128xf32>
    %cst_8 = arith.constant dense<0.000000e+00> : vector<64xf32>
    %8 = vector.multi_reduction <add>, %7, %cst_8 [1] : vector<64x128xf32> to vector<64xf32>
    %9 = vector.shape_cast %8 : vector<64xf32> to vector<64x1xf32>
    %cst_9 = arith.constant 1.280000e+02 : f32
    %10 = vector.broadcast %cst_9 : f32 to vector<64x1xf32>
    %11 = arith.divf %9, %10 : vector<64x1xf32>
    %12 = vector.broadcast %11 : vector<64x1xf32> to vector<64x128xf32>
    %13 = arith.subf %7, %12 : vector<64x128xf32>
    %14 = arith.mulf %13, %13 : vector<64x128xf32>
    %cst_10 = arith.constant dense<0.000000e+00> : vector<64xf32>
    %15 = vector.multi_reduction <add>, %14, %cst_10 [1] : vector<64x128xf32> to vector<64xf32>
    %16 = vector.shape_cast %15 : vector<64xf32> to vector<64x1xf32>
    %cst_11 = arith.constant 1.280000e+02 : f32
    %17 = vector.broadcast %cst_11 : f32 to vector<64x1xf32>
    %18 = arith.divf %16, %17 : vector<64x1xf32>
    %cst_12 = arith.constant 9.99999974E-6 : f32
    %19 = vector.broadcast %cst_12 : f32 to vector<64x1xf32>
    %20 = arith.addf %18, %19 : vector<64x1xf32>
    %21 = math.rsqrt %20 : vector<64x1xf32>
    %22 = vector.broadcast %21 : vector<64x1xf32> to vector<64x128xf32>
    %23 = arith.mulf %13, %22 : vector<64x128xf32>
    %24 = vector.extract_strided_slice %6 {offsets = [0, 128], sizes = [64, 128], strides = [1, 1]} : vector<64x512xf32> to vector<64x128xf32>
    %cst_13 = arith.constant dense<0.000000e+00> : vector<64xf32>
    %25 = vector.multi_reduction <add>, %24, %cst_13 [1] : vector<64x128xf32> to vector<64xf32>
    %26 = vector.shape_cast %25 : vector<64xf32> to vector<64x1xf32>
    %cst_14 = arith.constant 1.280000e+02 : f32
    %27 = vector.broadcast %cst_14 : f32 to vector<64x1xf32>
    %28 = arith.divf %26, %27 : vector<64x1xf32>
    %29 = vector.broadcast %28 : vector<64x1xf32> to vector<64x128xf32>
    %30 = arith.subf %24, %29 : vector<64x128xf32>
    %31 = arith.mulf %30, %30 : vector<64x128xf32>
    %cst_15 = arith.constant dense<0.000000e+00> : vector<64xf32>
    %32 = vector.multi_reduction <add>, %31, %cst_15 [1] : vector<64x128xf32> to vector<64xf32>
    %33 = vector.shape_cast %32 : vector<64xf32> to vector<64x1xf32>
    %cst_16 = arith.constant 1.280000e+02 : f32
    %34 = vector.broadcast %cst_16 : f32 to vector<64x1xf32>
    %35 = arith.divf %33, %34 : vector<64x1xf32>
    %cst_17 = arith.constant 9.99999974E-6 : f32
    %36 = vector.broadcast %cst_17 : f32 to vector<64x1xf32>
    %37 = arith.addf %35, %36 : vector<64x1xf32>
    %38 = math.rsqrt %37 : vector<64x1xf32>
    %39 = vector.broadcast %38 : vector<64x1xf32> to vector<64x128xf32>
    %40 = arith.mulf %30, %39 : vector<64x128xf32>
    %41 = vector.extract_strided_slice %6 {offsets = [0, 256], sizes = [64, 128], strides = [1, 1]} : vector<64x512xf32> to vector<64x128xf32>
    %cst_18 = arith.constant dense<0.000000e+00> : vector<64xf32>
    %42 = vector.multi_reduction <add>, %41, %cst_18 [1] : vector<64x128xf32> to vector<64xf32>
    %43 = vector.shape_cast %42 : vector<64xf32> to vector<64x1xf32>
    %cst_19 = arith.constant 1.280000e+02 : f32
    %44 = vector.broadcast %cst_19 : f32 to vector<64x1xf32>
    %45 = arith.divf %43, %44 : vector<64x1xf32>
    %46 = vector.broadcast %45 : vector<64x1xf32> to vector<64x128xf32>
    %47 = arith.subf %41, %46 : vector<64x128xf32>
    %48 = arith.mulf %47, %47 : vector<64x128xf32>
    %cst_20 = arith.constant dense<0.000000e+00> : vector<64xf32>
    %49 = vector.multi_reduction <add>, %48, %cst_20 [1] : vector<64x128xf32> to vector<64xf32>
    %50 = vector.shape_cast %49 : vector<64xf32> to vector<64x1xf32>
    %cst_21 = arith.constant 1.280000e+02 : f32
    %51 = vector.broadcast %cst_21 : f32 to vector<64x1xf32>
    %52 = arith.divf %50, %51 : vector<64x1xf32>
    %cst_22 = arith.constant 9.99999974E-6 : f32
    %53 = vector.broadcast %cst_22 : f32 to vector<64x1xf32>
    %54 = arith.addf %52, %53 : vector<64x1xf32>
    %55 = math.rsqrt %54 : vector<64x1xf32>
    %56 = vector.broadcast %55 : vector<64x1xf32> to vector<64x128xf32>
    %57 = arith.mulf %47, %56 : vector<64x128xf32>
    %58 = vector.extract_strided_slice %6 {offsets = [0, 384], sizes = [64, 128], strides = [1, 1]} : vector<64x512xf32> to vector<64x128xf32>
    %cst_23 = arith.constant dense<0.000000e+00> : vector<64xf32>
    %59 = vector.multi_reduction <add>, %58, %cst_23 [1] : vector<64x128xf32> to vector<64xf32>
    %60 = vector.shape_cast %59 : vector<64xf32> to vector<64x1xf32>
    %cst_24 = arith.constant 1.280000e+02 : f32
    %61 = vector.broadcast %cst_24 : f32 to vector<64x1xf32>
    %62 = arith.divf %60, %61 : vector<64x1xf32>
    %63 = vector.broadcast %62 : vector<64x1xf32> to vector<64x128xf32>
    %64 = arith.subf %58, %63 : vector<64x128xf32>
    %65 = arith.mulf %64, %64 : vector<64x128xf32>
    %cst_25 = arith.constant dense<0.000000e+00> : vector<64xf32>
    %66 = vector.multi_reduction <add>, %65, %cst_25 [1] : vector<64x128xf32> to vector<64xf32>
    %67 = vector.shape_cast %66 : vector<64xf32> to vector<64x1xf32>
    %cst_26 = arith.constant 1.280000e+02 : f32
    %68 = vector.broadcast %cst_26 : f32 to vector<64x1xf32>
    %69 = arith.divf %67, %68 : vector<64x1xf32>
    %cst_27 = arith.constant 9.99999974E-6 : f32
    %70 = vector.broadcast %cst_27 : f32 to vector<64x1xf32>
    %71 = arith.addf %69, %70 : vector<64x1xf32>
    %72 = math.rsqrt %71 : vector<64x1xf32>
    %73 = vector.broadcast %72 : vector<64x1xf32> to vector<64x128xf32>
    %74 = arith.mulf %64, %73 : vector<64x128xf32>
    %75 = tpu.concatenate %23, %40, %57, %74 in 1 : vector<64x128xf32>, vector<64x128xf32>, vector<64x128xf32>, vector<64x128xf32> -> vector<64x512xf32>
    %76 = vector.extract_strided_slice %75 {offsets = [0, 0], sizes = [32, 512], strides = [1, 1]} : vector<64x512xf32> to vector<32x512xf32>
    %77 = vector.extract_strided_slice %75 {offsets = [32, 0], sizes = [32, 512], strides = [1, 1]} : vector<64x512xf32> to vector<32x512xf32>
    %cst_28 = arith.constant 0.000000e+00 : f32
    %78 = vector.broadcast %cst_28 : f32 to vector<32x512xf32>
    %79 = arith.subf %78, %77 : vector<32x512xf32>
    %80 = math.exp %79 : vector<32x512xf32>
    %cst_29 = arith.constant 1.000000e+00 : f32
    %81 = vector.broadcast %cst_29 : f32 to vector<32x512xf32>
    %82 = arith.addf %81, %80 : vector<32x512xf32>
    %cst_30 = arith.constant 1.000000e+00 : f32
    %83 = vector.broadcast %cst_30 : f32 to vector<32x512xf32>
    %84 = arith.divf %83, %82 : vector<32x512xf32>
    %85 = arith.mulf %76, %84 : vector<32x512xf32>
    %cst_31 = arith.constant dense<0.000000e+00> : vector<64x512xf32>
    %86 = tpu.matmul %2, %85, %cst_31 {dimension_numbers = #tpu.dot_dimension_numbers<[1], [0], [0], [1], [0, 0, 1, 1], [], []>} : vector<64x32xf32>, vector<32x512xf32>, vector<64x512xf32> -> vector<64x512xf32>
    %87 = vector.extract_strided_slice %86 {offsets = [0, 0], sizes = [64, 128], strides = [1, 1]} : vector<64x512xf32> to vector<64x128xf32>
    %cst_32 = arith.constant dense<0.000000e+00> : vector<64xf32>
    %88 = vector.multi_reduction <add>, %87, %cst_32 [1] : vector<64x128xf32> to vector<64xf32>
    %89 = vector.shape_cast %88 : vector<64xf32> to vector<64x1xf32>
    %cst_33 = arith.constant 1.280000e+02 : f32
    %90 = vector.broadcast %cst_33 : f32 to vector<64x1xf32>
    %91 = arith.divf %89, %90 : vector<64x1xf32>
    %92 = vector.broadcast %91 : vector<64x1xf32> to vector<64x128xf32>
    %93 = arith.subf %87, %92 : vector<64x128xf32>
    %94 = arith.mulf %93, %93 : vector<64x128xf32>
    %cst_34 = arith.constant dense<0.000000e+00> : vector<64xf32>
    %95 = vector.multi_reduction <add>, %94, %cst_34 [1] : vector<64x128xf32> to vector<64xf32>
    %96 = vector.shape_cast %95 : vector<64xf32> to vector<64x1xf32>
    %cst_35 = arith.constant 1.280000e+02 : f32
    %97 = vector.broadcast %cst_35 : f32 to vector<64x1xf32>
    %98 = arith.divf %96, %97 : vector<64x1xf32>
    %cst_36 = arith.constant 9.99999974E-6 : f32
    %99 = vector.broadcast %cst_36 : f32 to vector<64x1xf32>
    %100 = arith.addf %98, %99 : vector<64x1xf32>
    %101 = math.rsqrt %100 : vector<64x1xf32>
    %102 = vector.broadcast %101 : vector<64x1xf32> to vector<64x128xf32>
    %103 = arith.mulf %93, %102 : vector<64x128xf32>
    %104 = vector.extract_strided_slice %86 {offsets = [0, 128], sizes = [64, 128], strides = [1, 1]} : vector<64x512xf32> to vector<64x128xf32>
    %cst_37 = arith.constant dense<0.000000e+00> : vector<64xf32>
    %105 = vector.multi_reduction <add>, %104, %cst_37 [1] : vector<64x128xf32> to vector<64xf32>
    %106 = vector.shape_cast %105 : vector<64xf32> to vector<64x1xf32>
    %cst_38 = arith.constant 1.280000e+02 : f32
    %107 = vector.broadcast %cst_38 : f32 to vector<64x1xf32>
    %108 = arith.divf %106, %107 : vector<64x1xf32>
    %109 = vector.broadcast %108 : vector<64x1xf32> to vector<64x128xf32>
    %110 = arith.subf %104, %109 : vector<64x128xf32>
    %111 = arith.mulf %110, %110 : vector<64x128xf32>
    %cst_39 = arith.constant dense<0.000000e+00> : vector<64xf32>
    %112 = vector.multi_reduction <add>, %111, %cst_39 [1] : vector<64x128xf32> to vector<64xf32>
    %113 = vector.shape_cast %112 : vector<64xf32> to vector<64x1xf32>
    %cst_40 = arith.constant 1.280000e+02 : f32
    %114 = vector.broadcast %cst_40 : f32 to vector<64x1xf32>
    %115 = arith.divf %113, %114 : vector<64x1xf32>
    %cst_41 = arith.constant 9.99999974E-6 : f32
    %116 = vector.broadcast %cst_41 : f32 to vector<64x1xf32>
    %117 = arith.addf %115, %116 : vector<64x1xf32>
    %118 = math.rsqrt %117 : vector<64x1xf32>
    %119 = vector.broadcast %118 : vector<64x1xf32> to vector<64x128xf32>
    %120 = arith.mulf %110, %119 : vector<64x128xf32>
    %121 = vector.extract_strided_slice %86 {offsets = [0, 256], sizes = [64, 128], strides = [1, 1]} : vector<64x512xf32> to vector<64x128xf32>
    %cst_42 = arith.constant dense<0.000000e+00> : vector<64xf32>
    %122 = vector.multi_reduction <add>, %121, %cst_42 [1] : vector<64x128xf32> to vector<64xf32>
    %123 = vector.shape_cast %122 : vector<64xf32> to vector<64x1xf32>
    %cst_43 = arith.constant 1.280000e+02 : f32
    %124 = vector.broadcast %cst_43 : f32 to vector<64x1xf32>
    %125 = arith.divf %123, %124 : vector<64x1xf32>
    %126 = vector.broadcast %125 : vector<64x1xf32> to vector<64x128xf32>
    %127 = arith.subf %121, %126 : vector<64x128xf32>
    %128 = arith.mulf %127, %127 : vector<64x128xf32>
    %cst_44 = arith.constant dense<0.000000e+00> : vector<64xf32>
    %129 = vector.multi_reduction <add>, %128, %cst_44 [1] : vector<64x128xf32> to vector<64xf32>
    %130 = vector.shape_cast %129 : vector<64xf32> to vector<64x1xf32>
    %cst_45 = arith.constant 1.280000e+02 : f32
    %131 = vector.broadcast %cst_45 : f32 to vector<64x1xf32>
    %132 = arith.divf %130, %131 : vector<64x1xf32>
    %cst_46 = arith.constant 9.99999974E-6 : f32
    %133 = vector.broadcast %cst_46 : f32 to vector<64x1xf32>
    %134 = arith.addf %132, %133 : vector<64x1xf32>
    %135 = math.rsqrt %134 : vector<64x1xf32>
    %136 = vector.broadcast %135 : vector<64x1xf32> to vector<64x128xf32>
    %137 = arith.mulf %127, %136 : vector<64x128xf32>
    %138 = vector.extract_strided_slice %86 {offsets = [0, 384], sizes = [64, 128], strides = [1, 1]} : vector<64x512xf32> to vector<64x128xf32>
    %cst_47 = arith.constant dense<0.000000e+00> : vector<64xf32>
    %139 = vector.multi_reduction <add>, %138, %cst_47 [1] : vector<64x128xf32> to vector<64xf32>
    %140 = vector.shape_cast %139 : vector<64xf32> to vector<64x1xf32>
    %cst_48 = arith.constant 1.280000e+02 : f32
    %141 = vector.broadcast %cst_48 : f32 to vector<64x1xf32>
    %142 = arith.divf %140, %141 : vector<64x1xf32>
    %143 = vector.broadcast %142 : vector<64x1xf32> to vector<64x128xf32>
    %144 = arith.subf %138, %143 : vector<64x128xf32>
    %145 = arith.mulf %144, %144 : vector<64x128xf32>
    %cst_49 = arith.constant dense<0.000000e+00> : vector<64xf32>
    %146 = vector.multi_reduction <add>, %145, %cst_49 [1] : vector<64x128xf32> to vector<64xf32>
    %147 = vector.shape_cast %146 : vector<64xf32> to vector<64x1xf32>
    %cst_50 = arith.constant 1.280000e+02 : f32
    %148 = vector.broadcast %cst_50 : f32 to vector<64x1xf32>
    %149 = arith.divf %147, %148 : vector<64x1xf32>
    %cst_51 = arith.constant 9.99999974E-6 : f32
    %150 = vector.broadcast %cst_51 : f32 to vector<64x1xf32>
    %151 = arith.addf %149, %150 : vector<64x1xf32>
    %152 = math.rsqrt %151 : vector<64x1xf32>
    %153 = vector.broadcast %152 : vector<64x1xf32> to vector<64x128xf32>
    %154 = arith.mulf %144, %153 : vector<64x128xf32>
    %155 = tpu.concatenate %103, %120, %137, %154 in 1 : vector<64x128xf32>, vector<64x128xf32>, vector<64x128xf32>, vector<64x128xf32> -> vector<64x512xf32>
    %156 = vector.extract_strided_slice %155 {offsets = [0, 0], sizes = [32, 512], strides = [1, 1]} : vector<64x512xf32> to vector<32x512xf32>
    %157 = vector.extract_strided_slice %155 {offsets = [32, 0], sizes = [32, 512], strides = [1, 1]} : vector<64x512xf32> to vector<32x512xf32>
    %cst_52 = arith.constant 0.000000e+00 : f32
    %158 = vector.broadcast %cst_52 : f32 to vector<32x512xf32>
    %159 = arith.subf %158, %157 : vector<32x512xf32>
    %160 = math.exp %159 : vector<32x512xf32>
    %cst_53 = arith.constant 1.000000e+00 : f32
    %161 = vector.broadcast %cst_53 : f32 to vector<32x512xf32>
    %162 = arith.addf %161, %160 : vector<32x512xf32>
    %cst_54 = arith.constant 1.000000e+00 : f32
    %163 = vector.broadcast %cst_54 : f32 to vector<32x512xf32>
    %164 = arith.divf %163, %162 : vector<32x512xf32>
    %165 = arith.mulf %156, %164 : vector<32x512xf32>
    %166 = arith.addf %85, %165 : vector<32x512xf32>
    %cst_55 = arith.constant 0.707106769 : f32
    %167 = vector.broadcast %cst_55 : f32 to vector<32x512xf32>
    %168 = arith.mulf %166, %167 : vector<32x512xf32>
    %169 = tpu.concatenate %168, %168, %168 in 0 : vector<32x512xf32>, vector<32x512xf32>, vector<32x512xf32> -> vector<96x512xf32>
    %cst_56 = arith.constant dense<0.000000e+00> : vector<192x512xf32>
    %170 = tpu.matmul %3, %168, %cst_56 {dimension_numbers = #tpu.dot_dimension_numbers<[1], [0], [0], [1], [0, 0, 1, 1], [], []>} : vector<192x32xf32>, vector<32x512xf32>, vector<192x512xf32> -> vector<192x512xf32>
    %171 = vector.extract_strided_slice %170 {offsets = [0, 0], sizes = [192, 128], strides = [1, 1]} : vector<192x512xf32> to vector<192x128xf32>
    %cst_57 = arith.constant dense<0.000000e+00> : vector<192xf32>
    %172 = vector.multi_reduction <add>, %171, %cst_57 [1] : vector<192x128xf32> to vector<192xf32>
    %173 = vector.shape_cast %172 : vector<192xf32> to vector<192x1xf32>
    %cst_58 = arith.constant 1.280000e+02 : f32
    %174 = vector.broadcast %cst_58 : f32 to vector<192x1xf32>
    %175 = arith.divf %173, %174 : vector<192x1xf32>
    %176 = vector.broadcast %175 : vector<192x1xf32> to vector<192x128xf32>
    %177 = arith.subf %171, %176 : vector<192x128xf32>
    %178 = arith.mulf %177, %177 : vector<192x128xf32>
    %cst_59 = arith.constant dense<0.000000e+00> : vector<192xf32>
    %179 = vector.multi_reduction <add>, %178, %cst_59 [1] : vector<192x128xf32> to vector<192xf32>
    %180 = vector.shape_cast %179 : vector<192xf32> to vector<192x1xf32>
    %cst_60 = arith.constant 1.280000e+02 : f32
    %181 = vector.broadcast %cst_60 : f32 to vector<192x1xf32>
    %182 = arith.divf %180, %181 : vector<192x1xf32>
    %cst_61 = arith.constant 9.99999974E-6 : f32
    %183 = vector.broadcast %cst_61 : f32 to vector<192x1xf32>
    %184 = arith.addf %182, %183 : vector<192x1xf32>
    %185 = math.rsqrt %184 : vector<192x1xf32>
    %186 = vector.broadcast %185 : vector<192x1xf32> to vector<192x128xf32>
    %187 = arith.mulf %177, %186 : vector<192x128xf32>
    %188 = vector.extract_strided_slice %170 {offsets = [0, 128], sizes = [192, 128], strides = [1, 1]} : vector<192x512xf32> to vector<192x128xf32>
    %cst_62 = arith.constant dense<0.000000e+00> : vector<192xf32>
    %189 = vector.multi_reduction <add>, %188, %cst_62 [1] : vector<192x128xf32> to vector<192xf32>
    %190 = vector.shape_cast %189 : vector<192xf32> to vector<192x1xf32>
    %cst_63 = arith.constant 1.280000e+02 : f32
    %191 = vector.broadcast %cst_63 : f32 to vector<192x1xf32>
    %192 = arith.divf %190, %191 : vector<192x1xf32>
    %193 = vector.broadcast %192 : vector<192x1xf32> to vector<192x128xf32>
    %194 = arith.subf %188, %193 : vector<192x128xf32>
    %195 = arith.mulf %194, %194 : vector<192x128xf32>
    %cst_64 = arith.constant dense<0.000000e+00> : vector<192xf32>
    %196 = vector.multi_reduction <add>, %195, %cst_64 [1] : vector<192x128xf32> to vector<192xf32>
    %197 = vector.shape_cast %196 : vector<192xf32> to vector<192x1xf32>
    %cst_65 = arith.constant 1.280000e+02 : f32
    %198 = vector.broadcast %cst_65 : f32 to vector<192x1xf32>
    %199 = arith.divf %197, %198 : vector<192x1xf32>
    %cst_66 = arith.constant 9.99999974E-6 : f32
    %200 = vector.broadcast %cst_66 : f32 to vector<192x1xf32>
    %201 = arith.addf %199, %200 : vector<192x1xf32>
    %202 = math.rsqrt %201 : vector<192x1xf32>
    %203 = vector.broadcast %202 : vector<192x1xf32> to vector<192x128xf32>
    %204 = arith.mulf %194, %203 : vector<192x128xf32>
    %205 = vector.extract_strided_slice %170 {offsets = [0, 256], sizes = [192, 128], strides = [1, 1]} : vector<192x512xf32> to vector<192x128xf32>
    %cst_67 = arith.constant dense<0.000000e+00> : vector<192xf32>
    %206 = vector.multi_reduction <add>, %205, %cst_67 [1] : vector<192x128xf32> to vector<192xf32>
    %207 = vector.shape_cast %206 : vector<192xf32> to vector<192x1xf32>
    %cst_68 = arith.constant 1.280000e+02 : f32
    %208 = vector.broadcast %cst_68 : f32 to vector<192x1xf32>
    %209 = arith.divf %207, %208 : vector<192x1xf32>
    %210 = vector.broadcast %209 : vector<192x1xf32> to vector<192x128xf32>
    %211 = arith.subf %205, %210 : vector<192x128xf32>
    %212 = arith.mulf %211, %211 : vector<192x128xf32>
    %cst_69 = arith.constant dense<0.000000e+00> : vector<192xf32>
    %213 = vector.multi_reduction <add>, %212, %cst_69 [1] : vector<192x128xf32> to vector<192xf32>
    %214 = vector.shape_cast %213 : vector<192xf32> to vector<192x1xf32>
    %cst_70 = arith.constant 1.280000e+02 : f32
    %215 = vector.broadcast %cst_70 : f32 to vector<192x1xf32>
    %216 = arith.divf %214, %215 : vector<192x1xf32>
    %cst_71 = arith.constant 9.99999974E-6 : f32
    %217 = vector.broadcast %cst_71 : f32 to vector<192x1xf32>
    %218 = arith.addf %216, %217 : vector<192x1xf32>
    %219 = math.rsqrt %218 : vector<192x1xf32>
    %220 = vector.broadcast %219 : vector<192x1xf32> to vector<192x128xf32>
    %221 = arith.mulf %211, %220 : vector<192x128xf32>
    %222 = vector.extract_strided_slice %170 {offsets = [0, 384], sizes = [192, 128], strides = [1, 1]} : vector<192x512xf32> to vector<192x128xf32>
    %cst_72 = arith.constant dense<0.000000e+00> : vector<192xf32>
    %223 = vector.multi_reduction <add>, %222, %cst_72 [1] : vector<192x128xf32> to vector<192xf32>
    %224 = vector.shape_cast %223 : vector<192xf32> to vector<192x1xf32>
    %cst_73 = arith.constant 1.280000e+02 : f32
    %225 = vector.broadcast %cst_73 : f32 to vector<192x1xf32>
    %226 = arith.divf %224, %225 : vector<192x1xf32>
    %227 = vector.broadcast %226 : vector<192x1xf32> to vector<192x128xf32>
    %228 = arith.subf %222, %227 : vector<192x128xf32>
    %229 = arith.mulf %228, %228 : vector<192x128xf32>
    %cst_74 = arith.constant dense<0.000000e+00> : vector<192xf32>
    %230 = vector.multi_reduction <add>, %229, %cst_74 [1] : vector<192x128xf32> to vector<192xf32>
    %231 = vector.shape_cast %230 : vector<192xf32> to vector<192x1xf32>
    %cst_75 = arith.constant 1.280000e+02 : f32
    %232 = vector.broadcast %cst_75 : f32 to vector<192x1xf32>
    %233 = arith.divf %231, %232 : vector<192x1xf32>
    %cst_76 = arith.constant 9.99999974E-6 : f32
    %234 = vector.broadcast %cst_76 : f32 to vector<192x1xf32>
    %235 = arith.addf %233, %234 : vector<192x1xf32>
    %236 = math.rsqrt %235 : vector<192x1xf32>
    %237 = vector.broadcast %236 : vector<192x1xf32> to vector<192x128xf32>
    %238 = arith.mulf %228, %237 : vector<192x128xf32>
    %239 = tpu.concatenate %187, %204, %221, %238 in 1 : vector<192x128xf32>, vector<192x128xf32>, vector<192x128xf32>, vector<192x128xf32> -> vector<192x512xf32>
    %240 = vector.extract_strided_slice %239 {offsets = [0, 0], sizes = [96, 512], strides = [1, 1]} : vector<192x512xf32> to vector<96x512xf32>
    %241 = vector.extract_strided_slice %239 {offsets = [96, 0], sizes = [96, 512], strides = [1, 1]} : vector<192x512xf32> to vector<96x512xf32>
    %cst_77 = arith.constant 0.000000e+00 : f32
    %242 = vector.broadcast %cst_77 : f32 to vector<96x512xf32>
    %243 = arith.subf %242, %241 : vector<96x512xf32>
    %244 = math.exp %243 : vector<96x512xf32>
    %cst_78 = arith.constant 1.000000e+00 : f32
    %245 = vector.broadcast %cst_78 : f32 to vector<96x512xf32>
    %246 = arith.addf %245, %244 : vector<96x512xf32>
    %cst_79 = arith.constant 1.000000e+00 : f32
    %247 = vector.broadcast %cst_79 : f32 to vector<96x512xf32>
    %248 = arith.divf %247, %246 : vector<96x512xf32>
    %249 = arith.mulf %240, %248 : vector<96x512xf32>
    %250 = arith.addf %169, %249 : vector<96x512xf32>
    %cst_80 = arith.constant 0.707106769 : f32
    %251 = vector.broadcast %cst_80 : f32 to vector<96x512xf32>
    %252 = arith.mulf %250, %251 : vector<96x512xf32>
    %cst_81 = arith.constant dense<0.000000e+00> : vector<192x512xf32>
    %253 = tpu.matmul %4, %252, %cst_81 {dimension_numbers = #tpu.dot_dimension_numbers<[1], [0], [0], [1], [0, 0, 1, 1], [], []>} : vector<192x96xf32>, vector<96x512xf32>, vector<192x512xf32> -> vector<192x512xf32>
    %254 = vector.extract_strided_slice %253 {offsets = [0, 0], sizes = [192, 128], strides = [1, 1]} : vector<192x512xf32> to vector<192x128xf32>
    %cst_82 = arith.constant dense<0.000000e+00> : vector<192xf32>
    %255 = vector.multi_reduction <add>, %254, %cst_82 [1] : vector<192x128xf32> to vector<192xf32>
    %256 = vector.shape_cast %255 : vector<192xf32> to vector<192x1xf32>
    %cst_83 = arith.constant 1.280000e+02 : f32
    %257 = vector.broadcast %cst_83 : f32 to vector<192x1xf32>
    %258 = arith.divf %256, %257 : vector<192x1xf32>
    %259 = vector.broadcast %258 : vector<192x1xf32> to vector<192x128xf32>
    %260 = arith.subf %254, %259 : vector<192x128xf32>
    %261 = arith.mulf %260, %260 : vector<192x128xf32>
    %cst_84 = arith.constant dense<0.000000e+00> : vector<192xf32>
    %262 = vector.multi_reduction <add>, %261, %cst_84 [1] : vector<192x128xf32> to vector<192xf32>
    %263 = vector.shape_cast %262 : vector<192xf32> to vector<192x1xf32>
    %cst_85 = arith.constant 1.280000e+02 : f32
    %264 = vector.broadcast %cst_85 : f32 to vector<192x1xf32>
    %265 = arith.divf %263, %264 : vector<192x1xf32>
    %cst_86 = arith.constant 9.99999974E-6 : f32
    %266 = vector.broadcast %cst_86 : f32 to vector<192x1xf32>
    %267 = arith.addf %265, %266 : vector<192x1xf32>
    %268 = math.rsqrt %267 : vector<192x1xf32>
    %269 = vector.broadcast %268 : vector<192x1xf32> to vector<192x128xf32>
    %270 = arith.mulf %260, %269 : vector<192x128xf32>
    %271 = vector.extract_strided_slice %253 {offsets = [0, 128], sizes = [192, 128], strides = [1, 1]} : vector<192x512xf32> to vector<192x128xf32>
    %cst_87 = arith.constant dense<0.000000e+00> : vector<192xf32>
    %272 = vector.multi_reduction <add>, %271, %cst_87 [1] : vector<192x128xf32> to vector<192xf32>
    %273 = vector.shape_cast %272 : vector<192xf32> to vector<192x1xf32>
    %cst_88 = arith.constant 1.280000e+02 : f32
    %274 = vector.broadcast %cst_88 : f32 to vector<192x1xf32>
    %275 = arith.divf %273, %274 : vector<192x1xf32>
    %276 = vector.broadcast %275 : vector<192x1xf32> to vector<192x128xf32>
    %277 = arith.subf %271, %276 : vector<192x128xf32>
    %278 = arith.mulf %277, %277 : vector<192x128xf32>
    %cst_89 = arith.constant dense<0.000000e+00> : vector<192xf32>
    %279 = vector.multi_reduction <add>, %278, %cst_89 [1] : vector<192x128xf32> to vector<192xf32>
    %280 = vector.shape_cast %279 : vector<192xf32> to vector<192x1xf32>
    %cst_90 = arith.constant 1.280000e+02 : f32
    %281 = vector.broadcast %cst_90 : f32 to vector<192x1xf32>
    %282 = arith.divf %280, %281 : vector<192x1xf32>
    %cst_91 = arith.constant 9.99999974E-6 : f32
    %283 = vector.broadcast %cst_91 : f32 to vector<192x1xf32>
    %284 = arith.addf %282, %283 : vector<192x1xf32>
    %285 = math.rsqrt %284 : vector<192x1xf32>
    %286 = vector.broadcast %285 : vector<192x1xf32> to vector<192x128xf32>
    %287 = arith.mulf %277, %286 : vector<192x128xf32>
    %288 = vector.extract_strided_slice %253 {offsets = [0, 256], sizes = [192, 128], strides = [1, 1]} : vector<192x512xf32> to vector<192x128xf32>
    %cst_92 = arith.constant dense<0.000000e+00> : vector<192xf32>
    %289 = vector.multi_reduction <add>, %288, %cst_92 [1] : vector<192x128xf32> to vector<192xf32>
    %290 = vector.shape_cast %289 : vector<192xf32> to vector<192x1xf32>
    %cst_93 = arith.constant 1.280000e+02 : f32
    %291 = vector.broadcast %cst_93 : f32 to vector<192x1xf32>
    %292 = arith.divf %290, %291 : vector<192x1xf32>
    %293 = vector.broadcast %292 : vector<192x1xf32> to vector<192x128xf32>
    %294 = arith.subf %288, %293 : vector<192x128xf32>
    %295 = arith.mulf %294, %294 : vector<192x128xf32>
    %cst_94 = arith.constant dense<0.000000e+00> : vector<192xf32>
    %296 = vector.multi_reduction <add>, %295, %cst_94 [1] : vector<192x128xf32> to vector<192xf32>
    %297 = vector.shape_cast %296 : vector<192xf32> to vector<192x1xf32>
    %cst_95 = arith.constant 1.280000e+02 : f32
    %298 = vector.broadcast %cst_95 : f32 to vector<192x1xf32>
    %299 = arith.divf %297, %298 : vector<192x1xf32>
    %cst_96 = arith.constant 9.99999974E-6 : f32
    %300 = vector.broadcast %cst_96 : f32 to vector<192x1xf32>
    %301 = arith.addf %299, %300 : vector<192x1xf32>
    %302 = math.rsqrt %301 : vector<192x1xf32>
    %303 = vector.broadcast %302 : vector<192x1xf32> to vector<192x128xf32>
    %304 = arith.mulf %294, %303 : vector<192x128xf32>
    %305 = vector.extract_strided_slice %253 {offsets = [0, 384], sizes = [192, 128], strides = [1, 1]} : vector<192x512xf32> to vector<192x128xf32>
    %cst_97 = arith.constant dense<0.000000e+00> : vector<192xf32>
    %306 = vector.multi_reduction <add>, %305, %cst_97 [1] : vector<192x128xf32> to vector<192xf32>
    %307 = vector.shape_cast %306 : vector<192xf32> to vector<192x1xf32>
    %cst_98 = arith.constant 1.280000e+02 : f32
    %308 = vector.broadcast %cst_98 : f32 to vector<192x1xf32>
    %309 = arith.divf %307, %308 : vector<192x1xf32>
    %310 = vector.broadcast %309 : vector<192x1xf32> to vector<192x128xf32>
    %311 = arith.subf %305, %310 : vector<192x128xf32>
    %312 = arith.mulf %311, %311 : vector<192x128xf32>
    %cst_99 = arith.constant dense<0.000000e+00> : vector<192xf32>
    %313 = vector.multi_reduction <add>, %312, %cst_99 [1] : vector<192x128xf32> to vector<192xf32>
    %314 = vector.shape_cast %313 : vector<192xf32> to vector<192x1xf32>
    %cst_100 = arith.constant 1.280000e+02 : f32
    %315 = vector.broadcast %cst_100 : f32 to vector<192x1xf32>
    %316 = arith.divf %314, %315 : vector<192x1xf32>
    %cst_101 = arith.constant 9.99999974E-6 : f32
    %317 = vector.broadcast %cst_101 : f32 to vector<192x1xf32>
    %318 = arith.addf %316, %317 : vector<192x1xf32>
    %319 = math.rsqrt %318 : vector<192x1xf32>
    %320 = vector.broadcast %319 : vector<192x1xf32> to vector<192x128xf32>
    %321 = arith.mulf %311, %320 : vector<192x128xf32>
    %322 = tpu.concatenate %270, %287, %304, %321 in 1 : vector<192x128xf32>, vector<192x128xf32>, vector<192x128xf32>, vector<192x128xf32> -> vector<192x512xf32>
    %323 = vector.extract_strided_slice %322 {offsets = [0, 0], sizes = [96, 512], strides = [1, 1]} : vector<192x512xf32> to vector<96x512xf32>
    %324 = vector.extract_strided_slice %322 {offsets = [96, 0], sizes = [96, 512], strides = [1, 1]} : vector<192x512xf32> to vector<96x512xf32>
    %cst_102 = arith.constant 0.000000e+00 : f32
    %325 = vector.broadcast %cst_102 : f32 to vector<96x512xf32>
    %326 = arith.subf %325, %324 : vector<96x512xf32>
    %327 = math.exp %326 : vector<96x512xf32>
    %cst_103 = arith.constant 1.000000e+00 : f32
    %328 = vector.broadcast %cst_103 : f32 to vector<96x512xf32>
    %329 = arith.addf %328, %327 : vector<96x512xf32>
    %cst_104 = arith.constant 1.000000e+00 : f32
    %330 = vector.broadcast %cst_104 : f32 to vector<96x512xf32>
    %331 = arith.divf %330, %329 : vector<96x512xf32>
    %332 = arith.mulf %323, %331 : vector<96x512xf32>
    %333 = arith.addf %252, %332 : vector<96x512xf32>
    %cst_105 = arith.constant 0.707106769 : f32
    %334 = vector.broadcast %cst_105 : f32 to vector<96x512xf32>
    %335 = arith.mulf %333, %334 : vector<96x512xf32>
    %cst_106 = arith.constant 0.000000e+00 : f32
    %336 = vector.broadcast %cst_106 : f32 to vector<96x512xf32>
    %337 = arith.maximumf %335, %336 : vector<96x512xf32>
    %cst_107 = arith.constant dense<0.000000e+00> : vector<16x512xf32>
    %338 = tpu.matmul %5, %337, %cst_107 {dimension_numbers = #tpu.dot_dimension_numbers<[1], [0], [0], [1], [0, 0, 1, 1], [], []>} : vector<16x96xf32>, vector<96x512xf32>, vector<16x512xf32> -> vector<16x512xf32>
    %c0_108 = arith.constant 0 : index
    %c0_109 = arith.constant 0 : index
    %339 = vector.load %arg4[%c0_108, %c0_109] : memref<16x1xf32, #tpu.memory_space<vmem>>, vector<16x1xf32>
    %340 = vector.broadcast %339 : vector<16x1xf32> to vector<16x512xf32>
    %341 = arith.addf %338, %340 : vector<16x512xf32>
    %cst_110 = arith.constant 0.000000e+00 : f32
    %342 = vector.broadcast %cst_110 : f32 to vector<16x512xf32>
    %343 = arith.maximumf %341, %342 : vector<16x512xf32>
    %c0_111 = arith.constant 0 : index
    %c0_112 = arith.constant 0 : index
    %344 = vector.load %arg5[%c0_111, %c0_112] : memref<16x512xf32, #tpu.memory_space<vmem>>, vector<16x512xf32>
    tpu.vector_store %arg5[%c0_111, %c0_112], %343 {strides = array<i32>} : memref<16x512xf32, #tpu.memory_space<vmem>>, vector<16x512xf32>,
    return
  }
  func.func @transform_0(%arg0: i32) -> (i32, i32) {
    %c0_i32 = arith.constant 0 : i32
    %c0_i32_0 = arith.constant 0 : i32
    return %c0_i32, %arg0 : i32, i32
  }
  func.func @transform_1(%arg0: i32) -> (i32, i32) {
    %c0_i32 = arith.constant 0 : i32
    %c0_i32_0 = arith.constant 0 : i32
    %c0_i32_1 = arith.constant 0 : i32
    return %c0_i32, %c0_i32_0 : i32, i32
  }
  func.func @transform_2(%arg0: i32) -> (i32, i32) {
    %c0_i32 = arith.constant 0 : i32
    %c0_i32_0 = arith.constant 0 : i32
    %c0_i32_1 = arith.constant 0 : i32
    return %c0_i32, %c0_i32_0 : i32, i32
  }
  func.func @transform_3(%arg0: i32) -> (i32, i32) {
    %c0_i32 = arith.constant 0 : i32
    %c0_i32_0 = arith.constant 0 : i32
    %c0_i32_1 = arith.constant 0 : i32
    return %c0_i32, %c0_i32_0 : i32, i32
  }
  func.func @transform_4(%arg0: i32) -> (i32, i32) {
    %c0_i32 = arith.constant 0 : i32
    %c0_i32_0 = arith.constant 0 : i32
    return %c0_i32, %arg0 : i32, i32
  }
}

</mosaic_0001>

<bundles_post_ra>
// kernel: encoder_tabnet.1
= control target key start
LH: loop header
LB: loop body
LE: loop exit
PB: predicated region body
PF: predicated region fallthrough
CT: control target
= control target key end

     0   :  { %9 = vsyncpa [#allocation4], 0  ;;  %s11907_s0 = inlined_call_operand.vmem [shape: f32[32,1024], index: 0, kind: input, shape index: {}]   ;;  %s11908_s1 = inlined_call_operand.vmem [shape: f32[320,32], index: 1, kind: input, shape index: {}]   ;;  %s11909_s2 = inlined_call_operand.vmem [shape: f32[208,96], index: 2, kind: input, shape index: {}]   ;;  %s11910_s3 = inlined_call_operand.vmem [shape: f32[16,1], index: 3, kind: input, shape index: {}]   ;;  %s11911_s4 = inlined_call_operand.hbm [shape: f32[16,1024], index: 4, kind: output, shape index: {}]  }
   0x1   :  { %11 = vsyncpa [#allocation4 + $0x1], 0  ;;  %s7378_s15 = smov 0   ;;  %s7380_s16 = smov 0  }
   0x2   :  { %s7382_s17 = smov 0   ;;  %s7384_s18 = smov 0  }
   0x3 LB: > { %s6066_s19 = sadd.s32 4294967295, %s7345_s18   ;;  %s6067_s20 = sadd.s32 4294967294, %s7345_s18   ;;  %s7345_s18 = sphi %s7384_s18, %s13076_s18   ;;  %s7341_s17 = sphi %s7382_s17, %s13075_s17   ;;  %s7337_s16 = sphi %s7380_s16, %s13074_s16   ;;  %s7333_s15 = sphi %s7378_s15, %s13073_s15  }
   0x4   : > { %s7401_s21 = sadd.s32 1, %s7345_s18   ;;  %s24_s22 = sadd.s32 1, %s7341_s17 }
   0x5   : > { %s21_s23 = ssub.s32 %s7345_s18, %s7401_s21  ;;  %p31_p0 = scmp.ne.s32.totalorder %s7341_s17, %s7337_s16 }
   0x6   : > { %p22_p1 = scmp.eq.s32.totalorder %s21_s23, 0  ;;  %p32_p2 = scmp.eq.s32.totalorder %s7345_s18, 0 }
   0x7   : > { %p124_p3 = scmp.eq.s32.totalorder %s6066_s19, 1  ;;  %p129_p4 = scmp.ne.s32.totalorder %s7337_s16, %s7333_s15 }
   0x8   : > { %s7414_s24 = scalar_select %p22_p1, %s7341_s17, %s24_s22  }
   0x9   : > { %p33_p5 = por %p32_p2, %p31_p0  ;;  %p7416_p6 = por %p124_p3, %p31_p0 }
   0xa   : > { %p130_p7 = scmp.eq.s32.totalorder %s6067_s20, 1  ;;  %p6069_p9 = scmp.ge.s32.totalorder %s7345_s18, 2 }
   0xc   : > { %p7420_p8 = por %p130_p7, %p129_p4  ;;  %155 = sbr.rel (%p6069_p9) target bundleno = 29 (0x1d), region = 28 }
  0x11   : > { %158 = sbr.rel (!%p33_p5) target bundleno = 29 (0x1d), region = 32  ;;  %s160_s27 = sand.u32 (%p33_p5), 1, %s7341_s17  }
  0x12   : > { %s6213_s28 = sshll.u32 (%p33_p5), %s7345_s18, 5  ;;  %s6070_s29 = sshll.u32 (%p33_p5), %s160_s27, 7 }
  0x13   : > { %s7432_s6 = scalar_lea.vmem (%p33_p5), %s11907_s0, %s6213_s28  ;;  %s162_s7 = scalar_lea.vmem (%p33_p5), [#allocation2], %s6070_s29 }
  0x14   : > { %v178_v0 = vld [vmem:[%s7432_s6] sm:$0xff] (%p33_p5)  ;;  %v180_v1 = vld [vmem:[%s7432_s6 + $0x8] sm:$0xff] (%p33_p5)  ;;  %v182_v2 = vld [vmem:[%s7432_s6 + $0x10] sm:$0xff] (%p33_p5) }
  0x15   : > { %179 = vst [vmem:[%s162_s7] sm:$0xff] (%p33_p5), %v178_v0  ;;  %181 = vst [vmem:[%s162_s7 + $0x8] sm:$0xff] (%p33_p5), %v180_v1  ;;  %v184_v3 = vld [vmem:[%s7432_s6 + $0x18] sm:$0xff] (%p33_p5)  ;;  %v186_v4 = vld [vmem:[%s7432_s6 + $0x40] sm:$0xff] (%p33_p5) }
  0x16   : > { %183 = vst [vmem:[%s162_s7 + $0x10] sm:$0xff] %v182_v2  ;;  %v188_v5 = vld [vmem:[%s7432_s6 + $0x48] sm:$0xff]  ;;  %185 = vst [vmem:[%s162_s7 + $0x18] sm:$0xff] %v184_v3  ;;  %v190_v6 = vld [vmem:[%s7432_s6 + $0x50] sm:$0xff] }
  0x17   : > { %187 = vst [vmem:[%s162_s7 + $0x20] sm:$0xff] %v186_v4  ;;  %189 = vst [vmem:[%s162_s7 + $0x28] sm:$0xff] %v188_v5  ;;  %v192_v7 = vld [vmem:[%s7432_s6 + $0x58] sm:$0xff]  ;;  %v194_v8 = vld [vmem:[%s7432_s6 + $0x80] sm:$0xff] }
  0x18   : > { %191 = vst [vmem:[%s162_s7 + $0x30] sm:$0xff] %v190_v6  ;;  %193 = vst [vmem:[%s162_s7 + $0x38] sm:$0xff] %v192_v7  ;;  %v196_v9 = vld [vmem:[%s7432_s6 + $0x88] sm:$0xff]  ;;  %v198_v10 = vld [vmem:[%s7432_s6 + $0x90] sm:$0xff] }
  0x19   : > { %195 = vst [vmem:[%s162_s7 + $0x40] sm:$0xff] %v194_v8  ;;  %v200_v11 = vld [vmem:[%s7432_s6 + $0x98] sm:$0xff]  ;;  %197 = vst [vmem:[%s162_s7 + $0x48] sm:$0xff] %v196_v9  ;;  %v202_v12 = vld [vmem:[%s7432_s6 + $0xc0] sm:$0xff] }
  0x1a   : > { %199 = vst [vmem:[%s162_s7 + $0x50] sm:$0xff] %v198_v10  ;;  %201 = vst [vmem:[%s162_s7 + $0x58] sm:$0xff] %v200_v11  ;;  %v204_v13 = vld [vmem:[%s7432_s6 + $0xc8] sm:$0xff]  ;;  %v206_v14 = vld [vmem:[%s7432_s6 + $0xd0] sm:$0xff] }
  0x1b   : > { %203 = vst [vmem:[%s162_s7 + $0x60] sm:$0xff] %v202_v12  ;;  %205 = vst [vmem:[%s162_s7 + $0x68] sm:$0xff] %v204_v13  ;;  %v208_v15 = vld [vmem:[%s7432_s6 + $0xd8] sm:$0xff] }
  0x1c   : > { %207 = vst [vmem:[%s162_s7 + $0x70] sm:$0xff] %v206_v14  ;;  %209 = vst [vmem:[%s162_s7 + $0x78] sm:$0xff] %v208_v15 }
  0x1d PF: > { %p6073_p10 = scmp.ge.s32.totalorder %s7345_s18, 1  ;;  %p214_p11 = scmp.lt.s32.totalorder %s7345_s18, 3 }
  0x1f   : > { %p215_p12 = pnand %p6073_p10, %p214_p11 }
  0x21   : > { %218 = sbr.rel (%p215_p12) target bundleno = 3034 (0xbda), region = 55 }
  0x26   : > { %s7453_s8 = sand.u32 1, %s7337_s16   ;;  %v11912_v16 = vmov 0.0   ;;  %v264_v33 = vld [vmem:[%s11908_s1] sm:$0xff]  ;;  %vm330_vm0 = vcmask 261120   ;;  %v265_v34 = vld [vmem:[%s11908_s1 + $0x8] sm:$0xff]  ;;  %v266_v35 = vld [vmem:[%s11908_s1 + $0x10] sm:$0xff] }
  0x27   : > { %s6074_s9 = sshll.u32 %s7453_s8, 7  ;;  %419 = vmatprep.mubr.f32.mxu0 %v11912_v16  ;;  %532 = vmatprep.mubr.f32.mxu1 %v11912_v16  ;;  %v267_v36 = vld [vmem:[%s11908_s1 + $0x18] sm:$0xff]  ;;  %v268_v37 = vld [vmem:[%s11908_s1 + $0x20] sm:$0xff]  ;;  %v269_v38 = vld [vmem:[%s11908_s1 + $0x28] sm:$0xff]  ;;  %vm3770_vm1 = vcmask 785408   ;;  %s6075_s28 = sshll.u32 %s7453_s8, 6 }
  0x28   : > { %s223_s10 = scalar_lea.vmem [#allocation2], %s6074_s9  ;;  %v270_v39 = vld [vmem:[%s11908_s1 + $0x30] sm:$0xff]  ;;  %v271_v40 = vld [vmem:[%s11908_s1 + $0x38] sm:$0xff]  ;;  %s245_s29 = scalar_lea.vmem [#allocation3], %s6075_s28 }
  0x29   : > { %v261_v17 = vld [vmem:[%s223_s10 + $0x68] sm:$0xff]  ;;  %v263_v18 = vld [vmem:[%s223_s10 + $0x78] sm:$0xff]  ;;  %v260_v19 = vld [vmem:[%s223_s10 + $0x60] sm:$0xff]  ;;  %s5999_s30 = sshll.u32 %s245_s29, 4  ;;  %s6214_s5 = sshll.u32 %s6066_s19, 9  ;;  %s11859_s30 = int_to_ptr.vmem [resolvable:$true] %s5999_s30 }
  0x2a   : > { %379 = vmatprep.subr.mxu0 %v261_v17  ;;  %492 = vmatprep.subr.mxu1 %v263_v18  ;;  %v262_v20 = vld [vmem:[%s223_s10 + $0x70] sm:$0xff]  ;;  %v257_v21 = vld [vmem:[%s223_s10 + $0x48] sm:$0xff]  ;;  %v259_v22 = vld [vmem:[%s223_s10 + $0x58] sm:$0xff]  ;;  %s11864_s9 = scalar_lea.hbm %s11911_s4, %s6214_s5  ;;  %s7285_s11 = scalar_lea.vmem %s11859_s30, 1024 }
  0x2b   : > { %380 = vmatpush1.msra.mxu0 %v260_v19  ;;  %493 = vmatpush1.msra.mxu1 %v262_v20  ;;  %v256_v23 = vld [vmem:[%s223_s10 + $0x40] sm:$0xff]  ;;  %v258_v24 = vld [vmem:[%s223_s10 + $0x50] sm:$0xff]  ;;  %v253_v25 = vld [vmem:[%s223_s10 + $0x28] sm:$0xff]  ;;  %p7286_p13 = scmp.ne.s32.totalorder %s11859_s30, %s7285_s11  ;;  %s7349_s19 = smov [#allocation3]  }
  0x2c   : > { %381 = vmatprep.subr.mxu0 %v257_v21  ;;  %494 = vmatprep.subr.mxu1 %v259_v22  ;;  %v255_v26 = vld [vmem:[%s223_s10 + $0x38] sm:$0xff]  ;;  %v252_v27 = vld [vmem:[%s223_s10 + $0x20] sm:$0xff]  ;;  %v254_v28 = vld [vmem:[%s223_s10 + $0x30] sm:$0xff]  ;;  %s7289_s12 = sshll.u32 %s7349_s19, 4  ;;  %s7290_s12 = int_to_ptr.vmem [resolvable:$false] %s7289_s12 }
  0x2d   : > { %382 = vmatpush1.msra.mxu0 %v256_v23  ;;  %495 = vmatpush1.msra.mxu1 %v258_v24  ;;  %v249_v29 = vld [vmem:[%s223_s10 + $0x8] sm:$0xff]  ;;  %v251_v30 = vld [vmem:[%s223_s10 + $0x18] sm:$0xff]  ;;  %v248_v31 = vld [vmem:[%s223_s10] sm:$0xff]  ;;  %p7287_p0 = pnand %p7286_p13, %p7416_p6  ;;  %s7291_s13 = scalar_lea.vmem %s7290_s12, 2048 }
  0x2e   : > { %383 = vmatprep.subr.mxu0 %v253_v25  ;;  %496 = vmatprep.subr.mxu1 %v255_v26  ;;  %v250_v32 = vld [vmem:[%s223_s10 + $0x10] sm:$0xff]  ;;  %s5986_s10 = scalar_lea.sflag [#allocation4], %s7453_s8  ;;  %p7292_p2 = scmp.lt.s32.totalorder %s11859_s30, %s7290_s12 }
  0x2f   : > { %384 = vmatpush1.msra.mxu0 %v252_v27  ;;  %497 = vmatpush1.msra.mxu1 %v254_v28  ;;  %p7288_p1 = pneg %p7287_p0  ;;  %p7293_p3 = scmp.lt.s32.totalorder %s7291_s13, %s7285_s11 }
  0x30   : > { %385 = vmatprep.subr.mxu0 %v249_v29  ;;  %498 = vmatprep.subr.mxu1 %v251_v30 }
  0x31   : > { %386 = vmatpush1.msra.mxu0 %v248_v31  ;;  %499 = vmatpush1.msra.mxu1 %v250_v32  ;;  %p7294_p4 = por %p7293_p3, %p7292_p2 }
  0x32   : > { %6076 = vmatmul.mubr.msk.f32.vlgmr.msra.gmra.mxu0 %vm330_vm0, %v264_v33  ;;  %6084 = vmatmul.mubr.msk.f32.vlgmr.msra.gmra.mxu1 %vm330_vm0, %v264_v33 }
  0x33   : > { %425 = vmatprep.mubr.f32.mxu0 %v11912_v16  ;;  %538 = vmatprep.mubr.f32.mxu1 %v11912_v16  ;;  %p7295_p5 = pnand %p7294_p4, %p7288_p1 }
  0x36   : > { %6077 = vmatmul.mubr.msk.f32.gmra.mxu0 %vm330_vm0, %v265_v34  ;;  %6085 = vmatmul.mubr.msk.f32.gmra.mxu1 %vm330_vm0, %v265_v34 }
  0x37   : > { %431 = vmatprep.mubr.f32.mxu0 %v11912_v16  ;;  %544 = vmatprep.mubr.f32.mxu1 %v11912_v16 }
  0x3a   : > { %6078 = vmatmul.mubr.msk.f32.gmra.mxu0 %vm330_vm0, %v266_v35  ;;  %6086 = vmatmul.mubr.msk.f32.gmra.mxu1 %vm330_vm0, %v266_v35 }
  0x3b   : > { %437 = vmatprep.mubr.f32.mxu0 %v11912_v16  ;;  %550 = vmatprep.mubr.f32.mxu1 %v11912_v16 }
  0x3e   : > { %6079 = vmatmul.mubr.msk.f32.gmra.mxu0 %vm330_vm0, %v267_v36  ;;  %6087 = vmatmul.mubr.msk.f32.gmra.mxu1 %vm330_vm0, %v267_v36 }
  0x3f   : > { %443 = vmatprep.mubr.f32.mxu0 %v11912_v16  ;;  %556 = vmatprep.mubr.f32.mxu1 %v11912_v16 }
  0x42   : > { %6080 = vmatmul.mubr.msk.f32.gmra.mxu0 %vm330_vm0, %v268_v37  ;;  %6088 = vmatmul.mubr.msk.f32.gmra.mxu1 %vm330_vm0, %v268_v37 }
  0x43   : > { %449 = vmatprep.mubr.f32.mxu0 %v11912_v16  ;;  %562 = vmatprep.mubr.f32.mxu1 %v11912_v16 }
  0x46   : > { %6081 = vmatmul.mubr.msk.f32.gmra.mxu0 %vm330_vm0, %v269_v38  ;;  %6089 = vmatmul.mubr.msk.f32.gmra.mxu1 %vm330_vm0, %v269_v38 }
  0x47   : > { %568 = vmatprep.mubr.f32.mxu1 %v11912_v16  ;;  %455 = vmatprep.mubr.f32.mxu0 %v11912_v16 }
  0x4a   : > { %6090 = vmatmul.mubr.msk.f32.gmra.mxu1 %vm330_vm0, %v270_v39  ;;  %6082 = vmatmul.mubr.msk.f32.gmra.mxu0 %vm330_vm0, %v270_v39 }
  0x4b   : > { %461 = vmatprep.mubr.f32.mxu0 %v11912_v16  ;;  %574 = vmatprep.mubr.f32.mxu1 %v11912_v16 }
  0x4e   : > { %6083 = vmatmul.mubr.msk.f32.gmra.mxu0 %vm330_vm0, %v271_v40  ;;  %6091 = vmatmul.mubr.msk.f32.gmra.mxu1 %vm330_vm0, %v271_v40 }
  0x4f   : > { %1134 = vmatprep.mubr.f32.mxu0 %v11912_v16  ;;  %1247 = vmatprep.mubr.f32.mxu1 %v11912_v16 }
  0xf2   : > { %v7514_v41 = vpop.f32.mrf.mxu0  ;;  %v7516_v42 = vpop.f32.mrf.mxu1 }
  0xf4   : > { %v7518_v43 = vpop.f32.mrf.mxu0  ;;  %v7520_v44 = vpop.f32.mrf.mxu1 }
  0xf6   : > { %v7522_v45 = vpop.f32.mrf.mxu0  ;;  %v7524_v46 = vpop.f32.mrf.mxu1 }
  0xf8   : > { %v7526_v47 = vpop.f32.mrf.mxu0  ;;  %v7528_v48 = vpop.f32.mrf.mxu1 }
  0xfa   : > { %v7530_v49 = vpop.f32.mrf.mxu0  ;;  %v7532_v50 = vpop.f32.mrf.mxu1 }
  0xfc   : > { %v7534_v51 = vpop.f32.mrf.mxu0  ;;  %v7536_v52 = vpop.f32.mrf.mxu1 }
  0xfe   : > { %v7538_v53 = vpop.f32.mrf.mxu0  ;;  %v7540_v54 = vpop.f32.mrf.mxu1 }
 0x100   : > { %v7542_v55 = vpop.f32.mrf.mxu0  ;;  %v7544_v56 = vpop.f32.mrf.mxu1 }
 0x102   : > { %v7546_v57 = vpop.f32.mrf.mxu0  ;;  %v7548_v58 = vpop.f32.mrf.mxu1 }
 0x104   : > { %v7550_v59 = vpop.f32.mrf.mxu0  ;;  %v7552_v60 = vpop.f32.mrf.mxu1 }
 0x106   : > { %v451_v61 = vpop.f32.mrf.mxu0  ;;  %v564_v62 = vpop.f32.mrf.mxu1 }
 0x107   : > { %768 = vadd.xlane.f32.xlu1 %v564_v62  ;;  %591 = vadd.xlane.f32.xlu0 %v451_v61 }
 0x108   : > { %v453_v63 = vpop.f32.mrf.mxu0  ;;  %v566_v0 = vpop.f32.mrf.mxu1 }
 0x10a   : > { %v7554_v1 = vpop.f32.mrf.mxu0  ;;  %v570_v3 = vpop.f32.mrf.mxu1 }
 0x10b   : > { %856 = vadd.xlane.f32.xlu1 %v566_v0  ;;  %680 = vadd.xlane.f32.xlu0 %v453_v63 }
 0x10c   : > { %v7556_v2 = vpop.f32.mrf.mxu0  ;;  %v7561_v5 = vpop.f32.mrf.mxu1 }
 0x10e   : > { %v7559_v4 = vpop.f32.mrf.mxu0  ;;  %v7567_v7 = vpop.f32.mrf.mxu1 }
 0x10f   : > { %770 = vadd.xlane.f32.xlu1 %v570_v3  ;;  %593 = vadd.xlane.f32.xlu0 %v7554_v1 }
 0x110   : > { %v7565_v6 = vpop.f32.mrf.mxu0  ;;  %v7571_v8 = vpop.f32.mrf.mxu1 }
 0x113   : > { %858 = vadd.xlane.f32.xlu1 %v7561_v5  ;;  %682 = vadd.xlane.f32.xlu0 %v7556_v2 }
 0x117   : > { %595 = vadd.xlane.f32.xlu1 %v7559_v4  ;;  %684 = vadd.xlane.f32.xlu0 %v7565_v6 }
 0x11b   : > { %772 = vadd.xlane.f32.xlu1 %v7567_v7  ;;  %860 = vadd.xlane.f32.xlu0 %v7571_v8 }
 0x11f   : > { %854 = vadd.xlane.f32.xlu1 %v7552_v60  ;;  %678 = vadd.xlane.f32.xlu0 %v7550_v59 }
 0x123   : > { %766 = vadd.xlane.f32.xlu1 %v7548_v58  ;;  %589 = vadd.xlane.f32.xlu0 %v7546_v57 }
 0x127   : > { %852 = vadd.xlane.f32.xlu1 %v7544_v56  ;;  %676 = vadd.xlane.f32.xlu0 %v7542_v55 }
 0x12b   : > { %764 = vadd.xlane.f32.xlu1 %v7540_v54  ;;  %587 = vadd.xlane.f32.xlu0 %v7538_v53 }
 0x12f   : > { %850 = vadd.xlane.f32.xlu1 %v7536_v52  ;;  %674 = vadd.xlane.f32.xlu0 %v7534_v51 }
 0x133   : > { %762 = vadd.xlane.f32.xlu1 %v7532_v50  ;;  %585 = vadd.xlane.f32.xlu0 %v7530_v49 }
 0x137   : > { %848 = vadd.xlane.f32.xlu1 %v7528_v48  ;;  %672 = vadd.xlane.f32.xlu0 %v7526_v47 }
 0x13b   : > { %760 = vadd.xlane.f32.xlu1 %v7524_v46  ;;  %583 = vadd.xlane.f32.xlu0 %v7522_v45 }
 0x13f   : > { %846 = vadd.xlane.f32.xlu1 %v7520_v44  ;;  %670 = vadd.xlane.f32.xlu0 %v7518_v43 }
 0x143   : > { %758 = vadd.xlane.f32.xlu1 %v7516_v42  ;;  %581 = vadd.xlane.f32.xlu0 %v7514_v41 }
 0x190   : > { %v769_v9 = vpop.xlane.xlu1 %768  ;;  %v592_v10 = vpop.xlane.xlu0 %591 }
 0x191   : > { %v779_v11 = vmul.f32 0.0078125, %v769_v9  ;;  %v603_v12 = vmul.f32 0.0078125, %v592_v10 }
 0x193   : > { %v7595_v13 = vsub.f32 %v564_v62, %v779_v11  ;;  %v7597_v14 = vsub.f32 %v451_v61, %v603_v12 }
 0x194   : > { %v857_v15 = vpop.xlane.xlu1 %856  ;;  %v681_v17 = vpop.xlane.xlu0 %680 }
 0x195   : > { %v867_v18 = vmul.f32 0.0078125, %v857_v15  ;;  %v691_v19 = vmul.f32 0.0078125, %v681_v17  ;;  %v795_v20 = vmul.f32 %v7595_v13, %v7595_v13  ;;  %v619_v21 = vmul.f32 %v7597_v14, %v7597_v14 }
 0x197   : > { %808 = vadd.xlane.f32.xlu1 %v795_v20  ;;  %632 = vadd.xlane.f32.xlu0 %v619_v21  ;;  %v7603_v22 = vsub.f32 %v566_v0, %v867_v18  ;;  %v7605_v23 = vsub.f32 %v453_v63, %v691_v19 }
 0x198   : > { %v771_v24 = vpop.xlane.xlu1 %770  ;;  %v594_v25 = vpop.xlane.xlu0 %593 }
 0x199   : > { %v780_v26 = vmul.f32 0.0078125, %v771_v24  ;;  %v604_v27 = vmul.f32 0.0078125, %v594_v25  ;;  %v883_v28 = vmul.f32 %v7603_v22, %v7603_v22  ;;  %v707_v29 = vmul.f32 %v7605_v23, %v7605_v23 }
 0x19b   : > { %896 = vadd.xlane.f32.xlu1 %v883_v28  ;;  %720 = vadd.xlane.f32.xlu0 %v707_v29  ;;  %v7611_v30 = vsub.f32 %v570_v3, %v780_v26  ;;  %v7614_v31 = vsub.f32 %v7554_v1, %v604_v27 }
 0x19c   : > { %v859_v32 = vpop.xlane.xlu1 %858  ;;  %v683_v33 = vpop.xlane.xlu0 %682 }
 0x19d   : > { %v868_v34 = vmul.f32 0.0078125, %v859_v32  ;;  %v692_v35 = vmul.f32 0.0078125, %v683_v33  ;;  %v796_v36 = vmul.f32 %v7611_v30, %v7611_v30  ;;  %v620_v37 = vmul.f32 %v7614_v31, %v7614_v31 }
 0x19f   : > { %810 = vadd.xlane.f32.xlu1 %v796_v36  ;;  %634 = vadd.xlane.f32.xlu0 %v620_v37  ;;  %v7621_v38 = vsub.f32 %v7561_v5, %v868_v34  ;;  %v7624_v39 = vsub.f32 %v7556_v2, %v692_v35 }
 0x1a0   : > { %v596_v40 = vpop.xlane.xlu1 %595  ;;  %v685_v61 = vpop.xlane.xlu0 %684 }
 0x1a1   : > { %v605_v62 = vmul.f32 0.0078125, %v596_v40  ;;  %v693_v63 = vmul.f32 0.0078125, %v685_v61  ;;  %v884_v0 = vmul.f32 %v7621_v38, %v7621_v38  ;;  %v708_v1 = vmul.f32 %v7624_v39, %v7624_v39 }
 0x1a3   : > { %898 = vadd.xlane.f32.xlu1 %v884_v0  ;;  %722 = vadd.xlane.f32.xlu0 %v708_v1  ;;  %v7631_v3 = vsub.f32 %v7559_v4, %v605_v62  ;;  %v7636_v12 = vsub.f32 %v7565_v6, %v693_v63 }
 0x1a4   : > { %v773_v5 = vpop.xlane.xlu1 %772  ;;  %v861_v9 = vpop.xlane.xlu0 %860 }
 0x1a5   : > { %v781_v10 = vmul.f32 0.0078125, %v773_v5  ;;  %v869_v2 = vmul.f32 0.0078125, %v861_v9  ;;  %v621_v11 = vmul.f32 %v7631_v3, %v7631_v3  ;;  %v709_v24 = vmul.f32 %v7636_v12, %v7636_v12 }
 0x1a7   : > { %636 = vadd.xlane.f32.xlu0 %v621_v11  ;;  %v7639_v15 = vsub.f32 %v7567_v7, %v781_v10  ;;  %v7642_v19 = vsub.f32 %v7571_v8, %v869_v2 }
 0x1a8   : > { %v855_v17 = vpop.xlane.xlu1 %854  ;;  %v679_v18 = vpop.xlane.xlu0 %678 }
 0x1a9   : > { %v866_v4 = vmul.f32 0.0078125, %v855_v17  ;;  %v690_v20 = vmul.f32 0.0078125, %v679_v18  ;;  %v797_v21 = vmul.f32 %v7639_v15, %v7639_v15  ;;  %v885_v26 = vmul.f32 %v7642_v19, %v7642_v19 }
 0x1ab   : > { %812 = vadd.xlane.f32.xlu1 %v797_v21  ;;  %724 = vadd.xlane.f32.xlu0 %v709_v24  ;;  %v7649_v6 = vsub.f32 %v7550_v59, %v690_v20  ;;  %v7656_v29 = vsub.f32 %v7552_v60, %v866_v4 }
 0x1ac   : > { %v767_v7 = vpop.xlane.xlu1 %766  ;;  %v590_v25 = vpop.xlane.xlu0 %589 }
 0x1ad   : > { %v778_v8 = vmul.f32 0.0078125, %v767_v7  ;;  %v602_v27 = vmul.f32 0.0078125, %v590_v25  ;;  %v706_v28 = vmul.f32 %v7649_v6, %v7649_v6  ;;  %v882_v37 = vmul.f32 %v7656_v29, %v7656_v29 }
 0x1af   : > { %900 = vadd.xlane.f32.xlu1 %v885_v26  ;;  %718 = vadd.xlane.f32.xlu0 %v706_v28  ;;  %v7659_v32 = vsub.f32 %v7546_v57, %v602_v27  ;;  %v7662_v34 = vsub.f32 %v7548_v58, %v778_v8 }
 0x1b0   : > { %v853_v59 = vpop.xlane.xlu1 %852  ;;  %v677_v33 = vpop.xlane.xlu0 %676 }
 0x1b1   : > { %v865_v35 = vmul.f32 0.0078125, %v853_v59  ;;  %v689_v36 = vmul.f32 0.0078125, %v677_v33  ;;  %v618_v40 = vmul.f32 %v7659_v32, %v7659_v32  ;;  %v794_v62 = vmul.f32 %v7662_v34, %v7662_v34 }
 0x1b3   : > { %894 = vadd.xlane.f32.xlu1 %v882_v37  ;;  %630 = vadd.xlane.f32.xlu0 %v618_v40  ;;  %v7669_v60 = vsub.f32 %v7542_v55, %v689_v36  ;;  %v7676_v1 = vsub.f32 %v7544_v56, %v865_v35 }
 0x1b4   : > { %v765_v57 = vpop.xlane.xlu1 %764  ;;  %v588_v61 = vpop.xlane.xlu0 %587 }
 0x1b5   : > { %v777_v58 = vmul.f32 0.0078125, %v765_v57  ;;  %v601_v63 = vmul.f32 0.0078125, %v588_v61  ;;  %v705_v0 = vmul.f32 %v7669_v60, %v7669_v60  ;;  %v881_v17 = vmul.f32 %v7676_v1, %v7676_v1 }
 0x1b7   : > { %806 = vadd.xlane.f32.xlu1 %v794_v62  ;;  %716 = vadd.xlane.f32.xlu0 %v705_v0  ;;  %v7679_v5 = vsub.f32 %v7538_v53, %v601_v63  ;;  %v7682_v10 = vsub.f32 %v7540_v54, %v777_v58 }
 0x1b8   : > { %v851_v55 = vpop.xlane.xlu1 %850  ;;  %v675_v9 = vpop.xlane.xlu0 %674 }
 0x1b9   : > { %v864_v2 = vmul.f32 0.0078125, %v851_v55  ;;  %v688_v11 = vmul.f32 0.0078125, %v675_v9  ;;  %v617_v18 = vmul.f32 %v7679_v5, %v7679_v5  ;;  %v793_v20 = vmul.f32 %v7682_v10, %v7682_v10 }
 0x1bb   : > { %892 = vadd.xlane.f32.xlu1 %v881_v17  ;;  %628 = vadd.xlane.f32.xlu0 %v617_v18  ;;  %v7689_v56 = vsub.f32 %v7534_v51, %v688_v11  ;;  %v7696_v7 = vsub.f32 %v7536_v52, %v864_v2 }
 0x1bc   : > { %v763_v53 = vpop.xlane.xlu1 %762  ;;  %v586_v4 = vpop.xlane.xlu0 %585 }
 0x1bd   : > { %v776_v54 = vmul.f32 0.0078125, %v763_v53  ;;  %v600_v21 = vmul.f32 0.0078125, %v586_v4  ;;  %v704_v24 = vmul.f32 %v7689_v56, %v7689_v56  ;;  %v880_v59 = vmul.f32 %v7696_v7, %v7696_v7 }
 0x1bf   : > { %804 = vadd.xlane.f32.xlu1 %v793_v20  ;;  %714 = vadd.xlane.f32.xlu0 %v704_v24  ;;  %v7699_v25 = vsub.f32 %v7530_v49, %v600_v21  ;;  %v7702_v8 = vsub.f32 %v7532_v50, %v776_v54 }
 0x1c0   : > { %v849_v51 = vpop.xlane.xlu1 %848  ;;  %v673_v26 = vpop.xlane.xlu0 %672 }
 0x1c1   : > { %v863_v27 = vmul.f32 0.0078125, %v849_v51  ;;  %v687_v28 = vmul.f32 0.0078125, %v673_v26  ;;  %v616_v33 = vmul.f32 %v7699_v25, %v7699_v25  ;;  %v792_v36 = vmul.f32 %v7702_v8, %v7702_v8 }
 0x1c3   : > { %890 = vadd.xlane.f32.xlu1 %v880_v59  ;;  %626 = vadd.xlane.f32.xlu0 %v616_v33  ;;  %v7709_v52 = vsub.f32 %v7526_v47, %v687_v28  ;;  %v7716_v57 = vsub.f32 %v7528_v48, %v863_v27 }
 0x1c4   : > { %v761_v49 = vpop.xlane.xlu1 %760  ;;  %v584_v35 = vpop.xlane.xlu0 %583 }
 0x1c5   : > { %v775_v50 = vmul.f32 0.0078125, %v761_v49  ;;  %v599_v37 = vmul.f32 0.0078125, %v584_v35  ;;  %v703_v40 = vmul.f32 %v7709_v52, %v7709_v52  ;;  %v879_v55 = vmul.f32 %v7716_v57, %v7716_v57 }
 0x1c7   : > { %802 = vadd.xlane.f32.xlu1 %v792_v36  ;;  %712 = vadd.xlane.f32.xlu0 %v703_v40  ;;  %v7719_v61 = vsub.f32 %v7522_v45, %v599_v37  ;;  %v7722_v58 = vsub.f32 %v7524_v46, %v775_v50 }
 0x1c8   : > { %v847_v47 = vpop.xlane.xlu1 %846  ;;  %v671_v62 = vpop.xlane.xlu0 %670 }
 0x1c9   : > { %v862_v63 = vmul.f32 0.0078125, %v847_v47  ;;  %v686_v0 = vmul.f32 0.0078125, %v671_v62  ;;  %v615_v9 = vmul.f32 %v7719_v61, %v7719_v61  ;;  %v791_v11 = vmul.f32 %v7722_v58, %v7722_v58 }
 0x1cb   : > { %888 = vadd.xlane.f32.xlu1 %v879_v55  ;;  %624 = vadd.xlane.f32.xlu0 %v615_v9  ;;  %v7729_v48 = vsub.f32 %v7518_v43, %v686_v0  ;;  %v7736_v53 = vsub.f32 %v7520_v44, %v862_v63 }
 0x1cc   : > { %v759_v45 = vpop.xlane.xlu1 %758  ;;  %v582_v2 = vpop.xlane.xlu0 %581 }
 0x1cd   : > { %v774_v46 = vmul.f32 0.0078125, %v759_v45  ;;  %v598_v17 = vmul.f32 0.0078125, %v582_v2  ;;  %v702_v18 = vmul.f32 %v7729_v48, %v7729_v48  ;;  %v878_v43 = vmul.f32 %v7736_v53, %v7736_v53 }
 0x1cf   : > { %800 = vadd.xlane.f32.xlu1 %v791_v11  ;;  %710 = vadd.xlane.f32.xlu0 %v702_v18  ;;  %v7739_v4 = vsub.f32 %v7514_v41, %v598_v17  ;;  %v7746_v54 = vsub.f32 %v7516_v42, %v774_v46 }
 0x1d1   : > { %v614_v20 = vmul.f32 %v7739_v4, %v7739_v4  ;;  %v790_v44 = vmul.f32 %v7746_v54, %v7746_v54 }
 0x1d3   : > { %886 = vadd.xlane.f32.xlu1 %v878_v43  ;;  %622 = vadd.xlane.f32.xlu0 %v614_v20 }
 0x1d7   : > { %798 = vadd.xlane.f32.xlu1 %v790_v44 }
 0x220   : > { %v809_v21 = vpop.xlane.xlu1 %808  ;;  %v633_v24 = vpop.xlane.xlu0 %632 }
 0x221   : > { %v819_v51 = vmul.f32 0.0078125, %v809_v21  ;;  %v643_v41 = vmul.f32 0.0078125, %v633_v24 }
 0x223   : > { %v827_v26 = vadd.f32 1e-05, %v819_v51  ;;  %v651_v27 = vadd.f32 1e-05, %v643_v41 }
 0x224   : > { %v897_v28 = vpop.xlane.xlu1 %896  ;;  %v721_v59 = vpop.xlane.xlu0 %720 }
 0x225   : > { %6261 = vrsqrt.f32 %v827_v26  ;;  %v907_v33 = vmul.f32 0.0078125, %v897_v28  ;;  %v731_v49 = vmul.f32 0.0078125, %v721_v59 }
 0x226   : > { %6263 = vrsqrt.f32 %v651_v27 }
 0x227   : > { %v915_v42 = vadd.f32 1e-05, %v907_v33  ;;  %v739_v35 = vadd.f32 1e-05, %v731_v49 }
 0x228   : > { %v811_v36 = vpop.xlane.xlu1 %810  ;;  %v635_v50 = vpop.xlane.xlu0 %634 }
 0x229   : > { %6265 = vrsqrt.f32 %v915_v42  ;;  %v820_v37 = vmul.f32 0.0078125, %v811_v36  ;;  %v644_v40 = vmul.f32 0.0078125, %v635_v50 }
 0x22a   : > { %6267 = vrsqrt.f32 %v739_v35 }
 0x22b   : > { %v828_v47 = vadd.f32 1e-05, %v820_v37  ;;  %v652_v62 = vadd.f32 1e-05, %v644_v40 }
 0x22c   : > { %v899_v63 = vpop.xlane.xlu1 %898  ;;  %v723_v0 = vpop.xlane.xlu0 %722 }
 0x22d   : > { %6269 = vrsqrt.f32 %v828_v47  ;;  %v908_v55 = vmul.f32 0.0078125, %v899_v63  ;;  %v732_v9 = vmul.f32 0.0078125, %v723_v0 }
 0x22e   : > { %6271 = vrsqrt.f32 %v652_v62 }
 0x22f   : > { %v916_v45 = vadd.f32 1e-05, %v908_v55  ;;  %v740_v2 = vadd.f32 1e-05, %v732_v9 }
 0x230   : > { %v637_v11 = vpop.xlane.xlu0 %636 }
 0x231   : > { %6273 = vrsqrt.f32 %v916_v45  ;;  %v645_v46 = vmul.f32 0.0078125, %v637_v11 }
 0x232   : > { %v6262_v17 = vpop.eup %6261  ;;  %6275 = vrsqrt.f32 %v740_v2 }
 0x233   : > { %v6264_v18 = vpop.eup %6263  ;;  %v843_v43 = vmul.f32 %v6262_v17, %v7595_v13  ;;  %v653_v20 = vadd.f32 1e-05, %v645_v46 }
 0x234   : > { %v667_v44 = vmul.f32 %v6264_v18, %v7597_v14  ;;  %v813_v21 = vpop.xlane.xlu1 %812  ;;  %v725_v24 = vpop.xlane.xlu0 %724 }
 0x235   : > { %v940_v51 = vsub.f32 0.0, %v843_v43  ;;  %6277 = vrsqrt.f32 %v653_v20  ;;  %v821_v41 = vmul.f32 0.0078125, %v813_v21  ;;  %v733_v26 = vmul.f32 0.0078125, %v725_v24 }
 0x236   : > { %v6266_v27 = vpop.eup %6265  ;;  %v938_v28 = vsub.f32 0.0, %v667_v44 }
 0x237   : > { %v6268_v59 = vpop.eup %6267  ;;  %v962_v33 = vmul.f32 1.442695, %v940_v51  ;;  %v931_v49 = vmul.f32 %v6266_v27, %v7603_v22  ;;  %v829_v42 = vadd.f32 1e-05, %v821_v41  ;;  %v741_v13 = vadd.f32 1e-05, %v733_v26 }
 0x238   : > { %v958_v35 = vmul.f32 1.442695, %v938_v28  ;;  %v755_v36 = vmul.f32 %v6268_v59, %v7605_v23  ;;  %v901_v50 = vpop.xlane.xlu1 %900  ;;  %v719_v37 = vpop.xlane.xlu0 %718 }
 0x239   : > { %6279 = vpow2.f32 %v962_v33  ;;  %v941_v14 = vsub.f32 0.0, %v931_v49  ;;  %v909_v40 = vmul.f32 0.0078125, %v901_v50  ;;  %v730_v47 = vmul.f32 0.0078125, %v719_v37 }
 0x23a   : > { %v6270_v62 = vpop.eup %6269  ;;  %6281 = vpow2.f32 %v958_v35  ;;  %v939_v63 = vsub.f32 0.0, %v755_v36 }
 0x23b   : > { %v6272_v0 = vpop.eup %6271  ;;  %v964_v55 = vmul.f32 1.442695, %v941_v14  ;;  %v844_v9 = vmul.f32 %v6270_v62, %v7611_v30  ;;  %6283 = vrsqrt.f32 %v829_v42  ;;  %v917_v22 = vadd.f32 1e-05, %v909_v40 }
 0x23c   : > { %v960_v45 = vmul.f32 1.442695, %v939_v63  ;;  %v668_v2 = vmul.f32 %v6272_v0, %v7614_v31  ;;  %6285 = vrsqrt.f32 %v741_v13  ;;  %v738_v23 = vadd.f32 1e-05, %v730_v47  ;;  %v895_v11 = vpop.xlane.xlu1 %894  ;;  %v631_v46 = vpop.xlane.xlu0 %630 }
 0x23d   : > { %6287 = vpow2.f32 %v964_v55  ;;  %v944_v17 = vsub.f32 0.0, %v844_v9  ;;  %v906_v18 = vmul.f32 0.0078125, %v895_v11  ;;  %v642_v43 = vmul.f32 0.0078125, %v631_v46 }
 0x23e   : > { %v6274_v20 = vpop.eup %6273  ;;  %6289 = vpow2.f32 %v960_v45  ;;  %v942_v44 = vsub.f32 0.0, %v668_v2 }
 0x23f   : > { %v6276_v21 = vpop.eup %6275  ;;  %v970_v24 = vmul.f32 1.442695, %v944_v17  ;;  %v932_v30 = vmul.f32 %v6274_v20, %v7621_v38  ;;  %6291 = vrsqrt.f32 %v917_v22  ;;  %v914_v51 = vadd.f32 1e-05, %v906_v18 }
 0x240   : > { %v966_v41 = vmul.f32 1.442695, %v942_v44  ;;  %v756_v31 = vmul.f32 %v6276_v21, %v7624_v39  ;;  %6293 = vrsqrt.f32 %v738_v23  ;;  %v650_v26 = vadd.f32 1e-05, %v642_v43  ;;  %v807_v27 = vpop.xlane.xlu1 %806  ;;  %v717_v28 = vpop.xlane.xlu0 %716 }
 0x241   : > { %6295 = vpow2.f32 %v970_v24  ;;  %v945_v59 = vsub.f32 0.0, %v932_v30  ;;  %v818_v33 = vmul.f32 0.0078125, %v807_v27  ;;  %v729_v49 = vmul.f32 0.0078125, %v717_v28 }
 0x242   : > { %v6278_v42 = vpop.eup %6277  ;;  %6297 = vpow2.f32 %v966_v41  ;;  %v943_v35 = vsub.f32 0.0, %v756_v31 }
 0x243   : > { %v972_v36 = vmul.f32 1.442695, %v945_v59  ;;  %v669_v13 = vmul.f32 %v6278_v42, %v7631_v3  ;;  %6299 = vrsqrt.f32 %v914_v51  ;;  %v826_v38 = vadd.f32 1e-05, %v818_v33 }
 0x244   : > { %v968_v50 = vmul.f32 1.442695, %v943_v35  ;;  %6301 = vrsqrt.f32 %v650_v26  ;;  %v737_v37 = vadd.f32 1e-05, %v729_v49  ;;  %v893_v39 = vpop.xlane.xlu1 %892  ;;  %v629_v14 = vpop.xlane.xlu0 %628 }
 0x245   : > { %6303 = vpow2.f32 %v972_v36  ;;  %v946_v40 = vsub.f32 0.0, %v669_v13  ;;  %v905_v47 = vmul.f32 0.0078125, %v893_v39  ;;  %v641_v62 = vmul.f32 0.0078125, %v629_v14 }
 0x246   : > { %v7759_v63 = vpop.eup %6279  ;;  %6305 = vpow2.f32 %v968_v50 }
 0x247   : > { %v6282_v0 = vpop.eup %6281  ;;  %v974_v55 = vmul.f32 1.442695, %v946_v40  ;;  %6307 = vrsqrt.f32 %v826_v38  ;;  %v913_v9 = vadd.f32 1e-05, %v905_v47  ;;  %v649_v45 = vadd.f32 1e-05, %v641_v62 }
 0x248   : > { %v6284_v22 = vpop.eup %6283  ;;  %v986_v3 = vadd.f32 1.0, %v6282_v0  ;;  %6309 = vrsqrt.f32 %v737_v37  ;;  %v805_v2 = vpop.xlane.xlu1 %804 }
 0x249   : > { %v715_v23 = vpop.xlane.xlu0 %714  ;;  %v6286_v11 = vpop.eup %6285  ;;  %6311 = vpow2.f32 %v974_v55  ;;  %v845_v46 = vmul.f32 %v6284_v22, %v7639_v15  ;;  %v817_v17 = vmul.f32 0.0078125, %v805_v2 }
 0x24a   : > { %v728_v18 = vmul.f32 0.0078125, %v715_v23  ;;  %v7762_v43 = vpop.eup %6287  ;;  %v757_v20 = vmul.f32 %v6286_v11, %v7636_v12  ;;  %6313 = vrsqrt.f32 %v913_v9 }
 0x24b   : > { %v7765_v44 = vpop.eup %6289  ;;  %v948_v21 = vsub.f32 0.0, %v845_v46  ;;  %6315 = vrsqrt.f32 %v649_v45  ;;  %v825_v24 = vadd.f32 1e-05, %v817_v17 }
 0x24c   : > { %v736_v30 = vadd.f32 1e-05, %v728_v18  ;;  %v6292_v51 = vpop.eup %6291  ;;  %v947_v41 = vsub.f32 0.0, %v757_v20  ;;  %v891_v31 = vpop.xlane.xlu1 %890  ;;  %6317 = vrcp.f32 %v986_v3 }
 0x24d   : > { %v627_v26 = vpop.xlane.xlu0 %626  ;;  %v6294_v27 = vpop.eup %6293  ;;  %v978_v15 = vmul.f32 1.442695, %v948_v21  ;;  %v933_v28 = vmul.f32 %v6292_v51, %v7642_v19  ;;  %6319 = vrsqrt.f32 %v825_v24  ;;  %v904_v59 = vmul.f32 0.0078125, %v891_v31 }
 0x24e   : > { %v7768_v33 = vpop.eup %6295  ;;  %v976_v12 = vmul.f32 1.442695, %v947_v41  ;;  %v754_v49 = vmul.f32 %v6294_v27, %v7649_v6  ;;  %6321 = vrsqrt.f32 %v736_v30  ;;  %v640_v42 = vmul.f32 0.0078125, %v627_v26 }
 0x24f   : > { %v7771_v35 = vpop.eup %6297  ;;  %6323 = vpow2.f32 %v978_v15  ;;  %v949_v36 = vsub.f32 0.0, %v933_v28  ;;  %v912_v13 = vadd.f32 1e-05, %v904_v59 }
 0x250   : > { %v6300_v38 = vpop.eup %6299  ;;  %6325 = vpow2.f32 %v976_v12  ;;  %v935_v50 = vsub.f32 0.0, %v754_v49  ;;  %v648_v37 = vadd.f32 1e-05, %v640_v42  ;;  %v803_v39 = vpop.xlane.xlu1 %802 }
 0x251   : > { %v713_v19 = vpop.xlane.xlu0 %712  ;;  %v6302_v14 = vpop.eup %6301  ;;  %v980_v40 = vmul.f32 1.442695, %v949_v36  ;;  %v930_v47 = vmul.f32 %v6300_v38, %v7656_v29  ;;  %6327 = vrsqrt.f32 %v912_v13  ;;  %v816_v62 = vmul.f32 0.0078125, %v803_v39 }
 0x252   : > { %v7774_v6 = vpop.eup %6303  ;;  %v952_v0 = vmul.f32 1.442695, %v935_v50  ;;  %v666_v55 = vmul.f32 %v6302_v14, %v7659_v32  ;;  %6329 = vrsqrt.f32 %v648_v37  ;;  %v727_v9 = vmul.f32 0.0078125, %v713_v19 }
 0x253   : > { %v6306_v22 = vpop.eup %6305  ;;  %6331 = vpow2.f32 %v980_v40  ;;  %v937_v3 = vsub.f32 0.0, %v930_v47  ;;  %v824_v45 = vadd.f32 1e-05, %v816_v62 }
 0x254   : > { %v6308_v2 = vpop.eup %6307  ;;  %6333 = vpow2.f32 %v952_v0  ;;  %v934_v23 = vsub.f32 0.0, %v666_v55  ;;  %v735_v11 = vadd.f32 1e-05, %v727_v9  ;;  %v889_v46 = vpop.xlane.xlu1 %888  ;;  %v991_v37 = vadd.f32 1.0, %v6306_v22 }
 0x255   : > { %v625_v17 = vpop.xlane.xlu0 %624  ;;  %v7777_v29 = vpop.eup %6309  ;;  %v956_v18 = vmul.f32 1.442695, %v937_v3  ;;  %v842_v20 = vmul.f32 %v6308_v2, %v7662_v34  ;;  %6335 = vrsqrt.f32 %v824_v45  ;;  %v903_v21 = vmul.f32 0.0078125, %v889_v46 }
 0x256   : > { %v6312_v32 = vpop.eup %6311  ;;  %v950_v24 = vmul.f32 1.442695, %v934_v23  ;;  %6337 = vrsqrt.f32 %v735_v11  ;;  %v639_v30 = vmul.f32 0.0078125, %v625_v17  ;;  %v990_v3 = vadd.f32 1.0, %v7771_v35 }
 0x257   : > { %v7780_v51 = vpop.eup %6313  ;;  %6339 = vpow2.f32 %v956_v18  ;;  %v936_v41 = vsub.f32 0.0, %v842_v20  ;;  %v911_v31 = vadd.f32 1e-05, %v903_v21  ;;  %v994_v27 = vadd.f32 1.0, %v6312_v32 }
 0x258   : > { %v7782_v26 = vpop.eup %6315  ;;  %6341 = vpow2.f32 %v950_v24  ;;  %v647_v15 = vadd.f32 1e-05, %v639_v30  ;;  %v801_v28 = vpop.xlane.xlu1 %800  ;;  %v987_v11 = vadd.f32 1.0, %v7765_v44  ;;  %v992_v44 = vadd.f32 1.0, %v7768_v33 }
 0x259   : > { %v711_v59 = vpop.xlane.xlu0 %710  ;;  %v7784_v12 = vpop.eup %6317  ;;  %v954_v34 = vmul.f32 1.442695, %v936_v41  ;;  %6343 = vrsqrt.f32 %v911_v31  ;;  %v815_v49 = vmul.f32 0.0078125, %v801_v28  ;;  %v993_v31 = vadd.f32 1.0, %v7774_v6 }
 0x25a   : > { %v726_v42 = vmul.f32 0.0078125, %v711_v59  ;;  %v7786_v36 = vpop.eup %6319  ;;  %6345 = vrsqrt.f32 %v647_v15  ;;  %v753_v33 = vmul.f32 %v7777_v29, %v7669_v60 }
 0x25b   : > { %v7788_v13 = vpop.eup %6321  ;;  %6347 = vpow2.f32 %v954_v34  ;;  %v823_v38 = vadd.f32 1e-05, %v815_v49  ;;  %v989_v34 = vadd.f32 1.0, %v7762_v43 }
 0x25c   : > { %v734_v50 = vadd.f32 1e-05, %v726_v42  ;;  %v6324_v39 = vpop.eup %6323  ;;  %v887_v19 = vpop.xlane.xlu1 %886  ;;  %6349 = vrcp.f32 %v994_v27  ;;  %v988_v42 = vadd.f32 1.0, %v7759_v63 }
 0x25d   : > { %v623_v14 = vpop.xlane.xlu0 %622  ;;  %v6326_v40 = vpop.eup %6325  ;;  %6351 = vrsqrt.f32 %v823_v38  ;;  %v902_v47 = vmul.f32 0.0078125, %v887_v19  ;;  %v996_v32 = vadd.f32 1.0, %v6324_v39 }
 0x25e   : > { %v638_v62 = vmul.f32 0.0078125, %v623_v14  ;;  %v7790_v0 = vpop.eup %6327  ;;  %6353 = vrsqrt.f32 %v734_v50  ;;  %v995_v55 = vadd.f32 1.0, %v6326_v40  ;;  %v665_v14 = vmul.f32 %v7782_v26, %v7679_v5 }
 0x25f   : > { %v6330_v9 = vpop.eup %6329  ;;  %v910_v45 = vadd.f32 1e-05, %v902_v47  ;;  %6355 = vrcp.f32 %v991_v37  ;;  %v752_v47 = vmul.f32 %v7788_v13, %v7689_v56  ;;  %v929_v13 = vmul.f32 %v7780_v51, %v7676_v1 }
 0x260   : > { %v646_v2 = vadd.f32 1e-05, %v638_v62  ;;  %v6332_v23 = vpop.eup %6331  ;;  %v799_v22 = vpop.xlane.xlu1 %798  ;;  %6357 = vrcp.f32 %v995_v55  ;;  %v664_v43 = vmul.f32 %v6330_v9, %v7699_v25 }
 0x261   : > { %v6334_v46 = vpop.eup %6333  ;;  %6359 = vrsqrt.f32 %v910_v45  ;;  %v814_v17 = vmul.f32 0.0078125, %v799_v22  ;;  %v997_v20 = vadd.f32 1.0, %v6332_v23  ;;  %v841_v45 = vmul.f32 %v7786_v36, %v7682_v10 }
 0x262   : > { %v7794_v18 = vpop.eup %6335  ;;  %6361 = vrsqrt.f32 %v646_v2  ;;  %v983_v30 = vadd.f32 1.0, %v6334_v46 }
 0x263   : > { %v6338_v21 = vpop.eup %6337  ;;  %v822_v24 = vadd.f32 1e-05, %v814_v17  ;;  %6363 = vrcp.f32 %v990_v3 }
 0x264   : > { %v6340_v35 = vpop.eup %6339  ;;  %6365 = vrcp.f32 %v987_v11  ;;  %v751_v62 = vmul.f32 %v6338_v21, %v7709_v52  ;;  %v840_v11 = vmul.f32 %v7794_v18, %v7702_v8 }
 0x265   : > { %v6342_v41 = vpop.eup %6341  ;;  %6367 = vrsqrt.f32 %v822_v24  ;;  %v985_v50 = vadd.f32 1.0, %v6340_v35 }
 0x266   : > { %v6344_v27 = vpop.eup %6343  ;;  %6369 = vrcp.f32 %v997_v20  ;;  %v982_v28 = vadd.f32 1.0, %v6342_v41 }
 0x267   : > { %v6346_v15 = vpop.eup %6345  ;;  %6371 = vrcp.f32 %v996_v32  ;;  %v927_v36 = vmul.f32 %v6344_v27, %v7716_v57  ;;  %v272_v57 = vld [vmem:[%s11908_s1 + $0x40] sm:$0xff] }
 0x268   : > { %v6348_v59 = vpop.eup %6347  ;;  %6373 = vrcp.f32 %v983_v30  ;;  %v663_v60 = vmul.f32 %v6346_v15, %v7719_v61  ;;  %v276_v15 = vld [vmem:[%s11908_s1 + $0x60] sm:$0xff] }
 0x269   : > { %v6350_v49 = vpop.eup %6349  ;;  %6375 = vrcp.f32 %v993_v31  ;;  %v984_v6 = vadd.f32 1.0, %v6348_v59  ;;  %v278_v59 = vld [vmem:[%s11908_s1 + $0x70] sm:$0xff] }
 0x26a   : > { %v6352_v38 = vpop.eup %6351  ;;  %6377 = vrcp.f32 %v992_v44  ;;  %v7810_v3 = vmul.f32 %v6350_v49, %v665_v14  ;;  %v7826_v9 = vmul.f32 %v7784_v12, %v663_v60  ;;  %v928_v12 = vmul.f32 %v7790_v0, %v7696_v7  ;;  %v275_v44 = vld [vmem:[%s11908_s1 + $0x58] sm:$0xff] }
 0x26b   : > { %v6354_v37 = vpop.eup %6353  ;;  %6379 = vrcp.f32 %v982_v28  ;;  %v839_v18 = vmul.f32 %v6352_v38, %v7722_v58  ;;  %v277_v28 = vld [vmem:[%s11908_s1 + $0x68] sm:$0xff] }
 0x26c   : > { %v6356_v39 = vpop.eup %6355  ;;  %6381 = vrcp.f32 %v989_v34  ;;  %v750_v22 = vmul.f32 %v6354_v37, %v7729_v48  ;;  %v279_v34 = vld [vmem:[%s11908_s1 + $0x78] sm:$0xff] }
 0x26d   : > { %v6358_v19 = vpop.eup %6357  ;;  %6383 = vrcp.f32 %v988_v42  ;;  %v7814_v5 = vmul.f32 %v6356_v39, %v752_v47 }
 0x26e   : > { %v6360_v63 = vpop.eup %6359  ;;  %v7805_v40 = vmul.f32 %v6358_v19, %v753_v33  ;;  %6385 = vrcp.f32 %v985_v50 }
 0x26f   : > { %v6362_v55 = vpop.eup %6361  ;;  %6387 = vrcp.f32 %v984_v6  ;;  %v926_v58 = vmul.f32 %v6360_v63, %v7736_v53  ;;  %v273_v53 = vld [vmem:[%s11908_s1 + $0x48] sm:$0xff] }
 0x270   : > { %v6364_v29 = vpop.eup %6363  ;;  %1094 = vmatprep.subr.mxu0 %v7805_v40  ;;  %v662_v8 = vmul.f32 %v6362_v55, %v7739_v4 }
 0x271   : > { %v6366_v25 = vpop.eup %6365  ;;  %1095 = vmatpush1.msra.mxu0 %v7810_v3  ;;  %v7817_v26 = vmul.f32 %v6364_v29, %v664_v43 }
 0x272   : > { %v6368_v56 = vpop.eup %6367  ;;  %1096 = vmatprep.subr.mxu0 %v7814_v5  ;;  %v7820_v52 = vmul.f32 %v6366_v25, %v751_v62 }
 0x273   : > { %v6370_v61 = vpop.eup %6369  ;;  %1097 = vmatpush1.msra.mxu0 %v7817_v26  ;;  %v838_v30 = vmul.f32 %v6368_v56, %v7746_v54  ;;  %v274_v54 = vld [vmem:[%s11908_s1 + $0x50] sm:$0xff] }
 0x274   : > { %v6372_v2 = vpop.eup %6371  ;;  %1098 = vmatprep.subr.mxu0 %v7820_v52  ;;  %v7831_v23 = vmul.f32 %v6370_v61, %v929_v13 }
 0x275   : > { %v6374_v1 = vpop.eup %6373  ;;  %1099 = vmatpush1.msra.mxu0 %v7826_v9  ;;  %v7837_v51 = vmul.f32 %v6372_v2, %v841_v45 }
 0x276   : > { %v6376_v46 = vpop.eup %6375  ;;  %1207 = vmatprep.subr.mxu1 %v7831_v23  ;;  %v7842_v10 = vmul.f32 %v6374_v1, %v750_v22 }
 0x277   : > { %v6378_v17 = vpop.eup %6377  ;;  %1208 = vmatpush1.msra.mxu1 %v7837_v51  ;;  %v7846_v48 = vmul.f32 %v6376_v46, %v928_v12 }
 0x278   : > { %v6380_v20 = vpop.eup %6379  ;;  %1100 = vmatprep.subr.mxu0 %v7842_v10  ;;  %v7851_v7 = vmul.f32 %v6378_v17, %v840_v11 }
 0x279   : > { %v6382_v0 = vpop.eup %6381  ;;  %1209 = vmatprep.subr.mxu1 %v7846_v48  ;;  %v7854_v21 = vmul.f32 %v6380_v20, %v662_v8 }
 0x27a   : > { %v6384_v32 = vpop.eup %6383  ;;  %1210 = vmatpush1.msra.mxu1 %v7851_v7  ;;  %v7860_v4 = vmul.f32 %v6382_v0, %v927_v36 }
 0x27b   : > { %12229 = vst [vmem:[#allocation6_spill] sm:$0xff] %v7854_v21  ;;  %v6386_v24 = vpop.eup %6385  ;;  %1101 = vmatpush1.msra.mxu0 %v7854_v21  ;;  %v7864_v35 = vmul.f32 %v6384_v32, %v839_v18 }
 0x27c   : > { %v6388_v41 = vpop.eup %6387  ;;  %1211 = vmatprep.subr.mxu1 %v7860_v4  ;;  %6092 = vmatmul.mubr.msk.f32.vlgmr.msra.gmra.mxu0 %vm330_vm0, %v272_v57  ;;  %v7869_v31 = vmul.f32 %v6386_v24, %v926_v58 }
 0x27d   : > { %1212 = vmatpush1.msra.mxu1 %v7864_v35  ;;  %1140 = vmatprep.mubr.f32.mxu0 %v11912_v16  ;;  %v7873_v27 = vmul.f32 %v6388_v41, %v838_v30 }
 0x27e   : > { %12230 = vst [vmem:[#allocation7_spill] sm:$0xff] %v7869_v31  ;;  %1213 = vmatprep.subr.mxu1 %v7869_v31 }
 0x27f   : > { %12231 = vst [vmem:[#allocation8_spill] sm:$0xff] %v7873_v27  ;;  %1214 = vmatpush1.msra.mxu1 %v7873_v27 }
 0x280   : > { %6093 = vmatmul.mubr.msk.f32.gmra.mxu0 %vm330_vm0, %v273_v53  ;;  %6100 = vmatmul.mubr.msk.f32.vlgmr.msra.gmra.mxu1 %vm330_vm0, %v272_v57 }
 0x281   : > { %1146 = vmatprep.mubr.f32.mxu0 %v11912_v16  ;;  %1253 = vmatprep.mubr.f32.mxu1 %v11912_v16 }
 0x284   : > { %6094 = vmatmul.mubr.msk.f32.gmra.mxu0 %vm330_vm0, %v274_v54  ;;  %6101 = vmatmul.mubr.msk.f32.gmra.mxu1 %vm330_vm0, %v273_v53 }
 0x285   : > { %1152 = vmatprep.mubr.f32.mxu0 %v11912_v16  ;;  %1259 = vmatprep.mubr.f32.mxu1 %v11912_v16 }
 0x288   : > { %6095 = vmatmul.mubr.msk.f32.gmra.mxu0 %vm330_vm0, %v275_v44  ;;  %6102 = vmatmul.mubr.msk.f32.gmra.mxu1 %vm330_vm0, %v274_v54 }
 0x289   : > { %1158 = vmatprep.mubr.f32.mxu0 %v11912_v16  ;;  %1265 = vmatprep.mubr.f32.mxu1 %v11912_v16 }
 0x28c   : > { %6096 = vmatmul.mubr.msk.f32.gmra.mxu0 %vm330_vm0, %v276_v15  ;;  %6103 = vmatmul.mubr.msk.f32.gmra.mxu1 %vm330_vm0, %v275_v44 }
 0x28d   : > { %1164 = vmatprep.mubr.f32.mxu0 %v11912_v16  ;;  %1271 = vmatprep.mubr.f32.mxu1 %v11912_v16 }
 0x290   : > { %6097 = vmatmul.mubr.msk.f32.gmra.mxu0 %vm330_vm0, %v277_v28  ;;  %6104 = vmatmul.mubr.msk.f32.gmra.mxu1 %vm330_vm0, %v276_v15 }
 0x291   : > { %1277 = vmatprep.mubr.f32.mxu1 %v11912_v16  ;;  %1170 = vmatprep.mubr.f32.mxu0 %v11912_v16 }
 0x294   : > { %6105 = vmatmul.mubr.msk.f32.gmra.mxu1 %vm330_vm0, %v277_v28  ;;  %6098 = vmatmul.mubr.msk.f32.gmra.mxu0 %vm330_vm0, %v278_v59 }
 0x295   : > { %1283 = vmatprep.mubr.f32.mxu1 %v11912_v16  ;;  %1176 = vmatprep.mubr.f32.mxu0 %v11912_v16 }
 0x298   : > { %6106 = vmatmul.mubr.msk.f32.gmra.mxu1 %vm330_vm0, %v278_v59  ;;  %6099 = vmatmul.mubr.msk.f32.gmra.mxu0 %vm330_vm0, %v279_v34 }
 0x299   : > { %1289 = vmatprep.mubr.f32.mxu1 %v11912_v16  ;;  %1928 = vmatprep.mubr.f32.mxu0 %v11912_v16 }
 0x29c   : > { %6107 = vmatmul.mubr.msk.f32.gmra.mxu1 %vm330_vm0, %v279_v34 }
 0x29d   : > { %2137 = vmatprep.mubr.f32.mxu1 %v11912_v16 }
 0x33c   : > { %v7928_v49 = vpop.f32.mrf.mxu0 }
 0x33e   : > { %v7930_v42 = vpop.f32.mrf.mxu0 }
 0x340   : > { %v7932_v38 = vpop.f32.mrf.mxu0  ;;  %v7934_v50 = vpop.f32.mrf.mxu1 }
 0x342   : > { %v7936_v37 = vpop.f32.mrf.mxu0  ;;  %v7938_v6 = vpop.f32.mrf.mxu1 }
 0x344   : > { %v7940_v39 = vpop.f32.mrf.mxu0  ;;  %v7942_v33 = vpop.f32.mrf.mxu1 }
 0x346   : > { %v7944_v19 = vpop.f32.mrf.mxu0  ;;  %v7946_v14 = vpop.f32.mrf.mxu1 }
 0x348   : > { %v7948_v43 = vpop.f32.mrf.mxu0  ;;  %v7950_v63 = vpop.f32.mrf.mxu1 }
 0x34a   : > { %v7952_v47 = vpop.f32.mrf.mxu0  ;;  %v7954_v62 = vpop.f32.mrf.mxu1 }
 0x34c   : > { %v7956_v55 = vpop.f32.mrf.mxu0  ;;  %v7958_v60 = vpop.f32.mrf.mxu1 }
 0x34e   : > { %v7960_v29 = vpop.f32.mrf.mxu0  ;;  %v7962_v25 = vpop.f32.mrf.mxu1 }
 0x350   : > { %v1166_v56 = vpop.f32.mrf.mxu0  ;;  %v7964_v13 = vpop.f32.mrf.mxu1 }
 0x351   : > { %1306 = vadd.xlane.f32.xlu0 %v1166_v56 }
 0x352   : > { %v7966_v61 = vpop.f32.mrf.mxu1  ;;  %v1168_v45 = vpop.f32.mrf.mxu0 }
 0x354   : > { %v1279_v2 = vpop.f32.mrf.mxu1  ;;  %v1172_v22 = vpop.f32.mrf.mxu0 }
 0x355   : > { %1482 = vadd.xlane.f32.xlu1 %v1279_v2  ;;  %1394 = vadd.xlane.f32.xlu0 %v1168_v45 }
 0x356   : > { %v1281_v11 = vpop.f32.mrf.mxu1  ;;  %v1174_v1 = vpop.f32.mrf.mxu0 }
 0x358   : > { %v1285_v12 = vpop.f32.mrf.mxu1  ;;  %v7968_v46 = vpop.f32.mrf.mxu0 }
 0x359   : > { %1570 = vadd.xlane.f32.xlu1 %v1281_v11  ;;  %1308 = vadd.xlane.f32.xlu0 %v1172_v22 }
 0x35a   : > { %v7970_v36 = vpop.f32.mrf.mxu1  ;;  %v7974_v17 = vpop.f32.mrf.mxu0 }
 0x35c   : > { %v7976_v8 = vpop.f32.mrf.mxu1 }
 0x35d   : > { %1484 = vadd.xlane.f32.xlu1 %v1285_v12  ;;  %1396 = vadd.xlane.f32.xlu0 %v1174_v1 }
 0x35e   : > { %v7980_v18 = vpop.f32.mrf.mxu1 }
 0x361   : > { %1572 = vadd.xlane.f32.xlu1 %v7970_v36  ;;  %1310 = vadd.xlane.f32.xlu0 %v7968_v46 }
 0x365   : > { %1486 = vadd.xlane.f32.xlu1 %v7976_v8  ;;  %1398 = vadd.xlane.f32.xlu0 %v7974_v17 }
 0x369   : > { %1574 = vadd.xlane.f32.xlu1 %v7980_v18  ;;  %1392 = vadd.xlane.f32.xlu0 %v7960_v29 }
 0x36d   : > { %1568 = vadd.xlane.f32.xlu1 %v7966_v61  ;;  %1304 = vadd.xlane.f32.xlu0 %v7956_v55 }
 0x371   : > { %1480 = vadd.xlane.f32.xlu1 %v7964_v13  ;;  %1390 = vadd.xlane.f32.xlu0 %v7952_v47 }
 0x375   : > { %1566 = vadd.xlane.f32.xlu1 %v7962_v25  ;;  %1302 = vadd.xlane.f32.xlu0 %v7948_v43 }
 0x379   : > { %1478 = vadd.xlane.f32.xlu1 %v7958_v60  ;;  %1388 = vadd.xlane.f32.xlu0 %v7944_v19 }
 0x37d   : > { %1564 = vadd.xlane.f32.xlu1 %v7954_v62  ;;  %1300 = vadd.xlane.f32.xlu0 %v7940_v39 }
 0x381   : > { %1476 = vadd.xlane.f32.xlu1 %v7950_v63  ;;  %1386 = vadd.xlane.f32.xlu0 %v7936_v37 }
 0x385   : > { %1562 = vadd.xlane.f32.xlu1 %v7946_v14  ;;  %1298 = vadd.xlane.f32.xlu0 %v7932_v38 }
 0x389   : > { %1474 = vadd.xlane.f32.xlu1 %v7942_v33  ;;  %1384 = vadd.xlane.f32.xlu0 %v7930_v42 }
 0x38d   : > { %1560 = vadd.xlane.f32.xlu1 %v7938_v6  ;;  %1296 = vadd.xlane.f32.xlu0 %v7928_v49 }
 0x391   : > { %1472 = vadd.xlane.f32.xlu1 %v7934_v50 }
 0x3da   : > { %v1307_v20 = vpop.xlane.xlu0 %1306 }
 0x3db   : > { %v1317_v0 = vmul.f32 0.0078125, %v1307_v20 }
 0x3dd   : > { %v8003_v57 = vsub.f32 %v1166_v56, %v1317_v0 }
 0x3de   : > { %v1483_v32 = vpop.xlane.xlu1 %1482  ;;  %v1395_v58 = vpop.xlane.xlu0 %1394 }
 0x3df   : > { %v1493_v24 = vmul.f32 0.0078125, %v1483_v32  ;;  %v1405_v30 = vmul.f32 0.0078125, %v1395_v58  ;;  %v1333_v41 = vmul.f32 %v8003_v57, %v8003_v57 }
 0x3e1   : > { %v8007_v53 = vsub.f32 %v1168_v45, %v1405_v30  ;;  %1346 = vadd.xlane.f32.xlu0 %v1333_v41  ;;  %v8009_v54 = vsub.f32 %v1279_v2, %v1493_v24 }
 0x3e2   : > { %v1571_v44 = vpop.xlane.xlu1 %1570  ;;  %v1309_v15 = vpop.xlane.xlu0 %1308 }
 0x3e3   : > { %v1581_v28 = vmul.f32 0.0078125, %v1571_v44  ;;  %v1318_v59 = vmul.f32 0.0078125, %v1309_v15  ;;  %v1509_v34 = vmul.f32 %v8009_v54, %v8009_v54  ;;  %v1421_v56 = vmul.f32 %v8007_v53, %v8007_v53 }
 0x3e5   : > { %v8015_v20 = vsub.f32 %v1281_v11, %v1581_v28  ;;  %v8017_v0 = vsub.f32 %v1172_v22, %v1318_v59  ;;  %1522 = vadd.xlane.f32.xlu1 %v1509_v34  ;;  %1434 = vadd.xlane.f32.xlu0 %v1421_v56 }
 0x3e6   : > { %v1485_v45 = vpop.xlane.xlu1 %1484  ;;  %v1397_v32 = vpop.xlane.xlu0 %1396 }
 0x3e7   : > { %v1494_v2 = vmul.f32 0.0078125, %v1485_v45  ;;  %v1406_v58 = vmul.f32 0.0078125, %v1397_v32  ;;  %v1597_v24 = vmul.f32 %v8015_v20, %v8015_v20  ;;  %v1334_v30 = vmul.f32 %v8017_v0, %v8017_v0 }
 0x3e9   : > { %v8023_v41 = vsub.f32 %v1285_v12, %v1494_v2  ;;  %v8025_v44 = vsub.f32 %v1174_v1, %v1406_v58  ;;  %1610 = vadd.xlane.f32.xlu1 %v1597_v24  ;;  %1348 = vadd.xlane.f32.xlu0 %v1334_v30 }
 0x3ea   : > { %v1573_v22 = vpop.xlane.xlu1 %1572  ;;  %v1311_v11 = vpop.xlane.xlu0 %1310 }
 0x3eb   : > { %v1582_v15 = vmul.f32 0.0078125, %v1573_v22  ;;  %v1319_v28 = vmul.f32 0.0078125, %v1311_v11  ;;  %v1510_v59 = vmul.f32 %v8023_v41, %v8023_v41  ;;  %v1422_v34 = vmul.f32 %v8025_v44, %v8025_v44 }
 0x3ed   : > { %v8032_v56 = vsub.f32 %v7970_v36, %v1582_v15  ;;  %v8035_v12 = vsub.f32 %v7968_v46, %v1319_v28  ;;  %1524 = vadd.xlane.f32.xlu1 %v1510_v59  ;;  %1436 = vadd.xlane.f32.xlu0 %v1422_v34 }
 0x3ee   : > { %v1487_v1 = vpop.xlane.xlu1 %1486  ;;  %v1399_v45 = vpop.xlane.xlu0 %1398 }
 0x3ef   : > { %v1495_v32 = vmul.f32 0.0078125, %v1487_v1  ;;  %v1407_v2 = vmul.f32 0.0078125, %v1399_v45  ;;  %v1598_v58 = vmul.f32 %v8032_v56, %v8032_v56  ;;  %v1335_v24 = vmul.f32 %v8035_v12, %v8035_v12 }
 0x3f1   : > { %v8042_v30 = vsub.f32 %v7976_v8, %v1495_v32  ;;  %v8045_v36 = vsub.f32 %v7974_v17, %v1407_v2  ;;  %1612 = vadd.xlane.f32.xlu1 %v1598_v58  ;;  %1350 = vadd.xlane.f32.xlu0 %v1335_v24 }
 0x3f2   : > { %v1575_v46 = vpop.xlane.xlu1 %1574  ;;  %v1393_v22 = vpop.xlane.xlu0 %1392 }
 0x3f3   : > { %v1583_v11 = vmul.f32 0.0078125, %v1575_v46  ;;  %v1404_v15 = vmul.f32 0.0078125, %v1393_v22  ;;  %v1511_v28 = vmul.f32 %v8042_v30, %v8042_v30  ;;  %v1423_v59 = vmul.f32 %v8045_v36, %v8045_v36 }
 0x3f5   : > { %v8052_v34 = vsub.f32 %v7980_v18, %v1583_v11  ;;  %v8055_v8 = vsub.f32 %v7960_v29, %v1404_v15  ;;  %1526 = vadd.xlane.f32.xlu1 %v1511_v28  ;;  %1438 = vadd.xlane.f32.xlu0 %v1423_v59 }
 0x3f6   : > { %v1569_v17 = vpop.xlane.xlu1 %1568  ;;  %v1305_v1 = vpop.xlane.xlu0 %1304 }
 0x3f7   : > { %v1580_v45 = vmul.f32 0.0078125, %v1569_v17  ;;  %v1316_v32 = vmul.f32 0.0078125, %v1305_v1  ;;  %v1599_v2 = vmul.f32 %v8052_v34, %v8052_v34  ;;  %v1420_v58 = vmul.f32 %v8055_v8, %v8055_v8 }
 0x3f9   : > { %v8062_v24 = vsub.f32 %v7966_v61, %v1580_v45  ;;  %v8065_v18 = vsub.f32 %v7956_v55, %v1316_v32  ;;  %1614 = vadd.xlane.f32.xlu1 %v1599_v2  ;;  %1432 = vadd.xlane.f32.xlu0 %v1420_v58 }
 0x3fa   : > { %v1481_v29 = vpop.xlane.xlu1 %1480  ;;  %v1391_v46 = vpop.xlane.xlu0 %1390 }
 0x3fb   : > { %v1492_v22 = vmul.f32 0.0078125, %v1481_v29  ;;  %v1403_v11 = vmul.f32 0.0078125, %v1391_v46  ;;  %v1596_v15 = vmul.f32 %v8062_v24, %v8062_v24  ;;  %v1332_v28 = vmul.f32 %v8065_v18, %v8065_v18 }
 0x3fd   : > { %v8072_v59 = vsub.f32 %v7964_v13, %v1492_v22  ;;  %v8075_v61 = vsub.f32 %v7952_v47, %v1403_v11  ;;  %1608 = vadd.xlane.f32.xlu1 %v1596_v15  ;;  %1344 = vadd.xlane.f32.xlu0 %v1332_v28 }
 0x3fe   : > { %v1567_v55 = vpop.xlane.xlu1 %1566  ;;  %v1303_v17 = vpop.xlane.xlu0 %1302 }
 0x3ff   : > { %v1579_v1 = vmul.f32 0.0078125, %v1567_v55  ;;  %v1315_v45 = vmul.f32 0.0078125, %v1303_v17  ;;  %v1508_v32 = vmul.f32 %v8072_v59, %v8072_v59  ;;  %v1419_v2 = vmul.f32 %v8075_v61, %v8075_v61 }
 0x401   : > { %v8082_v58 = vsub.f32 %v7962_v25, %v1579_v1  ;;  %v8085_v13 = vsub.f32 %v7948_v43, %v1315_v45  ;;  %1520 = vadd.xlane.f32.xlu1 %v1508_v32  ;;  %1430 = vadd.xlane.f32.xlu0 %v1419_v2 }
 0x402   : > { %v1479_v47 = vpop.xlane.xlu1 %1478  ;;  %v1389_v29 = vpop.xlane.xlu0 %1388 }
 0x403   : > { %v1491_v46 = vmul.f32 0.0078125, %v1479_v47  ;;  %v1402_v22 = vmul.f32 0.0078125, %v1389_v29  ;;  %v1595_v11 = vmul.f32 %v8082_v58, %v8082_v58  ;;  %v1331_v15 = vmul.f32 %v8085_v13, %v8085_v13 }
 0x405   : > { %v8092_v28 = vsub.f32 %v7958_v60, %v1491_v46  ;;  %v8095_v25 = vsub.f32 %v7944_v19, %v1402_v22  ;;  %1606 = vadd.xlane.f32.xlu1 %v1595_v11  ;;  %1342 = vadd.xlane.f32.xlu0 %v1331_v15 }
 0x406   : > { %v1565_v43 = vpop.xlane.xlu1 %1564  ;;  %v1301_v55 = vpop.xlane.xlu0 %1300 }
 0x407   : > { %v1578_v17 = vmul.f32 0.0078125, %v1565_v43  ;;  %v1314_v1 = vmul.f32 0.0078125, %v1301_v55  ;;  %v1507_v45 = vmul.f32 %v8092_v28, %v8092_v28  ;;  %v1418_v32 = vmul.f32 %v8095_v25, %v8095_v25 }
 0x409   : > { %v8102_v2 = vsub.f32 %v7954_v62, %v1578_v17  ;;  %v8105_v60 = vsub.f32 %v7940_v39, %v1314_v1  ;;  %1518 = vadd.xlane.f32.xlu1 %v1507_v45  ;;  %1428 = vadd.xlane.f32.xlu0 %v1418_v32 }
 0x40a   : > { %v1477_v19 = vpop.xlane.xlu1 %1476  ;;  %v1387_v47 = vpop.xlane.xlu0 %1386 }
 0x40b   : > { %v1490_v29 = vmul.f32 0.0078125, %v1477_v19  ;;  %v1401_v46 = vmul.f32 0.0078125, %v1387_v47  ;;  %v1594_v22 = vmul.f32 %v8102_v2, %v8102_v2  ;;  %v1330_v11 = vmul.f32 %v8105_v60, %v8105_v60 }
 0x40d   : > { %v8112_v15 = vsub.f32 %v7950_v63, %v1490_v29  ;;  %v8115_v62 = vsub.f32 %v7936_v37, %v1401_v46  ;;  %1604 = vadd.xlane.f32.xlu1 %v1594_v22  ;;  %1340 = vadd.xlane.f32.xlu0 %v1330_v11 }
 0x40e   : > { %v1563_v39 = vpop.xlane.xlu1 %1562  ;;  %v1299_v43 = vpop.xlane.xlu0 %1298 }
 0x40f   : > { %v1577_v55 = vmul.f32 0.0078125, %v1563_v39  ;;  %v1313_v17 = vmul.f32 0.0078125, %v1299_v43  ;;  %v1506_v1 = vmul.f32 %v8112_v15, %v8112_v15  ;;  %v1417_v45 = vmul.f32 %v8115_v62, %v8115_v62 }
 0x411   : > { %v8122_v32 = vsub.f32 %v7946_v14, %v1577_v55  ;;  %v8125_v63 = vsub.f32 %v7932_v38, %v1313_v17  ;;  %1516 = vadd.xlane.f32.xlu1 %v1506_v1  ;;  %1426 = vadd.xlane.f32.xlu0 %v1417_v45 }
 0x412   : > { %v1475_v37 = vpop.xlane.xlu1 %1474  ;;  %v1385_v19 = vpop.xlane.xlu0 %1384 }
 0x413   : > { %v1489_v47 = vmul.f32 0.0078125, %v1475_v37  ;;  %v1400_v29 = vmul.f32 0.0078125, %v1385_v19  ;;  %v1593_v46 = vmul.f32 %v8122_v32, %v8122_v32  ;;  %v1329_v22 = vmul.f32 %v8125_v63, %v8125_v63 }
 0x415   : > { %v8132_v11 = vsub.f32 %v7942_v33, %v1489_v47  ;;  %v8135_v14 = vsub.f32 %v7930_v42, %v1400_v29  ;;  %1602 = vadd.xlane.f32.xlu1 %v1593_v46  ;;  %1338 = vadd.xlane.f32.xlu0 %v1329_v22 }
 0x416   : > { %v1561_v38 = vpop.xlane.xlu1 %1560  ;;  %v1297_v39 = vpop.xlane.xlu0 %1296 }
 0x417   : > { %v1576_v43 = vmul.f32 0.0078125, %v1561_v38  ;;  %v1312_v55 = vmul.f32 0.0078125, %v1297_v39  ;;  %v1505_v17 = vmul.f32 %v8132_v11, %v8132_v11  ;;  %v1416_v1 = vmul.f32 %v8135_v14, %v8135_v14 }
 0x419   : > { %v8142_v45 = vsub.f32 %v7938_v6, %v1576_v43  ;;  %v8145_v33 = vsub.f32 %v7928_v49, %v1312_v55  ;;  %1514 = vadd.xlane.f32.xlu1 %v1505_v17  ;;  %1424 = vadd.xlane.f32.xlu0 %v1416_v1 }
 0x41a   : > { %v1473_v42 = vpop.xlane.xlu1 %1472 }
 0x41b   : > { %v1488_v37 = vmul.f32 0.0078125, %v1473_v42  ;;  %v1592_v19 = vmul.f32 %v8142_v45, %v8142_v45  ;;  %v1328_v47 = vmul.f32 %v8145_v33, %v8145_v33 }
 0x41d   : > { %v8152_v29 = vsub.f32 %v7934_v50, %v1488_v37  ;;  %1600 = vadd.xlane.f32.xlu1 %v1592_v19  ;;  %1336 = vadd.xlane.f32.xlu0 %v1328_v47 }
 0x41f   : > { %v1504_v6 = vmul.f32 %v8152_v29, %v8152_v29 }
 0x421   : > { %1512 = vadd.xlane.f32.xlu1 %v1504_v6 }
 0x46a   : > { %v1347_v49 = vpop.xlane.xlu0 %1346 }
 0x46b   : > { %v1357_v46 = vmul.f32 0.0078125, %v1347_v49 }
 0x46d   : > { %v1365_v22 = vadd.f32 1e-05, %v1357_v46 }
 0x46e   : > { %v1523_v38 = vpop.xlane.xlu1 %1522  ;;  %v1435_v39 = vpop.xlane.xlu0 %1434 }
 0x46f   : > { %6389 = vrsqrt.f32 %v1365_v22  ;;  %v1533_v43 = vmul.f32 0.0078125, %v1523_v38  ;;  %v1445_v55 = vmul.f32 0.0078125, %v1435_v39 }
 0x471   : > { %v1541_v17 = vadd.f32 1e-05, %v1533_v43  ;;  %v1453_v1 = vadd.f32 1e-05, %v1445_v55 }
 0x472   : > { %v1611_v42 = vpop.xlane.xlu1 %1610  ;;  %v1349_v16 = vpop.xlane.xlu0 %1348 }
 0x473   : > { %6391 = vrsqrt.f32 %v1541_v17  ;;  %v1621_v50 = vmul.f32 0.0078125, %v1611_v42  ;;  %v1358_v37 = vmul.f32 0.0078125, %v1349_v16 }
 0x474   : > { %6393 = vrsqrt.f32 %v1453_v1 }
 0x475   : > { %v1629_v19 = vadd.f32 1e-05, %v1621_v50  ;;  %v1366_v47 = vadd.f32 1e-05, %v1358_v37 }
 0x476   : > { %v1525_v27 = vpop.xlane.xlu1 %1524  ;;  %v1437_v6 = vpop.xlane.xlu0 %1436 }
 0x477   : > { %6395 = vrsqrt.f32 %v1629_v19  ;;  %v1534_v49 = vmul.f32 0.0078125, %v1525_v27  ;;  %v1446_v46 = vmul.f32 0.0078125, %v1437_v6 }
 0x478   : > { %6397 = vrsqrt.f32 %v1366_v47 }
 0x479   : > { %v1542_v21 = vadd.f32 1e-05, %v1534_v49  ;;  %v1454_v22 = vadd.f32 1e-05, %v1446_v46 }
 0x47a   : > { %v1613_v38 = vpop.xlane.xlu1 %1612  ;;  %v1351_v39 = vpop.xlane.xlu0 %1350 }
 0x47b   : > { %6399 = vrsqrt.f32 %v1542_v21  ;;  %v1622_v43 = vmul.f32 0.0078125, %v1613_v38  ;;  %v1359_v55 = vmul.f32 0.0078125, %v1351_v39 }
 0x47c   : > { %v6390_v31 = vpop.eup %6389  ;;  %6401 = vrsqrt.f32 %v1454_v22 }
 0x47d   : > { %v1381_v16 = vmul.f32 %v6390_v31, %v8003_v57  ;;  %v1630_v17 = vadd.f32 1e-05, %v1622_v43  ;;  %v1367_v1 = vadd.f32 1e-05, %v1359_v55 }
 0x47e   : > { %v1527_v42 = vpop.xlane.xlu1 %1526  ;;  %v1439_v50 = vpop.xlane.xlu0 %1438 }
 0x47f   : > { %v1652_v37 = vsub.f32 0.0, %v1381_v16  ;;  %6403 = vrsqrt.f32 %v1630_v17  ;;  %v1535_v27 = vmul.f32 0.0078125, %v1527_v42  ;;  %v1447_v19 = vmul.f32 0.0078125, %v1439_v50 }
 0x480   : > { %v6392_v47 = vpop.eup %6391  ;;  %6405 = vrsqrt.f32 %v1367_v1 }
 0x481   : > { %v6394_v6 = vpop.eup %6393  ;;  %v1672_v49 = vmul.f32 1.442695, %v1652_v37  ;;  %v1557_v21 = vmul.f32 %v6392_v47, %v8009_v54  ;;  %v1543_v46 = vadd.f32 1e-05, %v1535_v27  ;;  %v1455_v38 = vadd.f32 1e-05, %v1447_v19 }
 0x482   : > { %v1469_v22 = vmul.f32 %v6394_v6, %v8007_v53  ;;  %v1615_v39 = vpop.xlane.xlu1 %1614  ;;  %v1433_v31 = vpop.xlane.xlu0 %1432 }
 0x483   : > { %6407 = vpow2.f32 %v1672_v49  ;;  %v1654_v57 = vsub.f32 0.0, %v1557_v21  ;;  %v1623_v43 = vmul.f32 0.0078125, %v1615_v39  ;;  %v1444_v55 = vmul.f32 0.0078125, %v1433_v31 }
 0x484   : > { %v6396_v16 = vpop.eup %6395  ;;  %v1653_v17 = vsub.f32 0.0, %v1469_v22  ;;  %6409 = vrsqrt.f32 %v1543_v46 }
 0x485   : > { %v6398_v42 = vpop.eup %6397  ;;  %v1676_v50 = vmul.f32 1.442695, %v1654_v57  ;;  %v1645_v1 = vmul.f32 %v6396_v16, %v8015_v20  ;;  %6411 = vrsqrt.f32 %v1455_v38  ;;  %v1631_v37 = vadd.f32 1e-05, %v1623_v43 }
 0x486   : > { %v1674_v54 = vmul.f32 1.442695, %v1653_v17  ;;  %v1382_v27 = vmul.f32 %v6398_v42, %v8017_v0  ;;  %v1452_v19 = vadd.f32 1e-05, %v1444_v55  ;;  %v1609_v53 = vpop.xlane.xlu1 %1608  ;;  %v1345_v47 = vpop.xlane.xlu0 %1344 }
 0x487   : > { %6413 = vpow2.f32 %v1676_v50  ;;  %v1655_v6 = vsub.f32 0.0, %v1645_v1  ;;  %v1620_v49 = vmul.f32 0.0078125, %v1609_v53  ;;  %v1356_v21 = vmul.f32 0.0078125, %v1345_v47 }
 0x488   : > { %v6400_v39 = vpop.eup %6399  ;;  %6415 = vpow2.f32 %v1674_v54  ;;  %v1656_v22 = vsub.f32 0.0, %v1382_v27 }
 0x489   : > { %v6402_v46 = vpop.eup %6401  ;;  %v1678_v31 = vmul.f32 1.442695, %v1655_v6  ;;  %v1558_v57 = vmul.f32 %v6400_v39, %v8023_v41  ;;  %6417 = vrsqrt.f32 %v1631_v37  ;;  %v1628_v20 = vadd.f32 1e-05, %v1620_v49 }
 0x48a   : > { %v1680_v38 = vmul.f32 1.442695, %v1656_v22  ;;  %v1470_v43 = vmul.f32 %v6402_v46, %v8025_v44  ;;  %6419 = vrsqrt.f32 %v1452_v19  ;;  %v1364_v0 = vadd.f32 1e-05, %v1356_v21  ;;  %v1521_v55 = vpop.xlane.xlu1 %1520  ;;  %v1431_v16 = vpop.xlane.xlu0 %1430 }
 0x48b   : > { %6421 = vpow2.f32 %v1678_v31  ;;  %v1658_v17 = vsub.f32 0.0, %v1558_v57  ;;  %v1532_v42 = vmul.f32 0.0078125, %v1521_v55  ;;  %v1443_v50 = vmul.f32 0.0078125, %v1431_v16 }
 0x48c   : > { %v6404_v1 = vpop.eup %6403  ;;  %6423 = vpow2.f32 %v1680_v38  ;;  %v1657_v54 = vsub.f32 0.0, %v1470_v43 }
 0x48d   : > { %v6406_v27 = vpop.eup %6405  ;;  %v1684_v53 = vmul.f32 1.442695, %v1658_v17  ;;  %v1646_v41 = vmul.f32 %v6404_v1, %v8032_v56  ;;  %6425 = vrsqrt.f32 %v1628_v20  ;;  %v1540_v37 = vadd.f32 1e-05, %v1532_v42 }
 0x48e   : > { %v1682_v47 = vmul.f32 1.442695, %v1657_v54  ;;  %v1383_v44 = vmul.f32 %v6406_v27, %v8035_v12  ;;  %6427 = vrsqrt.f32 %v1364_v0  ;;  %v1451_v19 = vadd.f32 1e-05, %v1443_v50  ;;  %v1607_v6 = vpop.xlane.xlu1 %1606  ;;  %v1343_v49 = vpop.xlane.xlu0 %1342 }
 0x48f   : > { %6429 = vpow2.f32 %v1684_v53  ;;  %v1659_v21 = vsub.f32 0.0, %v1646_v41  ;;  %v1619_v39 = vmul.f32 0.0078125, %v1607_v6 }
 0x490   : > { %v6408_v22 = vpop.eup %6407  ;;  %6431 = vpow2.f32 %v1682_v47  ;;  %v1660_v46 = vsub.f32 0.0, %v1383_v44 }
 0x491   : > { %v6410_v31 = vpop.eup %6409  ;;  %v1700_v57 = vadd.f32 1.0, %v6408_v22  ;;  %v1686_v38 = vmul.f32 1.442695, %v1659_v21  ;;  %6433 = vrsqrt.f32 %v1540_v37  ;;  %v1627_v12 = vadd.f32 1e-05, %v1619_v39 }
 0x492   : > { %v6412_v56 = vpop.eup %6411  ;;  %v1688_v20 = vmul.f32 1.442695, %v1660_v46  ;;  %v1559_v43 = vmul.f32 %v6410_v31, %v8042_v30  ;;  %6435 = vrsqrt.f32 %v1451_v19  ;;  %v1519_v0 = vpop.xlane.xlu1 %1518 }
 0x493   : > { %v1429_v55 = vpop.xlane.xlu0 %1428  ;;  %6437 = vrcp.f32 %v1700_v57  ;;  %v1471_v16 = vmul.f32 %v6412_v56, %v8045_v36 }
 0x494   : > { %v6414_v17 = vpop.eup %6413  ;;  %6439 = vpow2.f32 %v1686_v38  ;;  %v1662_v42 = vsub.f32 0.0, %v1559_v43 }
 0x495   : > { %v6416_v50 = vpop.eup %6415  ;;  %v1702_v1 = vadd.f32 1.0, %v6414_v17  ;;  %6441 = vpow2.f32 %v1688_v20  ;;  %v1661_v54 = vsub.f32 0.0, %v1471_v16 }
 0x496   : > { %v6418_v27 = vpop.eup %6417  ;;  %v1701_v53 = vadd.f32 1.0, %v6416_v50  ;;  %v1692_v41 = vmul.f32 1.442695, %v1662_v42  ;;  %6443 = vrsqrt.f32 %v1627_v12  ;;  %v1605_v37 = vpop.xlane.xlu1 %1604  ;;  %v1355_v12 = vmul.f32 0.0078125, %v1343_v49 }
 0x497   : > { %v1341_v30 = vpop.xlane.xlu0 %1340  ;;  %v6420_v47 = vpop.eup %6419  ;;  %6445 = vrcp.f32 %v1702_v1  ;;  %v1690_v44 = vmul.f32 1.442695, %v1661_v54  ;;  %v1647_v19 = vmul.f32 %v6418_v27, %v8052_v34 }
 0x498   : > { %v6422_v6 = vpop.eup %6421  ;;  %6447 = vrcp.f32 %v1701_v53  ;;  %v1468_v36 = vmul.f32 %v6420_v47, %v8055_v8 }
 0x499   : > { %v6424_v21 = vpop.eup %6423  ;;  %v1703_v39 = vadd.f32 1.0, %v6422_v6  ;;  %6449 = vpow2.f32 %v1692_v41  ;;  %v1663_v22 = vsub.f32 0.0, %v1647_v19  ;;  %v1531_v41 = vmul.f32 0.0078125, %v1519_v0 }
 0x49a   : > { %v6426_v46 = vpop.eup %6425  ;;  %v1704_v31 = vadd.f32 1.0, %v6424_v21  ;;  %6451 = vpow2.f32 %v1690_v44  ;;  %v1649_v57 = vsub.f32 0.0, %v1468_v36  ;;  %v1517_v38 = vpop.xlane.xlu1 %1516  ;;  %v1363_v19 = vadd.f32 1e-05, %v1355_v12 }
 0x49b   : > { %v6428_v56 = vpop.eup %6427  ;;  %6453 = vrcp.f32 %v1703_v39  ;;  %v1694_v20 = vmul.f32 1.442695, %v1663_v22  ;;  %v1644_v43 = vmul.f32 %v6426_v46, %v8062_v24  ;;  %v1427_v17 = vpop.xlane.xlu0 %1426  ;;  %v1442_v36 = vmul.f32 0.0078125, %v1429_v55 }
 0x49c   : > { %v6430_v34 = vpop.eup %6429  ;;  %6455 = vrcp.f32 %v1704_v31  ;;  %v1666_v16 = vmul.f32 1.442695, %v1649_v57  ;;  %v1380_v8 = vmul.f32 %v6428_v56, %v8065_v18  ;;  %v1539_v0 = vadd.f32 1e-05, %v1531_v41 }
 0x49d   : > { %v6432_v42 = vpop.eup %6431  ;;  %v1706_v50 = vadd.f32 1.0, %v6430_v34  ;;  %6457 = vpow2.f32 %v1694_v20  ;;  %v1651_v1 = vsub.f32 0.0, %v1644_v43  ;;  %v1450_v34 = vadd.f32 1e-05, %v1442_v36 }
 0x49e   : > { %v6434_v54 = vpop.eup %6433  ;;  %v1705_v27 = vadd.f32 1.0, %v6432_v42  ;;  %6459 = vpow2.f32 %v1666_v16  ;;  %v1648_v53 = vsub.f32 0.0, %v1380_v8  ;;  %v1603_v47 = vpop.xlane.xlu1 %1602  ;;  %v1354_v55 = vmul.f32 0.0078125, %v1341_v30 }
 0x49f   : > { %v8171_v44 = vpop.eup %6435  ;;  %6461 = vrcp.f32 %v1706_v50  ;;  %v1670_v24 = vmul.f32 1.442695, %v1651_v1  ;;  %v1556_v49 = vmul.f32 %v6434_v54, %v8072_v59  ;;  %v1339_v31 = vpop.xlane.xlu0 %1338  ;;  %v1618_v59 = vmul.f32 0.0078125, %v1605_v37 }
 0x4a0   : > { %v8174_v6 = vpop.eup %6437  ;;  %6463 = vrcp.f32 %v1705_v27  ;;  %v1664_v18 = vmul.f32 1.442695, %v1648_v53  ;;  %v1530_v54 = vmul.f32 0.0078125, %v1517_v38  ;;  %v1362_v37 = vadd.f32 1e-05, %v1354_v55 }
 0x4a1   : > { %v6440_v21 = vpop.eup %6439  ;;  %6465 = vpow2.f32 %v1670_v24  ;;  %v1650_v39 = vsub.f32 0.0, %v1556_v49  ;;  %v1626_v1 = vadd.f32 1e-05, %v1618_v59  ;;  %v1441_v41 = vmul.f32 0.0078125, %v1427_v17 }
 0x4a2   : > { %v6442_v22 = vpop.eup %6441  ;;  %v1707_v46 = vadd.f32 1.0, %v6440_v21  ;;  %6467 = vpow2.f32 %v1664_v18  ;;  %v1515_v43 = vpop.xlane.xlu1 %1514  ;;  %v1538_v21 = vadd.f32 1e-05, %v1530_v54 }
 0x4a3   : > { %v8176_v57 = vpop.eup %6443  ;;  %v1708_v56 = vadd.f32 1.0, %v6442_v22  ;;  %v1668_v20 = vmul.f32 1.442695, %v1650_v39  ;;  %6469 = vrsqrt.f32 %v1363_v19  ;;  %v1425_v24 = vpop.xlane.xlu0 %1424  ;;  %v1617_v39 = vmul.f32 0.0078125, %v1603_v47 }
 0x4a4   : > { %v8178_v12 = vpop.eup %6445  ;;  %6471 = vrcp.f32 %v1707_v46  ;;  %v1449_v46 = vadd.f32 1e-05, %v1441_v41  ;;  %v1529_v17 = vmul.f32 0.0078125, %v1515_v43 }
 0x4a5   : > { %v8180_v16 = vpop.eup %6447  ;;  %6473 = vrcp.f32 %v1708_v56 }
 0x4a6   : > { %v6450_v8 = vpop.eup %6449  ;;  %6475 = vpow2.f32 %v1668_v20  ;;  %v1601_v30 = vpop.xlane.xlu1 %1600 }
 0x4a7   : > { %v6452_v42 = vpop.eup %6451  ;;  %v1710_v50 = vadd.f32 1.0, %v6450_v8  ;;  %6477 = vrsqrt.f32 %v1539_v0  ;;  %v1353_v0 = vmul.f32 0.0078125, %v1339_v31  ;;  %v1337_v59 = vpop.xlane.xlu0 %1336  ;;  %v1625_v8 = vadd.f32 1e-05, %v1617_v39 }
 0x4a8   : > { %v8182_v27 = vpop.eup %6453  ;;  %v1709_v53 = vadd.f32 1.0, %v6452_v42  ;;  %6479 = vrsqrt.f32 %v1450_v34  ;;  %v1440_v42 = vmul.f32 0.0078125, %v1425_v24  ;;  %v1537_v31 = vadd.f32 1e-05, %v1529_v17 }
 0x4a9   : > { %v8184_v49 = vpop.eup %6455  ;;  %6481 = vrcp.f32 %v1710_v50  ;;  %v1361_v54 = vadd.f32 1e-05, %v1353_v0  ;;  %v1352_v41 = vmul.f32 0.0078125, %v1337_v59 }
 0x4aa   : > { %v6458_v19 = vpop.eup %6457  ;;  %6483 = vrcp.f32 %v1709_v53  ;;  %v1513_v50 = vpop.xlane.xlu1 %1512  ;;  %v1616_v53 = vmul.f32 0.0078125, %v1601_v30  ;;  %v1467_v30 = vmul.f32 %v8171_v44, %v8075_v61  ;;  %v1643_v61 = vmul.f32 %v8176_v57, %v8082_v58 }
 0x4ab   : > { %v6460_v18 = vpop.eup %6459  ;;  %v1711_v36 = vadd.f32 1.0, %v6458_v19  ;;  %6485 = vrsqrt.f32 %v1626_v1  ;;  %v1528_v43 = vmul.f32 0.0078125, %v1513_v50 }
 0x4ac   : > { %v8186_v22 = vpop.eup %6461  ;;  %v1697_v38 = vadd.f32 1.0, %v6460_v18  ;;  %6487 = vrsqrt.f32 %v1362_v37 }
 0x4ad   : > { %v6464_v56 = vpop.eup %6463  ;;  %6489 = vrcp.f32 %v1711_v36  ;;  %v1448_v36 = vadd.f32 1e-05, %v1440_v42  ;;  %v1536_v59 = vadd.f32 1e-05, %v1528_v43 }
 0x4ae   : > { %v6466_v20 = vpop.eup %6465  ;;  %6491 = vrcp.f32 %v1697_v38  ;;  %v1624_v38 = vadd.f32 1e-05, %v1616_v53 }
 0x4af   : > { %v6468_v34 = vpop.eup %6467  ;;  %v1699_v55 = vadd.f32 1.0, %v6466_v20  ;;  %6493 = vrsqrt.f32 %v1538_v21 }
 0x4b0   : > { %v6470_v1 = vpop.eup %6469  ;;  %v1696_v47 = vadd.f32 1.0, %v6468_v34  ;;  %6495 = vrsqrt.f32 %v1449_v46  ;;  %v1360_v46 = vadd.f32 1e-05, %v1352_v41 }
 0x4b1   : > { %v6472_v37 = vpop.eup %6471  ;;  %6497 = vrcp.f32 %v1699_v55  ;;  %v1379_v21 = vmul.f32 %v6470_v1, %v8085_v13 }
 0x4b2   : > { %v6474_v19 = vpop.eup %6473  ;;  %6499 = vrcp.f32 %v1696_v47 }
 0x4b3   : > { %v6476_v18 = vpop.eup %6475  ;;  %6501 = vrsqrt.f32 %v1625_v8  ;;  %v1756_v0 = vmul.f32 %v6474_v19, %v1379_v21 }
 0x4b4   : > { %v6478_v39 = vpop.eup %6477  ;;  %v1698_v24 = vadd.f32 1.0, %v6476_v18  ;;  %6503 = vrsqrt.f32 %v1361_v54 }
 0x4b5   : > { %v6480_v20 = vpop.eup %6479  ;;  %6505 = vrsqrt.f32 %v1537_v31  ;;  %v1555_v55 = vmul.f32 %v6478_v39, %v8092_v28  ;;  %v1772_v54 = vadd.f32 %v1756_v0, %v7810_v3 }
 0x4b6   : > { %v6482_v17 = vpop.eup %6481  ;;  %6507 = vrcp.f32 %v1698_v24  ;;  %v1466_v34 = vmul.f32 %v6480_v20, %v8095_v25 }
 0x4b7   : > { %v6484_v8 = vpop.eup %6483  ;;  %6509 = vrsqrt.f32 %v1448_v36  ;;  %v1758_v1 = vmul.f32 %v6482_v17, %v1555_v55 }
 0x4b8   : > { %v6486_v13 = vpop.eup %6485  ;;  %6511 = vrsqrt.f32 %v1624_v38  ;;  %v1757_v42 = vmul.f32 %v6484_v8, %v1467_v30  ;;  %v1753_v50 = vmul.f32 %v6464_v56, %v1466_v34 }
 0x4b9   : > { %v6488_v47 = vpop.eup %6487  ;;  %6513 = vrsqrt.f32 %v1360_v46  ;;  %v1642_v44 = vmul.f32 %v6486_v13, %v8102_v2  ;;  %v1774_v58 = vadd.f32 %v1758_v1, %v7837_v51  ;;  %v8204_v2 = vmul.f32 0.70710677, %v1772_v54 }
 0x4ba   : > { %v6490_v53 = vpop.eup %6489  ;;  %6515 = vrsqrt.f32 %v1536_v59  ;;  %v1773_v28 = vadd.f32 %v1757_v42, %v7805_v40  ;;  %v1769_v25 = vadd.f32 %v1753_v50, %v7814_v5  ;;  %v1378_v31 = vmul.f32 %v6488_v47, %v8105_v60 }
 0x4bb   : > { %v6492_v41 = vpop.eup %6491  ;;  %v1759_v56 = vmul.f32 %v6490_v53, %v1643_v61  ;;  %v1755_v19 = vmul.f32 %v6472_v37, %v1642_v44  ;;  %12233 = vst [vmem:[#allocation10_spill] sm:$0xff] %v8204_v2  ;;  %v8222_v38 = vmul.f32 0.70710677, %v1774_v58  ;;  %v282_v58 = vld [vmem:[%s11908_s1 + $0x90] sm:$0xff] }
 0x4bc   : > { %v6494_v43 = vpop.eup %6493  ;;  %v8200_v18 = vmul.f32 0.70710677, %v1773_v28  ;;  %v1752_v3 = vmul.f32 %v8184_v49, %v1378_v31  ;;  %v8210_v37 = vmul.f32 0.70710677, %v1769_v25 }
 0x4bd   : > { %v6496_v57 = vpop.eup %6495  ;;  %v1775_v36 = vadd.f32 %v1759_v56, %v7831_v23  ;;  %v1771_v40 = vadd.f32 %v1755_v19, %v7846_v48  ;;  %v1554_v5 = vmul.f32 %v6494_v43, %v8112_v15  ;;  %12237 = vst [vmem:[#allocation14_spill] sm:$0xff] %v8222_v38  ;;  %v280_v56 = vld [vmem:[%s11908_s1 + $0x80] sm:$0xff]  ;;  %v12251_v43 = vmov 0.0  }
 0x4be   : > { %12232 = vst [vmem:[#allocation9_spill] sm:$0xff] %v8200_v18  ;;  %v6498_v60 = vpop.eup %6497  ;;  %1888 = vmatprep.subr.mxu0 %v8200_v18  ;;  %12234 = vst [vmem:[#allocation11_spill] sm:$0xff] %v8210_v37  ;;  %v1768_v21 = vadd.f32 %v1752_v3, %v7817_v26  ;;  %v1465_v49 = vmul.f32 %v6496_v57, %v8115_v62  ;;  %v281_v3 = vld [vmem:[%s11908_s1 + $0x88] sm:$0xff]  ;;  %v283_v57 = vld [vmem:[%s11908_s1 + $0x98] sm:$0xff] }
 0x4bf   : > { %v6500_v39 = vpop.eup %6499  ;;  %1889 = vmatpush1.msra.mxu0 %v8204_v2  ;;  %v8215_v51 = vmul.f32 0.70710677, %v1775_v36  ;;  %v1754_v23 = vmul.f32 %v8186_v22, %v1554_v5  ;;  %v8225_v26 = vmul.f32 0.70710677, %v1771_v40  ;;  %v284_v36 = vld [vmem:[%s11908_s1 + $0xa0] sm:$0xff]  ;;  %v285_v40 = vld [vmem:[%s11908_s1 + $0xa8] sm:$0xff] }
 0x4c0   : > { %v6502_v24 = vpop.eup %6501  ;;  %1890 = vmatprep.subr.mxu0 %v8210_v37  ;;  %v8219_v48 = vmul.f32 0.70710677, %v1768_v21  ;;  %v1749_v15 = vmul.f32 %v8180_v16, %v1465_v49  ;;  %v286_v5 = vld [vmem:[%s11908_s1 + $0xb0] sm:$0xff]  ;;  %v288_v21 = vld [vmem:[%s11908_s1 + $0xc0] sm:$0xff]  ;;  %v289_v49 = vld [vmem:[%s11908_s1 + $0xc8] sm:$0xff] }
 0x4c1   : > { %12235 = vst [vmem:[#allocation12_spill] sm:$0xff] %v8215_v51  ;;  %v6504_v20 = vpop.eup %6503  ;;  %2097 = vmatprep.subr.mxu1 %v8215_v51  ;;  %12238 = vst [vmem:[#allocation15_spill] sm:$0xff] %v8225_v26  ;;  %v1770_v62 = vadd.f32 %v1754_v23, %v7851_v7  ;;  %v1641_v46 = vmul.f32 %v6502_v24, %v8122_v32  ;;  %v291_v23 = vld [vmem:[%s11908_s1 + $0xd8] sm:$0xff]  ;;  %v292_v24 = vld [vmem:[%s11908_s1 + $0xe0] sm:$0xff] }
 0x4c2   : > { %12236 = vst [vmem:[#allocation13_spill] sm:$0xff] %v8219_v48  ;;  %v6506_v30 = vpop.eup %6505  ;;  %1891 = vmatpush1.msra.mxu0 %v8219_v48  ;;  %v1765_v22 = vadd.f32 %v1749_v15, %v7820_v52  ;;  %v1377_v0 = vmul.f32 %v6504_v20, %v8125_v63  ;;  %2098 = vmatpush1.msra.mxu1 %v8222_v38  ;;  %v293_v15 = vld [vmem:[%s11908_s1 + $0xe8] sm:$0xff]  ;;  %v294_v20 = vld [vmem:[%s11908_s1 + $0xf0] sm:$0xff] }
 0x4c3   : > { %v6508_v16 = vpop.eup %6507  ;;  %2099 = vmatprep.subr.mxu1 %v8225_v26  ;;  %v8234_v17 = vmul.f32 0.70710677, %v1770_v62  ;;  %v1751_v59 = vmul.f32 %v8182_v27, %v1641_v46  ;;  %v1553_v7 = vmul.f32 %v6506_v30, %v8132_v11  ;;  %v295_v62 = vld [vmem:[%s11908_s1 + $0xf8] sm:$0xff]  ;;  %v296_v46 = vld [vmem:[%s11908_s1 + $0x100] sm:$0xff]  ;;  %v297_v30 = vld [vmem:[%s11908_s1 + $0x108] sm:$0xff] }
 0x4c4   : > { %v6510_v34 = vpop.eup %6509  ;;  %v8238_v32 = vmul.f32 0.70710677, %v1765_v22  ;;  %v1748_v55 = vmul.f32 %v8174_v6, %v1377_v0  ;;  %v298_v22 = vld [vmem:[%s11908_s1 + $0x110] sm:$0xff]  ;;  %v299_v0 = vld [vmem:[%s11908_s1 + $0x118] sm:$0xff] }
 0x4c5   : > { %12239 = vst [vmem:[#allocation16_spill] sm:$0xff] %v8234_v17  ;;  %v6512_v8 = vpop.eup %6511  ;;  %v1464_v52 = vmul.f32 %v6510_v34, %v8135_v14  ;;  %2100 = vmatpush1.msra.mxu1 %v8234_v17  ;;  %v1767_v63 = vadd.f32 %v1751_v59, %v7860_v4  ;;  %v1750_v13 = vmul.f32 %v8178_v12, %v1553_v7  ;;  %v301_v59 = vld [vmem:[%s11908_s1 + $0x128] sm:$0xff]  ;;  %v302_v7 = vld [vmem:[%s11908_s1 + $0x130] sm:$0xff]  ;;  %v303_v34 = vld [vmem:[%s11908_s1 + $0x138] sm:$0xff] }
 0x4c6   : > { %12240 = vst [vmem:[#allocation17_spill] sm:$0xff] %v8238_v32  ;;  %v6514_v42 = vpop.eup %6513  ;;  %1892 = vmatprep.subr.mxu0 %v8238_v32  ;;  %v1764_v27 = vadd.f32 %v1748_v55, %v7826_v9  ;;  %v1640_v11 = vmul.f32 %v6512_v8, %v8142_v45  ;;  %v12244_v45 = vld [vmem:[#allocation7_spill] sm:$0xff] }
 0x4c7   : > { %v6516_v50 = vpop.eup %6515  ;;  %v1745_v1 = vmul.f32 %v6492_v41, %v1464_v52  ;;  %v1376_v6 = vmul.f32 %v6514_v42, %v8145_v33  ;;  %v8249_v47 = vmul.f32 0.70710677, %v1767_v63  ;;  %v1766_v14 = vadd.f32 %v1750_v13, %v7864_v35  ;;  %v12246_v35 = vld [vmem:[#allocation6_spill] sm:$0xff] }
 0x4c8   : > { %v8252_v54 = vmul.f32 0.70710677, %v1764_v27  ;;  %v1747_v4 = vmul.f32 %v6498_v60, %v1640_v11  ;;  %v1552_v12 = vmul.f32 %v6516_v50, %v8152_v29  ;;  %v12248_v29 = vld [vmem:[#allocation8_spill] sm:$0xff]  ;;  %v287_v60 = vld [vmem:[%s11908_s1 + $0xb8] sm:$0xff] }
 0x4c9   : > { %12241 = vst [vmem:[#allocation18_spill] sm:$0xff] %v8249_v47  ;;  %v1761_v61 = vadd.f32 %v1745_v1, %v7842_v10  ;;  %v1744_v44 = vmul.f32 %v6500_v39, %v1376_v6  ;;  %2101 = vmatprep.subr.mxu1 %v8249_v47  ;;  %v8257_v9 = vmul.f32 0.70710677, %v1766_v14  ;;  %v290_v39 = vld [vmem:[%s11908_s1 + $0xd0] sm:$0xff] }
 0x4ca   : > { %12242 = vst [vmem:[#allocation19_spill] sm:$0xff] %v8252_v54  ;;  %1893 = vmatpush1.msra.mxu0 %v8252_v54  ;;  %v1763_v33 = vadd.f32 %v1747_v4, %v12244_v45  ;;  %v1746_v53 = vmul.f32 %v6508_v16, %v1552_v12  ;;  %v300_v16 = vld [vmem:[%s11908_s1 + $0x120] sm:$0xff] }
 0x4cb   : > { %12243 = vst [vmem:[#allocation20_spill] sm:$0xff] %v8257_v9  ;;  %v8261_v28 = vmul.f32 0.70710677, %v1761_v61  ;;  %v1760_v25 = vadd.f32 %v1744_v44, %v12246_v35  ;;  %2102 = vmatpush1.msra.mxu1 %v8257_v9 }
 0x4cc   : > { %v8265_v31 = vmul.f32 0.70710677, %v1763_v33  ;;  %v1762_v10 = vadd.f32 %v1746_v53, %v12248_v29 }
 0x4cd   : > { %12245 = vst [vmem:[#allocation7_spill] sm:$0xff] %v8261_v28  ;;  %1894 = vmatprep.subr.mxu0 %v8261_v28  ;;  %v8269_v41 = vmul.f32 0.70710677, %v1760_v25 }
 0x4ce   : > { %12247 = vst [vmem:[#allocation6_spill] sm:$0xff] %v8265_v31  ;;  %2103 = vmatprep.subr.mxu1 %v8265_v31  ;;  %v8275_v19 = vmul.f32 0.70710677, %v1762_v10 }
 0x4cf   : > { %12249 = vst [vmem:[#allocation8_spill] sm:$0xff] %v8269_v41  ;;  %1895 = vmatpush1.msra.mxu0 %v8269_v41 }
 0x4d0   : > { %12250 = vst [vmem:[#allocation21_spill] sm:$0xff] %v8275_v19  ;;  %6108 = vmatmul.mubr.msk.f32.vlgmr.msra.gmra.mxu0 %vm330_vm0, %v280_v56  ;;  %2104 = vmatpush1.msra.mxu1 %v8275_v19 }
 0x4d1   : > { %6132 = vmatmul.mubr.msk.f32.vlgmr.msra.gmra.mxu1 %vm330_vm0, %v280_v56  ;;  %1934 = vmatprep.mubr.f32.mxu0 %v12251_v43 }
 0x4d2   : > { %2143 = vmatprep.mubr.f32.mxu1 %v12251_v43 }
 0x4d4   : > { %6109 = vmatmul.mubr.msk.f32.gmra.mxu0 %vm330_vm0, %v281_v3 }
 0x4d5   : > { %6133 = vmatmul.mubr.msk.f32.gmra.mxu1 %vm330_vm0, %v281_v3  ;;  %1940 = vmatprep.mubr.f32.mxu0 %v12251_v43 }
 0x4d6   : > { %2149 = vmatprep.mubr.f32.mxu1 %v12251_v43 }
 0x4d8   : > { %6110 = vmatmul.mubr.msk.f32.gmra.mxu0 %vm330_vm0, %v282_v58 }
 0x4d9   : > { %6134 = vmatmul.mubr.msk.f32.gmra.mxu1 %vm330_vm0, %v282_v58  ;;  %1946 = vmatprep.mubr.f32.mxu0 %v12251_v43 }
 0x4da   : > { %2155 = vmatprep.mubr.f32.mxu1 %v12251_v43 }
 0x4dc   : > { %6111 = vmatmul.mubr.msk.f32.gmra.mxu0 %vm330_vm0, %v283_v57 }
 0x4dd   : > { %6135 = vmatmul.mubr.msk.f32.gmra.mxu1 %vm330_vm0, %v283_v57  ;;  %1952 = vmatprep.mubr.f32.mxu0 %v12251_v43 }
 0x4de   : > { %2161 = vmatprep.mubr.f32.mxu1 %v12251_v43 }
 0x4e0   : > { %6112 = vmatmul.mubr.msk.f32.gmra.mxu0 %vm330_vm0, %v284_v36 }
 0x4e1   : > { %6136 = vmatmul.mubr.msk.f32.gmra.mxu1 %vm330_vm0, %v284_v36  ;;  %1958 = vmatprep.mubr.f32.mxu0 %v12251_v43 }
 0x4e2   : > { %2167 = vmatprep.mubr.f32.mxu1 %v12251_v43 }
 0x4e4   : > { %6113 = vmatmul.mubr.msk.f32.gmra.mxu0 %vm330_vm0, %v285_v40 }
 0x4e5   : > { %6137 = vmatmul.mubr.msk.f32.gmra.mxu1 %vm330_vm0, %v285_v40  ;;  %1964 = vmatprep.mubr.f32.mxu0 %v12251_v43 }
 0x4e6   : > { %2173 = vmatprep.mubr.f32.mxu1 %v12251_v43 }
 0x4e8   : > { %6114 = vmatmul.mubr.msk.f32.gmra.mxu0 %vm330_vm0, %v286_v5 }
 0x4e9   : > { %6138 = vmatmul.mubr.msk.f32.gmra.mxu1 %vm330_vm0, %v286_v5  ;;  %1970 = vmatprep.mubr.f32.mxu0 %v12251_v43 }
 0x4ea   : > { %2179 = vmatprep.mubr.f32.mxu1 %v12251_v43 }
 0x4ec   : > { %6115 = vmatmul.mubr.msk.f32.gmra.mxu0 %vm330_vm0, %v287_v60 }
 0x4ed   : > { %6139 = vmatmul.mubr.msk.f32.gmra.mxu1 %vm330_vm0, %v287_v60  ;;  %1976 = vmatprep.mubr.f32.mxu0 %v12251_v43 }
 0x4ee   : > { %2185 = vmatprep.mubr.f32.mxu1 %v12251_v43 }
 0x4f0   : > { %6116 = vmatmul.mubr.msk.f32.gmra.mxu0 %vm330_vm0, %v288_v21 }
 0x4f1   : > { %6140 = vmatmul.mubr.msk.f32.gmra.mxu1 %vm330_vm0, %v288_v21  ;;  %1982 = vmatprep.mubr.f32.mxu0 %v12251_v43 }
 0x4f2   : > { %2191 = vmatprep.mubr.f32.mxu1 %v12251_v43 }
 0x4f4   : > { %6117 = vmatmul.mubr.msk.f32.gmra.mxu0 %vm330_vm0, %v289_v49 }
 0x4f5   : > { %6141 = vmatmul.mubr.msk.f32.gmra.mxu1 %vm330_vm0, %v289_v49  ;;  %1988 = vmatprep.mubr.f32.mxu0 %v12251_v43 }
 0x4f6   : > { %2197 = vmatprep.mubr.f32.mxu1 %v12251_v43 }
 0x4f8   : > { %6118 = vmatmul.mubr.msk.f32.gmra.mxu0 %vm330_vm0, %v290_v39 }
 0x4f9   : > { %6142 = vmatmul.mubr.msk.f32.gmra.mxu1 %vm330_vm0, %v290_v39  ;;  %1994 = vmatprep.mubr.f32.mxu0 %v12251_v43 }
 0x4fa   : > { %2203 = vmatprep.mubr.f32.mxu1 %v12251_v43 }
 0x4fc   : > { %6119 = vmatmul.mubr.msk.f32.gmra.mxu0 %vm330_vm0, %v291_v23 }
 0x4fd   : > { %6143 = vmatmul.mubr.msk.f32.gmra.mxu1 %vm330_vm0, %v291_v23  ;;  %2000 = vmatprep.mubr.f32.mxu0 %v12251_v43 }
 0x4fe   : > { %2209 = vmatprep.mubr.f32.mxu1 %v12251_v43 }
 0x500   : > { %6120 = vmatmul.mubr.msk.f32.gmra.mxu0 %vm330_vm0, %v292_v24 }
 0x501   : > { %6144 = vmatmul.mubr.msk.f32.gmra.mxu1 %vm330_vm0, %v292_v24  ;;  %2006 = vmatprep.mubr.f32.mxu0 %v12251_v43 }
 0x502   : > { %2215 = vmatprep.mubr.f32.mxu1 %v12251_v43 }
 0x504   : > { %6121 = vmatmul.mubr.msk.f32.gmra.mxu0 %vm330_vm0, %v293_v15 }
 0x505   : > { %6145 = vmatmul.mubr.msk.f32.gmra.mxu1 %vm330_vm0, %v293_v15  ;;  %2012 = vmatprep.mubr.f32.mxu0 %v12251_v43 }
 0x506   : > { %2221 = vmatprep.mubr.f32.mxu1 %v12251_v43 }
 0x508   : > { %6122 = vmatmul.mubr.msk.f32.gmra.mxu0 %vm330_vm0, %v294_v20 }
 0x509   : > { %6146 = vmatmul.mubr.msk.f32.gmra.mxu1 %vm330_vm0, %v294_v20  ;;  %2018 = vmatprep.mubr.f32.mxu0 %v12251_v43 }
 0x50a   : > { %2227 = vmatprep.mubr.f32.mxu1 %v12251_v43 }
 0x50c   : > { %6123 = vmatmul.mubr.msk.f32.gmra.mxu0 %vm330_vm0, %v295_v62 }
 0x50d   : > { %6147 = vmatmul.mubr.msk.f32.gmra.mxu1 %vm330_vm0, %v295_v62  ;;  %2024 = vmatprep.mubr.f32.mxu0 %v12251_v43 }
 0x50e   : > { %2233 = vmatprep.mubr.f32.mxu1 %v12251_v43 }
 0x510   : > { %6124 = vmatmul.mubr.msk.f32.gmra.mxu0 %vm330_vm0, %v296_v46 }
 0x511   : > { %6148 = vmatmul.mubr.msk.f32.gmra.mxu1 %vm330_vm0, %v296_v46  ;;  %2030 = vmatprep.mubr.f32.mxu0 %v12251_v43 }
 0x512   : > { %2239 = vmatprep.mubr.f32.mxu1 %v12251_v43 }
 0x514   : > { %6125 = vmatmul.mubr.msk.f32.gmra.mxu0 %vm330_vm0, %v297_v30 }
 0x515   : > { %6149 = vmatmul.mubr.msk.f32.gmra.mxu1 %vm330_vm0, %v297_v30  ;;  %2036 = vmatprep.mubr.f32.mxu0 %v12251_v43 }
 0x516   : > { %2245 = vmatprep.mubr.f32.mxu1 %v12251_v43 }
 0x518   : > { %6126 = vmatmul.mubr.msk.f32.gmra.mxu0 %vm330_vm0, %v298_v22 }
 0x519   : > { %6150 = vmatmul.mubr.msk.f32.gmra.mxu1 %vm330_vm0, %v298_v22  ;;  %2042 = vmatprep.mubr.f32.mxu0 %v12251_v43 }
 0x51a   : > { %2251 = vmatprep.mubr.f32.mxu1 %v12251_v43 }
 0x51c   : > { %6127 = vmatmul.mubr.msk.f32.gmra.mxu0 %vm330_vm0, %v299_v0 }
 0x51d   : > { %6151 = vmatmul.mubr.msk.f32.gmra.mxu1 %vm330_vm0, %v299_v0  ;;  %2048 = vmatprep.mubr.f32.mxu0 %v12251_v43 }
 0x51e   : > { %2257 = vmatprep.mubr.f32.mxu1 %v12251_v43 }
 0x520   : > { %6128 = vmatmul.mubr.msk.f32.gmra.mxu0 %vm330_vm0, %v300_v16 }
 0x521   : > { %6152 = vmatmul.mubr.msk.f32.gmra.mxu1 %vm330_vm0, %v300_v16  ;;  %2054 = vmatprep.mubr.f32.mxu0 %v12251_v43 }
 0x522   : > { %2263 = vmatprep.mubr.f32.mxu1 %v12251_v43 }
 0x524   : > { %6129 = vmatmul.mubr.msk.f32.gmra.mxu0 %vm330_vm0, %v301_v59 }
 0x525   : > { %6153 = vmatmul.mubr.msk.f32.gmra.mxu1 %vm330_vm0, %v301_v59  ;;  %2060 = vmatprep.mubr.f32.mxu0 %v12251_v43 }
 0x526   : > { %2269 = vmatprep.mubr.f32.mxu1 %v12251_v43 }
 0x528   : > { %6130 = vmatmul.mubr.msk.f32.gmra.mxu0 %vm330_vm0, %v302_v7 }
 0x529   : > { %6154 = vmatmul.mubr.msk.f32.gmra.mxu1 %vm330_vm0, %v302_v7  ;;  %2066 = vmatprep.mubr.f32.mxu0 %v12251_v43 }
 0x52a   : > { %2275 = vmatprep.mubr.f32.mxu1 %v12251_v43 }
 0x52c   : > { %6131 = vmatmul.mubr.msk.f32.gmra.mxu0 %vm330_vm0, %v303_v34 }
 0x52d   : > { %6155 = vmatmul.mubr.msk.f32.gmra.mxu1 %vm330_vm0, %v303_v34  ;;  %3907 = vmatprep.mubr.f32.mxu0 %v12251_v43 }
 0x52e   : > { %4116 = vmatprep.mubr.f32.mxu1 %v12251_v43 }
 0x590   : > { %v8444_v55 = vpop.f32.mrf.mxu0 }
 0x591   : > { %12252 = vst [vmem:[#allocation22_spill] sm:$0xff] %v8444_v55  ;;  %2282 = vadd.xlane.f32.xlu0 %v8444_v55  ;;  %v8447_v8 = vpop.f32.mrf.mxu1 }
 0x592   : > { %12253 = vst [vmem:[#allocation23_spill] sm:$0xff] %v8447_v8  ;;  %v8449_v52 = vpop.f32.mrf.mxu0  ;;  %2810 = vadd.xlane.f32.xlu1 %v8447_v8 }
 0x593   : > { %12254 = vst [vmem:[#allocation24_spill] sm:$0xff] %v8449_v52  ;;  %v8453_v63 = vpop.f32.mrf.mxu1 }
 0x594   : > { %12255 = vst [vmem:[#allocation25_spill] sm:$0xff] %v8453_v63  ;;  %v8455_v13 = vpop.f32.mrf.mxu0 }
 0x595   : > { %2546 = vadd.xlane.f32.xlu0 %v8449_v52  ;;  %12256 = vst [vmem:[#allocation26_spill] sm:$0xff] %v8455_v13  ;;  %v8459_v42 = vpop.f32.mrf.mxu1 }
 0x596   : > { %3074 = vadd.xlane.f32.xlu1 %v8453_v63  ;;  %12257 = vst [vmem:[#allocation27_spill] sm:$0xff] %v8459_v42  ;;  %v8461_v27 = vpop.f32.mrf.mxu0 }
 0x597   : > { %12258 = vst [vmem:[#allocation28_spill] sm:$0xff] %v8461_v27  ;;  %v8464_v11 = vpop.f32.mrf.mxu1 }
 0x598   : > { %12259 = vst [vmem:[#allocation29_spill] sm:$0xff] %v8464_v11  ;;  %v8467_v50 = vpop.f32.mrf.mxu0 }
 0x599   : > { %2284 = vadd.xlane.f32.xlu0 %v8455_v13  ;;  %12260 = vst [vmem:[#allocation30_spill] sm:$0xff] %v8467_v50  ;;  %v8471_v1 = vpop.f32.mrf.mxu1 }
 0x59a   : > { %2812 = vadd.xlane.f32.xlu1 %v8459_v42  ;;  %12261 = vst [vmem:[#allocation31_spill] sm:$0xff] %v8471_v1  ;;  %v8473_v6 = vpop.f32.mrf.mxu0 }
 0x59b   : > { %12262 = vst [vmem:[#allocation32_spill] sm:$0xff] %v8473_v6  ;;  %v8476_v14 = vpop.f32.mrf.mxu1 }
 0x59c   : > { %12263 = vst [vmem:[#allocation33_spill] sm:$0xff] %v8476_v14  ;;  %v8479_v4 = vpop.f32.mrf.mxu0 }
 0x59d   : > { %2548 = vadd.xlane.f32.xlu0 %v8461_v27  ;;  %12264 = vst [vmem:[#allocation34_spill] sm:$0xff] %v8479_v4  ;;  %v8483_v12 = vpop.f32.mrf.mxu1 }
 0x59e   : > { %3076 = vadd.xlane.f32.xlu1 %v8464_v11  ;;  %12265 = vst [vmem:[#allocation35_spill] sm:$0xff] %v8483_v12  ;;  %v8485_v61 = vpop.f32.mrf.mxu0 }
 0x59f   : > { %12266 = vst [vmem:[#allocation36_spill] sm:$0xff] %v8485_v61  ;;  %v8488_v44 = vpop.f32.mrf.mxu1 }
 0x5a0   : > { %12267 = vst [vmem:[#allocation37_spill] sm:$0xff] %v8488_v44  ;;  %v8491_v45 = vpop.f32.mrf.mxu0 }
 0x5a1   : > { %2286 = vadd.xlane.f32.xlu0 %v8467_v50  ;;  %12268 = vst [vmem:[#allocation38_spill] sm:$0xff] %v8491_v45  ;;  %v8495_v33 = vpop.f32.mrf.mxu1 }
 0x5a2   : > { %2814 = vadd.xlane.f32.xlu1 %v8471_v1  ;;  %12269 = vst [vmem:[#allocation39_spill] sm:$0xff] %v8495_v33  ;;  %v8497_v53 = vpop.f32.mrf.mxu0 }
 0x5a3   : > { %12270 = vst [vmem:[#allocation40_spill] sm:$0xff] %v8497_v53  ;;  %v8500_v35 = vpop.f32.mrf.mxu1 }
 0x5a4   : > { %12271 = vst [vmem:[#allocation41_spill] sm:$0xff] %v8500_v35  ;;  %v8503_v25 = vpop.f32.mrf.mxu0 }
 0x5a5   : > { %2550 = vadd.xlane.f32.xlu0 %v8473_v6  ;;  %12272 = vst [vmem:[#allocation42_spill] sm:$0xff] %v8503_v25  ;;  %v8507_v29 = vpop.f32.mrf.mxu1 }
 0x5a6   : > { %3078 = vadd.xlane.f32.xlu1 %v8476_v14  ;;  %12273 = vst [vmem:[#allocation43_spill] sm:$0xff] %v8507_v29  ;;  %v8509_v10 = vpop.f32.mrf.mxu0 }
 0x5a7   : > { %12274 = vst [vmem:[#allocation44_spill] sm:$0xff] %v8509_v10  ;;  %v8512_v56 = vpop.f32.mrf.mxu1 }
 0x5a8   : > { %12275 = vst [vmem:[#allocation45_spill] sm:$0xff] %v8512_v56  ;;  %v8515_v3 = vpop.f32.mrf.mxu0 }
 0x5a9   : > { %2288 = vadd.xlane.f32.xlu0 %v8479_v4  ;;  %12276 = vst [vmem:[#allocation46_spill] sm:$0xff] %v8515_v3  ;;  %v8519_v58 = vpop.f32.mrf.mxu1 }
 0x5aa   : > { %2816 = vadd.xlane.f32.xlu1 %v8483_v12  ;;  %12277 = vst [vmem:[#allocation47_spill] sm:$0xff] %v8519_v58  ;;  %v8521_v57 = vpop.f32.mrf.mxu0 }
 0x5ab   : > { %12278 = vst [vmem:[#allocation48_spill] sm:$0xff] %v8521_v57  ;;  %v8524_v36 = vpop.f32.mrf.mxu1 }
 0x5ac   : > { %12279 = vst [vmem:[#allocation49_spill] sm:$0xff] %v8524_v36  ;;  %v8527_v40 = vpop.f32.mrf.mxu0 }
 0x5ad   : > { %2552 = vadd.xlane.f32.xlu0 %v8485_v61  ;;  %12280 = vst [vmem:[#allocation50_spill] sm:$0xff] %v8527_v40  ;;  %v8531_v5 = vpop.f32.mrf.mxu1 }
 0x5ae   : > { %3080 = vadd.xlane.f32.xlu1 %v8488_v44  ;;  %12281 = vst [vmem:[#allocation51_spill] sm:$0xff] %v8531_v5  ;;  %v8533_v60 = vpop.f32.mrf.mxu0 }
 0x5af   : > { %v8536_v21 = vpop.f32.mrf.mxu1 }
 0x5b0   : > { %v8539_v49 = vpop.f32.mrf.mxu0 }
 0x5b1   : > { %2290 = vadd.xlane.f32.xlu0 %v8491_v45  ;;  %v8543_v39 = vpop.f32.mrf.mxu1 }
 0x5b2   : > { %2818 = vadd.xlane.f32.xlu1 %v8495_v33  ;;  %v8545_v23 = vpop.f32.mrf.mxu0 }
 0x5b3   : > { %v8548_v24 = vpop.f32.mrf.mxu1 }
 0x5b4   : > { %v8551_v15 = vpop.f32.mrf.mxu0 }
 0x5b5   : > { %2554 = vadd.xlane.f32.xlu0 %v8497_v53  ;;  %v8555_v20 = vpop.f32.mrf.mxu1 }
 0x5b6   : > { %3082 = vadd.xlane.f32.xlu1 %v8500_v35  ;;  %v8557_v62 = vpop.f32.mrf.mxu0 }
 0x5b7   : > { %v8560_v46 = vpop.f32.mrf.mxu1 }
 0x5b8   : > { %v8563_v30 = vpop.f32.mrf.mxu0 }
 0x5b9   : > { %2292 = vadd.xlane.f32.xlu0 %v8503_v25  ;;  %v8567_v22 = vpop.f32.mrf.mxu1 }
 0x5ba   : > { %2820 = vadd.xlane.f32.xlu1 %v8507_v29  ;;  %v8569_v0 = vpop.f32.mrf.mxu0 }
 0x5bb   : > { %v8572_v16 = vpop.f32.mrf.mxu1 }
 0x5bc   : > { %v8575_v59 = vpop.f32.mrf.mxu0 }
 0x5bd   : > { %2556 = vadd.xlane.f32.xlu0 %v8509_v10  ;;  %v8579_v7 = vpop.f32.mrf.mxu1 }
 0x5be   : > { %3084 = vadd.xlane.f32.xlu1 %v8512_v56  ;;  %v8581_v34 = vpop.f32.mrf.mxu0 }
 0x5bf   : > { %v8584_v43 = vpop.f32.mrf.mxu1 }
 0x5c0   : > { %v8587_v31 = vpop.f32.mrf.mxu0 }
 0x5c1   : > { %2294 = vadd.xlane.f32.xlu0 %v8515_v3  ;;  %v8591_v47 = vpop.f32.mrf.mxu1 }
 0x5c2   : > { %2822 = vadd.xlane.f32.xlu1 %v8519_v58  ;;  %v8593_v26 = vpop.f32.mrf.mxu0 }
 0x5c3   : > { %v8596_v28 = vpop.f32.mrf.mxu1 }
 0x5c4   : > { %v8599_v51 = vpop.f32.mrf.mxu0 }
 0x5c5   : > { %2558 = vadd.xlane.f32.xlu0 %v8521_v57  ;;  %v8603_v32 = vpop.f32.mrf.mxu1 }
 0x5c6   : > { %3086 = vadd.xlane.f32.xlu1 %v8524_v36  ;;  %v8605_v37 = vpop.f32.mrf.mxu0 }
 0x5c7   : > { %v8608_v18 = vpop.f32.mrf.mxu1 }
 0x5c8   : > { %v8611_v17 = vpop.f32.mrf.mxu0 }
 0x5c9   : > { %2296 = vadd.xlane.f32.xlu0 %v8527_v40  ;;  %v8615_v38 = vpop.f32.mrf.mxu1 }
 0x5ca   : > { %2824 = vadd.xlane.f32.xlu1 %v8531_v5  ;;  %v8617_v48 = vpop.f32.mrf.mxu0 }
 0x5cb   : > { %v8620_v19 = vpop.f32.mrf.mxu1 }
 0x5cc   : > { %v8623_v9 = vpop.f32.mrf.mxu0 }
 0x5cd   : > { %2560 = vadd.xlane.f32.xlu0 %v8533_v60  ;;  %v8627_v2 = vpop.f32.mrf.mxu1 }
 0x5ce   : > { %3088 = vadd.xlane.f32.xlu1 %v8536_v21  ;;  %v8629_v54 = vpop.f32.mrf.mxu0 }
 0x5cf   : > { %v8632_v41 = vpop.f32.mrf.mxu1 }
 0x5d0   : > { %v8635_v8 = vpop.f32.mrf.mxu0 }
 0x5d1   : > { %2298 = vadd.xlane.f32.xlu0 %v8539_v49  ;;  %v8639_v55 = vpop.f32.mrf.mxu1 }
 0x5d2   : > { %2826 = vadd.xlane.f32.xlu1 %v8543_v39  ;;  %v8641_v63 = vpop.f32.mrf.mxu0 }
 0x5d3   : > { %v8644_v52 = vpop.f32.mrf.mxu1 }
 0x5d4   : > { %v8647_v42 = vpop.f32.mrf.mxu0 }
 0x5d5   : > { %2562 = vadd.xlane.f32.xlu0 %v8545_v23  ;;  %v8651_v13 = vpop.f32.mrf.mxu1 }
 0x5d6   : > { %3090 = vadd.xlane.f32.xlu1 %v8548_v24  ;;  %v8655_v27 = vpop.f32.mrf.mxu0 }
 0x5d7   : > { %v8660_v50 = vpop.f32.mrf.mxu1 }
 0x5d8   : > { %v8665_v6 = vpop.f32.mrf.mxu0 }
 0x5d9   : > { %2300 = vadd.xlane.f32.xlu0 %v8551_v15 }
 0x5da   : > { %2828 = vadd.xlane.f32.xlu1 %v8555_v20  ;;  %v8675_v44 = vpop.f32.mrf.mxu0 }
 0x5dc   : > { %v8685_v33 = vpop.f32.mrf.mxu0 }
 0x5dd   : > { %2564 = vadd.xlane.f32.xlu0 %v8557_v62 }
 0x5de   : > { %3092 = vadd.xlane.f32.xlu1 %v8560_v46  ;;  %v8695_v35 = vpop.f32.mrf.mxu0 }
 0x5e0   : > { %v8705_v29 = vpop.f32.mrf.mxu0 }
 0x5e1   : > { %2302 = vadd.xlane.f32.xlu0 %v8563_v30 }
 0x5e2   : > { %2830 = vadd.xlane.f32.xlu1 %v8567_v22  ;;  %v8715_v56 = vpop.f32.mrf.mxu0 }
 0x5e3   : > { %12296 = vst [vmem:[#allocation66_spill] sm:$0xff] %v8715_v56 }
 0x5e4   : > { %v8725_v58 = vpop.f32.mrf.mxu0 }
 0x5e5   : > { %2566 = vadd.xlane.f32.xlu0 %v8569_v0  ;;  %12300 = vst [vmem:[#allocation70_spill] sm:$0xff] %v8725_v58 }
 0x5e6   : > { %3094 = vadd.xlane.f32.xlu1 %v8572_v16  ;;  %v8735_v36 = vpop.f32.mrf.mxu0 }
 0x5e7   : > { %12304 = vst [vmem:[#allocation74_spill] sm:$0xff] %v8735_v36 }
 0x5e8   : > { %v8745_v5 = vpop.f32.mrf.mxu0 }
 0x5e9   : > { %2304 = vadd.xlane.f32.xlu0 %v8575_v59  ;;  %12308 = vst [vmem:[#allocation78_spill] sm:$0xff] %v8745_v5 }
 0x5ea   : > { %2832 = vadd.xlane.f32.xlu1 %v8579_v7 }
 0x5ed   : > { %2568 = vadd.xlane.f32.xlu0 %v8581_v34 }
 0x5ee   : > { %3096 = vadd.xlane.f32.xlu1 %v8584_v43 }
 0x5f1   : > { %2306 = vadd.xlane.f32.xlu0 %v8587_v31 }
 0x5f2   : > { %2834 = vadd.xlane.f32.xlu1 %v8591_v47 }
 0x5f5   : > { %2570 = vadd.xlane.f32.xlu0 %v8593_v26 }
 0x5f6   : > { %3098 = vadd.xlane.f32.xlu1 %v8596_v28 }
 0x5f9   : > { %2308 = vadd.xlane.f32.xlu0 %v8599_v51 }
 0x5fa   : > { %2836 = vadd.xlane.f32.xlu1 %v8603_v32 }
 0x5fd   : > { %2572 = vadd.xlane.f32.xlu0 %v8605_v37 }
 0x5fe   : > { %3100 = vadd.xlane.f32.xlu1 %v8608_v18 }
 0x601   : > { %2310 = vadd.xlane.f32.xlu0 %v8611_v17 }
 0x602   : > { %2838 = vadd.xlane.f32.xlu1 %v8615_v38 }
 0x605   : > { %2574 = vadd.xlane.f32.xlu0 %v8617_v48 }
 0x606   : > { %3102 = vadd.xlane.f32.xlu1 %v8620_v19 }
 0x609   : > { %2312 = vadd.xlane.f32.xlu0 %v8623_v9 }
 0x60a   : > { %2840 = vadd.xlane.f32.xlu1 %v8627_v2 }
 0x60d   : > { %2576 = vadd.xlane.f32.xlu0 %v8629_v54 }
 0x60e   : > { %3104 = vadd.xlane.f32.xlu1 %v8632_v41 }
 0x611   : > { %2314 = vadd.xlane.f32.xlu0 %v8635_v8 }
 0x612   : > { %2842 = vadd.xlane.f32.xlu1 %v8639_v55 }
 0x615   : > { %2578 = vadd.xlane.f32.xlu0 %v8641_v63 }
 0x616   : > { %3106 = vadd.xlane.f32.xlu1 %v8644_v52 }
 0x619   : > { %2316 = vadd.xlane.f32.xlu0 %v8647_v42 }
 0x61a   : > { %v8653_v11 = vpop.xlane.xlu0 %2282  ;;  %2844 = vadd.xlane.f32.xlu1 %v8651_v13 }
 0x61b   : > { %12282 = vst [vmem:[#allocation52_spill] sm:$0xff] %v8653_v11  ;;  %v8658_v1 = vpop.xlane.xlu1 %2810  ;;  %v8671_v11 = vpop.f32.mrf.mxu1 }
 0x61c   : > { %12283 = vst [vmem:[#allocation53_spill] sm:$0xff] %v8658_v1 }
 0x61d   : > { %2580 = vadd.xlane.f32.xlu0 %v8655_v27  ;;  %v8680_v61 = vpop.f32.mrf.mxu1 }
 0x61e   : > { %v8663_v14 = vpop.xlane.xlu0 %2546  ;;  %3108 = vadd.xlane.f32.xlu1 %v8660_v50 }
 0x61f   : > { %12284 = vst [vmem:[#allocation54_spill] sm:$0xff] %v8663_v14  ;;  %v8668_v12 = vpop.xlane.xlu1 %3074 }
 0x620   : > { %12285 = vst [vmem:[#allocation55_spill] sm:$0xff] %v8668_v12 }
 0x621   : > { %2318 = vadd.xlane.f32.xlu0 %v8665_v6 }
 0x622   : > { %v8673_v4 = vpop.xlane.xlu0 %2284  ;;  %2846 = vadd.xlane.f32.xlu1 %v8671_v11 }
 0x623   : > { %12286 = vst [vmem:[#allocation56_spill] sm:$0xff] %v8673_v4  ;;  %v8678_v1 = vpop.xlane.xlu1 %2812  ;;  %v8691_v4 = vpop.f32.mrf.mxu1 }
 0x624   : > { %12287 = vst [vmem:[#allocation57_spill] sm:$0xff] %v8678_v1 }
 0x625   : > { %2582 = vadd.xlane.f32.xlu0 %v8675_v44  ;;  %v8700_v53 = vpop.f32.mrf.mxu1 }
 0x626   : > { %v8683_v14 = vpop.xlane.xlu0 %2548  ;;  %3110 = vadd.xlane.f32.xlu1 %v8680_v61 }
 0x627   : > { %12288 = vst [vmem:[#allocation58_spill] sm:$0xff] %v8683_v14  ;;  %v8688_v12 = vpop.xlane.xlu1 %3076 }
 0x628   : > { %12289 = vst [vmem:[#allocation59_spill] sm:$0xff] %v8688_v12 }
 0x629   : > { %2320 = vadd.xlane.f32.xlu0 %v8685_v33 }
 0x62a   : > { %v8693_v45 = vpop.xlane.xlu0 %2286  ;;  %2848 = vadd.xlane.f32.xlu1 %v8691_v4 }
 0x62b   : > { %12290 = vst [vmem:[#allocation60_spill] sm:$0xff] %v8693_v45  ;;  %v8698_v1 = vpop.xlane.xlu1 %2814  ;;  %v8711_v45 = vpop.f32.mrf.mxu1 }
 0x62c   : > { %12291 = vst [vmem:[#allocation61_spill] sm:$0xff] %v8698_v1  ;;  %12294 = vst [vmem:[#allocation64_spill] sm:$0xff] %v8711_v45 }
 0x62d   : > { %2584 = vadd.xlane.f32.xlu0 %v8695_v35  ;;  %v8720_v10 = vpop.f32.mrf.mxu1 }
 0x62e   : > { %v8703_v14 = vpop.xlane.xlu0 %2550  ;;  %3112 = vadd.xlane.f32.xlu1 %v8700_v53  ;;  %12298 = vst [vmem:[#allocation68_spill] sm:$0xff] %v8720_v10 }
 0x62f   : > { %12292 = vst [vmem:[#allocation62_spill] sm:$0xff] %v8703_v14  ;;  %v8708_v12 = vpop.xlane.xlu1 %3078 }
 0x630   : > { %12293 = vst [vmem:[#allocation63_spill] sm:$0xff] %v8708_v12 }
 0x631   : > { %2322 = vadd.xlane.f32.xlu0 %v8705_v29 }
 0x632   : > { %v8713_v25 = vpop.xlane.xlu0 %2288  ;;  %2850 = vadd.xlane.f32.xlu1 %v8711_v45 }
 0x633   : > { %12295 = vst [vmem:[#allocation65_spill] sm:$0xff] %v8713_v25  ;;  %v8718_v1 = vpop.xlane.xlu1 %2816  ;;  %v8731_v25 = vpop.f32.mrf.mxu1 }
 0x634   : > { %12297 = vst [vmem:[#allocation67_spill] sm:$0xff] %v8718_v1  ;;  %12302 = vst [vmem:[#allocation72_spill] sm:$0xff] %v8731_v25 }
 0x635   : > { %2586 = vadd.xlane.f32.xlu0 %v8715_v56  ;;  %v8740_v57 = vpop.f32.mrf.mxu1 }
 0x636   : > { %v8723_v14 = vpop.xlane.xlu0 %2552  ;;  %3114 = vadd.xlane.f32.xlu1 %v8720_v10  ;;  %12306 = vst [vmem:[#allocation76_spill] sm:$0xff] %v8740_v57 }
 0x637   : > { %12299 = vst [vmem:[#allocation69_spill] sm:$0xff] %v8723_v14  ;;  %v8728_v12 = vpop.xlane.xlu1 %3080 }
 0x638   : > { %12301 = vst [vmem:[#allocation71_spill] sm:$0xff] %v8728_v12 }
 0x639   : > { %2324 = vadd.xlane.f32.xlu0 %v8725_v58 }
 0x63a   : > { %v8733_v3 = vpop.xlane.xlu0 %2290  ;;  %2852 = vadd.xlane.f32.xlu1 %v8731_v25  ;;  %v8755_v25 = vpop.f32.mrf.mxu0 }
 0x63b   : > { %12303 = vst [vmem:[#allocation73_spill] sm:$0xff] %v8733_v3  ;;  %v8738_v1 = vpop.xlane.xlu1 %2818  ;;  %v8751_v3 = vpop.f32.mrf.mxu1  ;;  %12312 = vst [vmem:[#allocation82_spill] sm:$0xff] %v8755_v25 }
 0x63c   : > { %12305 = vst [vmem:[#allocation75_spill] sm:$0xff] %v8738_v1  ;;  %12310 = vst [vmem:[#allocation80_spill] sm:$0xff] %v8751_v3 }
 0x63d   : > { %2588 = vadd.xlane.f32.xlu0 %v8735_v36  ;;  %v8760_v36 = vpop.f32.mrf.mxu1 }
 0x63e   : > { %v8743_v14 = vpop.xlane.xlu0 %2554  ;;  %3116 = vadd.xlane.f32.xlu1 %v8740_v57  ;;  %12314 = vst [vmem:[#allocation84_spill] sm:$0xff] %v8760_v36  ;;  %v8765_v57 = vpop.f32.mrf.mxu0 }
 0x63f   : > { %12307 = vst [vmem:[#allocation77_spill] sm:$0xff] %v8743_v14  ;;  %v8748_v12 = vpop.xlane.xlu1 %3082  ;;  %12316 = vst [vmem:[#allocation86_spill] sm:$0xff] %v8765_v57 }
 0x640   : > { %12309 = vst [vmem:[#allocation79_spill] sm:$0xff] %v8748_v12 }
 0x641   : > { %2326 = vadd.xlane.f32.xlu0 %v8745_v5 }
 0x642   : > { %v8753_v40 = vpop.xlane.xlu0 %2292  ;;  %2854 = vadd.xlane.f32.xlu1 %v8751_v3  ;;  %v8775_v3 = vpop.f32.mrf.mxu0 }
 0x643   : > { %12311 = vst [vmem:[#allocation81_spill] sm:$0xff] %v8753_v40  ;;  %v8758_v1 = vpop.xlane.xlu1 %2820  ;;  %v8771_v40 = vpop.f32.mrf.mxu1  ;;  %12320 = vst [vmem:[#allocation90_spill] sm:$0xff] %v8775_v3 }
 0x644   : > { %12313 = vst [vmem:[#allocation83_spill] sm:$0xff] %v8758_v1  ;;  %12318 = vst [vmem:[#allocation88_spill] sm:$0xff] %v8771_v40 }
 0x645   : > { %2590 = vadd.xlane.f32.xlu0 %v8755_v25  ;;  %v8780_v25 = vpop.f32.mrf.mxu1 }
 0x646   : > { %v8763_v14 = vpop.xlane.xlu0 %2556  ;;  %3118 = vadd.xlane.f32.xlu1 %v8760_v36  ;;  %12322 = vst [vmem:[#allocation92_spill] sm:$0xff] %v8780_v25 }
 0x647   : > { %12315 = vst [vmem:[#allocation85_spill] sm:$0xff] %v8763_v14  ;;  %v8768_v12 = vpop.xlane.xlu1 %3084 }
 0x648   : > { %12317 = vst [vmem:[#allocation87_spill] sm:$0xff] %v8768_v12 }
 0x649   : > { %2328 = vadd.xlane.f32.xlu0 %v8765_v57 }
 0x64a   : > { %v8773_v5 = vpop.xlane.xlu0 %2294  ;;  %2856 = vadd.xlane.f32.xlu1 %v8771_v40 }
 0x64b   : > { %12319 = vst [vmem:[#allocation89_spill] sm:$0xff] %v8773_v5  ;;  %v8778_v1 = vpop.xlane.xlu1 %2822 }
 0x64c   : > { %12321 = vst [vmem:[#allocation91_spill] sm:$0xff] %v8778_v1 }
 0x64d   : > { %2592 = vadd.xlane.f32.xlu0 %v8775_v3 }
 0x64e   : > { %v8783_v14 = vpop.xlane.xlu0 %2558  ;;  %3120 = vadd.xlane.f32.xlu1 %v8780_v25 }
 0x64f   : > { %12323 = vst [vmem:[#allocation93_spill] sm:$0xff] %v8783_v14  ;;  %v8786_v12 = vpop.xlane.xlu1 %3086 }
 0x650   : > { %12324 = vst [vmem:[#allocation94_spill] sm:$0xff] %v8786_v12 }
 0x652   : > { %v8788_v57 = vpop.xlane.xlu0 %2296 }
 0x653   : > { %v8790_v36 = vpop.xlane.xlu1 %2824 }
 0x654   : > { %12325 = vst [vmem:[#allocation95_spill] sm:$0xff] %v8790_v36 }
 0x656   : > { %v2561_v5 = vpop.xlane.xlu0 %2560 }
 0x657   : > { %v2601_v58 = vmul.f32 0.0078125, %v2561_v5  ;;  %v3089_v10 = vpop.xlane.xlu1 %3088 }
 0x658   : > { %v3129_v40 = vmul.f32 0.0078125, %v3089_v10 }
 0x659   : > { %v8793_v1 = vsub.f32 %v8533_v60, %v2601_v58 }
 0x65a   : > { %v8796_v56 = vsub.f32 %v8536_v21, %v3129_v40  ;;  %v2299_v3 = vpop.xlane.xlu0 %2298 }
 0x65b   : > { %12326 = vst [vmem:[#allocation96_spill] sm:$0xff] %v8793_v1  ;;  %v2338_v14 = vmul.f32 0.0078125, %v2299_v3  ;;  %v2649_v25 = vmul.f32 %v8793_v1, %v8793_v1  ;;  %v2827_v12 = vpop.xlane.xlu1 %2826 }
 0x65c   : > { %12327 = vst [vmem:[#allocation97_spill] sm:$0xff] %v8796_v56  ;;  %v2866_v45 = vmul.f32 0.0078125, %v2827_v12  ;;  %v3177_v36 = vmul.f32 %v8796_v56, %v8796_v56 }
 0x65d   : > { %v8803_v5 = vsub.f32 %v8539_v49, %v2338_v14  ;;  %2680 = vadd.xlane.f32.xlu0 %v2649_v25 }
 0x65e   : > { %v8806_v10 = vsub.f32 %v8543_v39, %v2866_v45  ;;  %v2563_v58 = vpop.xlane.xlu0 %2562  ;;  %3208 = vadd.xlane.f32.xlu1 %v3177_v36 }
 0x65f   : > { %12328 = vst [vmem:[#allocation98_spill] sm:$0xff] %v8803_v5  ;;  %v2602_v40 = vmul.f32 0.0078125, %v2563_v58  ;;  %v2386_v3 = vmul.f32 %v8803_v5, %v8803_v5  ;;  %v3091_v60 = vpop.xlane.xlu1 %3090 }
 0x660   : > { %12329 = vst [vmem:[#allocation99_spill] sm:$0xff] %v8806_v10  ;;  %v3130_v21 = vmul.f32 0.0078125, %v3091_v60  ;;  %v2914_v12 = vmul.f32 %v8806_v10, %v8806_v10 }
 0x661   : > { %v8813_v56 = vsub.f32 %v8545_v23, %v2602_v40  ;;  %2418 = vadd.xlane.f32.xlu0 %v2386_v3 }
 0x662   : > { %v8816_v14 = vsub.f32 %v8548_v24, %v3130_v21  ;;  %v2301_v45 = vpop.xlane.xlu0 %2300  ;;  %2946 = vadd.xlane.f32.xlu1 %v2914_v12 }
 0x663   : > { %12330 = vst [vmem:[#allocation100_spill] sm:$0xff] %v8813_v56  ;;  %v2339_v25 = vmul.f32 0.0078125, %v2301_v45  ;;  %v2650_v36 = vmul.f32 %v8813_v56, %v8813_v56  ;;  %v2829_v49 = vpop.xlane.xlu1 %2828 }
 0x664   : > { %12331 = vst [vmem:[#allocation101_spill] sm:$0xff] %v8816_v14  ;;  %v2867_v39 = vmul.f32 0.0078125, %v2829_v49  ;;  %v3178_v58 = vmul.f32 %v8816_v14, %v8816_v14 }
 0x665   : > { %v8823_v60 = vsub.f32 %v8551_v15, %v2339_v25  ;;  %2682 = vadd.xlane.f32.xlu0 %v2650_v36 }
 0x666   : > { %v8826_v23 = vsub.f32 %v8555_v20, %v2867_v39  ;;  %v2565_v24 = vpop.xlane.xlu0 %2564  ;;  %3210 = vadd.xlane.f32.xlu1 %v3178_v58 }
 0x667   : > { %12332 = vst [vmem:[#allocation102_spill] sm:$0xff] %v8823_v60  ;;  %v2603_v40 = vmul.f32 0.0078125, %v2565_v24  ;;  %v2387_v3 = vmul.f32 %v8823_v60, %v8823_v60  ;;  %v3093_v21 = vpop.xlane.xlu1 %3092  ;;  %v12421_v60 = vld [vmem:[#allocation39_spill] sm:$0xff] }
 0x668   : > { %12333 = vst [vmem:[#allocation103_spill] sm:$0xff] %v8826_v23  ;;  %v3131_v12 = vmul.f32 0.0078125, %v3093_v21  ;;  %v2915_v45 = vmul.f32 %v8826_v23, %v8826_v23  ;;  %v12409_v23 = vld [vmem:[#allocation43_spill] sm:$0xff] }
 0x669   : > { %v8833_v49 = vsub.f32 %v8557_v62, %v2603_v40  ;;  %2420 = vadd.xlane.f32.xlu0 %v2387_v3 }
 0x66a   : > { %v8836_v15 = vsub.f32 %v8560_v46, %v3131_v12  ;;  %v2303_v20 = vpop.xlane.xlu0 %2302  ;;  %2948 = vadd.xlane.f32.xlu1 %v2915_v45 }
 0x66b   : > { %12334 = vst [vmem:[#allocation104_spill] sm:$0xff] %v8833_v49  ;;  %v2340_v25 = vmul.f32 0.0078125, %v2303_v20  ;;  %v2651_v36 = vmul.f32 %v8833_v49, %v8833_v49  ;;  %v2831_v39 = vpop.xlane.xlu1 %2830  ;;  %v12385_v49 = vld [vmem:[#allocation51_spill] sm:$0xff] }
 0x66c   : > { %12335 = vst [vmem:[#allocation105_spill] sm:$0xff] %v8836_v15  ;;  %v2868_v58 = vmul.f32 0.0078125, %v2831_v39  ;;  %v3179_v24 = vmul.f32 %v8836_v15, %v8836_v15 }
 0x66d   : > { %v8843_v21 = vsub.f32 %v8563_v30, %v2340_v25  ;;  %2684 = vadd.xlane.f32.xlu0 %v2651_v36 }
 0x66e   : > { %v8846_v62 = vsub.f32 %v8567_v22, %v2868_v58  ;;  %v2567_v46 = vpop.xlane.xlu0 %2566  ;;  %3212 = vadd.xlane.f32.xlu1 %v3179_v24 }
 0x66f   : > { %12336 = vst [vmem:[#allocation106_spill] sm:$0xff] %v8843_v21  ;;  %v2604_v40 = vmul.f32 0.0078125, %v2567_v46  ;;  %v2388_v3 = vmul.f32 %v8843_v21, %v8843_v21  ;;  %v3095_v12 = vpop.xlane.xlu1 %3094 }
 0x670   : > { %12337 = vst [vmem:[#allocation107_spill] sm:$0xff] %v8846_v62  ;;  %v3132_v45 = vmul.f32 0.0078125, %v3095_v12  ;;  %v2916_v20 = vmul.f32 %v8846_v62, %v8846_v62 }
 0x671   : > { %v8853_v39 = vsub.f32 %v8569_v0, %v2604_v40  ;;  %2422 = vadd.xlane.f32.xlu0 %v2388_v3 }
 0x672   : > { %v8856_v30 = vsub.f32 %v8572_v16, %v3132_v45  ;;  %v2305_v22 = vpop.xlane.xlu0 %2304  ;;  %2950 = vadd.xlane.f32.xlu1 %v2916_v20 }
 0x673   : > { %12338 = vst [vmem:[#allocation108_spill] sm:$0xff] %v8853_v39  ;;  %v2341_v25 = vmul.f32 0.0078125, %v2305_v22  ;;  %v2652_v36 = vmul.f32 %v8853_v39, %v8853_v39  ;;  %v2833_v58 = vpop.xlane.xlu1 %2832  ;;  %v12364_v39 = vld [vmem:[#allocation78_spill] sm:$0xff] }
 0x674   : > { %12339 = vst [vmem:[#allocation109_spill] sm:$0xff] %v8856_v30  ;;  %v2869_v24 = vmul.f32 0.0078125, %v2833_v58  ;;  %v3180_v46 = vmul.f32 %v8856_v30, %v8856_v30 }
 0x675   : > { %v8863_v12 = vsub.f32 %v8575_v59, %v2341_v25  ;;  %2686 = vadd.xlane.f32.xlu0 %v2652_v36 }
 0x676   : > { %v8866_v0 = vsub.f32 %v8579_v7, %v2869_v24  ;;  %v2569_v16 = vpop.xlane.xlu0 %2568  ;;  %3214 = vadd.xlane.f32.xlu1 %v3180_v46 }
 0x677   : > { %12340 = vst [vmem:[#allocation110_spill] sm:$0xff] %v8863_v12  ;;  %v2605_v40 = vmul.f32 0.0078125, %v2569_v16  ;;  %v2389_v3 = vmul.f32 %v8863_v12, %v8863_v12  ;;  %v3097_v45 = vpop.xlane.xlu1 %3096  ;;  %v12360_v12 = vld [vmem:[#allocation74_spill] sm:$0xff] }
 0x678   : > { %12341 = vst [vmem:[#allocation111_spill] sm:$0xff] %v8866_v0  ;;  %v3133_v20 = vmul.f32 0.0078125, %v3097_v45  ;;  %v2917_v22 = vmul.f32 %v8866_v0, %v8866_v0  ;;  %v12356_v0 = vld [vmem:[#allocation70_spill] sm:$0xff] }
 0x679   : > { %v8873_v58 = vsub.f32 %v8581_v34, %v2605_v40  ;;  %2424 = vadd.xlane.f32.xlu0 %v2389_v3 }
 0x67a   : > { %v8876_v59 = vsub.f32 %v8584_v43, %v3133_v20  ;;  %v2307_v7 = vpop.xlane.xlu0 %2306  ;;  %2952 = vadd.xlane.f32.xlu1 %v2917_v22 }
 0x67b   : > { %12342 = vst [vmem:[#allocation112_spill] sm:$0xff] %v8873_v58  ;;  %v2342_v25 = vmul.f32 0.0078125, %v2307_v7  ;;  %v2653_v36 = vmul.f32 %v8873_v58, %v8873_v58  ;;  %v2835_v24 = vpop.xlane.xlu1 %2834 }
 0x67c   : > { %12343 = vst [vmem:[#allocation113_spill] sm:$0xff] %v8876_v59  ;;  %v2870_v46 = vmul.f32 0.0078125, %v2835_v24  ;;  %v3181_v16 = vmul.f32 %v8876_v59, %v8876_v59  ;;  %v12352_v59 = vld [vmem:[#allocation66_spill] sm:$0xff] }
 0x67d   : > { %v8883_v45 = vsub.f32 %v8587_v31, %v2342_v25  ;;  %2688 = vadd.xlane.f32.xlu0 %v2653_v36 }
 0x67e   : > { %v8886_v34 = vsub.f32 %v8591_v47, %v2870_v46  ;;  %v2571_v43 = vpop.xlane.xlu0 %2570  ;;  %3216 = vadd.xlane.f32.xlu1 %v3181_v16 }
 0x67f   : > { %v2606_v40 = vmul.f32 0.0078125, %v2571_v43  ;;  %v2390_v3 = vmul.f32 %v8883_v45, %v8883_v45  ;;  %v3099_v20 = vpop.xlane.xlu1 %3098 }
 0x680   : > { %v3134_v22 = vmul.f32 0.0078125, %v3099_v20  ;;  %v2918_v7 = vmul.f32 %v8886_v34, %v8886_v34 }
 0x681   : > { %v8893_v24 = vsub.f32 %v8593_v26, %v2606_v40  ;;  %2426 = vadd.xlane.f32.xlu0 %v2390_v3 }
 0x682   : > { %v8896_v31 = vsub.f32 %v8596_v28, %v3134_v22  ;;  %v2309_v47 = vpop.xlane.xlu0 %2308  ;;  %2954 = vadd.xlane.f32.xlu1 %v2918_v7 }
 0x683   : > { %v2343_v25 = vmul.f32 0.0078125, %v2309_v47  ;;  %v2654_v36 = vmul.f32 %v8893_v24, %v8893_v24  ;;  %v2837_v46 = vpop.xlane.xlu1 %2836 }
 0x684   : > { %v2871_v16 = vmul.f32 0.0078125, %v2837_v46  ;;  %v3182_v43 = vmul.f32 %v8896_v31, %v8896_v31 }
 0x685   : > { %v8903_v20 = vsub.f32 %v8599_v51, %v2343_v25  ;;  %2690 = vadd.xlane.f32.xlu0 %v2654_v36 }
 0x686   : > { %v8906_v26 = vsub.f32 %v8603_v32, %v2871_v16  ;;  %v2573_v28 = vpop.xlane.xlu0 %2572  ;;  %3218 = vadd.xlane.f32.xlu1 %v3182_v43 }
 0x687   : > { %v2607_v40 = vmul.f32 0.0078125, %v2573_v28  ;;  %v2391_v3 = vmul.f32 %v8903_v20, %v8903_v20  ;;  %v3101_v22 = vpop.xlane.xlu1 %3100 }
 0x688   : > { %v3135_v7 = vmul.f32 0.0078125, %v3101_v22  ;;  %v2919_v47 = vmul.f32 %v8906_v26, %v8906_v26 }
 0x689   : > { %v8913_v46 = vsub.f32 %v8605_v37, %v2607_v40  ;;  %2428 = vadd.xlane.f32.xlu0 %v2391_v3 }
 0x68a   : > { %v8916_v51 = vsub.f32 %v8608_v18, %v3135_v7  ;;  %v2311_v32 = vpop.xlane.xlu0 %2310  ;;  %2956 = vadd.xlane.f32.xlu1 %v2919_v47 }
 0x68b   : > { %v2344_v25 = vmul.f32 0.0078125, %v2311_v32  ;;  %v2655_v36 = vmul.f32 %v8913_v46, %v8913_v46  ;;  %v2839_v16 = vpop.xlane.xlu1 %2838 }
 0x68c   : > { %v2872_v43 = vmul.f32 0.0078125, %v2839_v16  ;;  %v3183_v28 = vmul.f32 %v8916_v51, %v8916_v51 }
 0x68d   : > { %v8923_v22 = vsub.f32 %v8611_v17, %v2344_v25  ;;  %2692 = vadd.xlane.f32.xlu0 %v2655_v36 }
 0x68e   : > { %v8926_v37 = vsub.f32 %v8615_v38, %v2872_v43  ;;  %v2575_v18 = vpop.xlane.xlu0 %2574  ;;  %3220 = vadd.xlane.f32.xlu1 %v3183_v28 }
 0x68f   : > { %v2608_v40 = vmul.f32 0.0078125, %v2575_v18  ;;  %v2392_v3 = vmul.f32 %v8923_v22, %v8923_v22  ;;  %v3103_v7 = vpop.xlane.xlu1 %3102 }
 0x690   : > { %v3136_v47 = vmul.f32 0.0078125, %v3103_v7  ;;  %v2920_v32 = vmul.f32 %v8926_v37, %v8926_v37 }
 0x691   : > { %v8933_v16 = vsub.f32 %v8617_v48, %v2608_v40  ;;  %2430 = vadd.xlane.f32.xlu0 %v2392_v3 }
 0x692   : > { %v8936_v17 = vsub.f32 %v8620_v19, %v3136_v47  ;;  %v2313_v38 = vpop.xlane.xlu0 %2312  ;;  %2958 = vadd.xlane.f32.xlu1 %v2920_v32 }
 0x693   : > { %v2345_v25 = vmul.f32 0.0078125, %v2313_v38  ;;  %v2656_v36 = vmul.f32 %v8933_v16, %v8933_v16  ;;  %v2841_v43 = vpop.xlane.xlu1 %2840 }
 0x694   : > { %v2873_v28 = vmul.f32 0.0078125, %v2841_v43  ;;  %v3184_v18 = vmul.f32 %v8936_v17, %v8936_v17 }
 0x695   : > { %v8943_v7 = vsub.f32 %v8623_v9, %v2345_v25  ;;  %2694 = vadd.xlane.f32.xlu0 %v2656_v36 }
 0x696   : > { %v8946_v48 = vsub.f32 %v8627_v2, %v2873_v28  ;;  %v2577_v19 = vpop.xlane.xlu0 %2576  ;;  %3222 = vadd.xlane.f32.xlu1 %v3184_v18 }
 0x697   : > { %v2609_v40 = vmul.f32 0.0078125, %v2577_v19  ;;  %v2393_v3 = vmul.f32 %v8943_v7, %v8943_v7  ;;  %v3105_v47 = vpop.xlane.xlu1 %3104 }
 0x698   : > { %v3137_v32 = vmul.f32 0.0078125, %v3105_v47  ;;  %v2921_v38 = vmul.f32 %v8946_v48, %v8946_v48 }
 0x699   : > { %v8953_v43 = vsub.f32 %v8629_v54, %v2609_v40  ;;  %2432 = vadd.xlane.f32.xlu0 %v2393_v3 }
 0x69a   : > { %v8956_v9 = vsub.f32 %v8632_v41, %v3137_v32  ;;  %v2315_v2 = vpop.xlane.xlu0 %2314  ;;  %2960 = vadd.xlane.f32.xlu1 %v2921_v38 }
 0x69b   : > { %v2346_v25 = vmul.f32 0.0078125, %v2315_v2  ;;  %v2657_v36 = vmul.f32 %v8953_v43, %v8953_v43  ;;  %v2843_v28 = vpop.xlane.xlu1 %2842 }
 0x69c   : > { %v2874_v18 = vmul.f32 0.0078125, %v2843_v28  ;;  %v3185_v19 = vmul.f32 %v8956_v9, %v8956_v9 }
 0x69d   : > { %v8963_v47 = vsub.f32 %v8635_v8, %v2346_v25  ;;  %2696 = vadd.xlane.f32.xlu0 %v2657_v36 }
 0x69e   : > { %v8966_v54 = vsub.f32 %v8639_v55, %v2874_v18  ;;  %v2579_v41 = vpop.xlane.xlu0 %2578  ;;  %3224 = vadd.xlane.f32.xlu1 %v3185_v19 }
 0x69f   : > { %v2610_v40 = vmul.f32 0.0078125, %v2579_v41  ;;  %v2394_v3 = vmul.f32 %v8963_v47, %v8963_v47  ;;  %v3107_v32 = vpop.xlane.xlu1 %3106 }
 0x6a0   : > { %v3138_v38 = vmul.f32 0.0078125, %v3107_v32  ;;  %v2922_v2 = vmul.f32 %v8966_v54, %v8966_v54 }
 0x6a1   : > { %v8973_v28 = vsub.f32 %v8641_v63, %v2610_v40  ;;  %2434 = vadd.xlane.f32.xlu0 %v2394_v3 }
 0x6a2   : > { %v8976_v8 = vsub.f32 %v8644_v52, %v3138_v38  ;;  %v2317_v55 = vpop.xlane.xlu0 %2316  ;;  %2962 = vadd.xlane.f32.xlu1 %v2922_v2 }
 0x6a3   : > { %v2347_v25 = vmul.f32 0.0078125, %v2317_v55  ;;  %v2658_v36 = vmul.f32 %v8973_v28, %v8973_v28  ;;  %v2845_v18 = vpop.xlane.xlu1 %2844 }
 0x6a4   : > { %v2875_v19 = vmul.f32 0.0078125, %v2845_v18  ;;  %v3186_v41 = vmul.f32 %v8976_v8, %v8976_v8 }
 0x6a5   : > { %v8983_v32 = vsub.f32 %v8647_v42, %v2347_v25  ;;  %2698 = vadd.xlane.f32.xlu0 %v2658_v36 }
 0x6a6   : > { %v8986_v63 = vsub.f32 %v8651_v13, %v2875_v19  ;;  %v2581_v52 = vpop.xlane.xlu0 %2580  ;;  %3226 = vadd.xlane.f32.xlu1 %v3186_v41 }
 0x6a7   : > { %v2611_v40 = vmul.f32 0.0078125, %v2581_v52  ;;  %v2395_v3 = vmul.f32 %v8983_v32, %v8983_v32  ;;  %v3109_v38 = vpop.xlane.xlu1 %3108 }
 0x6a8   : > { %v3139_v2 = vmul.f32 0.0078125, %v3109_v38  ;;  %v2923_v55 = vmul.f32 %v8986_v63, %v8986_v63 }
 0x6a9   : > { %v8993_v18 = vsub.f32 %v8655_v27, %v2611_v40  ;;  %2436 = vadd.xlane.f32.xlu0 %v2395_v3 }
 0x6aa   : > { %v8996_v42 = vsub.f32 %v8660_v50, %v3139_v2  ;;  %v2319_v13 = vpop.xlane.xlu0 %2318  ;;  %2964 = vadd.xlane.f32.xlu1 %v2923_v55 }
 0x6ab   : > { %v2348_v25 = vmul.f32 0.0078125, %v2319_v13  ;;  %v2659_v36 = vmul.f32 %v8993_v18, %v8993_v18  ;;  %v2847_v19 = vpop.xlane.xlu1 %2846 }
 0x6ac   : > { %v2876_v41 = vmul.f32 0.0078125, %v2847_v19  ;;  %v3187_v52 = vmul.f32 %v8996_v42, %v8996_v42 }
 0x6ad   : > { %v9003_v38 = vsub.f32 %v8665_v6, %v2348_v25  ;;  %2700 = vadd.xlane.f32.xlu0 %v2659_v36 }
 0x6ae   : > { %v9006_v27 = vsub.f32 %v8671_v11, %v2876_v41  ;;  %v2583_v50 = vpop.xlane.xlu0 %2582  ;;  %3228 = vadd.xlane.f32.xlu1 %v3187_v52 }
 0x6af   : > { %v2612_v40 = vmul.f32 0.0078125, %v2583_v50  ;;  %v2396_v3 = vmul.f32 %v9003_v38, %v9003_v38  ;;  %v3111_v2 = vpop.xlane.xlu1 %3110 }
 0x6b0   : > { %v3140_v55 = vmul.f32 0.0078125, %v3111_v2  ;;  %v2924_v13 = vmul.f32 %v9006_v27, %v9006_v27 }
 0x6b1   : > { %v9013_v19 = vsub.f32 %v8675_v44, %v2612_v40  ;;  %2438 = vadd.xlane.f32.xlu0 %v2396_v3 }
 0x6b2   : > { %v9016_v6 = vsub.f32 %v8680_v61, %v3140_v55  ;;  %v2321_v11 = vpop.xlane.xlu0 %2320  ;;  %2966 = vadd.xlane.f32.xlu1 %v2924_v13 }
 0x6b3   : > { %v2349_v25 = vmul.f32 0.0078125, %v2321_v11  ;;  %v2660_v36 = vmul.f32 %v9013_v19, %v9013_v19  ;;  %v2849_v41 = vpop.xlane.xlu1 %2848 }
 0x6b4   : > { %12344 = vst [vmem:[#allocation114_spill] sm:$0xff] %v9016_v6  ;;  %v2877_v52 = vmul.f32 0.0078125, %v2849_v41  ;;  %v3188_v50 = vmul.f32 %v9016_v6, %v9016_v6 }
 0x6b5   : > { %v9023_v2 = vsub.f32 %v8685_v33, %v2349_v25  ;;  %2702 = vadd.xlane.f32.xlu0 %v2660_v36 }
 0x6b6   : > { %v9026_v44 = vsub.f32 %v8691_v4, %v2877_v52  ;;  %v2585_v61 = vpop.xlane.xlu0 %2584  ;;  %3230 = vadd.xlane.f32.xlu1 %v3188_v50 }
 0x6b7   : > { %12345 = vst [vmem:[#allocation115_spill] sm:$0xff] %v9023_v2  ;;  %v2613_v40 = vmul.f32 0.0078125, %v2585_v61  ;;  %v2397_v3 = vmul.f32 %v9023_v2, %v9023_v2  ;;  %v3113_v55 = vpop.xlane.xlu1 %3112  ;;  %v12449_v2 = vld [vmem:[#allocation57_spill] sm:$0xff] }
 0x6b8   : > { %12346 = vst [vmem:[#allocation116_spill] sm:$0xff] %v9026_v44  ;;  %v3141_v13 = vmul.f32 0.0078125, %v3113_v55  ;;  %v2925_v11 = vmul.f32 %v9026_v44, %v9026_v44  ;;  %v2859_v6 = vmul.f32 0.0078125, %v12449_v2 }
 0x6b9   : > { %v9033_v41 = vsub.f32 %v8695_v35, %v2613_v40  ;;  %2440 = vadd.xlane.f32.xlu0 %v2397_v3  ;;  %v12350_v35 = vld [vmem:[#allocation64_spill] sm:$0xff] }
 0x6ba   : > { %v9036_v33 = vsub.f32 %v8700_v53, %v3141_v13  ;;  %v2323_v4 = vpop.xlane.xlu0 %2322  ;;  %2968 = vadd.xlane.f32.xlu1 %v2925_v11 }
 0x6bb   : > { %12347 = vst [vmem:[#allocation117_spill] sm:$0xff] %v9033_v41  ;;  %v2350_v25 = vmul.f32 0.0078125, %v2323_v4  ;;  %v2661_v36 = vmul.f32 %v9033_v41, %v9033_v41  ;;  %v2851_v52 = vpop.xlane.xlu1 %2850 }
 0x6bc   : > { %12348 = vst [vmem:[#allocation118_spill] sm:$0xff] %v9036_v33  ;;  %v2878_v50 = vmul.f32 0.0078125, %v2851_v52  ;;  %v3189_v61 = vmul.f32 %v9036_v33, %v9036_v33  ;;  %v12443_v33 = vld [vmem:[#allocation30_spill] sm:$0xff] }
 0x6bd   : > { %v9043_v55 = vsub.f32 %v8705_v29, %v2350_v25  ;;  %2704 = vadd.xlane.f32.xlu0 %v2661_v36  ;;  %v12354_v29 = vld [vmem:[#allocation68_spill] sm:$0xff] }
 0x6be   : > { %v9046_v40 = vsub.f32 %v12350_v35, %v2878_v50  ;;  %v2587_v53 = vpop.xlane.xlu0 %2586  ;;  %3232 = vadd.xlane.f32.xlu1 %v3189_v61 }
 0x6bf   : > { %12349 = vst [vmem:[#allocation119_spill] sm:$0xff] %v9043_v55  ;;  %v2614_v3 = vmul.f32 0.0078125, %v2587_v53  ;;  %v2398_v13 = vmul.f32 %v9043_v55, %v9043_v55  ;;  %v3115_v11 = vpop.xlane.xlu1 %3114  ;;  %v12439_v55 = vld [vmem:[#allocation33_spill] sm:$0xff] }
 0x6c0   : > { %12351 = vst [vmem:[#allocation64_spill] sm:$0xff] %v9046_v40  ;;  %v3142_v4 = vmul.f32 0.0078125, %v3115_v11  ;;  %v2926_v52 = vmul.f32 %v9046_v40, %v9046_v40 }
 0x6c1   : > { %v9053_v58 = vsub.f32 %v12352_v59, %v2614_v3  ;;  %2442 = vadd.xlane.f32.xlu0 %v2398_v13  ;;  %v12358_v59 = vld [vmem:[#allocation72_spill] sm:$0xff] }
 0x6c2   : > { %v9056_v25 = vsub.f32 %v12354_v29, %v3142_v4  ;;  %v2325_v36 = vpop.xlane.xlu0 %2324  ;;  %2970 = vadd.xlane.f32.xlu1 %v2926_v52 }
 0x6c3   : > { %12353 = vst [vmem:[#allocation66_spill] sm:$0xff] %v9053_v58  ;;  %v2351_v50 = vmul.f32 0.0078125, %v2325_v36  ;;  %v2662_v61 = vmul.f32 %v9053_v58, %v9053_v58  ;;  %v2853_v35 = vpop.xlane.xlu1 %2852  ;;  %v12420_v58 = vld [vmem:[#allocation71_spill] sm:$0xff] }
 0x6c4   : > { %12355 = vst [vmem:[#allocation68_spill] sm:$0xff] %v9056_v25  ;;  %v2879_v53 = vmul.f32 0.0078125, %v2853_v35  ;;  %v3190_v11 = vmul.f32 %v9056_v25, %v9056_v25  ;;  %v12415_v25 = vld [vmem:[#allocation41_spill] sm:$0xff] }
 0x6c5   : > { %v9063_v30 = vsub.f32 %v12356_v0, %v2351_v50  ;;  %2706 = vadd.xlane.f32.xlu0 %v2662_v61  ;;  %v12362_v0 = vld [vmem:[#allocation76_spill] sm:$0xff] }
 0x6c6   : > { %v9066_v3 = vsub.f32 %v12358_v59, %v2879_v53  ;;  %v2589_v13 = vpop.xlane.xlu0 %2588  ;;  %3234 = vadd.xlane.f32.xlu1 %v3190_v11 }
 0x6c7   : > { %12357 = vst [vmem:[#allocation70_spill] sm:$0xff] %v9063_v30  ;;  %v2615_v4 = vmul.f32 0.0078125, %v2589_v13  ;;  %v2399_v52 = vmul.f32 %v9063_v30, %v9063_v30  ;;  %v3117_v29 = vpop.xlane.xlu1 %3116  ;;  %v12414_v30 = vld [vmem:[#allocation75_spill] sm:$0xff] }
 0x6c8   : > { %12359 = vst [vmem:[#allocation72_spill] sm:$0xff] %v9066_v3  ;;  %v3143_v36 = vmul.f32 0.0078125, %v3117_v29  ;;  %v2927_v35 = vmul.f32 %v9066_v3, %v9066_v3  ;;  %v12408_v3 = vld [vmem:[#allocation79_spill] sm:$0xff] }
 0x6c9   : > { %v9073_v62 = vsub.f32 %v12360_v12, %v2615_v4  ;;  %2444 = vadd.xlane.f32.xlu0 %v2399_v52  ;;  %v12366_v12 = vld [vmem:[#allocation80_spill] sm:$0xff] }
 0x6ca   : > { %v9076_v50 = vsub.f32 %v12362_v0, %v3143_v36  ;;  %v2327_v61 = vpop.xlane.xlu0 %2326  ;;  %2972 = vadd.xlane.f32.xlu1 %v2927_v35 }
 0x6cb   : > { %12361 = vst [vmem:[#allocation74_spill] sm:$0xff] %v9073_v62  ;;  %v2352_v53 = vmul.f32 0.0078125, %v2327_v61  ;;  %v2663_v11 = vmul.f32 %v9073_v62, %v9073_v62  ;;  %v2855_v59 = vpop.xlane.xlu1 %2854  ;;  %v12368_v62 = vld [vmem:[#allocation82_spill] sm:$0xff] }
 0x6cc   : > { %12363 = vst [vmem:[#allocation76_spill] sm:$0xff] %v9076_v50  ;;  %v2880_v13 = vmul.f32 0.0078125, %v2855_v59  ;;  %v3191_v29 = vmul.f32 %v9076_v50, %v9076_v50 }
 0x6cd   : > { %v9083_v21 = vsub.f32 %v12364_v39, %v2352_v53  ;;  %2708 = vadd.xlane.f32.xlu0 %v2663_v11  ;;  %v12370_v39 = vld [vmem:[#allocation84_spill] sm:$0xff] }
 0x6ce   : > { %v9086_v4 = vsub.f32 %v12366_v12, %v2880_v13  ;;  %v2591_v52 = vpop.xlane.xlu0 %2590  ;;  %3236 = vadd.xlane.f32.xlu1 %v3191_v29 }
 0x6cf   : > { %12365 = vst [vmem:[#allocation78_spill] sm:$0xff] %v9083_v21  ;;  %v2616_v36 = vmul.f32 0.0078125, %v2591_v52  ;;  %v2400_v35 = vmul.f32 %v9083_v21, %v9083_v21  ;;  %v3119_v0 = vpop.xlane.xlu1 %3118  ;;  %v12372_v21 = vld [vmem:[#allocation86_spill] sm:$0xff] }
 0x6d0   : > { %12367 = vst [vmem:[#allocation80_spill] sm:$0xff] %v9086_v4  ;;  %v3144_v61 = vmul.f32 0.0078125, %v3119_v0  ;;  %v2928_v59 = vmul.f32 %v9086_v4, %v9086_v4 }
 0x6d1   : > { %v9093_v50 = vsub.f32 %v12368_v62, %v2616_v36  ;;  %2446 = vadd.xlane.f32.xlu0 %v2400_v35  ;;  %v12374_v62 = vld [vmem:[#allocation88_spill] sm:$0xff] }
 0x6d2   : > { %v9096_v53 = vsub.f32 %v12370_v39, %v3144_v61  ;;  %v2329_v11 = vpop.xlane.xlu0 %2328  ;;  %2974 = vadd.xlane.f32.xlu1 %v2928_v59  ;;  %v2337_v61 = vmul.f32 0.0078125, %v8788_v57  ;;  %v12381_v57 = vld [vmem:[#allocation93_spill] sm:$0xff] }
 0x6d3   : > { %12369 = vst [vmem:[#allocation82_spill] sm:$0xff] %v9093_v50  ;;  %v2353_v13 = vmul.f32 0.0078125, %v2329_v11  ;;  %v2664_v29 = vmul.f32 %v9093_v50, %v9093_v50  ;;  %v2857_v12 = vpop.xlane.xlu1 %2856 }
 0x6d4   : > { %12371 = vst [vmem:[#allocation84_spill] sm:$0xff] %v9096_v53  ;;  %v2881_v52 = vmul.f32 0.0078125, %v2857_v12  ;;  %v3192_v0 = vmul.f32 %v9096_v53, %v9096_v53  ;;  %v12376_v12 = vld [vmem:[#allocation95_spill] sm:$0xff] }
 0x6d5   : > { %v9103_v4 = vsub.f32 %v12372_v21, %v2353_v13  ;;  %2710 = vadd.xlane.f32.xlu0 %v2664_v29  ;;  %v2865_v50 = vmul.f32 0.0078125, %v12376_v12  ;;  %v12377_v13 = vld [vmem:[#allocation90_spill] sm:$0xff] }
 0x6d6   : > { %v9106_v36 = vsub.f32 %v12374_v62, %v2881_v52  ;;  %v2593_v35 = vpop.xlane.xlu0 %2592  ;;  %3238 = vadd.xlane.f32.xlu1 %v3192_v0  ;;  %v12379_v52 = vld [vmem:[#allocation92_spill] sm:$0xff]  ;;  %v2600_v0 = vmul.f32 0.0078125, %v12381_v57 }
 0x6d7   : > { %12373 = vst [vmem:[#allocation86_spill] sm:$0xff] %v9103_v4  ;;  %v2617_v59 = vmul.f32 0.0078125, %v2593_v35  ;;  %v2401_v39 = vmul.f32 %v9103_v4, %v9103_v4  ;;  %v3121_v11 = vpop.xlane.xlu1 %3120  ;;  %v12382_v35 = vld [vmem:[#allocation50_spill] sm:$0xff] }
 0x6d8   : > { %12375 = vst [vmem:[#allocation88_spill] sm:$0xff] %v9106_v36  ;;  %v3145_v15 = vmul.f32 0.0078125, %v3121_v11  ;;  %v2929_v21 = vmul.f32 %v9106_v36, %v9106_v36  ;;  %v9122_v53 = vsub.f32 %v12382_v35, %v2337_v61  ;;  %v12384_v11 = vld [vmem:[#allocation94_spill] sm:$0xff]  ;;  %v9128_v36 = vsub.f32 %v12385_v49, %v2865_v50  ;;  %v12391_v35 = vld [vmem:[#allocation49_spill] sm:$0xff] }
 0x6d9   : > { %v9115_v29 = vsub.f32 %v12377_v13, %v2617_v59  ;;  %2448 = vadd.xlane.f32.xlu0 %v2401_v39  ;;  %v3128_v4 = vmul.f32 0.0078125, %v12384_v11  ;;  %v12393_v50 = vld [vmem:[#allocation85_spill] sm:$0xff] }
 0x6da   : > { %v9118_v62 = vsub.f32 %v12379_v52, %v3145_v15  ;;  %2976 = vadd.xlane.f32.xlu1 %v2929_v21  ;;  %12383 = vst [vmem:[#allocation92_spill] sm:$0xff] %v9122_v53  ;;  %12386 = vst [vmem:[#allocation93_spill] sm:$0xff] %v9128_v36  ;;  %v12387_v15 = vld [vmem:[#allocation89_spill] sm:$0xff]  ;;  %v12388_v21 = vld [vmem:[#allocation48_spill] sm:$0xff]  ;;  %v2385_v61 = vmul.f32 %v9122_v53, %v9122_v53  ;;  %v2913_v49 = vmul.f32 %v9128_v36, %v9128_v36 }
 0x6db   : > { %12378 = vst [vmem:[#allocation95_spill] sm:$0xff] %v9115_v29  ;;  %v2665_v12 = vmul.f32 %v9115_v29, %v9115_v29  ;;  %v2336_v39 = vmul.f32 0.0078125, %v12387_v15  ;;  %v9134_v13 = vsub.f32 %v12388_v21, %v2600_v0  ;;  %v12390_v52 = vld [vmem:[#allocation91_spill] sm:$0xff]  ;;  %v9140_v11 = vsub.f32 %v12391_v35, %v3128_v4 }
 0x6dc   : > { %12380 = vst [vmem:[#allocation90_spill] sm:$0xff] %v9118_v62  ;;  %v3193_v59 = vmul.f32 %v9118_v62, %v9118_v62  ;;  %v2864_v57 = vmul.f32 0.0078125, %v12390_v52  ;;  %v12396_v21 = vld [vmem:[#allocation87_spill] sm:$0xff] }
 0x6dd   : > { %2712 = vadd.xlane.f32.xlu0 %v2665_v12  ;;  %12389 = vst [vmem:[#allocation50_spill] sm:$0xff] %v9134_v13  ;;  %12392 = vst [vmem:[#allocation94_spill] sm:$0xff] %v9140_v11  ;;  %v2599_v12 = vmul.f32 0.0078125, %v12393_v50  ;;  %v2648_v0 = vmul.f32 %v9134_v13, %v9134_v13  ;;  %v3127_v53 = vmul.f32 0.0078125, %v12396_v21  ;;  %v12397_v62 = vld [vmem:[#allocation47_spill] sm:$0xff]  ;;  %v3176_v4 = vmul.f32 %v9140_v11, %v9140_v11  ;;  %v12400_v50 = vld [vmem:[#allocation44_spill] sm:$0xff] }
 0x6de   : > { %3240 = vadd.xlane.f32.xlu1 %v3193_v59  ;;  %v12394_v59 = vld [vmem:[#allocation46_spill] sm:$0xff]  ;;  %v9152_v52 = vsub.f32 %v12397_v62, %v2864_v57  ;;  %v12402_v21 = vld [vmem:[#allocation83_spill] sm:$0xff]  ;;  %v12403_v57 = vld [vmem:[#allocation45_spill] sm:$0xff] }
 0x6df   : > { %v9146_v15 = vsub.f32 %v12394_v59, %v2336_v39  ;;  %v9160_v39 = vsub.f32 %v12400_v50, %v2599_v12  ;;  %v2863_v62 = vmul.f32 0.0078125, %v12402_v21  ;;  %v9168_v13 = vsub.f32 %v12403_v57, %v3127_v53  ;;  %v12406_v12 = vld [vmem:[#allocation42_spill] sm:$0xff] }
 0x6e0   : > { %12398 = vst [vmem:[#allocation89_spill] sm:$0xff] %v9152_v52  ;;  %v3126_v21 = vmul.f32 0.0078125, %v12408_v3  ;;  %v2862_v3 = vmul.f32 0.0078125, %v12414_v30  ;;  %v3125_v30 = vmul.f32 0.0078125, %v12420_v58  ;;  %v12426_v58 = vld [vmem:[#allocation67_spill] sm:$0xff] }
 0x6e1   : > { %2416 = vadd.xlane.f32.xlu0 %v2385_v61  ;;  %12395 = vst [vmem:[#allocation51_spill] sm:$0xff] %v9146_v15  ;;  %v12399_v61 = vld [vmem:[#allocation81_spill] sm:$0xff]  ;;  %12401 = vst [vmem:[#allocation48_spill] sm:$0xff] %v9160_v39  ;;  %v2384_v59 = vmul.f32 %v9146_v15, %v9146_v15  ;;  %v2647_v15 = vmul.f32 %v9160_v39, %v9160_v39  ;;  %v9180_v53 = vsub.f32 %v12409_v23, %v2863_v62 }
 0x6e2   : > { %2944 = vadd.xlane.f32.xlu1 %v2913_v49  ;;  %v2335_v49 = vmul.f32 0.0078125, %v12399_v61  ;;  %12404 = vst [vmem:[#allocation91_spill] sm:$0xff] %v9168_v13  ;;  %v12405_v61 = vld [vmem:[#allocation77_spill] sm:$0xff]  ;;  %v3175_v57 = vmul.f32 %v9168_v13, %v9168_v13  ;;  %v9192_v23 = vsub.f32 %v12415_v25, %v3126_v21  ;;  %v12418_v13 = vld [vmem:[#allocation38_spill] sm:$0xff]  ;;  %v9204_v25 = vsub.f32 %v12421_v60, %v2862_v3 }
 0x6e3   : > { %v2598_v11 = vmul.f32 0.0078125, %v12405_v61  ;;  %12410 = vst [vmem:[#allocation85_spill] sm:$0xff] %v9180_v53  ;;  %v2911_v62 = vmul.f32 %v9180_v53, %v9180_v53  ;;  %v2861_v60 = vmul.f32 0.0078125, %v12426_v58  ;;  %v12427_v3 = vld [vmem:[#allocation37_spill] sm:$0xff]  ;;  %v12432_v58 = vld [vmem:[#allocation63_spill] sm:$0xff] }
 0x6e4   : > { %v9174_v50 = vsub.f32 %v12406_v12, %v2335_v49  ;;  %12416 = vst [vmem:[#allocation87_spill] sm:$0xff] %v9192_v23  ;;  %12422 = vst [vmem:[#allocation81_spill] sm:$0xff] %v9204_v25  ;;  %v3174_v21 = vmul.f32 %v9192_v23, %v9192_v23  ;;  %v9220_v14 = vsub.f32 %v12427_v3, %v3125_v30  ;;  %v3124_v30 = vmul.f32 0.0078125, %v12432_v58  ;;  %v12433_v3 = vld [vmem:[#allocation35_spill] sm:$0xff] }
 0x6e5   : > { %2678 = vadd.xlane.f32.xlu0 %v2648_v0  ;;  %v2912_v0 = vmul.f32 %v9152_v52, %v9152_v52  ;;  %v12412_v52 = vld [vmem:[#allocation40_spill] sm:$0xff]  ;;  %v9236_v40 = vsub.f32 %v12433_v3, %v2861_v60  ;;  %v12438_v60 = vld [vmem:[#allocation61_spill] sm:$0xff] }
 0x6e6   : > { %v9156_v35 = vpop.xlane.xlu0 %2680  ;;  %3206 = vadd.xlane.f32.xlu1 %v3176_v4  ;;  %12407 = vst [vmem:[#allocation49_spill] sm:$0xff] %v9174_v50  ;;  %v9186_v49 = vsub.f32 %v12412_v52, %v2598_v11  ;;  %v2383_v12 = vmul.f32 %v9174_v50, %v9174_v50  ;;  %12428 = vst [vmem:[#allocation83_spill] sm:$0xff] %v9220_v14  ;;  %v2860_v3 = vmul.f32 0.0078125, %v12438_v60 }
 0x6e7   : > { %v9164_v36 = vpop.xlane.xlu1 %3208  ;;  %12434 = vst [vmem:[#allocation77_spill] sm:$0xff] %v9236_v40 }
 0x6e8   : > { %12413 = vst [vmem:[#allocation46_spill] sm:$0xff] %v9186_v49  ;;  %v2646_v52 = vmul.f32 %v9186_v49, %v9186_v49 }
 0x6e9   : > { %2414 = vadd.xlane.f32.xlu0 %v2384_v59 }
 0x6ea   : > { %v2419_v4 = vpop.xlane.xlu0 %2418  ;;  %2942 = vadd.xlane.f32.xlu1 %v2912_v0  ;;  %v12411_v0 = vld [vmem:[#allocation73_spill] sm:$0xff] }
 0x6eb   : > { %v2947_v29 = vpop.xlane.xlu1 %2946  ;;  %v2334_v61 = vmul.f32 0.0078125, %v12411_v0 }
 0x6ec   : > { %v2986_v1 = vmul.f32 0.0078125, %v2947_v29 }
 0x6ed   : > { %2676 = vadd.xlane.f32.xlu0 %v2647_v15  ;;  %v9198_v11 = vsub.f32 %v12418_v13, %v2334_v61  ;;  %v12424_v13 = vld [vmem:[#allocation36_spill] sm:$0xff] }
 0x6ee   : > { %v2683_v59 = vpop.xlane.xlu0 %2682  ;;  %3204 = vadd.xlane.f32.xlu1 %v3175_v57  ;;  %v12417_v57 = vld [vmem:[#allocation69_spill] sm:$0xff] }
 0x6ef   : > { %v3211_v39 = vpop.xlane.xlu1 %3210  ;;  %v2597_v0 = vmul.f32 0.0078125, %v12417_v57  ;;  %12419 = vst [vmem:[#allocation47_spill] sm:$0xff] %v9198_v11  ;;  %v2382_v49 = vmul.f32 %v9198_v11, %v9198_v11 }
 0x6f1   : > { %2412 = vadd.xlane.f32.xlu0 %v2383_v12  ;;  %v9212_v61 = vsub.f32 %v12424_v13, %v2597_v0  ;;  %v12430_v13 = vld [vmem:[#allocation34_spill] sm:$0xff] }
 0x6f2   : > { %v2421_v15 = vpop.xlane.xlu0 %2420  ;;  %2940 = vadd.xlane.f32.xlu1 %v2911_v62  ;;  %v12423_v62 = vld [vmem:[#allocation65_spill] sm:$0xff] }
 0x6f3   : > { %v2949_v50 = vpop.xlane.xlu1 %2948  ;;  %v2333_v57 = vmul.f32 0.0078125, %v12423_v62  ;;  %12425 = vst [vmem:[#allocation44_spill] sm:$0xff] %v9212_v61  ;;  %v12429_v62 = vld [vmem:[#allocation62_spill] sm:$0xff]  ;;  %v2645_v11 = vmul.f32 %v9212_v61, %v9212_v61  ;;  %v2721_v61 = vmul.f32 0.0078125, %v9156_v35  ;;  %v12442_v35 = vld [vmem:[#allocation59_spill] sm:$0xff] }
 0x6f4   : > { %v2596_v0 = vmul.f32 0.0078125, %v12429_v62  ;;  %v12435_v62 = vld [vmem:[#allocation60_spill] sm:$0xff]  ;;  %v3123_v5 = vmul.f32 0.0078125, %v12442_v35 }
 0x6f5   : > { %2674 = vadd.xlane.f32.xlu0 %v2646_v52  ;;  %v2910_v52 = vmul.f32 %v9204_v25, %v9204_v25  ;;  %v9228_v23 = vsub.f32 %v12430_v13, %v2333_v57  ;;  %v2332_v57 = vmul.f32 0.0078125, %v12435_v62  ;;  %v12436_v13 = vld [vmem:[#allocation32_spill] sm:$0xff]  ;;  %v2458_v62 = vmul.f32 0.0078125, %v2419_v4  ;;  %v12445_v4 = vld [vmem:[#allocation31_spill] sm:$0xff] }
 0x6f6   : > { %v9208_v12 = vpop.xlane.xlu0 %2684  ;;  %3202 = vadd.xlane.f32.xlu1 %v3174_v21  ;;  %v9244_v25 = vsub.f32 %v12436_v13, %v2596_v0  ;;  %v12441_v0 = vld [vmem:[#allocation58_spill] sm:$0xff]  ;;  %v12446_v35 = vld [vmem:[#allocation52_spill] sm:$0xff] }
 0x6f7   : > { %v9216_v53 = vpop.xlane.xlu1 %3212  ;;  %12431 = vst [vmem:[#allocation45_spill] sm:$0xff] %v9228_v23  ;;  %v2381_v58 = vmul.f32 %v9228_v23, %v9228_v23  ;;  %v2595_v13 = vmul.f32 0.0078125, %v12441_v0  ;;  %v9263_v60 = vsub.f32 %v12443_v33, %v2332_v57  ;;  %v12447_v33 = vld [vmem:[#allocation53_spill] sm:$0xff] }
 0x6f8   : > { %12437 = vst [vmem:[#allocation42_spill] sm:$0xff] %v9244_v25  ;;  %v9278_v57 = vmul.f32 0.0078125, %v12447_v33 }
 0x6f9   : > { %2410 = vadd.xlane.f32.xlu0 %v2382_v49  ;;  %v3173_v49 = vmul.f32 %v9220_v14, %v9220_v14  ;;  %v9253_v14 = vsub.f32 %v12439_v55, %v3124_v30  ;;  %12444 = vst [vmem:[#allocation43_spill] sm:$0xff] %v9263_v60  ;;  %v2745_v55 = vadd.f32 1e-05, %v2721_v61  ;;  %v2722_v30 = vmul.f32 0.0078125, %v2683_v59 }
 0x6fa   : > { %v9224_v21 = vpop.xlane.xlu0 %2422  ;;  %2938 = vadd.xlane.f32.xlu1 %v2910_v52  ;;  %v2482_v59 = vadd.f32 1e-05, %v2458_v62  ;;  %v2459_v61 = vmul.f32 0.0078125, %v2421_v15  ;;  %v2380_v33 = vmul.f32 %v9263_v60, %v9263_v60  ;;  %v12452_v15 = vld [vmem:[#allocation29_spill] sm:$0xff]  ;;  %v3251_v60 = vmul.f32 0.0078125, %v9216_v53 }
 0x6fb   : > { %v9232_v56 = vpop.xlane.xlu1 %2950  ;;  %12440 = vst [vmem:[#allocation79_spill] sm:$0xff] %v9253_v14  ;;  %v3172_v29 = vmul.f32 %v9253_v14, %v9253_v14  ;;  %6517 = vrsqrt.f32 %v2745_v55  ;;  %v2723_v55 = vmul.f32 0.0078125, %v9208_v12 }
 0x6fd   : > { %2672 = vadd.xlane.f32.xlu0 %v2645_v11  ;;  %v3249_v11 = vmul.f32 0.0078125, %v9164_v36  ;;  %v2644_v36 = vmul.f32 %v9244_v25, %v9244_v25  ;;  %v12448_v25 = vld [vmem:[#allocation56_spill] sm:$0xff]  ;;  %v2747_v53 = vadd.f32 1e-05, %v2723_v55 }
 0x6fe   : > { %v9240_v52 = vpop.xlane.xlu0 %2686  ;;  %3200 = vadd.xlane.f32.xlu1 %v3173_v49  ;;  %v2909_v49 = vmul.f32 %v9236_v40, %v9236_v40  ;;  %v3250_v40 = vmul.f32 0.0078125, %v3211_v39  ;;  %v2331_v44 = vmul.f32 0.0078125, %v12448_v25  ;;  %v12450_v39 = vld [vmem:[#allocation28_spill] sm:$0xff] }
 0x6ff   : > { %v9249_v10 = vpop.xlane.xlu1 %3214  ;;  %v3273_v0 = vadd.f32 1e-05, %v3249_v11  ;;  %v9285_v14 = vsub.f32 %v12450_v39, %v2595_v13  ;;  %v2483_v13 = vadd.f32 1e-05, %v2459_v61 }
 0x700   : > { %v3274_v2 = vadd.f32 1e-05, %v3250_v40 }
 0x701   : > { %2408 = vadd.xlane.f32.xlu0 %v2381_v58  ;;  %v9270_v58 = vsub.f32 %v12445_v4, %v2860_v3  ;;  %v3010_v3 = vadd.f32 1e-05, %v2986_v1  ;;  %v2987_v4 = vmul.f32 0.0078125, %v2949_v50  ;;  %12451 = vst [vmem:[#allocation73_spill] sm:$0xff] %v9285_v14  ;;  %6519 = vrsqrt.f32 %v3273_v0  ;;  %v12454_v50 = vld [vmem:[#allocation54_spill] sm:$0xff] }
 0x702   : > { %v9260_v23 = vpop.xlane.xlu0 %2424  ;;  %2936 = vadd.xlane.f32.xlu1 %v2909_v49  ;;  %v9275_v49 = vmul.f32 0.0078125, %v12446_v35  ;;  %v2746_v35 = vadd.f32 1e-05, %v2722_v30  ;;  %v2594_v25 = vmul.f32 0.0078125, %v12454_v50  ;;  %6521 = vrsqrt.f32 %v2482_v59  ;;  %v12455_v30 = vld [vmem:[#allocation55_spill] sm:$0xff]  ;;  %v12456_v0 = vld [vmem:[#allocation26_spill] sm:$0xff] }
 0x703   : > { %v9267_v41 = vpop.xlane.xlu1 %2952  ;;  %v2908_v1 = vmul.f32 %v9270_v58, %v9270_v58  ;;  %6523 = vrsqrt.f32 %v3010_v3  ;;  %v3011_v39 = vadd.f32 1e-05, %v2987_v4  ;;  %v9301_v40 = vsub.f32 %v12456_v0, %v2331_v44  ;;  %v12458_v50 = vld [vmem:[#allocation27_spill] sm:$0xff] }
 0x704   : > { %6525 = vrsqrt.f32 %v2746_v35  ;;  %v2643_v59 = vmul.f32 %v9285_v14, %v9285_v14  ;;  %v9306_v12 = vsub.f32 %v12458_v50, %v2859_v6  ;;  %v2460_v4 = vmul.f32 0.0078125, %v9224_v21  ;;  %v12460_v6 = vld [vmem:[#allocation24_spill] sm:$0xff] }
 0x705   : > { %2670 = vadd.xlane.f32.xlu0 %v2644_v36  ;;  %v9292_v36 = vsub.f32 %v12452_v15, %v3123_v5  ;;  %12457 = vst [vmem:[#allocation75_spill] sm:$0xff] %v9301_v40  ;;  %6527 = vrsqrt.f32 %v3274_v2  ;;  %v3275_v35 = vadd.f32 1e-05, %v3251_v60  ;;  %v9313_v0 = vsub.f32 %v12460_v6, %v2594_v25 }
 0x706   : > { %v9282_v11 = vpop.xlane.xlu0 %2688  ;;  %3198 = vadd.xlane.f32.xlu1 %v3172_v29  ;;  %v3122_v29 = vmul.f32 0.0078125, %v12455_v30  ;;  %12459 = vst [vmem:[#allocation41_spill] sm:$0xff] %v9306_v12  ;;  %6529 = vrsqrt.f32 %v2483_v13  ;;  %v2379_v13 = vmul.f32 %v9301_v40, %v9301_v40  ;;  %v2484_v60 = vadd.f32 1e-05, %v2460_v4 }
 0x707   : > { %v9289_v62 = vpop.xlane.xlu1 %3216  ;;  %12453 = vst [vmem:[#allocation40_spill] sm:$0xff] %v9292_v36  ;;  %v3171_v3 = vmul.f32 %v9292_v36, %v9292_v36  ;;  %6531 = vrsqrt.f32 %v3011_v39  ;;  %12461 = vst [vmem:[#allocation69_spill] sm:$0xff] %v9313_v0  ;;  %v3252_v50 = vmul.f32 0.0078125, %v9249_v10 }
 0x709   : > { %2406 = vadd.xlane.f32.xlu0 %v2380_v33 }
 0x70a   : > { %v2427_v5 = vpop.xlane.xlu0 %2426  ;;  %2934 = vadd.xlane.f32.xlu1 %v2908_v1  ;;  %v2988_v1 = vmul.f32 0.0078125, %v9232_v56  ;;  %v2907_v56 = vmul.f32 %v9306_v12, %v9306_v12 }
 0x70b   : > { %v2462_v15 = vmul.f32 0.0078125, %v2427_v5  ;;  %v2955_v61 = vpop.xlane.xlu1 %2954 }
 0x70c   : > { %v2990_v33 = vmul.f32 0.0078125, %v2955_v61  ;;  %v12462_v61 = vld [vmem:[#allocation25_spill] sm:$0xff] }
 0x70d   : > { %v2486_v44 = vadd.f32 1e-05, %v2462_v15  ;;  %2668 = vadd.xlane.f32.xlu0 %v2643_v59  ;;  %v9318_v21 = vsub.f32 %v12462_v61, %v3122_v29  ;;  %v2724_v15 = vmul.f32 0.0078125, %v9240_v52  ;;  %v3012_v59 = vadd.f32 1e-05, %v2988_v1  ;;  %v12464_v29 = vld [vmem:[#allocation22_spill] sm:$0xff]  ;;  %v9330_v52 = vpop.eup %6517 }
 0x70e   : > { %v3014_v30 = vadd.f32 1e-05, %v2990_v33  ;;  %v2691_v5 = vpop.xlane.xlu0 %2690  ;;  %3196 = vadd.xlane.f32.xlu1 %v3171_v3  ;;  %v9338_v6 = vpop.eup %6519  ;;  %v3276_v61 = vadd.f32 1e-05, %v3252_v50 }
 0x70f   : > { %6533 = vrsqrt.f32 %v2486_v44  ;;  %v2726_v2 = vmul.f32 0.0078125, %v2691_v5  ;;  %v3219_v55 = vpop.xlane.xlu1 %3218  ;;  %12463 = vst [vmem:[#allocation38_spill] sm:$0xff] %v9318_v21  ;;  %v9326_v44 = vsub.f32 %v12464_v29, %v9275_v49  ;;  %v3170_v5 = vmul.f32 %v9318_v21, %v9318_v21 }
 0x710   : > { %6535 = vrsqrt.f32 %v3014_v30  ;;  %v3254_v39 = vmul.f32 0.0078125, %v3219_v55  ;;  %v2748_v49 = vadd.f32 1e-05, %v2724_v15  ;;  %v9341_v55 = vpop.eup %6521  ;;  %v2725_v29 = vmul.f32 0.0078125, %v9282_v11 }
 0x711   : > { %6537 = vrsqrt.f32 %v2747_v53  ;;  %v2750_v25 = vadd.f32 1e-05, %v2726_v2  ;;  %2404 = vadd.xlane.f32.xlu0 %v2379_v13  ;;  %12465 = vst [vmem:[#allocation71_spill] sm:$0xff] %v9326_v44  ;;  %v2642_v53 = vmul.f32 %v9313_v0, %v9313_v0  ;;  %v2461_v2 = vmul.f32 0.0078125, %v9260_v23 }
 0x712   : > { %6539 = vrsqrt.f32 %v3275_v35  ;;  %v3278_v33 = vadd.f32 1e-05, %v3254_v39  ;;  %v2429_v3 = vpop.xlane.xlu0 %2428  ;;  %2932 = vadd.xlane.f32.xlu1 %v2907_v56  ;;  %v12466_v35 = vld [vmem:[#allocation23_spill] sm:$0xff] }
 0x713   : > { %6541 = vrsqrt.f32 %v2750_v25  ;;  %v2463_v30 = vmul.f32 0.0078125, %v2429_v3  ;;  %v2957_v4 = vpop.xlane.xlu1 %2956  ;;  %v9334_v1 = vsub.f32 %v12466_v35, %v9278_v57  ;;  %v2989_v57 = vmul.f32 0.0078125, %v9267_v41  ;;  %v9344_v25 = vpop.eup %6523 }
 0x714   : > { %6543 = vrsqrt.f32 %v3278_v33  ;;  %v2991_v10 = vmul.f32 0.0078125, %v2957_v4  ;;  %v9348_v23 = vpop.eup %6525  ;;  %v2485_v41 = vadd.f32 1e-05, %v2461_v2  ;;  %v3253_v35 = vmul.f32 0.0078125, %v9289_v62 }
 0x715   : > { %12467 = vst [vmem:[#allocation39_spill] sm:$0xff] %v9334_v1  ;;  %6545 = vrsqrt.f32 %v2484_v60  ;;  %v2487_v13 = vadd.f32 1e-05, %v2463_v30  ;;  %2666 = vadd.xlane.f32.xlu0 %v2642_v53  ;;  %v2378_v60 = vmul.f32 %v9326_v44, %v9326_v44  ;;  %v9352_v50 = vpop.eup %6527  ;;  %v3013_v4 = vadd.f32 1e-05, %v2989_v57 }
 0x716   : > { %6547 = vrsqrt.f32 %v3012_v59  ;;  %v3015_v39 = vadd.f32 1e-05, %v2991_v10  ;;  %v2693_v56 = vpop.xlane.xlu0 %2692  ;;  %3194 = vadd.xlane.f32.xlu1 %v3170_v5  ;;  %v2906_v59 = vmul.f32 %v9334_v1, %v9334_v1  ;;  %v9355_v53 = vpop.eup %6529  ;;  %v3277_v62 = vadd.f32 1e-05, %v3253_v35 }
 0x717   : > { %6549 = vrsqrt.f32 %v2487_v13  ;;  %v2727_v33 = vmul.f32 0.0078125, %v2693_v56  ;;  %v3221_v15 = vpop.xlane.xlu1 %3220  ;;  %v9358_v13 = vpop.eup %6531 }
 0x718   : > { %6551 = vrsqrt.f32 %v3015_v39  ;;  %v3255_v3 = vmul.f32 0.0078125, %v3221_v15 }
 0x719   : > { %6553 = vrsqrt.f32 %v2748_v49  ;;  %v2751_v30 = vadd.f32 1e-05, %v2727_v33  ;;  %2402 = vadd.xlane.f32.xlu0 %v2378_v60  ;;  %v2749_v33 = vadd.f32 1e-05, %v2725_v29 }
 0x71a   : > { %6555 = vrsqrt.f32 %v3276_v61  ;;  %v3279_v10 = vadd.f32 1e-05, %v3255_v3  ;;  %v2431_v5 = vpop.xlane.xlu0 %2430  ;;  %2930 = vadd.xlane.f32.xlu1 %v2906_v59 }
 0x71b   : > { %6557 = vrsqrt.f32 %v2751_v30  ;;  %v2464_v39 = vmul.f32 0.0078125, %v2431_v5  ;;  %v2959_v56 = vpop.xlane.xlu1 %2958 }
 0x71c   : > { %v6534_v49 = vpop.eup %6533  ;;  %6559 = vrsqrt.f32 %v3279_v10  ;;  %v2992_v2 = vmul.f32 0.0078125, %v2959_v56 }
 0x71d   : > { %v6536_v11 = vpop.eup %6535  ;;  %6561 = vrsqrt.f32 %v2485_v41  ;;  %v2534_v60 = vmul.f32 %v6534_v49, %v8883_v45  ;;  %v2488_v61 = vadd.f32 1e-05, %v2464_v39 }
 0x71e   : > { %v9361_v57 = vpop.eup %6537  ;;  %6563 = vrsqrt.f32 %v3013_v4  ;;  %v3062_v15 = vmul.f32 %v6536_v11, %v8886_v34  ;;  %v3016_v3 = vadd.f32 1e-05, %v2992_v2  ;;  %v2695_v59 = vpop.xlane.xlu0 %2694 }
 0x71f   : > { %v9364_v30 = vpop.eup %6539  ;;  %v3338_v5 = vsub.f32 0.0, %v2534_v60  ;;  %6565 = vrsqrt.f32 %v2488_v61  ;;  %v2728_v10 = vmul.f32 0.0078125, %v2695_v59  ;;  %v3223_v56 = vpop.xlane.xlu1 %3222 }
 0x720   : > { %v6542_v1 = vpop.eup %6541  ;;  %v3340_v41 = vsub.f32 0.0, %v3062_v15  ;;  %6567 = vrsqrt.f32 %v3016_v3  ;;  %v3256_v29 = vmul.f32 0.0078125, %v3223_v56 }
 0x721   : > { %v6544_v45 = vpop.eup %6543  ;;  %6569 = vrsqrt.f32 %v2749_v33  ;;  %v3386_v39 = vmul.f32 1.442695, %v3338_v5  ;;  %v2798_v4 = vmul.f32 %v6542_v1, %v8893_v24  ;;  %v2752_v35 = vadd.f32 1e-05, %v2728_v10 }
 0x722   : > { %v9367_v49 = vpop.eup %6545  ;;  %6571 = vrsqrt.f32 %v3277_v62  ;;  %v3390_v34 = vmul.f32 1.442695, %v3340_v41  ;;  %v3326_v2 = vmul.f32 %v6544_v45, %v8896_v31  ;;  %v3280_v11 = vadd.f32 1e-05, %v3256_v29  ;;  %v2433_v60 = vpop.xlane.xlu0 %2432 }
 0x723   : > { %v9370_v61 = vpop.eup %6547  ;;  %6573 = vpow2.f32 %v3386_v39  ;;  %v3339_v15 = vsub.f32 0.0, %v2798_v4  ;;  %v2465_v3 = vmul.f32 0.0078125, %v2433_v60  ;;  %v2961_v59 = vpop.xlane.xlu1 %2960 }
 0x724   : > { %v6550_v56 = vpop.eup %6549  ;;  %6575 = vpow2.f32 %v3390_v34  ;;  %v3341_v33 = vsub.f32 0.0, %v3326_v2  ;;  %v2993_v5 = vmul.f32 0.0078125, %v2961_v59 }
 0x725   : > { %v6552_v24 = vpop.eup %6551  ;;  %v3388_v1 = vmul.f32 1.442695, %v3339_v15  ;;  %v2535_v10 = vmul.f32 %v6550_v56, %v8903_v20  ;;  %6577 = vrsqrt.f32 %v2752_v35  ;;  %v2489_v62 = vadd.f32 1e-05, %v2465_v3 }
 0x726   : > { %v9373_v41 = vpop.eup %6553  ;;  %v3392_v31 = vmul.f32 1.442695, %v3341_v33  ;;  %v3063_v29 = vmul.f32 %v6552_v24, %v8906_v26  ;;  %6579 = vrsqrt.f32 %v3280_v11  ;;  %v3017_v45 = vadd.f32 1e-05, %v2993_v5  ;;  %v2697_v39 = vpop.xlane.xlu0 %2696 }
 0x727   : > { %v9376_v4 = vpop.eup %6555  ;;  %6581 = vpow2.f32 %v3388_v1  ;;  %v3342_v34 = vsub.f32 0.0, %v2535_v10  ;;  %v2729_v2 = vmul.f32 0.0078125, %v2697_v39  ;;  %v3225_v60 = vpop.xlane.xlu1 %3224 }
 0x728   : > { %v6558_v59 = vpop.eup %6557  ;;  %6583 = vpow2.f32 %v3392_v31  ;;  %v3344_v15 = vsub.f32 0.0, %v3063_v29  ;;  %v3257_v20 = vmul.f32 0.0078125, %v3225_v60 }
 0x729   : > { %v6560_v35 = vpop.eup %6559  ;;  %v3394_v3 = vmul.f32 1.442695, %v3342_v34  ;;  %v2799_v56 = vmul.f32 %v6558_v59, %v8913_v46  ;;  %6585 = vrsqrt.f32 %v2489_v62  ;;  %v2753_v33 = vadd.f32 1e-05, %v2729_v2 }
 0x72a   : > { %v9379_v26 = vpop.eup %6561  ;;  %v3398_v11 = vmul.f32 1.442695, %v3344_v15  ;;  %v3327_v5 = vmul.f32 %v6560_v35, %v8916_v51  ;;  %6587 = vrsqrt.f32 %v3017_v45  ;;  %v3281_v24 = vadd.f32 1e-05, %v3257_v20  ;;  %v2435_v1 = vpop.xlane.xlu0 %2434 }
 0x72b   : > { %v9382_v10 = vpop.eup %6563  ;;  %6589 = vpow2.f32 %v3394_v3  ;;  %v3343_v31 = vsub.f32 0.0, %v2799_v56  ;;  %v2466_v29 = vmul.f32 0.0078125, %v2435_v1  ;;  %v2963_v39 = vpop.xlane.xlu1 %2962 }
 0x72c   : > { %v6566_v60 = vpop.eup %6565  ;;  %6591 = vpow2.f32 %v3398_v11  ;;  %v3345_v34 = vsub.f32 0.0, %v3327_v5  ;;  %v2994_v46 = vmul.f32 0.0078125, %v2963_v39 }
 0x72d   : > { %v6568_v62 = vpop.eup %6567  ;;  %v3396_v2 = vmul.f32 1.442695, %v3343_v31  ;;  %v2536_v59 = vmul.f32 %v6566_v60, %v8923_v22  ;;  %6593 = vrsqrt.f32 %v2753_v33  ;;  %v2490_v15 = vadd.f32 1e-05, %v2466_v29 }
 0x72e   : > { %v9385_v51 = vpop.eup %6569  ;;  %v3400_v45 = vmul.f32 1.442695, %v3345_v34  ;;  %v3064_v20 = vmul.f32 %v6568_v62, %v8926_v37  ;;  %6595 = vrsqrt.f32 %v3281_v24  ;;  %v3018_v35 = vadd.f32 1e-05, %v2994_v46  ;;  %v2699_v3 = vpop.xlane.xlu0 %2698 }
 0x72f   : > { %v9388_v56 = vpop.eup %6571  ;;  %6597 = vpow2.f32 %v3396_v2  ;;  %v3346_v11 = vsub.f32 0.0, %v2536_v59  ;;  %v2730_v5 = vmul.f32 0.0078125, %v2699_v3  ;;  %v3227_v1 = vpop.xlane.xlu1 %3226 }
 0x730   : > { %v6574_v39 = vpop.eup %6573  ;;  %6599 = vpow2.f32 %v3400_v45  ;;  %v3348_v31 = vsub.f32 0.0, %v3064_v20  ;;  %v3258_v22 = vmul.f32 0.0078125, %v3227_v1 }
 0x731   : > { %v6576_v33 = vpop.eup %6575  ;;  %v3482_v29 = vadd.f32 1.0, %v6574_v39  ;;  %v3402_v60 = vmul.f32 1.442695, %v3346_v11  ;;  %6601 = vrsqrt.f32 %v2490_v15  ;;  %v2754_v2 = vadd.f32 1e-05, %v2730_v5 }
 0x732   : > { %v6578_v34 = vpop.eup %6577  ;;  %v3484_v44 = vadd.f32 1.0, %v6576_v33  ;;  %v3406_v37 = vmul.f32 1.442695, %v3348_v31  ;;  %6603 = vrsqrt.f32 %v3018_v35  ;;  %v2437_v24 = vpop.xlane.xlu0 %2436  ;;  %v3282_v20 = vadd.f32 1e-05, %v3258_v22 }
 0x733   : > { %v6580_v46 = vpop.eup %6579  ;;  %6605 = vrcp.f32 %v3482_v29  ;;  %v2800_v62 = vmul.f32 %v6578_v34, %v8933_v16  ;;  %v2965_v59 = vpop.xlane.xlu1 %2964  ;;  %v2467_v11 = vmul.f32 0.0078125, %v2437_v24 }
 0x734   : > { %v9391_v3 = vpop.eup %6581  ;;  %6607 = vrcp.f32 %v3484_v44  ;;  %v3328_v45 = vmul.f32 %v6580_v46, %v8936_v17  ;;  %v2995_v31 = vmul.f32 0.0078125, %v2965_v59 }
 0x735   : > { %v9394_v1 = vpop.eup %6583  ;;  %6609 = vpow2.f32 %v3402_v60  ;;  %v3347_v15 = vsub.f32 0.0, %v2800_v62  ;;  %v2491_v46 = vadd.f32 1e-05, %v2467_v11 }
 0x736   : > { %v6586_v39 = vpop.eup %6585  ;;  %6611 = vpow2.f32 %v3406_v37  ;;  %v3349_v35 = vsub.f32 0.0, %v3328_v45  ;;  %v2701_v33 = vpop.xlane.xlu0 %2700  ;;  %v3019_v45 = vadd.f32 1e-05, %v2995_v31 }
 0x737   : > { %v6588_v29 = vpop.eup %6587  ;;  %v3404_v16 = vmul.f32 1.442695, %v3347_v15  ;;  %v2537_v5 = vmul.f32 %v6586_v39, %v8943_v7  ;;  %6613 = vrsqrt.f32 %v2754_v2  ;;  %v3229_v34 = vpop.xlane.xlu1 %3228  ;;  %v2731_v39 = vmul.f32 0.0078125, %v2701_v33 }
 0x738   : > { %v6590_v44 = vpop.eup %6589  ;;  %v3408_v21 = vmul.f32 1.442695, %v3349_v35  ;;  %v3065_v17 = vmul.f32 %v6588_v29, %v8946_v48  ;;  %6615 = vrsqrt.f32 %v3282_v20  ;;  %v3259_v11 = vmul.f32 0.0078125, %v3229_v34 }
 0x739   : > { %v6592_v22 = vpop.eup %6591  ;;  %v3486_v60 = vadd.f32 1.0, %v6590_v44  ;;  %6617 = vpow2.f32 %v3404_v16  ;;  %v3350_v24 = vsub.f32 0.0, %v2537_v5  ;;  %v2755_v33 = vadd.f32 1e-05, %v2731_v39 }
 0x73a   : > { %v6594_v37 = vpop.eup %6593  ;;  %v3488_v62 = vadd.f32 1.0, %v6592_v22  ;;  %6619 = vpow2.f32 %v3408_v21  ;;  %v3352_v59 = vsub.f32 0.0, %v3065_v17  ;;  %v2439_v15 = vpop.xlane.xlu0 %2438 }
 0x73b   : > { %v6596_v0 = vpop.eup %6595  ;;  %6621 = vrcp.f32 %v3486_v60  ;;  %v3410_v7 = vmul.f32 1.442695, %v3350_v24  ;;  %v2801_v2 = vmul.f32 %v6594_v37, %v8953_v43  ;;  %v2967_v35 = vpop.xlane.xlu1 %2966 }
 0x73c   : > { %v9399_v48 = vpop.eup %6597  ;;  %6623 = vrcp.f32 %v3488_v62  ;;  %v3414_v20 = vmul.f32 1.442695, %v3352_v59  ;;  %v3329_v29 = vmul.f32 %v6596_v0, %v8956_v9  ;;  %v3283_v0 = vadd.f32 1e-05, %v3259_v11 }
 0x73d   : > { %v9402_v16 = vpop.eup %6599  ;;  %6625 = vpow2.f32 %v3410_v7  ;;  %v3351_v21 = vsub.f32 0.0, %v2801_v2  ;;  %v2468_v59 = vmul.f32 0.0078125, %v2439_v15 }
 0x73e   : > { %v6602_v31 = vpop.eup %6601  ;;  %6627 = vpow2.f32 %v3414_v20  ;;  %v3353_v5 = vsub.f32 0.0, %v3329_v29  ;;  %v2703_v44 = vpop.xlane.xlu0 %2702  ;;  %v2996_v20 = vmul.f32 0.0078125, %v2967_v35 }
 0x73f   : > { %v6604_v17 = vpop.eup %6603  ;;  %v3412_v22 = vmul.f32 1.442695, %v3351_v21  ;;  %v2538_v43 = vmul.f32 %v6602_v31, %v8963_v47  ;;  %6629 = vrsqrt.f32 %v2491_v46  ;;  %v3231_v60 = vpop.xlane.xlu1 %3230 }
 0x740   : > { %v9405_v24 = vpop.eup %6605  ;;  %v3416_v37 = vmul.f32 1.442695, %v3353_v5  ;;  %v3066_v9 = vmul.f32 %v6604_v17, %v8966_v54  ;;  %6631 = vrsqrt.f32 %v3019_v45  ;;  %v2492_v17 = vadd.f32 1e-05, %v2468_v59 }
 0x741   : > { %12468 = vst [vmem:[#allocation65_spill] sm:$0xff] %v9405_v24  ;;  %v9408_v34 = vpop.eup %6607  ;;  %6633 = vpow2.f32 %v3412_v22  ;;  %v3354_v62 = vsub.f32 0.0, %v2538_v43  ;;  %v3020_v22 = vadd.f32 1e-05, %v2996_v20 }
 0x742   : > { %12469 = vst [vmem:[#allocation36_spill] sm:$0xff] %v9408_v34  ;;  %v6610_v7 = vpop.eup %6609  ;;  %6635 = vpow2.f32 %v3416_v37  ;;  %v3356_v2 = vsub.f32 0.0, %v3066_v9  ;;  %v2441_v47 = vpop.xlane.xlu0 %2440  ;;  %v2732_v9 = vmul.f32 0.0078125, %v2703_v44 }
 0x743   : > { %v6612_v46 = vpop.eup %6611  ;;  %v3490_v39 = vadd.f32 1.0, %v6610_v7  ;;  %v3418_v29 = vmul.f32 1.442695, %v3354_v62  ;;  %6637 = vrsqrt.f32 %v2755_v33  ;;  %v2969_v21 = vpop.xlane.xlu1 %2968 }
 0x744   : > { %v6614_v31 = vpop.eup %6613  ;;  %v3492_v5 = vadd.f32 1.0, %v6612_v46  ;;  %v3422_v54 = vmul.f32 1.442695, %v3356_v2  ;;  %6639 = vrsqrt.f32 %v3283_v0  ;;  %v3260_v2 = vmul.f32 0.0078125, %v3231_v60 }
 0x745   : > { %v6616_v45 = vpop.eup %6615  ;;  %6641 = vrcp.f32 %v3490_v39  ;;  %v2802_v11 = vmul.f32 %v6614_v31, %v8973_v28  ;;  %v2469_v46 = vmul.f32 0.0078125, %v2441_v47  ;;  %v2997_v20 = vmul.f32 0.0078125, %v2969_v21 }
 0x746   : > { %v9411_v15 = vpop.eup %6617  ;;  %6643 = vrcp.f32 %v3492_v5  ;;  %v3330_v35 = vmul.f32 %v6616_v45, %v8976_v8  ;;  %v2705_v43 = vpop.xlane.xlu0 %2704  ;;  %v2756_v44 = vadd.f32 1e-05, %v2732_v9 }
 0x747   : > { %v9414_v37 = vpop.eup %6619  ;;  %6645 = vpow2.f32 %v3418_v29  ;;  %v3355_v33 = vsub.f32 0.0, %v2802_v11  ;;  %v3233_v62 = vpop.xlane.xlu1 %3232  ;;  %v2733_v47 = vmul.f32 0.0078125, %v2705_v43 }
 0x748   : > { %v9416_v7 = vpop.eup %6621  ;;  %6647 = vpow2.f32 %v3422_v54  ;;  %v3357_v0 = vsub.f32 0.0, %v3330_v35  ;;  %v3284_v54 = vadd.f32 1e-05, %v3260_v2 }
 0x749   : > { %12470 = vst [vmem:[#allocation67_spill] sm:$0xff] %v9416_v7  ;;  %v9418_v28 = vpop.eup %6623  ;;  %v3420_v59 = vmul.f32 1.442695, %v3355_v33  ;;  %6649 = vrsqrt.f32 %v2492_v17  ;;  %v2493_v17 = vadd.f32 1e-05, %v2469_v46 }
 0x74a   : > { %12471 = vst [vmem:[#allocation37_spill] sm:$0xff] %v9418_v28  ;;  %v6626_v39 = vpop.eup %6625  ;;  %v3424_v8 = vmul.f32 1.442695, %v3357_v0  ;;  %6651 = vrsqrt.f32 %v3020_v22  ;;  %v2443_v31 = vpop.xlane.xlu0 %2442  ;;  %v3021_v22 = vadd.f32 1e-05, %v2997_v20  ;;  %v3261_v0 = vmul.f32 0.0078125, %v3233_v62 }
 0x74b   : > { %v6628_v5 = vpop.eup %6627  ;;  %v3494_v29 = vadd.f32 1.0, %v6626_v39  ;;  %6653 = vpow2.f32 %v3420_v59  ;;  %v2971_v45 = vpop.xlane.xlu1 %2970  ;;  %v2757_v46 = vadd.f32 1e-05, %v2733_v47 }
 0x74c   : > { %v6630_v11 = vpop.eup %6629  ;;  %v3496_v34 = vadd.f32 1.0, %v6628_v5  ;;  %6655 = vpow2.f32 %v3424_v8  ;;  %v3285_v20 = vadd.f32 1e-05, %v3261_v0 }
 0x74d   : > { %v6632_v60 = vpop.eup %6631  ;;  %6657 = vrcp.f32 %v3494_v29  ;;  %v2539_v35 = vmul.f32 %v6630_v11, %v8983_v32 }
 0x74e   : > { %v9421_v33 = vpop.eup %6633  ;;  %6659 = vrcp.f32 %v3496_v34  ;;  %v3067_v21 = vmul.f32 %v6632_v60, %v8986_v63  ;;  %v2707_v59 = vpop.xlane.xlu0 %2706 }
 0x74f   : > { %v9424_v9 = vpop.eup %6635  ;;  %v3358_v39 = vsub.f32 0.0, %v2539_v35  ;;  %6661 = vrsqrt.f32 %v2756_v44  ;;  %v3235_v8 = vpop.xlane.xlu1 %3234  ;;  %v2470_v35 = vmul.f32 0.0078125, %v2443_v31 }
 0x750   : > { %v6638_v2 = vpop.eup %6637  ;;  %v3360_v5 = vsub.f32 0.0, %v3067_v21  ;;  %6663 = vrsqrt.f32 %v3284_v54 }
 0x751   : > { %v6640_v29 = vpop.eup %6639  ;;  %v3426_v32 = vmul.f32 1.442695, %v3358_v39  ;;  %v2803_v43 = vmul.f32 %v6638_v2, %v8993_v18  ;;  %6665 = vrsqrt.f32 %v2493_v17  ;;  %v2998_v18 = vmul.f32 0.0078125, %v2971_v45 }
 0x752   : > { %v9427_v34 = vpop.eup %6641  ;;  %v3430_v63 = vmul.f32 1.442695, %v3360_v5  ;;  %v3331_v62 = vmul.f32 %v6640_v29, %v8996_v42  ;;  %6667 = vrsqrt.f32 %v3021_v22  ;;  %v2445_v11 = vpop.xlane.xlu0 %2444  ;;  %v2494_v31 = vadd.f32 1e-05, %v2470_v35 }
 0x753   : > { %12472 = vst [vmem:[#allocation62_spill] sm:$0xff] %v9427_v34  ;;  %v9430_v60 = vpop.eup %6643  ;;  %6669 = vpow2.f32 %v3426_v32  ;;  %v3359_v44 = vsub.f32 0.0, %v2803_v43  ;;  %v2973_v54 = vpop.xlane.xlu1 %2972  ;;  %v2734_v32 = vmul.f32 0.0078125, %v2707_v59  ;;  %v12544_v34 = vld [vmem:[#allocation20_spill] sm:$0xff] }
 0x754   : > { %12473 = vst [vmem:[#allocation34_spill] sm:$0xff] %v9430_v60  ;;  %v6646_v21 = vpop.eup %6645  ;;  %6671 = vpow2.f32 %v3430_v63  ;;  %v3361_v39 = vsub.f32 0.0, %v3331_v62  ;;  %v3262_v62 = vmul.f32 0.0078125, %v3235_v8  ;;  %v2999_v35 = vmul.f32 0.0078125, %v2973_v54  ;;  %v12474_v54 = vld [vmem:[#allocation114_spill] sm:$0xff]  ;;  %v12493_v60 = vld [vmem:[#allocation68_spill] sm:$0xff] }
 0x755   : > { %v6648_v17 = vpop.eup %6647  ;;  %v3498_v47 = vadd.f32 1.0, %v6646_v21  ;;  %v3428_v2 = vmul.f32 1.442695, %v3359_v44  ;;  %6673 = vrsqrt.f32 %v2757_v46  ;;  %v3022_v46 = vadd.f32 1e-05, %v2998_v18 }
 0x756   : > { %v6650_v5 = vpop.eup %6649  ;;  %v3500_v24 = vadd.f32 1.0, %v6648_v17  ;;  %v3432_v42 = vmul.f32 1.442695, %v3361_v39  ;;  %6675 = vrsqrt.f32 %v3285_v20  ;;  %v9432_v22 = vpop.xlane.xlu0 %2708  ;;  %v2471_v21 = vmul.f32 0.0078125, %v2445_v11 }
 0x757   : > { %v6652_v0 = vpop.eup %6651  ;;  %6677 = vrcp.f32 %v3498_v47  ;;  %v2540_v29 = vmul.f32 %v6650_v5, %v9003_v38  ;;  %v9435_v43 = vpop.xlane.xlu1 %3236 }
 0x758   : > { %v9437_v63 = vpop.eup %6653  ;;  %6679 = vrcp.f32 %v3500_v24  ;;  %v3068_v45 = vmul.f32 %v6652_v0, %v9006_v27  ;;  %v2758_v24 = vadd.f32 1e-05, %v2734_v32 }
 0x759   : > { %v9440_v44 = vpop.eup %6655  ;;  %6681 = vpow2.f32 %v3428_v2  ;;  %v3362_v20 = vsub.f32 0.0, %v2540_v29  ;;  %v3286_v2 = vadd.f32 1e-05, %v3262_v62 }
 0x75a   : > { %v9442_v39 = vpop.eup %6657  ;;  %6683 = vpow2.f32 %v3432_v42  ;;  %v3364_v38 = vsub.f32 0.0, %v3068_v45  ;;  %v9444_v59 = vpop.xlane.xlu0 %2446  ;;  %v2495_v42 = vadd.f32 1e-05, %v2471_v21  ;;  %v3023_v45 = vadd.f32 1e-05, %v2999_v35 }
 0x75b   : > { %v9446_v17 = vpop.eup %6659  ;;  %v3434_v47 = vmul.f32 1.442695, %v3362_v20  ;;  %6685 = vrsqrt.f32 %v2494_v31  ;;  %v9448_v27 = vpop.xlane.xlu1 %2974  ;;  %v12475_v20 = vld [vmem:[#allocation115_spill] sm:$0xff] }
 0x75c   : > { %v6662_v8 = vpop.eup %6661  ;;  %v3438_v18 = vmul.f32 1.442695, %v3364_v38  ;;  %6687 = vrsqrt.f32 %v3022_v46 }
 0x75d   : > { %v6664_v5 = vpop.eup %6663  ;;  %6689 = vpow2.f32 %v3434_v47  ;;  %v2804_v11 = vmul.f32 %v6662_v8, %v9013_v19  ;;  %v12476_v47 = vld [vmem:[#allocation116_spill] sm:$0xff] }
 0x75e   : > { %v6666_v0 = vpop.eup %6665  ;;  %6691 = vpow2.f32 %v3438_v18  ;;  %v3332_v29 = vmul.f32 %v6664_v5, %v12474_v54  ;;  %v9452_v28 = vpop.xlane.xlu0 %2710 }
 0x75f   : > { %v6668_v31 = vpop.eup %6667  ;;  %v3363_v32 = vsub.f32 0.0, %v2804_v11  ;;  %v2541_v7 = vmul.f32 %v6666_v0, %v12475_v20  ;;  %6693 = vrsqrt.f32 %v2758_v24  ;;  %v9455_v38 = vpop.xlane.xlu1 %3238  ;;  %v12477_v20 = vld [vmem:[#allocation117_spill] sm:$0xff] }
 0x760   : > { %v6670_v46 = vpop.eup %6669  ;;  %v3365_v62 = vsub.f32 0.0, %v3332_v29  ;;  %v3069_v36 = vmul.f32 %v6668_v31, %v12476_v47  ;;  %6695 = vrsqrt.f32 %v3286_v2  ;;  %v2735_v31 = vmul.f32 0.0078125, %v9432_v22  ;;  %v12479_v22 = vld [vmem:[#allocation96_spill] sm:$0xff] }
 0x761   : > { %v6672_v19 = vpop.eup %6671  ;;  %v3502_v21 = vadd.f32 1.0, %v6670_v46  ;;  %v3436_v8 = vmul.f32 1.442695, %v3363_v32  ;;  %v3366_v18 = vsub.f32 0.0, %v2541_v7  ;;  %6697 = vrsqrt.f32 %v2495_v42  ;;  %v12478_v42 = vld [vmem:[#allocation118_spill] sm:$0xff] }
 0x762   : > { %v6674_v35 = vpop.eup %6673  ;;  %v3504_v5 = vadd.f32 1.0, %v6672_v19  ;;  %v3440_v54 = vmul.f32 1.442695, %v3365_v62  ;;  %v3368_v12 = vsub.f32 0.0, %v3069_v36  ;;  %6699 = vrsqrt.f32 %v3023_v45  ;;  %v9458_v11 = vpop.xlane.xlu0 %2448 }
 0x763   : > { %v6676_v24 = vpop.eup %6675  ;;  %6701 = vrcp.f32 %v3502_v21  ;;  %v3442_v0 = vmul.f32 1.442695, %v3366_v18  ;;  %v2805_v29 = vmul.f32 %v6674_v35, %v12477_v20  ;;  %v9462_v2 = vpop.xlane.xlu1 %2976  ;;  %v3263_v36 = vmul.f32 0.0078125, %v9435_v43 }
 0x764   : > { %v9464_v46 = vpop.eup %6677  ;;  %6703 = vrcp.f32 %v3504_v5  ;;  %v3446_v7 = vmul.f32 1.442695, %v3368_v12  ;;  %v3333_v32 = vmul.f32 %v6676_v24, %v12478_v42  ;;  %v9476_v18 = vmul.f32 %v9330_v52, %v12479_v22  ;;  %v12481_v24 = vld [vmem:[#allocation97_spill] sm:$0xff]  ;;  %v12483_v42 = vld [vmem:[#allocation98_spill] sm:$0xff]  ;;  %v12484_v22 = vld [vmem:[#allocation119_spill] sm:$0xff] }
 0x765   : > { %v9468_v45 = vpop.eup %6679  ;;  %6705 = vpow2.f32 %v3436_v8  ;;  %v3367_v62 = vsub.f32 0.0, %v2805_v29  ;;  %v2759_v5 = vadd.f32 1e-05, %v2735_v31  ;;  %v9484_v8 = vmul.f32 %v9338_v6, %v12481_v24  ;;  %v12486_v24 = vld [vmem:[#allocation64_spill] sm:$0xff] }
 0x766   : > { %v9470_v47 = vpop.eup %6681  ;;  %6707 = vpow2.f32 %v3440_v54  ;;  %v3369_v19 = vsub.f32 0.0, %v3333_v32  ;;  %v9472_v21 = vpop.xlane.xlu0 %2712  ;;  %12480 = vst [vmem:[#allocation63_spill] sm:$0xff] %v9476_v18  ;;  %v3287_v29 = vadd.f32 1e-05, %v3263_v36  ;;  %v9488_v32 = vmul.f32 %v9341_v55, %v12483_v42  ;;  %v12487_v55 = vld [vmem:[#allocation100_spill] sm:$0xff] }
 0x767   : > { %v9478_v35 = vpop.eup %6683  ;;  %6709 = vpow2.f32 %v3442_v0  ;;  %v3444_v12 = vmul.f32 1.442695, %v3367_v62  ;;  %v9480_v43 = vpop.xlane.xlu1 %3240  ;;  %12482 = vst [vmem:[#allocation35_spill] sm:$0xff] %v9484_v8  ;;  %v2472_v31 = vmul.f32 0.0078125, %v9444_v59  ;;  %v12485_v62 = vld [vmem:[#allocation99_spill] sm:$0xff]  ;;  %v3000_v36 = vmul.f32 0.0078125, %v9448_v27 }
 0x768   : > { %v6686_v20 = vpop.eup %6685  ;;  %6711 = vpow2.f32 %v3446_v7  ;;  %v3448_v54 = vmul.f32 1.442695, %v3369_v19  ;;  %v9494_v18 = vmul.f32 %v9344_v25, %v12485_v62  ;;  %v9502_v42 = vmul.f32 %v9348_v23, %v12487_v55  ;;  %v12489_v25 = vld [vmem:[#allocation101_spill] sm:$0xff]  ;;  %v12491_v27 = vld [vmem:[#allocation102_spill] sm:$0xff] }
 0x769   : > { %v6688_v52 = vpop.eup %6687  ;;  %6713 = vpow2.f32 %v3444_v12  ;;  %v2542_v0 = vmul.f32 %v6686_v20, %v12484_v22  ;;  %v9508_v62 = vmul.f32 %v9352_v50, %v12489_v25  ;;  %v9512_v8 = vmul.f32 %v9355_v53, %v12491_v27 }
 0x76a   : > { %v6690_v6 = vpop.eup %6689  ;;  %6715 = vpow2.f32 %v3448_v54  ;;  %v3070_v7 = vmul.f32 %v6688_v52, %v12486_v24  ;;  %v9498_v19 = vpop.xlane.xlu0 %2416  ;;  %12488 = vst [vmem:[#allocation60_spill] sm:$0xff] %v9502_v42  ;;  %v3024_v25 = vadd.f32 1e-05, %v3000_v36  ;;  %v12497_v36 = vld [vmem:[#allocation104_spill] sm:$0xff] }
 0x76b   : > { %v6692_v12 = vpop.eup %6691  ;;  %v3506_v20 = vadd.f32 1.0, %v6690_v6  ;;  %v3370_v22 = vsub.f32 0.0, %v2542_v0  ;;  %6717 = vrsqrt.f32 %v2759_v5  ;;  %v9504_v59 = vpop.xlane.xlu1 %2944  ;;  %12490 = vst [vmem:[#allocation32_spill] sm:$0xff] %v9508_v62  ;;  %v12492_v6 = vld [vmem:[#allocation66_spill] sm:$0xff]  ;;  %v2496_v5 = vadd.f32 1e-05, %v2472_v31 }
 0x76c   : > { %v6694_v54 = vpop.eup %6693  ;;  %v3508_v52 = vadd.f32 1.0, %v6692_v12  ;;  %v3372_v24 = vsub.f32 0.0, %v3070_v7  ;;  %6719 = vrsqrt.f32 %v3287_v29  ;;  %v12494_v12 = vld [vmem:[#allocation70_spill] sm:$0xff] }
 0x76d   : > { %v6696_v23 = vpop.eup %6695  ;;  %6721 = vrcp.f32 %v3506_v20  ;;  %v3450_v55 = vmul.f32 1.442695, %v3370_v22  ;;  %v2806_v0 = vmul.f32 %v6694_v54, %v12492_v6  ;;  %v12495_v20 = vld [vmem:[#allocation103_spill] sm:$0xff]  ;;  %v2736_v6 = vmul.f32 0.0078125, %v9452_v28 }
 0x76e   : > { %v6698_v42 = vpop.eup %6697  ;;  %6723 = vrcp.f32 %v3508_v52  ;;  %v3454_v14 = vmul.f32 1.442695, %v3372_v24  ;;  %v3334_v50 = vmul.f32 %v6696_v23, %v12493_v60  ;;  %v9516_v62 = vpop.xlane.xlu0 %2678  ;;  %v9523_v22 = vmul.f32 %v9358_v13, %v12495_v20  ;;  %v12496_v52 = vld [vmem:[#allocation72_spill] sm:$0xff] }
 0x76f   : > { %v6700_v7 = vpop.eup %6699  ;;  %6725 = vpow2.f32 %v3450_v55  ;;  %v3371_v29 = vsub.f32 0.0, %v2806_v0  ;;  %v2543_v53 = vmul.f32 %v6698_v42, %v12494_v12  ;;  %v9519_v27 = vpop.xlane.xlu1 %3206  ;;  %v9530_v24 = vmul.f32 %v9361_v57, %v12497_v36 }
 0x770   : > { %v9525_v31 = vpop.eup %6701  ;;  %6727 = vpow2.f32 %v3454_v14  ;;  %v3373_v54 = vsub.f32 0.0, %v3334_v50  ;;  %v3071_v60 = vmul.f32 %v6700_v7, %v12496_v52  ;;  %v3264_v14 = vmul.f32 0.0078125, %v9455_v38  ;;  %v12501_v38 = vld [vmem:[#allocation106_spill] sm:$0xff] }
 0x771   : > { %12498 = vst [vmem:[#allocation61_spill] sm:$0xff] %v9530_v24  ;;  %v9532_v23 = vpop.eup %6703  ;;  %v3452_v55 = vmul.f32 1.442695, %v3371_v29  ;;  %v3374_v42 = vsub.f32 0.0, %v2543_v53  ;;  %6729 = vrsqrt.f32 %v2496_v5  ;;  %v2473_v20 = vmul.f32 0.0078125, %v9458_v11  ;;  %v12499_v5 = vld [vmem:[#allocation105_spill] sm:$0xff] }
 0x772   : > { %v9535_v0 = vpop.eup %6705  ;;  %v3456_v13 = vmul.f32 1.442695, %v3373_v54  ;;  %v3376_v12 = vsub.f32 0.0, %v3071_v60  ;;  %6731 = vrsqrt.f32 %v3024_v25  ;;  %v9538_v50 = vpop.xlane.xlu0 %2414  ;;  %v9547_v28 = vmul.f32 %v9364_v30, %v12499_v5 }
 0x773   : > { %v9540_v7 = vpop.eup %6707  ;;  %6733 = vpow2.f32 %v3452_v55  ;;  %v3458_v57 = vmul.f32 1.442695, %v3374_v42  ;;  %v9543_v29 = vpop.xlane.xlu1 %2942  ;;  %v3001_v25 = vmul.f32 0.0078125, %v9462_v2  ;;  %v9552_v52 = vmul.f32 %v9367_v49, %v12501_v38 }
 0x774   : > { %12500 = vst [vmem:[#allocation33_spill] sm:$0xff] %v9547_v28  ;;  %v6710_v53 = vpop.eup %6709  ;;  %6735 = vpow2.f32 %v3456_v13  ;;  %v3462_v54 = vmul.f32 1.442695, %v3376_v12  ;;  %v2760_v55 = vadd.f32 1e-05, %v2736_v6  ;;  %v2737_v11 = vmul.f32 0.0078125, %v9472_v21 }
 0x775   : > { %v6712_v60 = vpop.eup %6711  ;;  %v3510_v36 = vadd.f32 1.0, %v6710_v53  ;;  %6737 = vpow2.f32 %v3458_v57  ;;  %v3288_v30 = vadd.f32 1e-05, %v3264_v14  ;;  %v3265_v13 = vmul.f32 0.0078125, %v9480_v43  ;;  %v12502_v53 = vld [vmem:[#allocation108_spill] sm:$0xff]  ;;  %v12504_v21 = vld [vmem:[#allocation107_spill] sm:$0xff] }
 0x776   : > { %v9555_v42 = vpop.eup %6713  ;;  %v3512_v24 = vadd.f32 1.0, %v6712_v60  ;;  %6739 = vpow2.f32 %v3462_v54  ;;  %v9558_v12 = vpop.xlane.xlu0 %2676  ;;  %v2497_v49 = vadd.f32 1e-05, %v2473_v20  ;;  %v9566_v6 = vmul.f32 %v9373_v41, %v12502_v53  ;;  %v12505_v43 = vld [vmem:[#allocation110_spill] sm:$0xff]  ;;  %v12506_v60 = vld [vmem:[#allocation109_spill] sm:$0xff]  ;;  %v12509_v53 = vld [vmem:[#allocation111_spill] sm:$0xff] }
 0x777   : > { %v9560_v2 = vpop.eup %6715  ;;  %6741 = vrcp.f32 %v3510_v36  ;;  %v9562_v5 = vpop.xlane.xlu1 %3204  ;;  %v9570_v57 = vmul.f32 %v9370_v61, %v12504_v21  ;;  %v3025_v14 = vadd.f32 1e-05, %v3001_v25  ;;  %v9574_v38 = vmul.f32 %v9379_v26, %v12505_v43  ;;  %v12508_v28 = vld [vmem:[#allocation74_spill] sm:$0xff] }
 0x778   : > { %12503 = vst [vmem:[#allocation58_spill] sm:$0xff] %v9566_v6  ;;  %v6718_v54 = vpop.eup %6717  ;;  %6743 = vrcp.f32 %v3512_v24  ;;  %v9578_v20 = vmul.f32 %v9376_v4, %v12506_v60  ;;  %v2761_v41 = vadd.f32 1e-05, %v2737_v11  ;;  %v9583_v61 = vmul.f32 %v9382_v10, %v12509_v53  ;;  %v12510_v24 = vld [vmem:[#allocation76_spill] sm:$0xff]  ;;  %v12513_v11 = vld [vmem:[#allocation113_spill] sm:$0xff] }
 0x779   : > { %v6720_v36 = vpop.eup %6719  ;;  %v2807_v40 = vmul.f32 %v6718_v54, %v12508_v28  ;;  %6745 = vrsqrt.f32 %v2760_v55  ;;  %v3289_v26 = vadd.f32 1e-05, %v3265_v13  ;;  %v12511_v6 = vld [vmem:[#allocation112_spill] sm:$0xff]  ;;  %v2457_v55 = vmul.f32 0.0078125, %v9498_v19 }
 0x77a   : > { %12507 = vst [vmem:[#allocation59_spill] sm:$0xff] %v9578_v20  ;;  %v9585_v21 = vpop.eup %6721  ;;  %v3335_v25 = vmul.f32 %v6720_v36, %v12510_v24  ;;  %6747 = vrsqrt.f32 %v3288_v30  ;;  %v9588_v43 = vpop.xlane.xlu0 %2412  ;;  %v9592_v4 = vmul.f32 %v9385_v51, %v12511_v6  ;;  %v9601_v54 = vmul.f32 %v9388_v56, %v12513_v11 }
 0x77b   : > { %v9594_v60 = vpop.eup %6723  ;;  %v3375_v28 = vsub.f32 0.0, %v2807_v40  ;;  %6749 = vrsqrt.f32 %v2497_v49  ;;  %v9597_v10 = vpop.xlane.xlu1 %2940  ;;  %v2985_v36 = vmul.f32 0.0078125, %v9504_v59  ;;  %v9605_v51 = vadd.f32 1.0, %v9399_v48  ;;  %v12518_v48 = vld [vmem:[#allocation78_spill] sm:$0xff] }
 0x77c   : > { %12512 = vst [vmem:[#allocation30_spill] sm:$0xff] %v9592_v4  ;;  %12514 = vst [vmem:[#allocation31_spill] sm:$0xff] %v9601_v54  ;;  %v6726_v30 = vpop.eup %6725  ;;  %v3377_v13 = vsub.f32 0.0, %v3335_v25  ;;  %6751 = vrsqrt.f32 %v3025_v14  ;;  %v9608_v19 = vadd.f32 1.0, %v9391_v3  ;;  %v9613_v14 = vadd.f32 1.0, %v9394_v1  ;;  %v12537_v4 = vld [vmem:[#allocation92_spill] sm:$0xff] }
 0x77d   : > { %12515 = vst [vmem:[#allocation52_spill] sm:$0xff] %v9605_v51  ;;  %v6728_v6 = vpop.eup %6727  ;;  %v3514_v53 = vadd.f32 1.0, %v6726_v30  ;;  %v3460_v40 = vmul.f32 1.442695, %v3375_v28  ;;  %6753 = vrsqrt.f32 %v2761_v41  ;;  %v2481_v11 = vadd.f32 1e-05, %v2457_v55 }
 0x77e   : > { %12516 = vst [vmem:[#allocation53_spill] sm:$0xff] %v9608_v19  ;;  %v6730_v49 = vpop.eup %6729  ;;  %v3516_v24 = vadd.f32 1.0, %v6728_v6  ;;  %v3464_v20 = vmul.f32 1.442695, %v3377_v13  ;;  %6755 = vrsqrt.f32 %v3289_v26  ;;  %v9610_v56 = vpop.xlane.xlu0 %2674  ;;  %12517 = vst [vmem:[#allocation56_spill] sm:$0xff] %v9613_v14  ;;  %v9619_v41 = vadd.f32 1.0, %v9411_v15 }
 0x77f   : > { %v6732_v59 = vpop.eup %6731  ;;  %6757 = vrcp.f32 %v3514_v53  ;;  %v2544_v25 = vmul.f32 %v6730_v49, %v12518_v48  ;;  %v9616_v30 = vpop.xlane.xlu1 %3202  ;;  %v12520_v28 = vld [vmem:[#allocation80_spill] sm:$0xff]  ;;  %v3009_v13 = vadd.f32 1e-05, %v2985_v36  ;;  %v9625_v6 = vadd.f32 1.0, %v9402_v16  ;;  %v12531_v51 = vld [vmem:[#allocation86_spill] sm:$0xff] }
 0x780   : > { %12519 = vst [vmem:[#allocation57_spill] sm:$0xff] %v9619_v41  ;;  %v9621_v3 = vpop.eup %6733  ;;  %6759 = vrcp.f32 %v3516_v24  ;;  %v3072_v26 = vmul.f32 %v6732_v59, %v12520_v28  ;;  %v2720_v55 = vmul.f32 0.0078125, %v9516_v62  ;;  %v9631_v49 = vadd.f32 1.0, %v9421_v33 }
 0x781   : > { %12521 = vst [vmem:[#allocation28_spill] sm:$0xff] %v9625_v6  ;;  %v9627_v1 = vpop.eup %6735  ;;  %6761 = vpow2.f32 %v3460_v40  ;;  %v3378_v53 = vsub.f32 0.0, %v2544_v25  ;;  %v3248_v24 = vmul.f32 0.0078125, %v9519_v27  ;;  %v9637_v36 = vadd.f32 1.0, %v9424_v9 }
 0x782   : > { %12522 = vst [vmem:[#allocation29_spill] sm:$0xff] %v9631_v49  ;;  %v6738_v15 = vpop.eup %6737  ;;  %6763 = vpow2.f32 %v3464_v20  ;;  %v3380_v48 = vsub.f32 0.0, %v3072_v26  ;;  %v9634_v14 = vpop.xlane.xlu0 %2410  ;;  %v2456_v40 = vmul.f32 0.0078125, %v9538_v50  ;;  %v2984_v27 = vmul.f32 0.0078125, %v9543_v29 }
 0x783   : > { %12523 = vst [vmem:[#allocation54_spill] sm:$0xff] %v9637_v36  ;;  %v6740_v16 = vpop.eup %6739  ;;  %v3518_v59 = vadd.f32 1.0, %v6738_v15  ;;  %v3466_v28 = vmul.f32 1.442695, %v3378_v53  ;;  %6765 = vrsqrt.f32 %v2481_v11  ;;  %v9640_v62 = vpop.xlane.xlu1 %2938  ;;  %v2744_v9 = vadd.f32 1e-05, %v2720_v55 }
 0x784   : > { %v9642_v33 = vpop.eup %6741  ;;  %v3520_v25 = vadd.f32 1.0, %v6740_v16  ;;  %v3470_v20 = vmul.f32 1.442695, %v3380_v48  ;;  %6767 = vrsqrt.f32 %v3009_v13  ;;  %v9648_v6 = vadd.f32 1.0, %v9437_v63  ;;  %v12528_v55 = vld [vmem:[#allocation82_spill] sm:$0xff] }
 0x785   : > { %v9645_v26 = vpop.eup %6743  ;;  %6769 = vrcp.f32 %v3518_v59  ;;  %v9651_v11 = vadd.f32 1.0, %v9414_v37  ;;  %v3272_v53 = vadd.f32 1e-05, %v3248_v24  ;;  %v9656_v48 = vadd.f32 1.0, %v9470_v47  ;;  %v12530_v24 = vld [vmem:[#allocation84_spill] sm:$0xff] }
 0x786   : > { %12524 = vst [vmem:[#allocation55_spill] sm:$0xff] %v9648_v6  ;;  %v6746_v50 = vpop.eup %6745  ;;  %6771 = vrcp.f32 %v3520_v25  ;;  %v9653_v15 = vpop.xlane.xlu0 %2672  ;;  %v9659_v29 = vadd.f32 1.0, %v9440_v44  ;;  %v2480_v63 = vadd.f32 1e-05, %v2456_v40  ;;  %v9665_v37 = vadd.f32 1.0, %v9478_v35 }
 0x787   : > { %12525 = vst [vmem:[#allocation26_spill] sm:$0xff] %v9651_v11  ;;  %12526 = vst [vmem:[#allocation27_spill] sm:$0xff] %v9656_v48  ;;  %v6748_v13 = vpop.eup %6747  ;;  %6773 = vpow2.f32 %v3466_v28  ;;  %v2808_v16 = vmul.f32 %v6746_v50, %v12528_v55  ;;  %v9662_v59 = vpop.xlane.xlu1 %3200  ;;  %v3008_v19 = vadd.f32 1e-05, %v2984_v27  ;;  %v2719_v47 = vmul.f32 0.0078125, %v9558_v12  ;;  %v12532_v55 = vld [vmem:[#allocation88_spill] sm:$0xff] }
 0x788   : > { %12527 = vst [vmem:[#allocation24_spill] sm:$0xff] %v9659_v29  ;;  %12529 = vst [vmem:[#allocation25_spill] sm:$0xff] %v9665_v37  ;;  %v6750_v25 = vpop.eup %6749  ;;  %6775 = vpow2.f32 %v3470_v20  ;;  %v3336_v11 = vmul.f32 %v6748_v13, %v12530_v24  ;;  %v3247_v28 = vmul.f32 0.0078125, %v9562_v5  ;;  %v2455_v35 = vmul.f32 0.0078125, %v9588_v43  ;;  %v12533_v24 = vld [vmem:[#allocation95_spill] sm:$0xff]  ;;  %v12534_v5 = vld [vmem:[#allocation90_spill] sm:$0xff] }
 0x789   : > { %v6752_v36 = vpop.eup %6751  ;;  %v3379_v44 = vsub.f32 0.0, %v2808_v16  ;;  %v2545_v29 = vmul.f32 %v6750_v25, %v12531_v51  ;;  %6777 = vrsqrt.f32 %v2744_v9  ;;  %v12551_v48 = vld [vmem:[#allocation49_spill] sm:$0xff] }
 0x78a   : > { %v6754_v40 = vpop.eup %6753  ;;  %v3381_v50 = vsub.f32 0.0, %v3336_v11  ;;  %v3073_v54 = vmul.f32 %v6752_v36, %v12532_v55  ;;  %6779 = vrsqrt.f32 %v3272_v53  ;;  %v2409_v20 = vpop.xlane.xlu0 %2408  ;;  %v2983_v53 = vmul.f32 0.0078125, %v9597_v10 }
 0x78b   : > { %v6756_v41 = vpop.eup %6755  ;;  %v3468_v13 = vmul.f32 1.442695, %v3379_v44  ;;  %v3382_v27 = vsub.f32 0.0, %v2545_v29  ;;  %v2809_v12 = vmul.f32 %v6754_v40, %v12533_v24  ;;  %6781 = vrsqrt.f32 %v2480_v63  ;;  %v2937_v16 = vpop.xlane.xlu1 %2936 }
 0x78c   : > { %v9674_v37 = vpop.eup %6757  ;;  %v3472_v51 = vmul.f32 1.442695, %v3381_v50  ;;  %v3384_v9 = vsub.f32 0.0, %v3073_v54  ;;  %v3337_v25 = vmul.f32 %v6756_v41, %v12534_v5  ;;  %6783 = vrsqrt.f32 %v3008_v19 }
 0x78d   : > { %v9677_v11 = vpop.eup %6759  ;;  %6785 = vpow2.f32 %v3468_v13  ;;  %v3474_v36 = vmul.f32 1.442695, %v3382_v27  ;;  %v3383_v43 = vsub.f32 0.0, %v2809_v12  ;;  %v2718_v40 = vmul.f32 0.0078125, %v9610_v56 }
 0x78e   : > { %v9680_v44 = vpop.eup %6761  ;;  %6787 = vpow2.f32 %v3472_v51  ;;  %v3478_v29 = vmul.f32 1.442695, %v3384_v9  ;;  %v3385_v63 = vsub.f32 0.0, %v3337_v25  ;;  %v2671_v55 = vpop.xlane.xlu0 %2670  ;;  %v2743_v19 = vadd.f32 1e-05, %v2719_v47 }
 0x78f   : > { %v9683_v50 = vpop.eup %6763  ;;  %6789 = vpow2.f32 %v3474_v36  ;;  %v3476_v54 = vmul.f32 1.442695, %v3383_v43  ;;  %v3199_v41 = vpop.xlane.xlu1 %3198  ;;  %v9686_v13 = vadd.f32 1.0, %v9535_v0  ;;  %v3271_v24 = vadd.f32 1e-05, %v3247_v28 }
 0x790   : > { %v6766_v27 = vpop.eup %6765  ;;  %6791 = vpow2.f32 %v3478_v29  ;;  %v3480_v10 = vmul.f32 1.442695, %v3385_v63  ;;  %v3246_v12 = vmul.f32 0.0078125, %v9616_v30  ;;  %v2479_v56 = vadd.f32 1e-05, %v2455_v35 }
 0x791   : > { %v9689_v51 = vpop.eup %6767  ;;  %6793 = vpow2.f32 %v3476_v54  ;;  %v9692_v9 = vadd.f32 1.0, %v9555_v42  ;;  %v9695_v5 = vadd.f32 1.0, %v9540_v7  ;;  %v3007_v0 = vadd.f32 1e-05, %v2983_v53 }
 0x792   : > { %v6770_v47 = vpop.eup %6769  ;;  %6795 = vpow2.f32 %v3480_v10  ;;  %v2742_v25 = vadd.f32 1e-05, %v2718_v40  ;;  %v2407_v36 = vpop.xlane.xlu0 %2406  ;;  %v9698_v43 = vadd.f32 1.0, %v9560_v2  ;;  %v2454_v30 = vmul.f32 0.0078125, %v9634_v14 }
 0x793   : > { %12535 = vst [vmem:[#allocation22_spill] sm:$0xff] %v9695_v5  ;;  %v6772_v28 = vpop.eup %6771  ;;  %6797 = vrsqrt.f32 %v2743_v19  ;;  %v2982_v35 = vmul.f32 0.0078125, %v9640_v62  ;;  %v2935_v29 = vpop.xlane.xlu1 %2934  ;;  %v9703_v42 = vadd.f32 1.0, %v9621_v3  ;;  %v3270_v63 = vadd.f32 1e-05, %v3246_v12 }
 0x794   : > { %12536 = vst [vmem:[#allocation23_spill] sm:$0xff] %v9698_v43  ;;  %v6774_v7 = vpop.eup %6773  ;;  %6799 = vrsqrt.f32 %v3271_v24  ;;  %v2717_v53 = vmul.f32 0.0078125, %v9653_v15  ;;  %v9707_v40 = vadd.f32 1.0, %v9627_v1  ;;  %v3245_v19 = vmul.f32 0.0078125, %v9662_v59 }
 0x795   : > { %v6776_v2 = vpop.eup %6775  ;;  %v3522_v54 = vadd.f32 1.0, %v6774_v7  ;;  %6801 = vrsqrt.f32 %v2479_v56  ;;  %v2453_v14 = vmul.f32 0.0078125, %v2409_v20  ;;  %v2981_v3 = vmul.f32 0.0078125, %v2937_v16 }
 0x796   : > { %v9710_v10 = vpop.eup %6777  ;;  %v3524_v62 = vadd.f32 1.0, %v6776_v2  ;;  %6803 = vrsqrt.f32 %v3007_v0  ;;  %v2716_v49 = vmul.f32 0.0078125, %v2671_v55  ;;  %v2669_v5 = vpop.xlane.xlu0 %2668  ;;  %v2478_v15 = vadd.f32 1e-05, %v2454_v30 }
 0x797   : > { %v9712_v24 = vpop.eup %6779  ;;  %6805 = vrcp.f32 %v3522_v54  ;;  %v3006_v12 = vadd.f32 1e-05, %v2982_v35  ;;  %v3197_v1 = vpop.xlane.xlu1 %3196  ;;  %v3658_v7 = vmul.f32 %v9674_v37, %v9488_v32  ;;  %v3244_v59 = vmul.f32 0.0078125, %v3199_v41 }
 0x798   : > { %v6782_v56 = vpop.eup %6781  ;;  %6807 = vrcp.f32 %v3524_v62  ;;  %v3662_v20 = vmul.f32 %v6770_v47, %v9512_v8  ;;  %v2529_v2 = vmul.f32 %v6766_v27, %v12537_v4  ;;  %v2741_v16 = vadd.f32 1e-05, %v2717_v53  ;;  %v12538_v27 = vld [vmem:[#allocation8_spill] sm:$0xff] }
 0x799   : > { %v9718_v0 = vpop.eup %6783  ;;  %6809 = vrsqrt.f32 %v2742_v25  ;;  %v3269_v55 = vadd.f32 1e-05, %v3245_v19  ;;  %v2477_v6 = vadd.f32 1e-05, %v2453_v14  ;;  %v3005_v30 = vadd.f32 1e-05, %v2981_v3 }
 0x79a   : > { %v9720_v54 = vpop.eup %6785  ;;  %6811 = vrsqrt.f32 %v3270_v63  ;;  %v2740_v35 = vadd.f32 1e-05, %v2716_v49  ;;  %v2452_v43 = vmul.f32 0.0078125, %v2407_v36  ;;  %v2405_v32 = vpop.xlane.xlu0 %2404  ;;  %v2980_v41 = vmul.f32 0.0078125, %v2935_v29  ;;  %v12539_v19 = vld [vmem:[#allocation19_spill] sm:$0xff] }
 0x79b   : > { %v9722_v37 = vpop.eup %6787  ;;  %6813 = vrsqrt.f32 %v2478_v15  ;;  %v2933_v8 = vpop.xlane.xlu1 %2932  ;;  %v9725_v4 = vadd.f32 1.0, %v9680_v44  ;;  %v3706_v47 = vadd.f32 %v3658_v7, %v12538_v27  ;;  %v3268_v53 = vadd.f32 1e-05, %v3244_v59 }
 0x79c   : > { %v6790_v25 = vpop.eup %6789  ;;  %6815 = vrsqrt.f32 %v3006_v12  ;;  %v3710_v14 = vadd.f32 %v3662_v20, %v12539_v19  ;;  %v3654_v63 = vmul.f32 %v9642_v33, %v2529_v2  ;;  %v9731_v62 = vadd.f32 1.0, %v9683_v50 }
 0x79d   : > { %v6792_v49 = vpop.eup %6791  ;;  %v3526_v36 = vadd.f32 1.0, %v6790_v25  ;;  %6817 = vrsqrt.f32 %v2741_v16  ;;  %v3664_v29 = vmul.f32 %v6772_v28, %v9523_v22  ;;  %v2476_v15 = vadd.f32 1e-05, %v2452_v43  ;;  %v12541_v16 = vld [vmem:[#allocation51_spill] sm:$0xff] }
 0x79e   : > { %v9734_v3 = vpop.eup %6793  ;;  %v3528_v44 = vadd.f32 1.0, %v6792_v49  ;;  %6819 = vrsqrt.f32 %v3269_v55  ;;  %v2715_v7 = vmul.f32 0.0078125, %v2669_v5  ;;  %v2667_v12 = vpop.xlane.xlu0 %2666  ;;  %v3004_v20 = vadd.f32 1e-05, %v2980_v41  ;;  %v12543_v49 = vld [vmem:[#allocation10_spill] sm:$0xff] }
 0x79f   : > { %v9736_v59 = vpop.eup %6795  ;;  %6821 = vrcp.f32 %v3526_v36  ;;  %v3195_v33 = vpop.xlane.xlu1 %3194  ;;  %v9738_v2 = vmul.f32 0.70710677, %v3706_v47  ;;  %v2528_v25 = vmul.f32 %v6782_v56, %v12541_v16  ;;  %v3243_v22 = vmul.f32 0.0078125, %v3197_v1  ;;  %v12545_v41 = vld [vmem:[#allocation50_spill] sm:$0xff] }
 0x7a0   : > { %v9741_v50 = vpop.eup %6797  ;;  %6823 = vrcp.f32 %v3528_v44  ;;  %v9743_v28 = vmul.f32 0.70710677, %v3710_v14  ;;  %v3702_v55 = vadd.f32 %v3654_v63, %v12543_v49  ;;  %v2451_v5 = vmul.f32 0.0078125, %v2405_v32  ;;  %v12547_v32 = vld [vmem:[#allocation93_spill] sm:$0xff] }
 0x7a1   : > { %12540 = vst [vmem:[#allocation114_spill] sm:$0xff] %v9738_v2  ;;  %v9746_v43 = vpop.eup %6799  ;;  %6825 = vrsqrt.f32 %v2477_v6  ;;  %v3712_v36 = vadd.f32 %v3664_v29, %v12544_v34  ;;  %v9751_v47 = vmul.f32 %v9710_v10, %v12545_v41  ;;  %v2739_v56 = vadd.f32 1e-05, %v2715_v7 }
 0x7a2   : > { %12542 = vst [vmem:[#allocation115_spill] sm:$0xff] %v9743_v28  ;;  %v6802_v2 = vpop.eup %6801  ;;  %6827 = vrsqrt.f32 %v3005_v30  ;;  %v2979_v16 = vmul.f32 0.0078125, %v2933_v8  ;;  %v2403_v44 = vpop.xlane.xlu0 %2402  ;;  %v3660_v1 = vmul.f32 %v9677_v11, %v9494_v18  ;;  %v2714_v63 = vmul.f32 0.0078125, %v2667_v12 }
 0x7a3   : > { %12546 = vst [vmem:[#allocation116_spill] sm:$0xff] %v9751_v47  ;;  %v9755_v14 = vpop.eup %6803  ;;  %6829 = vrsqrt.f32 %v2740_v35  ;;  %v3650_v6 = vmul.f32 %v9585_v21, %v2528_v25  ;;  %v3057_v29 = vmul.f32 %v9689_v51, %v12547_v32  ;;  %v3267_v10 = vadd.f32 1e-05, %v3243_v22  ;;  %v2931_v18 = vpop.xlane.xlu1 %2930  ;;  %v12550_v21 = vld [vmem:[#allocation21_spill] sm:$0xff] }
 0x7a4   : > { %v6806_v28 = vpop.eup %6805  ;;  %6831 = vrsqrt.f32 %v3268_v53  ;;  %v3242_v41 = vmul.f32 0.0078125, %v3195_v33  ;;  %v9760_v30 = vmul.f32 0.70710677, %v3702_v55  ;;  %v2475_v7 = vadd.f32 1e-05, %v2451_v5  ;;  %v12552_v33 = vld [vmem:[#allocation13_spill] sm:$0xff] }
 0x7a5   : > { %v6808_v8 = vpop.eup %6807  ;;  %6833 = vrsqrt.f32 %v2476_v15  ;;  %v2450_v47 = vmul.f32 0.0078125, %v2403_v44  ;;  %v9762_v11 = vmul.f32 0.70710677, %v3712_v36  ;;  %v3003_v12 = vadd.f32 1e-05, %v2979_v16  ;;  %v12553_v44 = vld [vmem:[#allocation89_spill] sm:$0xff] }
 0x7a6   : > { %12548 = vst [vmem:[#allocation117_spill] sm:$0xff] %v9760_v30  ;;  %v6810_v35 = vpop.eup %6809  ;;  %6835 = vrsqrt.f32 %v3004_v20  ;;  %v3708_v25 = vadd.f32 %v3660_v1, %v12550_v21  ;;  %v2527_v51 = vmul.f32 %v6802_v2, %v12551_v48  ;;  %v2738_v53 = vadd.f32 1e-05, %v2714_v63 }
 0x7a7   : > { %12549 = vst [vmem:[#allocation118_spill] sm:$0xff] %v9762_v11  ;;  %v9766_v32 = vpop.eup %6811  ;;  %6837 = vrsqrt.f32 %v2739_v56  ;;  %v3698_v22 = vadd.f32 %v3650_v6, %v12552_v33  ;;  %v3656_v15 = vmul.f32 %v9645_v26, %v3057_v29  ;;  %v3266_v5 = vadd.f32 1e-05, %v3242_v41 }
 0x7a8   : > { %v6814_v55 = vpop.eup %6813  ;;  %6839 = vrsqrt.f32 %v3267_v10  ;;  %v2978_v36 = vmul.f32 0.0078125, %v2931_v18  ;;  %v3056_v20 = vmul.f32 %v9718_v0, %v12553_v44  ;;  %v2474_v1 = vadd.f32 1e-05, %v2450_v47  ;;  %v12555_v47 = vld [vmem:[#allocation14_spill] sm:$0xff] }
 0x7a9   : > { %v6816_v16 = vpop.eup %6815  ;;  %6841 = vrsqrt.f32 %v2475_v7  ;;  %v3523_v48 = vadd.f32 1.0, %v9720_v54  ;;  %v3666_v2 = vmul.f32 %v6806_v28, %v9552_v52  ;;  %v3527_v63 = vadd.f32 1.0, %v9734_v3 }
 0x7aa   : > { %v6818_v56 = vpop.eup %6817  ;;  %6843 = vrsqrt.f32 %v3003_v12  ;;  %v3668_v26 = vmul.f32 %v6808_v8, %v9570_v57  ;;  %v3646_v6 = vmul.f32 %v9525_v31, %v2527_v51  ;;  %v3525_v0 = vadd.f32 1.0, %v9722_v37  ;;  %v12557_v8 = vld [vmem:[#allocation48_spill] sm:$0xff] }
 0x7ab   : > { %v9777_v29 = vpop.eup %6819  ;;  %6845 = vrsqrt.f32 %v2738_v53  ;;  %v9780_v10 = vmul.f32 0.70710677, %v3708_v25  ;;  %v3704_v41 = vadd.f32 %v3656_v15, %v12555_v47  ;;  %v3002_v52 = vadd.f32 1e-05, %v2978_v36  ;;  %v12558_v12 = vld [vmem:[#allocation16_spill] sm:$0xff]  ;;  %v12559_v53 = vld [vmem:[#allocation94_spill] sm:$0xff] }
 0x7ac   : > { %v6822_v54 = vpop.eup %6821  ;;  %6847 = vrsqrt.f32 %v3266_v5  ;;  %v9783_v28 = vmul.f32 0.70710677, %v3698_v22  ;;  %v3652_v3 = vmul.f32 %v9594_v60, %v3056_v20  ;;  %v3714_v31 = vadd.f32 %v3666_v2, %v12552_v33  ;;  %v12561_v5 = vld [vmem:[#allocation91_spill] sm:$0xff] }
 0x7ad   : > { %12554 = vst [vmem:[#allocation96_spill] sm:$0xff] %v9780_v10  ;;  %v6824_v7 = vpop.eup %6823  ;;  %6849 = vrsqrt.f32 %v2474_v1  ;;  %v3529_v57 = vadd.f32 1.0, %v9736_v59  ;;  %v9790_v37 = vmul.f32 %v9741_v50, %v12557_v8  ;;  %v3716_v25 = vadd.f32 %v3668_v26, %v12558_v12  ;;  %v12562_v50 = vld [vmem:[#allocation85_spill] sm:$0xff]  ;;  %v12563_v20 = vld [vmem:[#allocation47_spill] sm:$0xff] }
 0x7ae   : > { %12556 = vst [vmem:[#allocation97_spill] sm:$0xff] %v9783_v28  ;;  %v6826_v18 = vpop.eup %6825  ;;  %6851 = vrcp.f32 %v3527_v63  ;;  %v3694_v51 = vadd.f32 %v3646_v6, %v12539_v19  ;;  %v9796_v22 = vmul.f32 %v9712_v24, %v12559_v53  ;;  %v9798_v15 = vmul.f32 0.70710677, %v3704_v41  ;;  %v12564_v63 = vld [vmem:[#allocation81_spill] sm:$0xff] }
 0x7af   : > { %v6828_v60 = vpop.eup %6827  ;;  %6853 = vrcp.f32 %v3523_v48  ;;  %v9802_v59 = vmul.f32 %v9746_v43, %v12561_v5  ;;  %v3055_v36 = vmul.f32 %v9755_v14, %v12562_v50  ;;  %v2526_v1 = vmul.f32 %v6814_v55, %v12563_v20  ;;  %v12566_v43 = vld [vmem:[#allocation46_spill] sm:$0xff] }
 0x7b0   : > { %12560 = vst [vmem:[#allocation98_spill] sm:$0xff] %v9798_v15  ;;  %v6830_v44 = vpop.eup %6829  ;;  %6855 = vrsqrt.f32 %v3002_v52  ;;  %v3700_v2 = vadd.f32 %v3652_v3, %v12558_v12  ;;  %v3054_v24 = vmul.f32 %v6816_v16, %v12564_v63  ;;  %v3670_v48 = vmul.f32 %v6822_v54, %v9574_v38  ;;  %v12569_v16 = vld [vmem:[#allocation45_spill] sm:$0xff]  ;;  %v12578_v63 = vld [vmem:[#allocation42_spill] sm:$0xff] }
 0x7b1   : > { %v6832_v26 = vpop.eup %6831  ;;  %v9810_v6 = vmul.f32 0.70710677, %v3714_v31  ;;  %6857 = vrcp.f32 %v9725_v4  ;;  %v9814_v41 = vmul.f32 %v6810_v35, %v12566_v43  ;;  %v3672_v14 = vmul.f32 %v6824_v7, %v9583_v61  ;;  %v12570_v31 = vld [vmem:[#allocation77_spill] sm:$0xff] }
 0x7b2   : > { %v6834_v8 = vpop.eup %6833  ;;  %6859 = vrcp.f32 %v3529_v57  ;;  %v9817_v52 = vmul.f32 0.70710677, %v3716_v25  ;;  %v9819_v55 = vmul.f32 0.70710677, %v3694_v51  ;;  %v2525_v38 = vmul.f32 %v6826_v18, %v12569_v16  ;;  %v12573_v18 = vld [vmem:[#allocation43_spill] sm:$0xff] }
 0x7b3   : > { %12565 = vst [vmem:[#allocation119_spill] sm:$0xff] %v9810_v6  ;;  %v6836_v3 = vpop.eup %6835  ;;  %6861 = vrcp.f32 %v9703_v42  ;;  %v3648_v54 = vmul.f32 %v9532_v23, %v3055_v36  ;;  %v3053_v4 = vmul.f32 %v6828_v60, %v12570_v31  ;;  %v3642_v35 = vmul.f32 %v9464_v46, %v2526_v1  ;;  %v12572_v42 = vld [vmem:[#allocation44_spill] sm:$0xff]  ;;  %v12574_v46 = vld [vmem:[#allocation87_spill] sm:$0xff] }
 0x7b4   : > { %12567 = vst [vmem:[#allocation99_spill] sm:$0xff] %v9817_v52  ;;  %12568 = vst [vmem:[#allocation64_spill] sm:$0xff] %v9819_v55  ;;  %v6838_v53 = vpop.eup %6837  ;;  %6863 = vrcp.f32 %v3525_v0  ;;  %v9826_v57 = vmul.f32 0.70710677, %v3700_v2  ;;  %v3644_v61 = vmul.f32 %v9468_v45, %v3054_v24  ;;  %v3718_v25 = vadd.f32 %v3670_v48, %v12543_v49  ;;  %v12577_v2 = vld [vmem:[#allocation27_spill] sm:$0xff]  ;;  %v12579_v24 = vld [vmem:[#allocation62_spill] sm:$0xff] }
 0x7b5   : > { %v6840_v7 = vpop.eup %6839  ;;  %6865 = vrcp.f32 %v9692_v9  ;;  %v9832_v51 = vmul.f32 %v6818_v56, %v12572_v42  ;;  %v2524_v23 = vmul.f32 %v6834_v8, %v12573_v18  ;;  %v3720_v60 = vadd.f32 %v3672_v14, %v12555_v47  ;;  %v12581_v8 = vld [vmem:[#allocation23_spill] sm:$0xff]  ;;  %v12587_v18 = vld [vmem:[#allocation22_spill] sm:$0xff] }
 0x7b6   : > { %12571 = vst [vmem:[#allocation100_spill] sm:$0xff] %v9826_v57  ;;  %v6842_v5 = vpop.eup %6841  ;;  %6867 = vrcp.f32 %v9731_v62  ;;  %v9839_v0 = vmul.f32 %v9766_v32, %v12574_v46  ;;  %v3052_v45 = vmul.f32 %v6836_v3, %v9270_v58  ;;  %v3638_v9 = vmul.f32 %v9442_v39, %v2525_v38  ;;  %v12575_v58 = vld [vmem:[#allocation83_spill] sm:$0xff] }
 0x7b7   : > { %v6844_v50 = vpop.eup %6843  ;;  %6869 = vrcp.f32 %v9686_v13  ;;  %v9845_v56 = vadd.f32 %v3648_v54, %v12544_v34  ;;  %v3640_v36 = vmul.f32 %v9446_v17, %v3053_v4  ;;  %v9850_v62 = vadd.f32 %v3642_v35, %v12538_v27  ;;  %v12582_v14 = vld [vmem:[#allocation75_spill] sm:$0xff] }
 0x7b8   : > { %v6846_v20 = vpop.eup %6845  ;;  %6871 = vrcp.f32 %v9707_v40  ;;  %v9853_v32 = vadd.f32 %v3644_v61, %v12550_v21  ;;  %v9857_v1 = vmul.f32 %v9777_v29, %v12575_v58  ;;  %v9859_v39 = vmul.f32 0.70710677, %v3718_v25  ;;  %v12583_v29 = vld [vmem:[#allocation34_spill] sm:$0xff]  ;;  %v12584_v54 = vld [vmem:[#allocation55_spill] sm:$0xff]  ;;  %v12591_v58 = vld [vmem:[#allocation29_spill] sm:$0xff] }
 0x7b9   : > { %v6848_v13 = vpop.eup %6847  ;;  %6873 = vrcp.f32 %v12577_v2  ;;  %v9863_v17 = vmul.f32 %v6830_v44, %v12578_v63  ;;  %v3634_v40 = vmul.f32 %v12579_v24, %v2524_v23  ;;  %v9868_v43 = vmul.f32 0.70710677, %v3720_v60  ;;  %v12585_v4 = vld [vmem:[#allocation79_spill] sm:$0xff]  ;;  %v12586_v25 = vld [vmem:[#allocation30_spill] sm:$0xff]  ;;  %v12588_v23 = vld [vmem:[#allocation73_spill] sm:$0xff] }
 0x7ba   : > { %12576 = vst [vmem:[#allocation101_spill] sm:$0xff] %v9859_v39  ;;  %v9866_v48 = vpop.eup %6849  ;;  %6875 = vrcp.f32 %v12581_v8  ;;  %v2523_v3 = vmul.f32 %v6842_v5, %v12582_v14  ;;  %v3636_v16 = vmul.f32 %v12583_v29, %v3052_v45  ;;  %v9875_v31 = vadd.f32 %v3638_v9, %v12543_v49  ;;  %v12589_v60 = vld [vmem:[#allocation41_spill] sm:$0xff]  ;;  %v12590_v49 = vld [vmem:[#allocation58_spill] sm:$0xff] }
 0x7bb   : > { %12580 = vst [vmem:[#allocation102_spill] sm:$0xff] %v9868_v43  ;;  %v6852_v38 = vpop.eup %6851  ;;  %6877 = vrcp.f32 %v12584_v54  ;;  %v9878_v44 = vadd.f32 %v3640_v36, %v12555_v47  ;;  %v9881_v35 = vmul.f32 %v6832_v26, %v12585_v4  ;;  %v9886_v5 = vmul.f32 %v6838_v53, %v12588_v23  ;;  %v12592_v26 = vld [vmem:[#allocation40_spill] sm:$0xff]  ;;  %v12593_v63 = vld [vmem:[#allocation9_spill] sm:$0xff]  ;;  %v12595_v53 = vld [vmem:[#allocation67_spill] sm:$0xff] }
 0x7bc   : > { %v6854_v61 = vpop.eup %6853  ;;  %v3671_v42 = vmul.f32 %v6852_v38, %v12586_v25  ;;  %6879 = vrcp.f32 %v12587_v18  ;;  %v3051_v46 = vmul.f32 %v6844_v50, %v12589_v60  ;;  %v9894_v47 = vadd.f32 %v3634_v40, %v12552_v33  ;;  %v12594_v8 = vld [vmem:[#allocation25_spill] sm:$0xff]  ;;  %v12596_v38 = vld [vmem:[#allocation11_spill] sm:$0xff] }
 0x7bd   : > { %v9889_v45 = vpop.eup %6855  ;;  %v3667_v9 = vmul.f32 %v6854_v61, %v12590_v49  ;;  %6881 = vrcp.f32 %v12591_v58  ;;  %v9897_v36 = vmul.f32 %v6840_v7, %v12592_v26  ;;  %v9902_v14 = vmul.f32 %v12595_v53, %v2523_v3  ;;  %v12597_v4 = vld [vmem:[#allocation61_spill] sm:$0xff]  ;;  %v12601_v18 = vld [vmem:[#allocation31_spill] sm:$0xff]  ;;  %v12602_v3 = vld [vmem:[#allocation24_spill] sm:$0xff] }
 0x7be   : > { %v6858_v2 = vpop.eup %6857  ;;  %v3719_v24 = vadd.f32 %v3671_v42, %v12593_v63  ;;  %6883 = vrcp.f32 %v12594_v8  ;;  %v9905_v50 = vadd.f32 %v3636_v16, %v12558_v12  ;;  %v12598_v40 = vld [vmem:[#allocation57_spill] sm:$0xff]  ;;  %v12605_v58 = vld [vmem:[#allocation60_spill] sm:$0xff]  ;;  %v12607_v8 = vld [vmem:[#allocation38_spill] sm:$0xff] }
 0x7bf   : > { %v6860_v29 = vpop.eup %6859  ;;  %v3715_v54 = vadd.f32 %v3667_v9, %v12596_v38  ;;  %v3663_v33 = vmul.f32 %v6858_v2, %v12597_v4  ;;  %6885 = vrcp.f32 %v12598_v40  ;;  %v12599_v7 = vld [vmem:[#allocation69_spill] sm:$0xff]  ;;  %v12606_v2 = vld [vmem:[#allocation52_spill] sm:$0xff]  ;;  %v12610_v40 = vld [vmem:[#allocation59_spill] sm:$0xff] }
 0x7c0   : > { %v9911_v61 = vmul.f32 %v6846_v20, %v12599_v7  ;;  %v6862_v25 = vpop.eup %6861  ;;  %v9913_v42 = vmul.f32 0.70710677, %v3719_v24  ;;  %v3673_v23 = vmul.f32 %v6860_v29, %v12601_v18  ;;  %6887 = vrcp.f32 %v12602_v3  ;;  %v12603_v60 = vld [vmem:[#allocation37_spill] sm:$0xff]  ;;  %v12609_v29 = vld [vmem:[#allocation12_spill] sm:$0xff]  ;;  %v12611_v7 = vld [vmem:[#allocation54_spill] sm:$0xff] }
 0x7c1   : > { %v9918_v12 = vmul.f32 %v12603_v60, %v3051_v46  ;;  %v6864_v16 = vpop.eup %6863  ;;  %v12604_v49 = vld [vmem:[#allocation17_spill] sm:$0xff]  ;;  %v3659_v26 = vmul.f32 %v6862_v25, %v12605_v58  ;;  %6889 = vrcp.f32 %v12606_v2  ;;  %v9924_v20 = vmul.f32 %v6848_v13, %v12607_v8  ;;  %v12613_v25 = vld [vmem:[#allocation7_spill] sm:$0xff] }
 0x7c2   : > { %12600 = vst [vmem:[#allocation66_spill] sm:$0xff] %v9913_v42  ;;  %v3711_v9 = vadd.f32 %v3663_v33, %v12604_v49  ;;  %v6866_v53 = vpop.eup %6865  ;;  %3851 = vmatprep.subr.mxu0 %v9913_v42  ;;  %v9927_v24 = vmul.f32 0.70710677, %v3715_v54  ;;  %v3721_v4 = vadd.f32 %v3673_v23, %v12609_v29  ;;  %v3669_v46 = vmul.f32 %v6864_v16, %v12610_v40  ;;  %v12614_v13 = vld [vmem:[#allocation63_spill] sm:$0xff]  ;;  %v12615_v58 = vld [vmem:[#allocation53_spill] sm:$0xff] }
 0x7c3   : > { %6891 = vrcp.f32 %v12611_v7  ;;  %v6868_v18 = vpop.eup %6867  ;;  %3852 = vmatpush1.msra.mxu0 %v9859_v39  ;;  %v3707_v3 = vadd.f32 %v3659_v26, %v12613_v25  ;;  %v3655_v60 = vmul.f32 %v6866_v53, %v12614_v13  ;;  %v12617_v23 = vld [vmem:[#allocation15_spill] sm:$0xff]  ;;  %v12618_v8 = vld [vmem:[#allocation33_spill] sm:$0xff]  ;;  %v12619_v7 = vld [vmem:[#allocation26_spill] sm:$0xff] }
 0x7c4   : > { %12608 = vst [vmem:[#allocation68_spill] sm:$0xff] %v9927_v24  ;;  %v9933_v33 = vmul.f32 0.70710677, %v3711_v9  ;;  %6893 = vrcp.f32 %v12615_v58  ;;  %v6870_v2 = vpop.eup %6869  ;;  %3853 = vmatprep.subr.mxu0 %v9927_v24  ;;  %v9939_v54 = vmul.f32 0.70710677, %v3721_v4  ;;  %v3717_v16 = vadd.f32 %v3669_v46, %v12617_v23  ;;  %v12621_v53 = vld [vmem:[#allocation116_spill] sm:$0xff] }
 0x7c5   : > { %v3665_v40 = vmul.f32 %v6868_v18, %v12618_v8  ;;  %6895 = vrcp.f32 %v12619_v7  ;;  %v6872_v42 = vpop.eup %6871  ;;  %3854 = vmatpush1.msra.mxu0 %v9810_v6  ;;  %v9945_v9 = vmul.f32 0.70710677, %v3707_v3  ;;  %v3703_v26 = vadd.f32 %v3655_v60, %v12593_v63  ;;  %v12622_v58 = vld [vmem:[#allocation28_spill] sm:$0xff]  ;;  %v12624_v46 = vld [vmem:[#allocation18_spill] sm:$0xff]  ;;  %v12627_v6 = vld [vmem:[#allocation115_spill] sm:$0xff] }
 0x7c6   : > { %12612 = vst [vmem:[#allocation70_spill] sm:$0xff] %v9933_v33  ;;  %12616 = vst [vmem:[#allocation103_spill] sm:$0xff] %v9939_v54  ;;  %v3651_v13 = vmul.f32 %v6870_v2, %v12621_v53  ;;  %6897 = vrcp.f32 %v12622_v58  ;;  %v6874_v24 = vpop.eup %6873  ;;  %3855 = vmatprep.subr.mxu0 %v9933_v33  ;;  %4060 = vmatprep.subr.mxu1 %v9939_v54  ;;  %v9952_v4 = vmul.f32 0.70710677, %v3717_v16  ;;  %v12625_v8 = vld [vmem:[#allocation32_spill] sm:$0xff]  ;;  %v12629_v16 = vld [vmem:[#allocation71_spill] sm:$0xff] }
 0x7c7   : > { %12620 = vst [vmem:[#allocation72_spill] sm:$0xff] %v9945_v9  ;;  %v3713_v18 = vadd.f32 %v3665_v40, %v12624_v46  ;;  %v3661_v7 = vmul.f32 %v6872_v42, %v12625_v8  ;;  %v12626_v39 = vld [vmem:[#allocation56_spill] sm:$0xff]  ;;  %v6876_v3 = vpop.eup %6875  ;;  %3856 = vmatpush1.msra.mxu0 %v12627_v6  ;;  %4061 = vmatpush1.msra.mxu1 %v9868_v43  ;;  %v9962_v53 = vmul.f32 0.70710677, %v9845_v56  ;;  %v12632_v8 = vld [vmem:[#allocation6_spill] sm:$0xff] }
 0x7c8   : > { %12623 = vst [vmem:[#allocation104_spill] sm:$0xff] %v9952_v4  ;;  %6899 = vrcp.f32 %v12626_v39  ;;  %v3699_v60 = vadd.f32 %v3651_v13, %v12596_v38  ;;  %v3647_v2 = vmul.f32 %v6874_v24, %v9790_v37  ;;  %v2522_v58 = vmul.f32 %v9866_v48, %v12629_v16  ;;  %v6878_v40 = vpop.eup %6877  ;;  %3857 = vmatprep.subr.mxu0 %v9945_v9  ;;  %v12633_v13 = vld [vmem:[#allocation35_spill] sm:$0xff]  ;;  %v12634_v24 = vld [vmem:[#allocation114_spill] sm:$0xff] }
 0x7c9   : > { %12628 = vst [vmem:[#allocation105_spill] sm:$0xff] %v9962_v53  ;;  %4062 = vmatprep.subr.mxu1 %v9952_v4  ;;  %v9968_v39 = vmul.f32 0.70710677, %v3703_v26  ;;  %v9970_v42 = vmul.f32 0.70710677, %v3713_v18  ;;  %v3709_v54 = vadd.f32 %v3661_v7, %v12632_v8  ;;  %v3657_v33 = vmul.f32 %v6876_v3, %v12633_v13  ;;  %v6880_v37 = vpop.eup %6879  ;;  %3858 = vmatpush1.msra.mxu0 %v12634_v24 }
 0x7ca   : > { %4063 = vmatpush1.msra.mxu1 %v9817_v52  ;;  %v3695_v56 = vadd.f32 %v3647_v2, %v12604_v49  ;;  %v3643_v48 = vmul.f32 %v6878_v40, %v9814_v41  ;;  %v9979_v16 = vmul.f32 0.70710677, %v9850_v62  ;;  %v9983_v26 = vadd.f32 %v9902_v14, %v12539_v19  ;;  %v6882_v18 = vpop.eup %6881 }
 0x7cb   : > { %12630 = vst [vmem:[#allocation106_spill] sm:$0xff] %v9968_v39  ;;  %12631 = vst [vmem:[#allocation108_spill] sm:$0xff] %v9970_v42  ;;  %3859 = vmatprep.subr.mxu0 %v9968_v39  ;;  %4064 = vmatprep.subr.mxu1 %v9970_v42  ;;  %v9987_v7 = vmul.f32 0.70710677, %v3699_v60  ;;  %v9989_v3 = vmul.f32 0.70710677, %v3709_v54  ;;  %v3705_v2 = vadd.f32 %v3657_v33, %v12609_v29  ;;  %v6884_v40 = vpop.eup %6883 }
 0x7cc   : > { %12635 = vst [vmem:[#allocation107_spill] sm:$0xff] %v9979_v16  ;;  %v3653_v41 = vmul.f32 %v6880_v37, %v9796_v22  ;;  %3860 = vmatpush1.msra.mxu0 %v9760_v30  ;;  %4065 = vmatpush1.msra.mxu1 %v9762_v11  ;;  %v3691_v19 = vadd.f32 %v3643_v48, %v12613_v25  ;;  %v9998_v14 = vmul.f32 0.70710677, %v9853_v32  ;;  %v12639_v60 = vld [vmem:[#allocation65_spill] sm:$0xff]  ;;  %v6886_v54 = vpop.eup %6885  ;;  %v10003_v22 = vmul.f32 0.70710677, %v3695_v56 }
 0x7cd   : > { %12636 = vst [vmem:[#allocation110_spill] sm:$0xff] %v9987_v7  ;;  %12637 = vst [vmem:[#allocation109_spill] sm:$0xff] %v9989_v3  ;;  %v3639_v62 = vmul.f32 %v6882_v18, %v9832_v51  ;;  %v3626_v13 = vmul.f32 %v12639_v60, %v2522_v58  ;;  %3861 = vmatprep.subr.mxu0 %v9987_v7  ;;  %4066 = vmatprep.subr.mxu1 %v9989_v3  ;;  %v10005_v33 = vmul.f32 0.70710677, %v3705_v2  ;;  %v6888_v42 = vpop.eup %6887  ;;  %v12643_v56 = vld [vmem:[#allocation39_spill] sm:$0xff] }
 0x7ce   : > { %12638 = vst [vmem:[#allocation74_spill] sm:$0xff] %v9998_v14  ;;  %12640 = vst [vmem:[#allocation111_spill] sm:$0xff] %v10003_v22  ;;  %v3701_v37 = vadd.f32 %v3653_v41, %v12617_v23  ;;  %v3649_v48 = vmul.f32 %v6884_v40, %v9802_v59  ;;  %3862 = vmatpush1.msra.mxu0 %v9783_v28  ;;  %4067 = vmatpush1.msra.mxu1 %v9780_v10  ;;  %v10013_v32 = vmul.f32 0.70710677, %v9875_v31  ;;  %v6890_v2 = vpop.eup %6889 }
 0x7cf   : > { %12641 = vst [vmem:[#allocation76_spill] sm:$0xff] %v10005_v33  ;;  %v3687_v51 = vadd.f32 %v3639_v62, %v12593_v63  ;;  %v3635_v58 = vmul.f32 %v6886_v54, %v9863_v17  ;;  %v3050_v18 = vmul.f32 %v9889_v45, %v12643_v56  ;;  %3863 = vmatprep.subr.mxu0 %v10003_v22  ;;  %v10020_v59 = vmul.f32 0.70710677, %v3691_v19 }
 0x7d0   : > { %12642 = vst [vmem:[#allocation112_spill] sm:$0xff] %v10013_v32  ;;  %4068 = vmatprep.subr.mxu1 %v10005_v33  ;;  %v10022_v41 = vmul.f32 0.70710677, %v3701_v37  ;;  %v3697_v40 = vadd.f32 %v3649_v48, %v12624_v46  ;;  %v3645_v63 = vmul.f32 %v6888_v42, %v9839_v0  ;;  %v6892_v31 = vpop.eup %6891  ;;  %3864 = vmatpush1.msra.mxu0 %v9819_v55  ;;  %v10031_v62 = vmul.f32 0.70710677, %v9878_v44 }
 0x7d1   : > { %12644 = vst [vmem:[#allocation113_spill] sm:$0xff] %v10020_v59  ;;  %4069 = vmatpush1.msra.mxu1 %v9798_v15  ;;  %v3683_v17 = vadd.f32 %v3635_v58, %v12596_v38  ;;  %v3631_v45 = vmul.f32 %v6890_v2, %v9886_v5  ;;  %v3674_v19 = vadd.f32 %v3626_v13, %v12538_v27  ;;  %v6894_v60 = vpop.eup %6893  ;;  %v10036_v0 = vmul.f32 0.70710677, %v3687_v51  ;;  %v12650_v13 = vld [vmem:[#allocation36_spill] sm:$0xff] }
 0x7d2   : > { %12645 = vst [vmem:[#allocation78_spill] sm:$0xff] %v10022_v41  ;;  %12646 = vst [vmem:[#allocation80_spill] sm:$0xff] %v10031_v62  ;;  %3865 = vmatprep.subr.mxu0 %v10020_v59  ;;  %4070 = vmatprep.subr.mxu1 %v10022_v41  ;;  %v10038_v42 = vmul.f32 0.70710677, %v3697_v40  ;;  %v3693_v54 = vadd.f32 %v3645_v63, %v12632_v8  ;;  %v3641_v38 = vmul.f32 %v6892_v31, %v9857_v1  ;;  %v6896_v37 = vpop.eup %6895 }
 0x7d3   : > { %12647 = vst [vmem:[#allocation82_spill] sm:$0xff] %v10036_v0  ;;  %3866 = vmatpush1.msra.mxu0 %v9979_v16  ;;  %4071 = vmatpush1.msra.mxu1 %v9826_v57  ;;  %v10045_v27 = vmul.f32 0.70710677, %v9894_v47  ;;  %v3679_v44 = vadd.f32 %v3631_v45, %v12604_v49  ;;  %v3627_v5 = vmul.f32 %v6894_v60, %v9911_v61  ;;  %v6898_v51 = vpop.eup %6897  ;;  %v10052_v1 = vmul.f32 0.70710677, %v3683_v17  ;;  %v306_v60 = vld [vmem:[%s11909_s2 + $0x10] sm:$0xff] }
 0x7d4   : > { %12648 = vst [vmem:[#allocation84_spill] sm:$0xff] %v10038_v42  ;;  %v3628_v48 = vmul.f32 %v12650_v13, %v3050_v18  ;;  %3867 = vmatprep.subr.mxu0 %v10036_v0  ;;  %4072 = vmatprep.subr.mxu1 %v10038_v42  ;;  %v10054_v58 = vmul.f32 0.70710677, %v3693_v54  ;;  %v3689_v56 = vadd.f32 %v3641_v38, %v12609_v29  ;;  %v10061_v61 = vmul.f32 0.70710677, %v9983_v26  ;;  %v307_v54 = vld [vmem:[%s11909_s2 + $0x18] sm:$0xff] }
 0x7d5   : > { %12649 = vst [vmem:[#allocation86_spill] sm:$0xff] %v10045_v27  ;;  %12651 = vst [vmem:[#allocation88_spill] sm:$0xff] %v10052_v1  ;;  %v3637_v47 = vmul.f32 %v6896_v37, %v9881_v35  ;;  %v6900_v2 = vpop.eup %6899  ;;  %3868 = vmatpush1.msra.mxu0 %v10013_v32  ;;  %4073 = vmatpush1.msra.mxu1 %v9962_v53  ;;  %v3675_v49 = vadd.f32 %v3627_v5, %v12613_v25  ;;  %v10069_v35 = vmul.f32 0.70710677, %v3679_v44  ;;  %v12664_v45 = vmov 0.0   ;;  %v308_v38 = vld [vmem:[%s11909_s2 + $0x20] sm:$0xff] }
 0x7d6   : > { %12652 = vst [vmem:[#allocation95_spill] sm:$0xff] %v10054_v58  ;;  %12653 = vst [vmem:[#allocation90_spill] sm:$0xff] %v10061_v61  ;;  %v3633_v18 = vmul.f32 %v6898_v51, %v9897_v36  ;;  %v3680_v40 = vadd.f32 %v9918_v12, %v12544_v34  ;;  %3869 = vmatprep.subr.mxu0 %v10052_v1  ;;  %4074 = vmatprep.subr.mxu1 %v10054_v58  ;;  %v10071_v29 = vmul.f32 0.70710677, %v3689_v56  ;;  %v309_v37 = vld [vmem:[%s11909_s2 + $0x28] sm:$0xff]  ;;  %v310_v44 = vld [vmem:[%s11909_s2 + $0x30] sm:$0xff] }
 0x7d7   : > { %12654 = vst [vmem:[#allocation92_spill] sm:$0xff] %v10069_v35  ;;  %v3685_v63 = vadd.f32 %v3637_v47, %v12617_v23  ;;  %v3629_v26 = vmul.f32 %v6900_v2, %v9924_v20  ;;  %3870 = vmatpush1.msra.mxu0 %v10045_v27  ;;  %4075 = vmatpush1.msra.mxu1 %v9998_v14  ;;  %v10077_v36 = vmul.f32 0.70710677, %v3675_v49  ;;  %v10080_v12 = vmul.f32 0.70710677, %v3674_v19  ;;  %v305_v19 = vld [vmem:[%s11909_s2 + $0x8] sm:$0xff] }
 0x7d8   : > { %12655 = vst [vmem:[#allocation8_spill] sm:$0xff] %v10071_v29  ;;  %v3681_v34 = vadd.f32 %v3633_v18, %v12624_v46  ;;  %v3676_v25 = vadd.f32 %v3628_v48, %v12550_v21  ;;  %3871 = vmatprep.subr.mxu0 %v10069_v35  ;;  %4076 = vmatprep.subr.mxu1 %v10071_v29  ;;  %v10091_v23 = vmul.f32 0.70710677, %v9905_v50  ;;  %v304_v46 = vld [vmem:[%s11909_s2] sm:$0xff]  ;;  %v311_v5 = vld [vmem:[%s11909_s2 + $0x38] sm:$0xff]  ;;  %v313_v48 = vld [vmem:[%s11909_s2 + $0x48] sm:$0xff] }
 0x7d9   : > { %12656 = vst [vmem:[#allocation19_spill] sm:$0xff] %v10077_v36  ;;  %12657 = vst [vmem:[#allocation51_spill] sm:$0xff] %v10080_v12  ;;  %v10085_v31 = vmul.f32 0.70710677, %v3685_v63  ;;  %v3677_v20 = vadd.f32 %v3629_v26, %v12632_v8  ;;  %3872 = vmatpush1.msra.mxu0 %v10061_v61  ;;  %4077 = vmatpush1.msra.mxu1 %v10031_v62  ;;  %v10103_v8 = vmul.f32 0.70710677, %v3680_v40 }
 0x7da   : > { %12659 = vst [vmem:[#allocation20_spill] sm:$0xff] %v10091_v23  ;;  %3873 = vmatprep.subr.mxu0 %v10077_v36  ;;  %v10098_v21 = vmul.f32 0.70710677, %v3681_v34  ;;  %v10106_v50 = vmul.f32 0.70710677, %v3676_v25  ;;  %v312_v13 = vld [vmem:[%s11909_s2 + $0x40] sm:$0xff] }
 0x7db   : > { %12658 = vst [vmem:[#allocation10_spill] sm:$0xff] %v10085_v31  ;;  %4078 = vmatprep.subr.mxu1 %v10085_v31  ;;  %v10100_v17 = vmul.f32 0.70710677, %v3677_v20  ;;  %12662 = vst [vmem:[#allocation21_spill] sm:$0xff] %v10103_v8  ;;  %3874 = vmatpush1.msra.mxu0 %v10080_v12  ;;  %v314_v51 = vld [vmem:[%s11909_s2 + $0x50] sm:$0xff]  ;;  %v315_v56 = vld [vmem:[%s11909_s2 + $0x58] sm:$0xff] }
 0x7dc   : > { %12660 = vst [vmem:[#allocation50_spill] sm:$0xff] %v10098_v21  ;;  %4079 = vmatpush1.msra.mxu1 %v10091_v23  ;;  %12663 = vst [vmem:[#allocation49_spill] sm:$0xff] %v10106_v50  ;;  %6156 = vmatmul.mubr.msk.f32.vlgmr.msra.gmra.mxu0 %vm3770_vm1, %v304_v46  ;;  %v316_v47 = vld [vmem:[%s11909_s2 + $0x60] sm:$0xff]  ;;  %v317_v2 = vld [vmem:[%s11909_s2 + $0x68] sm:$0xff] }
 0x7dd   : > { %12661 = vst [vmem:[#allocation93_spill] sm:$0xff] %v10100_v17  ;;  %4080 = vmatprep.subr.mxu1 %v10098_v21  ;;  %3913 = vmatprep.mubr.f32.mxu0 %v12664_v45  ;;  %v318_v49 = vld [vmem:[%s11909_s2 + $0x70] sm:$0xff]  ;;  %v319_v18 = vld [vmem:[%s11909_s2 + $0x78] sm:$0xff]  ;;  %v320_v40 = vld [vmem:[%s11909_s2 + $0x80] sm:$0xff] }
 0x7de   : > { %4081 = vmatpush1.msra.mxu1 %v10103_v8  ;;  %v321_v63 = vld [vmem:[%s11909_s2 + $0x88] sm:$0xff]  ;;  %v322_v26 = vld [vmem:[%s11909_s2 + $0x90] sm:$0xff]  ;;  %v323_v34 = vld [vmem:[%s11909_s2 + $0x98] sm:$0xff] }
 0x7df   : > { %4082 = vmatprep.subr.mxu1 %v10100_v17  ;;  %v324_v25 = vld [vmem:[%s11909_s2 + $0xa0] sm:$0xff]  ;;  %v325_v20 = vld [vmem:[%s11909_s2 + $0xa8] sm:$0xff] }
 0x7e0   : > { %4083 = vmatpush1.msra.mxu1 %v10106_v50  ;;  %6157 = vmatmul.mubr.msk.f32.gmra.mxu0 %vm3770_vm1, %v305_v19 }
 0x7e1   : > { %6180 = vmatmul.mubr.msk.f32.vlgmr.msra.gmra.mxu1 %vm3770_vm1, %v304_v46  ;;  %3919 = vmatprep.mubr.f32.mxu0 %v12664_v45  ;;  %v326_v46 = vld [vmem:[%s11909_s2 + $0xb0] sm:$0xff] }
 0x7e2   : > { %4122 = vmatprep.mubr.f32.mxu1 %v12664_v45 }
 0x7e4   : > { %6158 = vmatmul.mubr.msk.f32.gmra.mxu0 %vm3770_vm1, %v306_v60 }
 0x7e5   : > { %6181 = vmatmul.mubr.msk.f32.gmra.mxu1 %vm3770_vm1, %v305_v19  ;;  %3925 = vmatprep.mubr.f32.mxu0 %v12664_v45  ;;  %v327_v19 = vld [vmem:[%s11909_s2 + $0xb8] sm:$0xff] }
 0x7e6   : > { %4128 = vmatprep.mubr.f32.mxu1 %v12664_v45 }
 0x7e8   : > { %6159 = vmatmul.mubr.msk.f32.gmra.mxu0 %vm3770_vm1, %v307_v54 }
 0x7e9   : > { %6182 = vmatmul.mubr.msk.f32.gmra.mxu1 %vm3770_vm1, %v306_v60  ;;  %3931 = vmatprep.mubr.f32.mxu0 %v12664_v45 }
 0x7ea   : > { %4134 = vmatprep.mubr.f32.mxu1 %v12664_v45 }
 0x7ec   : > { %6160 = vmatmul.mubr.msk.f32.gmra.mxu0 %vm3770_vm1, %v308_v38 }
 0x7ed   : > { %6183 = vmatmul.mubr.msk.f32.gmra.mxu1 %vm3770_vm1, %v307_v54  ;;  %3937 = vmatprep.mubr.f32.mxu0 %v12664_v45 }
 0x7ee   : > { %4140 = vmatprep.mubr.f32.mxu1 %v12664_v45 }
 0x7f0   : > { %6161 = vmatmul.mubr.msk.f32.gmra.mxu0 %vm3770_vm1, %v309_v37 }
 0x7f1   : > { %6184 = vmatmul.mubr.msk.f32.gmra.mxu1 %vm3770_vm1, %v308_v38  ;;  %3943 = vmatprep.mubr.f32.mxu0 %v12664_v45 }
 0x7f2   : > { %4146 = vmatprep.mubr.f32.mxu1 %v12664_v45 }
 0x7f4   : > { %6162 = vmatmul.mubr.msk.f32.gmra.mxu0 %vm3770_vm1, %v310_v44 }
 0x7f5   : > { %6185 = vmatmul.mubr.msk.f32.gmra.mxu1 %vm3770_vm1, %v309_v37  ;;  %3949 = vmatprep.mubr.f32.mxu0 %v12664_v45 }
 0x7f6   : > { %4152 = vmatprep.mubr.f32.mxu1 %v12664_v45 }
 0x7f8   : > { %6163 = vmatmul.mubr.msk.f32.gmra.mxu0 %vm3770_vm1, %v311_v5 }
 0x7f9   : > { %6186 = vmatmul.mubr.msk.f32.gmra.mxu1 %vm3770_vm1, %v310_v44  ;;  %3955 = vmatprep.mubr.f32.mxu0 %v12664_v45 }
 0x7fa   : > { %4158 = vmatprep.mubr.f32.mxu1 %v12664_v45 }
 0x7fc   : > { %6164 = vmatmul.mubr.msk.f32.gmra.mxu0 %vm3770_vm1, %v312_v13 }
 0x7fd   : > { %6187 = vmatmul.mubr.msk.f32.gmra.mxu1 %vm3770_vm1, %v311_v5  ;;  %3961 = vmatprep.mubr.f32.mxu0 %v12664_v45 }
 0x7fe   : > { %4164 = vmatprep.mubr.f32.mxu1 %v12664_v45 }
 0x800   : > { %6165 = vmatmul.mubr.msk.f32.gmra.mxu0 %vm3770_vm1, %v313_v48 }
 0x801   : > { %6188 = vmatmul.mubr.msk.f32.gmra.mxu1 %vm3770_vm1, %v312_v13  ;;  %3967 = vmatprep.mubr.f32.mxu0 %v12664_v45 }
 0x802   : > { %4170 = vmatprep.mubr.f32.mxu1 %v12664_v45 }
 0x804   : > { %6166 = vmatmul.mubr.msk.f32.gmra.mxu0 %vm3770_vm1, %v314_v51 }
 0x805   : > { %6189 = vmatmul.mubr.msk.f32.gmra.mxu1 %vm3770_vm1, %v313_v48  ;;  %3973 = vmatprep.mubr.f32.mxu0 %v12664_v45 }
 0x806   : > { %4176 = vmatprep.mubr.f32.mxu1 %v12664_v45 }
 0x808   : > { %6167 = vmatmul.mubr.msk.f32.gmra.mxu0 %vm3770_vm1, %v315_v56 }
 0x809   : > { %6190 = vmatmul.mubr.msk.f32.gmra.mxu1 %vm3770_vm1, %v314_v51  ;;  %3979 = vmatprep.mubr.f32.mxu0 %v12664_v45 }
 0x80a   : > { %4182 = vmatprep.mubr.f32.mxu1 %v12664_v45 }
 0x80c   : > { %6168 = vmatmul.mubr.msk.f32.gmra.mxu0 %vm3770_vm1, %v316_v47 }
 0x80d   : > { %6191 = vmatmul.mubr.msk.f32.gmra.mxu1 %vm3770_vm1, %v315_v56  ;;  %3985 = vmatprep.mubr.f32.mxu0 %v12664_v45 }
 0x80e   : > { %4188 = vmatprep.mubr.f32.mxu1 %v12664_v45 }
 0x810   : > { %6169 = vmatmul.mubr.msk.f32.gmra.mxu0 %vm3770_vm1, %v317_v2 }
 0x811   : > { %6192 = vmatmul.mubr.msk.f32.gmra.mxu1 %vm3770_vm1, %v316_v47  ;;  %3991 = vmatprep.mubr.f32.mxu0 %v12664_v45 }
 0x812   : > { %4194 = vmatprep.mubr.f32.mxu1 %v12664_v45 }
 0x814   : > { %6170 = vmatmul.mubr.msk.f32.gmra.mxu0 %vm3770_vm1, %v318_v49 }
 0x815   : > { %6193 = vmatmul.mubr.msk.f32.gmra.mxu1 %vm3770_vm1, %v317_v2  ;;  %3997 = vmatprep.mubr.f32.mxu0 %v12664_v45 }
 0x816   : > { %4200 = vmatprep.mubr.f32.mxu1 %v12664_v45 }
 0x818   : > { %6171 = vmatmul.mubr.msk.f32.gmra.mxu0 %vm3770_vm1, %v319_v18 }
 0x819   : > { %6194 = vmatmul.mubr.msk.f32.gmra.mxu1 %vm3770_vm1, %v318_v49  ;;  %4003 = vmatprep.mubr.f32.mxu0 %v12664_v45 }
 0x81a   : > { %4206 = vmatprep.mubr.f32.mxu1 %v12664_v45 }
 0x81c   : > { %6172 = vmatmul.mubr.msk.f32.gmra.mxu0 %vm3770_vm1, %v320_v40 }
 0x81d   : > { %6195 = vmatmul.mubr.msk.f32.gmra.mxu1 %vm3770_vm1, %v319_v18  ;;  %4009 = vmatprep.mubr.f32.mxu0 %v12664_v45 }
 0x81e   : > { %4212 = vmatprep.mubr.f32.mxu1 %v12664_v45 }
 0x820   : > { %6173 = vmatmul.mubr.msk.f32.gmra.mxu0 %vm3770_vm1, %v321_v63 }
 0x821   : > { %6196 = vmatmul.mubr.msk.f32.gmra.mxu1 %vm3770_vm1, %v320_v40  ;;  %4015 = vmatprep.mubr.f32.mxu0 %v12664_v45 }
 0x822   : > { %4218 = vmatprep.mubr.f32.mxu1 %v12664_v45 }
 0x824   : > { %6174 = vmatmul.mubr.msk.f32.gmra.mxu0 %vm3770_vm1, %v322_v26 }
 0x825   : > { %6197 = vmatmul.mubr.msk.f32.gmra.mxu1 %vm3770_vm1, %v321_v63  ;;  %4021 = vmatprep.mubr.f32.mxu0 %v12664_v45 }
 0x826   : > { %4224 = vmatprep.mubr.f32.mxu1 %v12664_v45 }
 0x828   : > { %6175 = vmatmul.mubr.msk.f32.gmra.mxu0 %vm3770_vm1, %v323_v34 }
 0x829   : > { %6198 = vmatmul.mubr.msk.f32.gmra.mxu1 %vm3770_vm1, %v322_v26  ;;  %4027 = vmatprep.mubr.f32.mxu0 %v12664_v45 }
 0x82a   : > { %4230 = vmatprep.mubr.f32.mxu1 %v12664_v45 }
 0x82c   : > { %6176 = vmatmul.mubr.msk.f32.gmra.mxu0 %vm3770_vm1, %v324_v25 }
 0x82d   : > { %6199 = vmatmul.mubr.msk.f32.gmra.mxu1 %vm3770_vm1, %v323_v34  ;;  %4033 = vmatprep.mubr.f32.mxu0 %v12664_v45 }
 0x82e   : > { %4236 = vmatprep.mubr.f32.mxu1 %v12664_v45 }
 0x830   : > { %6177 = vmatmul.mubr.msk.f32.gmra.mxu0 %vm3770_vm1, %v325_v20 }
 0x831   : > { %6200 = vmatmul.mubr.msk.f32.gmra.mxu1 %vm3770_vm1, %v324_v25  ;;  %4039 = vmatprep.mubr.f32.mxu0 %v12664_v45 }
 0x832   : > { %4242 = vmatprep.mubr.f32.mxu1 %v12664_v45 }
 0x834   : > { %6178 = vmatmul.mubr.msk.f32.gmra.mxu0 %vm3770_vm1, %v326_v46 }
 0x835   : > { %6201 = vmatmul.mubr.msk.f32.gmra.mxu1 %vm3770_vm1, %v325_v20  ;;  %4045 = vmatprep.mubr.f32.mxu0 %v12664_v45 }
 0x836   : > { %4248 = vmatprep.mubr.f32.mxu1 %v12664_v45 }
 0x838   : > { %6179 = vmatmul.mubr.msk.f32.gmra.mxu0 %vm3770_vm1, %v327_v19 }
 0x839   : > { %6202 = vmatmul.mubr.msk.f32.gmra.mxu1 %vm3770_vm1, %v326_v46  ;;  %5879 = vmatprep.mubr.f32.mxu0 %v12664_v45 }
 0x83a   : > { %4254 = vmatprep.mubr.f32.mxu1 %v12664_v45 }
 0x83d   : > { %6203 = vmatmul.mubr.msk.f32.gmra.mxu1 %vm3770_vm1, %v327_v19 }
 0x83e   : > { %5956 = vmatprep.mubr.f32.mxu1 %v12664_v45 }
 0x89c   : > { %v10277_v60 = vpop.f32.mrf.mxu0 }
 0x89d   : > { %12665 = vst [vmem:[#allocation13_spill] sm:$0xff] %v10277_v60  ;;  %4261 = vadd.xlane.f32.xlu0 %v10277_v60 }
 0x89e   : > { %v10280_v54 = vpop.f32.mrf.mxu0 }
 0x89f   : > { %12666 = vst [vmem:[#allocation89_spill] sm:$0xff] %v10280_v54 }
 0x8a0   : > { %v10286_v37 = vpop.f32.mrf.mxu0 }
 0x8a1   : > { %v10282_v38 = vpop.f32.mrf.mxu1  ;;  %4525 = vadd.xlane.f32.xlu0 %v10280_v54  ;;  %12668 = vst [vmem:[#allocation48_spill] sm:$0xff] %v10286_v37 }
 0x8a2   : > { %12667 = vst [vmem:[#allocation14_spill] sm:$0xff] %v10282_v38  ;;  %4789 = vadd.xlane.f32.xlu1 %v10282_v38  ;;  %v10292_v5 = vpop.f32.mrf.mxu0 }
 0x8a3   : > { %v10288_v44 = vpop.f32.mrf.mxu1  ;;  %12670 = vst [vmem:[#allocation94_spill] sm:$0xff] %v10292_v5 }
 0x8a4   : > { %12669 = vst [vmem:[#allocation16_spill] sm:$0xff] %v10288_v44  ;;  %v10298_v48 = vpop.f32.mrf.mxu0 }
 0x8a5   : > { %4263 = vadd.xlane.f32.xlu0 %v10286_v37  ;;  %v10294_v13 = vpop.f32.mrf.mxu1  ;;  %12672 = vst [vmem:[#allocation85_spill] sm:$0xff] %v10298_v48 }
 0x8a6   : > { %5053 = vadd.xlane.f32.xlu1 %v10288_v44  ;;  %12671 = vst [vmem:[#allocation91_spill] sm:$0xff] %v10294_v13  ;;  %v10304_v56 = vpop.f32.mrf.mxu0 }
 0x8a7   : > { %v10300_v51 = vpop.f32.mrf.mxu1  ;;  %12674 = vst [vmem:[#allocation81_spill] sm:$0xff] %v10304_v56 }
 0x8a8   : > { %12673 = vst [vmem:[#allocation47_spill] sm:$0xff] %v10300_v51  ;;  %v10310_v2 = vpop.f32.mrf.mxu0 }
 0x8a9   : > { %4527 = vadd.xlane.f32.xlu0 %v10292_v5  ;;  %v10306_v47 = vpop.f32.mrf.mxu1  ;;  %12676 = vst [vmem:[#allocation45_spill] sm:$0xff] %v10310_v2 }
 0x8aa   : > { %4791 = vadd.xlane.f32.xlu1 %v10294_v13  ;;  %12675 = vst [vmem:[#allocation46_spill] sm:$0xff] %v10306_v47  ;;  %v10316_v18 = vpop.f32.mrf.mxu0 }
 0x8ab   : > { %v10312_v49 = vpop.f32.mrf.mxu1  ;;  %12678 = vst [vmem:[#allocation44_spill] sm:$0xff] %v10316_v18 }
 0x8ac   : > { %12677 = vst [vmem:[#allocation77_spill] sm:$0xff] %v10312_v49  ;;  %v10322_v63 = vpop.f32.mrf.mxu0 }
 0x8ad   : > { %4265 = vadd.xlane.f32.xlu0 %v10298_v48  ;;  %v10318_v40 = vpop.f32.mrf.mxu1  ;;  %12680 = vst [vmem:[#allocation87_spill] sm:$0xff] %v10322_v63 }
 0x8ae   : > { %5055 = vadd.xlane.f32.xlu1 %v10300_v51  ;;  %12679 = vst [vmem:[#allocation43_spill] sm:$0xff] %v10318_v40  ;;  %v10328_v34 = vpop.f32.mrf.mxu0 }
 0x8af   : > { %v10324_v26 = vpop.f32.mrf.mxu1  ;;  %12682 = vst [vmem:[#allocation27_spill] sm:$0xff] %v10328_v34 }
 0x8b0   : > { %12681 = vst [vmem:[#allocation83_spill] sm:$0xff] %v10324_v26  ;;  %v10334_v20 = vpop.f32.mrf.mxu0 }
 0x8b1   : > { %4529 = vadd.xlane.f32.xlu0 %v10304_v56  ;;  %v10330_v25 = vpop.f32.mrf.mxu1  ;;  %12684 = vst [vmem:[#allocation62_spill] sm:$0xff] %v10334_v20 }
 0x8b2   : > { %4793 = vadd.xlane.f32.xlu1 %v10306_v47  ;;  %12683 = vst [vmem:[#allocation42_spill] sm:$0xff] %v10330_v25  ;;  %v10340_v19 = vpop.f32.mrf.mxu0 }
 0x8b3   : > { %v10336_v46 = vpop.f32.mrf.mxu1  ;;  %12686 = vst [vmem:[#allocation75_spill] sm:$0xff] %v10340_v19 }
 0x8b4   : > { %12685 = vst [vmem:[#allocation23_spill] sm:$0xff] %v10336_v46  ;;  %v10346_v17 = vpop.f32.mrf.mxu0 }
 0x8b5   : > { %4267 = vadd.xlane.f32.xlu0 %v10310_v2  ;;  %v10342_v45 = vpop.f32.mrf.mxu1  ;;  %12688 = vst [vmem:[#allocation55_spill] sm:$0xff] %v10346_v17 }
 0x8b6   : > { %5057 = vadd.xlane.f32.xlu1 %v10312_v49  ;;  %12687 = vst [vmem:[#allocation34_spill] sm:$0xff] %v10342_v45  ;;  %v10352_v31 = vpop.f32.mrf.mxu0 }
 0x8b7   : > { %v10348_v21 = vpop.f32.mrf.mxu1  ;;  %12690 = vst [vmem:[#allocation30_spill] sm:$0xff] %v10352_v31 }
 0x8b8   : > { %12689 = vst [vmem:[#allocation79_spill] sm:$0xff] %v10348_v21  ;;  %v10358_v8 = vpop.f32.mrf.mxu0 }
 0x8b9   : > { %4531 = vadd.xlane.f32.xlu0 %v10316_v18  ;;  %v10354_v50 = vpop.f32.mrf.mxu1  ;;  %12692 = vst [vmem:[#allocation73_spill] sm:$0xff] %v10358_v8 }
 0x8ba   : > { %4795 = vadd.xlane.f32.xlu1 %v10318_v40  ;;  %12691 = vst [vmem:[#allocation22_spill] sm:$0xff] %v10354_v50  ;;  %v10364_v23 = vpop.f32.mrf.mxu0 }
 0x8bb   : > { %v10360_v36 = vpop.f32.mrf.mxu1 }
 0x8bc   : > { %12693 = vst [vmem:[#allocation41_spill] sm:$0xff] %v10360_v36  ;;  %v10370_v29 = vpop.f32.mrf.mxu0 }
 0x8bd   : > { %4269 = vadd.xlane.f32.xlu0 %v10322_v63  ;;  %v10366_v12 = vpop.f32.mrf.mxu1 }
 0x8be   : > { %5059 = vadd.xlane.f32.xlu1 %v10324_v26  ;;  %12694 = vst [vmem:[#allocation58_spill] sm:$0xff] %v10366_v12  ;;  %v10376_v58 = vpop.f32.mrf.mxu0 }
 0x8bf   : > { %v10372_v35 = vpop.f32.mrf.mxu1 }
 0x8c0   : > { %v10382_v42 = vpop.f32.mrf.mxu0 }
 0x8c1   : > { %4533 = vadd.xlane.f32.xlu0 %v10328_v34  ;;  %v10378_v1 = vpop.f32.mrf.mxu1 }
 0x8c2   : > { %4797 = vadd.xlane.f32.xlu1 %v10330_v25  ;;  %v10388_v41 = vpop.f32.mrf.mxu0 }
 0x8c3   : > { %v10384_v0 = vpop.f32.mrf.mxu1 }
 0x8c4   : > { %v10394_v33 = vpop.f32.mrf.mxu0 }
 0x8c5   : > { %4271 = vadd.xlane.f32.xlu0 %v10334_v20  ;;  %v10390_v59 = vpop.f32.mrf.mxu1 }
 0x8c6   : > { %5061 = vadd.xlane.f32.xlu1 %v10336_v46  ;;  %v10400_v3 = vpop.f32.mrf.mxu0 }
 0x8c7   : > { %v10396_v22 = vpop.f32.mrf.mxu1 }
 0x8c8   : > { %v10406_v39 = vpop.f32.mrf.mxu0 }
 0x8c9   : > { %4535 = vadd.xlane.f32.xlu0 %v10340_v19  ;;  %v10402_v7 = vpop.f32.mrf.mxu1 }
 0x8ca   : > { %4799 = vadd.xlane.f32.xlu1 %v10342_v45  ;;  %v10412_v9 = vpop.f32.mrf.mxu0 }
 0x8cb   : > { %v10408_v4 = vpop.f32.mrf.mxu1 }
 0x8cc   : > { %v10418_v61 = vpop.f32.mrf.mxu0 }
 0x8cd   : > { %4273 = vadd.xlane.f32.xlu0 %v10346_v17  ;;  %v10414_v62 = vpop.f32.mrf.mxu1 }
 0x8ce   : > { %5063 = vadd.xlane.f32.xlu1 %v10348_v21  ;;  %v10424_v27 = vpop.f32.mrf.mxu0 }
 0x8cf   : > { %v10420_v14 = vpop.f32.mrf.mxu1 }
 0x8d0   : > { %v10430_v53 = vpop.f32.mrf.mxu0 }
 0x8d1   : > { %4537 = vadd.xlane.f32.xlu0 %v10352_v31  ;;  %v10426_v32 = vpop.f32.mrf.mxu1 }
 0x8d2   : > { %4801 = vadd.xlane.f32.xlu1 %v10354_v50  ;;  %v10436_v57 = vpop.f32.mrf.mxu0 }
 0x8d3   : > { %v10432_v43 = vpop.f32.mrf.mxu1 }
 0x8d4   : > { %v10442_v15 = vpop.f32.mrf.mxu0 }
 0x8d5   : > { %4275 = vadd.xlane.f32.xlu0 %v10358_v8  ;;  %v10438_v16 = vpop.f32.mrf.mxu1 }
 0x8d6   : > { %5065 = vadd.xlane.f32.xlu1 %v10360_v36  ;;  %v10448_v52 = vpop.f32.mrf.mxu0 }
 0x8d7   : > { %v10444_v55 = vpop.f32.mrf.mxu1 }
 0x8d8   : > { %v10454_v11 = vpop.f32.mrf.mxu0 }
 0x8d9   : > { %4539 = vadd.xlane.f32.xlu0 %v10364_v23  ;;  %v10450_v28 = vpop.f32.mrf.mxu1 }
 0x8da   : > { %4803 = vadd.xlane.f32.xlu1 %v10366_v12  ;;  %v10460_v6 = vpop.f32.mrf.mxu0 }
 0x8db   : > { %v10456_v30 = vpop.f32.mrf.mxu1 }
 0x8dc   : > { %v10466_v24 = vpop.f32.mrf.mxu0 }
 0x8dd   : > { %4277 = vadd.xlane.f32.xlu0 %v10370_v29  ;;  %v10462_v10 = vpop.f32.mrf.mxu1 }
 0x8de   : > { %5067 = vadd.xlane.f32.xlu1 %v10372_v35  ;;  %v10472_v44 = vpop.f32.mrf.mxu0 }
 0x8df   : > { %v10468_v38 = vpop.f32.mrf.mxu1 }
 0x8e0   : > { %v10478_v54 = vpop.f32.mrf.mxu0 }
 0x8e1   : > { %4541 = vadd.xlane.f32.xlu0 %v10376_v58  ;;  %v10474_v13 = vpop.f32.mrf.mxu1 }
 0x8e2   : > { %4805 = vadd.xlane.f32.xlu1 %v10378_v1  ;;  %v10486_v47 = vpop.f32.mrf.mxu0 }
 0x8e3   : > { %v10480_v51 = vpop.f32.mrf.mxu1 }
 0x8e4   : > { %v10492_v60 = vpop.f32.mrf.mxu0 }
 0x8e5   : > { %4279 = vadd.xlane.f32.xlu0 %v10382_v42  ;;  %v10488_v5 = vpop.f32.mrf.mxu1 }
 0x8e6   : > { %5069 = vadd.xlane.f32.xlu1 %v10384_v0 }
 0x8e7   : > { %v10498_v40 = vpop.f32.mrf.mxu1 }
 0x8e9   : > { %4543 = vadd.xlane.f32.xlu0 %v10388_v41  ;;  %v10508_v2 = vpop.f32.mrf.mxu1 }
 0x8ea   : > { %4807 = vadd.xlane.f32.xlu1 %v10390_v59 }
 0x8eb   : > { %v10518_v18 = vpop.f32.mrf.mxu1 }
 0x8ed   : > { %4281 = vadd.xlane.f32.xlu0 %v10394_v33  ;;  %v10528_v63 = vpop.f32.mrf.mxu1 }
 0x8ee   : > { %5071 = vadd.xlane.f32.xlu1 %v10396_v22 }
 0x8ef   : > { %v10538_v34 = vpop.f32.mrf.mxu1 }
 0x8f1   : > { %4545 = vadd.xlane.f32.xlu0 %v10400_v3  ;;  %v10548_v20 = vpop.f32.mrf.mxu1 }
 0x8f2   : > { %4809 = vadd.xlane.f32.xlu1 %v10402_v7  ;;  %12709 = vst [vmem:[#allocation52_spill] sm:$0xff] %v10548_v20 }
 0x8f3   : > { %v10558_v19 = vpop.f32.mrf.mxu1 }
 0x8f4   : > { %12713 = vst [vmem:[#allocation54_spill] sm:$0xff] %v10558_v19 }
 0x8f5   : > { %4283 = vadd.xlane.f32.xlu0 %v10406_v39  ;;  %v10568_v17 = vpop.f32.mrf.mxu1 }
 0x8f6   : > { %5073 = vadd.xlane.f32.xlu1 %v10408_v4  ;;  %12717 = vst [vmem:[#allocation15_spill] sm:$0xff] %v10568_v17 }
 0x8f7   : > { %v10578_v31 = vpop.f32.mrf.mxu1 }
 0x8f8   : > { %12721 = vst [vmem:[#allocation28_spill] sm:$0xff] %v10578_v31 }
 0x8f9   : > { %4547 = vadd.xlane.f32.xlu0 %v10412_v9 }
 0x8fa   : > { %4811 = vadd.xlane.f32.xlu1 %v10414_v62 }
 0x8fd   : > { %4285 = vadd.xlane.f32.xlu0 %v10418_v61 }
 0x8fe   : > { %5075 = vadd.xlane.f32.xlu1 %v10420_v14 }
 0x901   : > { %4549 = vadd.xlane.f32.xlu0 %v10424_v27 }
 0x902   : > { %4813 = vadd.xlane.f32.xlu1 %v10426_v32 }
 0x905   : > { %4287 = vadd.xlane.f32.xlu0 %v10430_v53 }
 0x906   : > { %5077 = vadd.xlane.f32.xlu1 %v10432_v43 }
 0x909   : > { %4551 = vadd.xlane.f32.xlu0 %v10436_v57 }
 0x90a   : > { %4815 = vadd.xlane.f32.xlu1 %v10438_v16 }
 0x90d   : > { %4289 = vadd.xlane.f32.xlu0 %v10442_v15 }
 0x90e   : > { %5079 = vadd.xlane.f32.xlu1 %v10444_v55 }
 0x911   : > { %4553 = vadd.xlane.f32.xlu0 %v10448_v52 }
 0x912   : > { %4817 = vadd.xlane.f32.xlu1 %v10450_v28 }
 0x915   : > { %4291 = vadd.xlane.f32.xlu0 %v10454_v11 }
 0x916   : > { %5081 = vadd.xlane.f32.xlu1 %v10456_v30 }
 0x919   : > { %4555 = vadd.xlane.f32.xlu0 %v10460_v6 }
 0x91a   : > { %4819 = vadd.xlane.f32.xlu1 %v10462_v10 }
 0x91d   : > { %4293 = vadd.xlane.f32.xlu0 %v10466_v24 }
 0x91e   : > { %5083 = vadd.xlane.f32.xlu1 %v10468_v38 }
 0x921   : > { %4557 = vadd.xlane.f32.xlu0 %v10472_v44 }
 0x922   : > { %4821 = vadd.xlane.f32.xlu1 %v10474_v13 }
 0x925   : > { %4295 = vadd.xlane.f32.xlu0 %v10478_v54 }
 0x926   : > { %5085 = vadd.xlane.f32.xlu1 %v10480_v51  ;;  %v10484_v37 = vpop.xlane.xlu0 %4261 }
 0x927   : > { %12695 = vst [vmem:[#allocation29_spill] sm:$0xff] %v10484_v37  ;;  %v10502_v37 = vpop.f32.mrf.mxu0 }
 0x929   : > { %4559 = vadd.xlane.f32.xlu0 %v10486_v47 }
 0x92a   : > { %4823 = vadd.xlane.f32.xlu1 %v10488_v5  ;;  %v10496_v48 = vpop.xlane.xlu0 %4525 }
 0x92b   : > { %v10494_v49 = vpop.xlane.xlu1 %4789  ;;  %12697 = vst [vmem:[#allocation9_spill] sm:$0xff] %v10496_v48 }
 0x92c   : > { %12696 = vst [vmem:[#allocation40_spill] sm:$0xff] %v10494_v49  ;;  %v10512_v49 = vpop.f32.mrf.mxu0 }
 0x92d   : > { %4297 = vadd.xlane.f32.xlu0 %v10492_v60 }
 0x92e   : > { %5087 = vadd.xlane.f32.xlu1 %v10498_v40  ;;  %v10506_v26 = vpop.xlane.xlu0 %4263 }
 0x92f   : > { %v10504_v56 = vpop.xlane.xlu1 %5053  ;;  %12699 = vst [vmem:[#allocation67_spill] sm:$0xff] %v10506_v26 }
 0x930   : > { %12698 = vst [vmem:[#allocation25_spill] sm:$0xff] %v10504_v56  ;;  %v10522_v56 = vpop.f32.mrf.mxu0 }
 0x931   : > { %4561 = vadd.xlane.f32.xlu0 %v10502_v37 }
 0x932   : > { %4825 = vadd.xlane.f32.xlu1 %v10508_v2  ;;  %v10516_v25 = vpop.xlane.xlu0 %4527 }
 0x933   : > { %v10514_v48 = vpop.xlane.xlu1 %4791  ;;  %12701 = vst [vmem:[#allocation61_spill] sm:$0xff] %v10516_v25 }
 0x934   : > { %12700 = vst [vmem:[#allocation11_spill] sm:$0xff] %v10514_v48  ;;  %v10532_v48 = vpop.f32.mrf.mxu0 }
 0x935   : > { %4299 = vadd.xlane.f32.xlu0 %v10512_v49 }
 0x936   : > { %5089 = vadd.xlane.f32.xlu1 %v10518_v18  ;;  %v10526_v46 = vpop.xlane.xlu0 %4265 }
 0x937   : > { %v10524_v26 = vpop.xlane.xlu1 %5055  ;;  %12703 = vst [vmem:[#allocation69_spill] sm:$0xff] %v10526_v46 }
 0x938   : > { %12702 = vst [vmem:[#allocation57_spill] sm:$0xff] %v10524_v26  ;;  %v10542_v26 = vpop.f32.mrf.mxu0 }
 0x939   : > { %4563 = vadd.xlane.f32.xlu0 %v10522_v56  ;;  %12706 = vst [vmem:[#allocation37_spill] sm:$0xff] %v10542_v26 }
 0x93a   : > { %4827 = vadd.xlane.f32.xlu1 %v10528_v63  ;;  %v10536_v45 = vpop.xlane.xlu0 %4529 }
 0x93b   : > { %v10534_v25 = vpop.xlane.xlu1 %4793  ;;  %12705 = vst [vmem:[#allocation24_spill] sm:$0xff] %v10536_v45 }
 0x93c   : > { %12704 = vst [vmem:[#allocation31_spill] sm:$0xff] %v10534_v25  ;;  %v10552_v25 = vpop.f32.mrf.mxu0 }
 0x93d   : > { %4301 = vadd.xlane.f32.xlu0 %v10532_v48  ;;  %12710 = vst [vmem:[#allocation38_spill] sm:$0xff] %v10552_v25 }
 0x93e   : > { %5091 = vadd.xlane.f32.xlu1 %v10538_v34  ;;  %v10546_v21 = vpop.xlane.xlu0 %4267 }
 0x93f   : > { %v10544_v46 = vpop.xlane.xlu1 %5057  ;;  %12708 = vst [vmem:[#allocation60_spill] sm:$0xff] %v10546_v21 }
 0x940   : > { %12707 = vst [vmem:[#allocation17_spill] sm:$0xff] %v10544_v46  ;;  %v10562_v46 = vpop.f32.mrf.mxu0 }
 0x941   : > { %4565 = vadd.xlane.f32.xlu0 %v10542_v26  ;;  %12714 = vst [vmem:[#allocation7_spill] sm:$0xff] %v10562_v46 }
 0x942   : > { %4829 = vadd.xlane.f32.xlu1 %v10548_v20  ;;  %v10556_v50 = vpop.xlane.xlu0 %4531 }
 0x943   : > { %v10554_v45 = vpop.xlane.xlu1 %4795  ;;  %12712 = vst [vmem:[#allocation59_spill] sm:$0xff] %v10556_v50 }
 0x944   : > { %12711 = vst [vmem:[#allocation12_spill] sm:$0xff] %v10554_v45  ;;  %v10572_v45 = vpop.f32.mrf.mxu0 }
 0x945   : > { %4303 = vadd.xlane.f32.xlu0 %v10552_v25  ;;  %12718 = vst [vmem:[#allocation33_spill] sm:$0xff] %v10572_v45 }
 0x946   : > { %5093 = vadd.xlane.f32.xlu1 %v10558_v19  ;;  %v10566_v36 = vpop.xlane.xlu0 %4269 }
 0x947   : > { %v10564_v21 = vpop.xlane.xlu1 %5059  ;;  %12716 = vst [vmem:[#allocation53_spill] sm:$0xff] %v10566_v36 }
 0x948   : > { %12715 = vst [vmem:[#allocation63_spill] sm:$0xff] %v10564_v21  ;;  %v10582_v21 = vpop.f32.mrf.mxu0 }
 0x949   : > { %4567 = vadd.xlane.f32.xlu0 %v10562_v46  ;;  %12722 = vst [vmem:[#allocation18_spill] sm:$0xff] %v10582_v21 }
 0x94a   : > { %4831 = vadd.xlane.f32.xlu1 %v10568_v17  ;;  %v10576_v12 = vpop.xlane.xlu0 %4533  ;;  %v10588_v17 = vpop.f32.mrf.mxu1 }
 0x94b   : > { %v10574_v50 = vpop.xlane.xlu1 %4797  ;;  %12720 = vst [vmem:[#allocation116_spill] sm:$0xff] %v10576_v12  ;;  %12725 = vst [vmem:[#allocation71_spill] sm:$0xff] %v10588_v17 }
 0x94c   : > { %12719 = vst [vmem:[#allocation26_spill] sm:$0xff] %v10574_v50  ;;  %v10592_v50 = vpop.f32.mrf.mxu0 }
 0x94d   : > { %4305 = vadd.xlane.f32.xlu0 %v10572_v45  ;;  %12726 = vst [vmem:[#allocation6_spill] sm:$0xff] %v10592_v50 }
 0x94e   : > { %5095 = vadd.xlane.f32.xlu1 %v10578_v31  ;;  %v10586_v8 = vpop.xlane.xlu0 %4271  ;;  %v10598_v31 = vpop.f32.mrf.mxu1 }
 0x94f   : > { %v10584_v36 = vpop.xlane.xlu1 %5061  ;;  %12724 = vst [vmem:[#allocation56_spill] sm:$0xff] %v10586_v8  ;;  %12729 = vst [vmem:[#allocation39_spill] sm:$0xff] %v10598_v31 }
 0x950   : > { %12723 = vst [vmem:[#allocation32_spill] sm:$0xff] %v10584_v36  ;;  %v10602_v36 = vpop.f32.mrf.mxu0 }
 0x951   : > { %4569 = vadd.xlane.f32.xlu0 %v10582_v21  ;;  %12730 = vst [vmem:[#allocation36_spill] sm:$0xff] %v10602_v36 }
 0x952   : > { %4833 = vadd.xlane.f32.xlu1 %v10588_v17  ;;  %v10596_v46 = vpop.xlane.xlu0 %4535  ;;  %v10608_v17 = vpop.f32.mrf.mxu1 }
 0x953   : > { %v10594_v12 = vpop.xlane.xlu1 %4799  ;;  %12728 = vst [vmem:[#allocation65_spill] sm:$0xff] %v10596_v46  ;;  %12733 = vst [vmem:[#allocation122_spill] sm:$0xff] %v10608_v17 }
 0x954   : > { %12727 = vst [vmem:[#allocation35_spill] sm:$0xff] %v10594_v12  ;;  %v10616_v21 = vpop.f32.mrf.mxu1 }
 0x955   : > { %4307 = vadd.xlane.f32.xlu0 %v10592_v50  ;;  %12736 = vst [vmem:[#allocation125_spill] sm:$0xff] %v10616_v21 }
 0x956   : > { %5097 = vadd.xlane.f32.xlu1 %v10598_v31  ;;  %v10606_v45 = vpop.xlane.xlu0 %4273 }
 0x957   : > { %v10604_v8 = vpop.xlane.xlu1 %5063  ;;  %12732 = vst [vmem:[#allocation121_spill] sm:$0xff] %v10606_v45 }
 0x958   : > { %12731 = vst [vmem:[#allocation120_spill] sm:$0xff] %v10604_v8 }
 0x959   : > { %4571 = vadd.xlane.f32.xlu0 %v10602_v36 }
 0x95a   : > { %4835 = vadd.xlane.f32.xlu1 %v10608_v17  ;;  %v10614_v46 = vpop.xlane.xlu0 %4537 }
 0x95b   : > { %v10612_v12 = vpop.xlane.xlu1 %4801  ;;  %12735 = vst [vmem:[#allocation124_spill] sm:$0xff] %v10614_v46 }
 0x95c   : > { %12734 = vst [vmem:[#allocation123_spill] sm:$0xff] %v10612_v12 }
 0x95e   : > { %5099 = vadd.xlane.f32.xlu1 %v10616_v21  ;;  %v10621_v31 = vpop.xlane.xlu0 %4275 }
 0x95f   : > { %v10619_v50 = vpop.xlane.xlu1 %5065  ;;  %12738 = vst [vmem:[#allocation127_spill] sm:$0xff] %v10621_v31 }
 0x960   : > { %12737 = vst [vmem:[#allocation126_spill] sm:$0xff] %v10619_v50 }
 0x962   : > { %v4540_v45 = vpop.xlane.xlu0 %4539 }
 0x963   : > { %v10623_v8 = vpop.xlane.xlu1 %4803  ;;  %v4580_v25 = vmul.f32 0.0078125, %v4540_v45 }
 0x964   : > { %12739 = vst [vmem:[#allocation128_spill] sm:$0xff] %v10623_v8 }
 0x965   : > { %v10626_v17 = vsub.f32 %v10364_v23, %v4580_v25 }
 0x966   : > { %v4278_v19 = vpop.xlane.xlu0 %4277 }
 0x967   : > { %v5068_v36 = vpop.xlane.xlu1 %5067  ;;  %v4317_v26 = vmul.f32 0.0078125, %v4278_v19  ;;  %v4628_v46 = vmul.f32 %v10626_v17, %v10626_v17 }
 0x968   : > { %v5108_v12 = vmul.f32 0.0078125, %v5068_v36 }
 0x969   : > { %v10634_v50 = vsub.f32 %v10370_v29, %v4317_v26  ;;  %4659 = vadd.xlane.f32.xlu0 %v4628_v46 }
 0x96a   : > { %v10631_v21 = vsub.f32 %v10372_v35, %v5108_v12  ;;  %v4542_v31 = vpop.xlane.xlu0 %4541 }
 0x96b   : > { %12740 = vst [vmem:[#allocation129_spill] sm:$0xff] %v10634_v50  ;;  %v4806_v8 = vpop.xlane.xlu1 %4805  ;;  %v4581_v20 = vmul.f32 0.0078125, %v4542_v31  ;;  %v4365_v36 = vmul.f32 %v10634_v50, %v10634_v50 }
 0x96c   : > { %v4845_v45 = vmul.f32 0.0078125, %v4806_v8  ;;  %v5156_v23 = vmul.f32 %v10631_v21, %v10631_v21 }
 0x96d   : > { %v10644_v35 = vsub.f32 %v10376_v58, %v4581_v20  ;;  %4397 = vadd.xlane.f32.xlu0 %v4365_v36 }
 0x96e   : > { %v10641_v25 = vsub.f32 %v10378_v1, %v4845_v45  ;;  %5187 = vadd.xlane.f32.xlu1 %v5156_v23  ;;  %v4280_v12 = vpop.xlane.xlu0 %4279 }
 0x96f   : > { %12742 = vst [vmem:[#allocation131_spill] sm:$0xff] %v10644_v35  ;;  %v5070_v29 = vpop.xlane.xlu1 %5069  ;;  %v4318_v46 = vmul.f32 0.0078125, %v4280_v12  ;;  %v4629_v8 = vmul.f32 %v10644_v35, %v10644_v35  ;;  %v12859_v35 = vld [vmem:[#allocation77_spill] sm:$0xff] }
 0x970   : > { %12741 = vst [vmem:[#allocation130_spill] sm:$0xff] %v10641_v25  ;;  %v5109_v26 = vmul.f32 0.0078125, %v5070_v29  ;;  %v4893_v31 = vmul.f32 %v10641_v25, %v10641_v25 }
 0x971   : > { %v10654_v1 = vsub.f32 %v10382_v42, %v4318_v46  ;;  %4661 = vadd.xlane.f32.xlu0 %v4629_v8 }
 0x972   : > { %v10651_v19 = vsub.f32 %v10384_v0, %v5109_v26  ;;  %4925 = vadd.xlane.f32.xlu1 %v4893_v31  ;;  %v4544_v20 = vpop.xlane.xlu0 %4543 }
 0x973   : > { %12744 = vst [vmem:[#allocation133_spill] sm:$0xff] %v10654_v1  ;;  %v4808_v58 = vpop.xlane.xlu1 %4807  ;;  %v4582_v23 = vmul.f32 0.0078125, %v4544_v20  ;;  %v4366_v29 = vmul.f32 %v10654_v1, %v10654_v1  ;;  %v12856_v1 = vld [vmem:[#allocation85_spill] sm:$0xff] }
 0x974   : > { %12743 = vst [vmem:[#allocation132_spill] sm:$0xff] %v10651_v19  ;;  %v4846_v45 = vmul.f32 0.0078125, %v4808_v58  ;;  %v5157_v36 = vmul.f32 %v10651_v19, %v10651_v19 }
 0x975   : > { %v10664_v0 = vsub.f32 %v10388_v41, %v4582_v23  ;;  %4399 = vadd.xlane.f32.xlu0 %v4366_v29 }
 0x976   : > { %v10661_v12 = vsub.f32 %v10390_v59, %v4846_v45  ;;  %5189 = vadd.xlane.f32.xlu1 %v5157_v36  ;;  %v4282_v26 = vpop.xlane.xlu0 %4281 }
 0x977   : > { %12746 = vst [vmem:[#allocation135_spill] sm:$0xff] %v10664_v0  ;;  %v5072_v42 = vpop.xlane.xlu1 %5071  ;;  %v4319_v31 = vmul.f32 0.0078125, %v4282_v26  ;;  %v4630_v58 = vmul.f32 %v10664_v0, %v10664_v0 }
 0x978   : > { %12745 = vst [vmem:[#allocation134_spill] sm:$0xff] %v10661_v12  ;;  %v5110_v46 = vmul.f32 0.0078125, %v5072_v42  ;;  %v4894_v8 = vmul.f32 %v10661_v12, %v10661_v12 }
 0x979   : > { %v10674_v59 = vsub.f32 %v10394_v33, %v4319_v31  ;;  %4663 = vadd.xlane.f32.xlu0 %v4630_v58 }
 0x97a   : > { %v10671_v20 = vsub.f32 %v10396_v22, %v5110_v46  ;;  %4927 = vadd.xlane.f32.xlu1 %v4894_v8  ;;  %v4546_v45 = vpop.xlane.xlu0 %4545 }
 0x97b   : > { %12748 = vst [vmem:[#allocation137_spill] sm:$0xff] %v10674_v59  ;;  %v4810_v41 = vpop.xlane.xlu1 %4809  ;;  %v4583_v36 = vmul.f32 0.0078125, %v4546_v45  ;;  %v4367_v42 = vmul.f32 %v10674_v59, %v10674_v59 }
 0x97c   : > { %12747 = vst [vmem:[#allocation136_spill] sm:$0xff] %v10671_v20  ;;  %v4847_v23 = vmul.f32 0.0078125, %v4810_v41  ;;  %v5158_v29 = vmul.f32 %v10671_v20, %v10671_v20 }
 0x97d   : > { %v10684_v22 = vsub.f32 %v10400_v3, %v4583_v36  ;;  %4401 = vadd.xlane.f32.xlu0 %v4367_v42 }
 0x97e   : > { %v10681_v26 = vsub.f32 %v10402_v7, %v4847_v23  ;;  %5191 = vadd.xlane.f32.xlu1 %v5158_v29  ;;  %v4284_v46 = vpop.xlane.xlu0 %4283 }
 0x97f   : > { %12750 = vst [vmem:[#allocation139_spill] sm:$0xff] %v10684_v22  ;;  %v5074_v33 = vpop.xlane.xlu1 %5073  ;;  %v4320_v8 = vmul.f32 0.0078125, %v4284_v46  ;;  %v4631_v41 = vmul.f32 %v10684_v22, %v10684_v22 }
 0x980   : > { %12749 = vst [vmem:[#allocation138_spill] sm:$0xff] %v10681_v26  ;;  %v5111_v31 = vmul.f32 0.0078125, %v5074_v33  ;;  %v4895_v58 = vmul.f32 %v10681_v26, %v10681_v26 }
 0x981   : > { %v10694_v7 = vsub.f32 %v10406_v39, %v4320_v8  ;;  %4665 = vadd.xlane.f32.xlu0 %v4631_v41 }
 0x982   : > { %v10691_v45 = vsub.f32 %v10408_v4, %v5111_v31  ;;  %4929 = vadd.xlane.f32.xlu1 %v4895_v58  ;;  %v4548_v23 = vpop.xlane.xlu0 %4547 }
 0x983   : > { %12752 = vst [vmem:[#allocation141_spill] sm:$0xff] %v10694_v7  ;;  %v4812_v3 = vpop.xlane.xlu1 %4811  ;;  %v4584_v29 = vmul.f32 0.0078125, %v4548_v23  ;;  %v4368_v33 = vmul.f32 %v10694_v7, %v10694_v7  ;;  %v12790_v7 = vld [vmem:[#allocation122_spill] sm:$0xff] }
 0x984   : > { %12751 = vst [vmem:[#allocation140_spill] sm:$0xff] %v10691_v45  ;;  %v4848_v36 = vmul.f32 0.0078125, %v4812_v3  ;;  %v5159_v42 = vmul.f32 %v10691_v45, %v10691_v45 }
 0x985   : > { %v10704_v4 = vsub.f32 %v10412_v9, %v4584_v29  ;;  %4403 = vadd.xlane.f32.xlu0 %v4368_v33 }
 0x986   : > { %v10701_v46 = vsub.f32 %v10414_v62, %v4848_v36  ;;  %5193 = vadd.xlane.f32.xlu1 %v5159_v42  ;;  %v4286_v31 = vpop.xlane.xlu0 %4285 }
 0x987   : > { %12754 = vst [vmem:[#allocation143_spill] sm:$0xff] %v10704_v4  ;;  %v5076_v39 = vpop.xlane.xlu1 %5075  ;;  %v4321_v58 = vmul.f32 0.0078125, %v4286_v31  ;;  %v4632_v3 = vmul.f32 %v10704_v4, %v10704_v4  ;;  %v12769_v4 = vld [vmem:[#allocation54_spill] sm:$0xff] }
 0x988   : > { %12753 = vst [vmem:[#allocation142_spill] sm:$0xff] %v10701_v46  ;;  %v5112_v8 = vmul.f32 0.0078125, %v5076_v39  ;;  %v4896_v41 = vmul.f32 %v10701_v46, %v10701_v46 }
 0x989   : > { %v10714_v62 = vsub.f32 %v10418_v61, %v4321_v58  ;;  %4667 = vadd.xlane.f32.xlu0 %v4632_v3 }
 0x98a   : > { %v10711_v23 = vsub.f32 %v10420_v14, %v5112_v8  ;;  %4931 = vadd.xlane.f32.xlu1 %v4896_v41  ;;  %v4550_v36 = vpop.xlane.xlu0 %4549 }
 0x98b   : > { %v4814_v9 = vpop.xlane.xlu1 %4813  ;;  %v4585_v42 = vmul.f32 0.0078125, %v4550_v36  ;;  %v4369_v39 = vmul.f32 %v10714_v62, %v10714_v62 }
 0x98c   : > { %12755 = vst [vmem:[#allocation144_spill] sm:$0xff] %v10711_v23  ;;  %v4849_v29 = vmul.f32 0.0078125, %v4814_v9  ;;  %v5160_v33 = vmul.f32 %v10711_v23, %v10711_v23 }
 0x98d   : > { %v10724_v14 = vsub.f32 %v10424_v27, %v4585_v42  ;;  %4405 = vadd.xlane.f32.xlu0 %v4369_v39 }
 0x98e   : > { %v10721_v31 = vsub.f32 %v10426_v32, %v4849_v29  ;;  %5195 = vadd.xlane.f32.xlu1 %v5160_v33  ;;  %v4288_v8 = vpop.xlane.xlu0 %4287 }
 0x98f   : > { %v5078_v61 = vpop.xlane.xlu1 %5077  ;;  %v4322_v41 = vmul.f32 0.0078125, %v4288_v8  ;;  %v4633_v9 = vmul.f32 %v10724_v14, %v10724_v14 }
 0x990   : > { %v5113_v58 = vmul.f32 0.0078125, %v5078_v61  ;;  %v4897_v3 = vmul.f32 %v10721_v31, %v10721_v31 }
 0x991   : > { %v10734_v32 = vsub.f32 %v10430_v53, %v4322_v41  ;;  %4669 = vadd.xlane.f32.xlu0 %v4633_v9 }
 0x992   : > { %v10731_v36 = vsub.f32 %v10432_v43, %v5113_v58  ;;  %4933 = vadd.xlane.f32.xlu1 %v4897_v3  ;;  %v4552_v29 = vpop.xlane.xlu0 %4551 }
 0x993   : > { %v4816_v27 = vpop.xlane.xlu1 %4815  ;;  %v4586_v33 = vmul.f32 0.0078125, %v4552_v29  ;;  %v4370_v61 = vmul.f32 %v10734_v32, %v10734_v32 }
 0x994   : > { %v4850_v42 = vmul.f32 0.0078125, %v4816_v27  ;;  %v5161_v39 = vmul.f32 %v10731_v36, %v10731_v36 }
 0x995   : > { %v10744_v43 = vsub.f32 %v10436_v57, %v4586_v33  ;;  %4407 = vadd.xlane.f32.xlu0 %v4370_v61 }
 0x996   : > { %v10741_v8 = vsub.f32 %v10438_v16, %v4850_v42  ;;  %5197 = vadd.xlane.f32.xlu1 %v5161_v39  ;;  %v4290_v58 = vpop.xlane.xlu0 %4289 }
 0x997   : > { %v5080_v53 = vpop.xlane.xlu1 %5079  ;;  %v4323_v3 = vmul.f32 0.0078125, %v4290_v58  ;;  %v4634_v27 = vmul.f32 %v10744_v43, %v10744_v43 }
 0x998   : > { %v5114_v41 = vmul.f32 0.0078125, %v5080_v53  ;;  %v4898_v9 = vmul.f32 %v10741_v8, %v10741_v8 }
 0x999   : > { %v10754_v16 = vsub.f32 %v10442_v15, %v4323_v3  ;;  %4671 = vadd.xlane.f32.xlu0 %v4634_v27 }
 0x99a   : > { %v10751_v29 = vsub.f32 %v10444_v55, %v5114_v41  ;;  %4935 = vadd.xlane.f32.xlu1 %v4898_v9  ;;  %v4554_v42 = vpop.xlane.xlu0 %4553 }
 0x99b   : > { %v4818_v57 = vpop.xlane.xlu1 %4817  ;;  %v4587_v39 = vmul.f32 0.0078125, %v4554_v42  ;;  %v4371_v53 = vmul.f32 %v10754_v16, %v10754_v16 }
 0x99c   : > { %v4851_v33 = vmul.f32 0.0078125, %v4818_v57  ;;  %v5162_v61 = vmul.f32 %v10751_v29, %v10751_v29 }
 0x99d   : > { %v10764_v55 = vsub.f32 %v10448_v52, %v4587_v39  ;;  %4409 = vadd.xlane.f32.xlu0 %v4371_v53 }
 0x99e   : > { %v10761_v58 = vsub.f32 %v10450_v28, %v4851_v33  ;;  %5199 = vadd.xlane.f32.xlu1 %v5162_v61  ;;  %v4292_v41 = vpop.xlane.xlu0 %4291 }
 0x99f   : > { %v5082_v15 = vpop.xlane.xlu1 %5081  ;;  %v4324_v9 = vmul.f32 0.0078125, %v4292_v41  ;;  %v4635_v57 = vmul.f32 %v10764_v55, %v10764_v55 }
 0x9a0   : > { %v5115_v3 = vmul.f32 0.0078125, %v5082_v15  ;;  %v4899_v27 = vmul.f32 %v10761_v58, %v10761_v58 }
 0x9a1   : > { %v10774_v28 = vsub.f32 %v10454_v11, %v4324_v9  ;;  %4673 = vadd.xlane.f32.xlu0 %v4635_v57 }
 0x9a2   : > { %v10771_v42 = vsub.f32 %v10456_v30, %v5115_v3  ;;  %4937 = vadd.xlane.f32.xlu1 %v4899_v27  ;;  %v4556_v33 = vpop.xlane.xlu0 %4555 }
 0x9a3   : > { %v4820_v52 = vpop.xlane.xlu1 %4819  ;;  %v4588_v61 = vmul.f32 0.0078125, %v4556_v33  ;;  %v4372_v15 = vmul.f32 %v10774_v28, %v10774_v28 }
 0x9a4   : > { %v4852_v39 = vmul.f32 0.0078125, %v4820_v52  ;;  %v5163_v53 = vmul.f32 %v10771_v42, %v10771_v42 }
 0x9a5   : > { %v10784_v30 = vsub.f32 %v10460_v6, %v4588_v61  ;;  %4411 = vadd.xlane.f32.xlu0 %v4372_v15 }
 0x9a6   : > { %v10781_v41 = vsub.f32 %v10462_v10, %v4852_v39  ;;  %5201 = vadd.xlane.f32.xlu1 %v5163_v53  ;;  %v4294_v3 = vpop.xlane.xlu0 %4293 }
 0x9a7   : > { %v5084_v11 = vpop.xlane.xlu1 %5083  ;;  %v4325_v27 = vmul.f32 0.0078125, %v4294_v3  ;;  %v4636_v52 = vmul.f32 %v10784_v30, %v10784_v30 }
 0x9a8   : > { %v5116_v9 = vmul.f32 0.0078125, %v5084_v11  ;;  %v4900_v57 = vmul.f32 %v10781_v41, %v10781_v41 }
 0x9a9   : > { %v10794_v10 = vsub.f32 %v10466_v24, %v4325_v27  ;;  %4675 = vadd.xlane.f32.xlu0 %v4636_v52 }
 0x9aa   : > { %v10791_v33 = vsub.f32 %v10468_v38, %v5116_v9  ;;  %4939 = vadd.xlane.f32.xlu1 %v4900_v57  ;;  %v4558_v39 = vpop.xlane.xlu0 %4557 }
 0x9ab   : > { %v4822_v6 = vpop.xlane.xlu1 %4821  ;;  %v4589_v53 = vmul.f32 0.0078125, %v4558_v39  ;;  %v4373_v11 = vmul.f32 %v10794_v10, %v10794_v10 }
 0x9ac   : > { %v4853_v61 = vmul.f32 0.0078125, %v4822_v6  ;;  %v5164_v15 = vmul.f32 %v10791_v33, %v10791_v33 }
 0x9ad   : > { %v10804_v38 = vsub.f32 %v10472_v44, %v4589_v53  ;;  %4413 = vadd.xlane.f32.xlu0 %v4373_v11 }
 0x9ae   : > { %v10801_v3 = vsub.f32 %v10474_v13, %v4853_v61  ;;  %5203 = vadd.xlane.f32.xlu1 %v5164_v15  ;;  %v4296_v9 = vpop.xlane.xlu0 %4295 }
 0x9af   : > { %v5086_v24 = vpop.xlane.xlu1 %5085  ;;  %v4326_v57 = vmul.f32 0.0078125, %v4296_v9  ;;  %v4637_v6 = vmul.f32 %v10804_v38, %v10804_v38 }
 0x9b0   : > { %v5117_v27 = vmul.f32 0.0078125, %v5086_v24  ;;  %v4901_v52 = vmul.f32 %v10801_v3, %v10801_v3 }
 0x9b1   : > { %v10814_v13 = vsub.f32 %v10478_v54, %v4326_v57  ;;  %4677 = vadd.xlane.f32.xlu0 %v4637_v6 }
 0x9b2   : > { %v10811_v39 = vsub.f32 %v10480_v51, %v5117_v27  ;;  %4941 = vadd.xlane.f32.xlu1 %v4901_v52  ;;  %v4560_v61 = vpop.xlane.xlu0 %4559 }
 0x9b3   : > { %v4824_v44 = vpop.xlane.xlu1 %4823  ;;  %v4590_v15 = vmul.f32 0.0078125, %v4560_v61  ;;  %v4374_v24 = vmul.f32 %v10814_v13, %v10814_v13 }
 0x9b4   : > { %v4854_v53 = vmul.f32 0.0078125, %v4824_v44  ;;  %v5165_v11 = vmul.f32 %v10811_v39, %v10811_v39 }
 0x9b5   : > { %v10824_v51 = vsub.f32 %v10486_v47, %v4590_v15  ;;  %4415 = vadd.xlane.f32.xlu0 %v4374_v24 }
 0x9b6   : > { %v10821_v9 = vsub.f32 %v10488_v5, %v4854_v53  ;;  %5205 = vadd.xlane.f32.xlu1 %v5165_v11  ;;  %v4298_v27 = vpop.xlane.xlu0 %4297 }
 0x9b7   : > { %v5088_v54 = vpop.xlane.xlu1 %5087  ;;  %v4327_v52 = vmul.f32 0.0078125, %v4298_v27  ;;  %v4638_v44 = vmul.f32 %v10824_v51, %v10824_v51 }
 0x9b8   : > { %v5118_v57 = vmul.f32 0.0078125, %v5088_v54  ;;  %v4902_v6 = vmul.f32 %v10821_v9, %v10821_v9 }
 0x9b9   : > { %v10834_v5 = vsub.f32 %v10492_v60, %v4327_v52  ;;  %4679 = vadd.xlane.f32.xlu0 %v4638_v44 }
 0x9ba   : > { %v10831_v61 = vsub.f32 %v10498_v40, %v5118_v57  ;;  %4943 = vadd.xlane.f32.xlu1 %v4902_v6  ;;  %v4562_v53 = vpop.xlane.xlu0 %4561 }
 0x9bb   : > { %12756 = vst [vmem:[#allocation145_spill] sm:$0xff] %v10834_v5  ;;  %v4826_v47 = vpop.xlane.xlu1 %4825  ;;  %v4591_v11 = vmul.f32 0.0078125, %v4562_v53  ;;  %v4375_v54 = vmul.f32 %v10834_v5, %v10834_v5 }
 0x9bc   : > { %v4855_v15 = vmul.f32 0.0078125, %v4826_v47  ;;  %v5166_v24 = vmul.f32 %v10831_v61, %v10831_v61 }
 0x9bd   : > { %v10844_v40 = vsub.f32 %v10502_v37, %v4591_v11  ;;  %4417 = vadd.xlane.f32.xlu0 %v4375_v54 }
 0x9be   : > { %v10841_v27 = vsub.f32 %v10508_v2, %v4855_v15  ;;  %5207 = vadd.xlane.f32.xlu1 %v5166_v24  ;;  %v4300_v57 = vpop.xlane.xlu0 %4299 }
 0x9bf   : > { %12758 = vst [vmem:[#allocation147_spill] sm:$0xff] %v10844_v40  ;;  %v5090_v60 = vpop.xlane.xlu1 %5089  ;;  %v4328_v6 = vmul.f32 0.0078125, %v4300_v57  ;;  %v4639_v47 = vmul.f32 %v10844_v40, %v10844_v40 }
 0x9c0   : > { %12757 = vst [vmem:[#allocation146_spill] sm:$0xff] %v10841_v27  ;;  %v5119_v52 = vmul.f32 0.0078125, %v5090_v60  ;;  %v4903_v44 = vmul.f32 %v10841_v27, %v10841_v27 }
 0x9c1   : > { %v10854_v2 = vsub.f32 %v10512_v49, %v4328_v6  ;;  %4681 = vadd.xlane.f32.xlu0 %v4639_v47 }
 0x9c2   : > { %v10851_v53 = vsub.f32 %v10518_v18, %v5119_v52  ;;  %4945 = vadd.xlane.f32.xlu1 %v4903_v44  ;;  %v4564_v15 = vpop.xlane.xlu0 %4563 }
 0x9c3   : > { %12760 = vst [vmem:[#allocation149_spill] sm:$0xff] %v10854_v2  ;;  %v4828_v37 = vpop.xlane.xlu1 %4827  ;;  %v4592_v24 = vmul.f32 0.0078125, %v4564_v15  ;;  %v4376_v60 = vmul.f32 %v10854_v2, %v10854_v2 }
 0x9c4   : > { %12759 = vst [vmem:[#allocation148_spill] sm:$0xff] %v10851_v53  ;;  %v4856_v11 = vmul.f32 0.0078125, %v4828_v37  ;;  %v5167_v54 = vmul.f32 %v10851_v53, %v10851_v53 }
 0x9c5   : > { %v10864_v18 = vsub.f32 %v10522_v56, %v4592_v24  ;;  %4419 = vadd.xlane.f32.xlu0 %v4376_v60 }
 0x9c6   : > { %v10861_v57 = vsub.f32 %v10528_v63, %v4856_v11  ;;  %5209 = vadd.xlane.f32.xlu1 %v5167_v54  ;;  %v4302_v52 = vpop.xlane.xlu0 %4301 }
 0x9c7   : > { %12762 = vst [vmem:[#allocation151_spill] sm:$0xff] %v10864_v18  ;;  %v5092_v49 = vpop.xlane.xlu1 %5091  ;;  %v4329_v44 = vmul.f32 0.0078125, %v4302_v52  ;;  %v4640_v37 = vmul.f32 %v10864_v18, %v10864_v18  ;;  %v12765_v52 = vld [vmem:[#allocation52_spill] sm:$0xff] }
 0x9c8   : > { %12761 = vst [vmem:[#allocation150_spill] sm:$0xff] %v10861_v57  ;;  %v5120_v6 = vmul.f32 0.0078125, %v5092_v49  ;;  %v4904_v47 = vmul.f32 %v10861_v57, %v10861_v57 }
 0x9c9   : > { %v10874_v63 = vsub.f32 %v10532_v48, %v4329_v44  ;;  %4683 = vadd.xlane.f32.xlu0 %v4640_v37 }
 0x9ca   : > { %v10871_v15 = vsub.f32 %v10538_v34, %v5120_v6  ;;  %4947 = vadd.xlane.f32.xlu1 %v4904_v47  ;;  %v4566_v11 = vpop.xlane.xlu0 %4565  ;;  %v12767_v34 = vld [vmem:[#allocation37_spill] sm:$0xff] }
 0x9cb   : > { %12764 = vst [vmem:[#allocation153_spill] sm:$0xff] %v10874_v63  ;;  %v4830_v56 = vpop.xlane.xlu1 %4829  ;;  %v4593_v54 = vmul.f32 0.0078125, %v4566_v11  ;;  %v4377_v49 = vmul.f32 %v10874_v63, %v10874_v63 }
 0x9cc   : > { %12763 = vst [vmem:[#allocation152_spill] sm:$0xff] %v10871_v15  ;;  %v4857_v24 = vmul.f32 0.0078125, %v4830_v56  ;;  %v5168_v60 = vmul.f32 %v10871_v15, %v10871_v15 }
 0x9cd   : > { %v10884_v6 = vsub.f32 %v12767_v34, %v4593_v54  ;;  %4421 = vadd.xlane.f32.xlu0 %v4377_v49 }
 0x9ce   : > { %v10881_v23 = vsub.f32 %v12765_v52, %v4857_v24  ;;  %5211 = vadd.xlane.f32.xlu1 %v5168_v60  ;;  %v4304_v44 = vpop.xlane.xlu0 %4303  ;;  %v12771_v24 = vld [vmem:[#allocation38_spill] sm:$0xff] }
 0x9cf   : > { %12768 = vst [vmem:[#allocation37_spill] sm:$0xff] %v10884_v6  ;;  %v5094_v48 = vpop.xlane.xlu1 %5093  ;;  %v4330_v37 = vmul.f32 0.0078125, %v4304_v44  ;;  %v4641_v11 = vmul.f32 %v10884_v6, %v10884_v6 }
 0x9d0   : > { %12766 = vst [vmem:[#allocation52_spill] sm:$0xff] %v10881_v23  ;;  %v5121_v47 = vmul.f32 0.0078125, %v5094_v48  ;;  %v4905_v56 = vmul.f32 %v10881_v23, %v10881_v23  ;;  %v12773_v23 = vld [vmem:[#allocation15_spill] sm:$0xff] }
 0x9d1   : > { %v10894_v52 = vsub.f32 %v12771_v24, %v4330_v37  ;;  %4685 = vadd.xlane.f32.xlu0 %v4641_v11 }
 0x9d2   : > { %v10891_v46 = vsub.f32 %v12769_v4, %v5121_v47  ;;  %4949 = vadd.xlane.f32.xlu1 %v4905_v56  ;;  %v4568_v60 = vpop.xlane.xlu0 %4567  ;;  %v12775_v4 = vld [vmem:[#allocation7_spill] sm:$0xff] }
 0x9d3   : > { %12772 = vst [vmem:[#allocation38_spill] sm:$0xff] %v10894_v52  ;;  %v4832_v54 = vpop.xlane.xlu1 %4831  ;;  %v4594_v34 = vmul.f32 0.0078125, %v4568_v60  ;;  %v4378_v44 = vmul.f32 %v10894_v52, %v10894_v52 }
 0x9d4   : > { %12770 = vst [vmem:[#allocation54_spill] sm:$0xff] %v10891_v46  ;;  %v4858_v49 = vmul.f32 0.0078125, %v4832_v54  ;;  %v5169_v48 = vmul.f32 %v10891_v46, %v10891_v46  ;;  %v12777_v46 = vld [vmem:[#allocation28_spill] sm:$0xff] }
 0x9d5   : > { %v10904_v47 = vsub.f32 %v12775_v4, %v4594_v34  ;;  %4423 = vadd.xlane.f32.xlu0 %v4378_v44 }
 0x9d6   : > { %v10901_v6 = vsub.f32 %v12773_v23, %v4858_v49  ;;  %5213 = vadd.xlane.f32.xlu1 %v5169_v48  ;;  %v4306_v56 = vpop.xlane.xlu0 %4305  ;;  %v12779_v23 = vld [vmem:[#allocation33_spill] sm:$0xff] }
 0x9d7   : > { %12776 = vst [vmem:[#allocation7_spill] sm:$0xff] %v10904_v47  ;;  %v5096_v37 = vpop.xlane.xlu1 %5095  ;;  %v4331_v24 = vmul.f32 0.0078125, %v4306_v56  ;;  %v4642_v60 = vmul.f32 %v10904_v47, %v10904_v47 }
 0x9d8   : > { %12774 = vst [vmem:[#allocation15_spill] sm:$0xff] %v10901_v6  ;;  %v5122_v11 = vmul.f32 0.0078125, %v5096_v37  ;;  %v4906_v54 = vmul.f32 %v10901_v6, %v10901_v6  ;;  %v12781_v6 = vld [vmem:[#allocation71_spill] sm:$0xff] }
 0x9d9   : > { %v10914_v49 = vsub.f32 %v12779_v23, %v4331_v24  ;;  %4687 = vadd.xlane.f32.xlu0 %v4642_v60 }
 0x9da   : > { %v10911_v52 = vsub.f32 %v12777_v46, %v5122_v11  ;;  %4951 = vadd.xlane.f32.xlu1 %v4906_v54  ;;  %v4570_v48 = vpop.xlane.xlu0 %4569  ;;  %v12783_v46 = vld [vmem:[#allocation18_spill] sm:$0xff] }
 0x9db   : > { %12780 = vst [vmem:[#allocation33_spill] sm:$0xff] %v10914_v49  ;;  %v4834_v34 = vpop.xlane.xlu1 %4833  ;;  %v4595_v4 = vmul.f32 0.0078125, %v4570_v48  ;;  %v4379_v56 = vmul.f32 %v10914_v49, %v10914_v49 }
 0x9dc   : > { %12778 = vst [vmem:[#allocation28_spill] sm:$0xff] %v10911_v52  ;;  %v4859_v44 = vmul.f32 0.0078125, %v4834_v34  ;;  %v5170_v37 = vmul.f32 %v10911_v52, %v10911_v52  ;;  %v12785_v52 = vld [vmem:[#allocation39_spill] sm:$0xff] }
 0x9dd   : > { %v10924_v11 = vsub.f32 %v12783_v46, %v4595_v4  ;;  %4425 = vadd.xlane.f32.xlu0 %v4379_v56  ;;  %v12789_v4 = vld [vmem:[#allocation127_spill] sm:$0xff] }
 0x9de   : > { %v10921_v47 = vsub.f32 %v12781_v6, %v4859_v44  ;;  %5215 = vadd.xlane.f32.xlu1 %v5170_v37  ;;  %v4308_v54 = vpop.xlane.xlu0 %4307  ;;  %v12787_v6 = vld [vmem:[#allocation6_spill] sm:$0xff]  ;;  %v4316_v37 = vmul.f32 0.0078125, %v12789_v4 }
 0x9df   : > { %12784 = vst [vmem:[#allocation18_spill] sm:$0xff] %v10924_v11  ;;  %v5098_v24 = vpop.xlane.xlu1 %5097  ;;  %v4332_v23 = vmul.f32 0.0078125, %v4308_v54  ;;  %v4643_v48 = vmul.f32 %v10924_v11, %v10924_v11 }
 0x9e0   : > { %12782 = vst [vmem:[#allocation71_spill] sm:$0xff] %v10921_v47  ;;  %v5123_v60 = vmul.f32 0.0078125, %v5098_v24  ;;  %v4907_v34 = vmul.f32 %v10921_v47, %v10921_v47 }
 0x9e1   : > { %v10934_v44 = vsub.f32 %v12787_v6, %v4332_v23  ;;  %4689 = vadd.xlane.f32.xlu0 %v4643_v48  ;;  %v12795_v6 = vld [vmem:[#allocation73_spill] sm:$0xff] }
 0x9e2   : > { %v10931_v49 = vsub.f32 %v12785_v52, %v5123_v60  ;;  %4953 = vadd.xlane.f32.xlu1 %v4907_v34  ;;  %v4572_v46 = vpop.xlane.xlu0 %4571  ;;  %v12792_v60 = vld [vmem:[#allocation36_spill] sm:$0xff]  ;;  %v10949_v4 = vsub.f32 %v12795_v6, %v4316_v37 }
 0x9e3   : > { %12788 = vst [vmem:[#allocation6_spill] sm:$0xff] %v10934_v44  ;;  %v4836_v56 = vpop.xlane.xlu1 %4835  ;;  %v4596_v54 = vmul.f32 0.0078125, %v4572_v46  ;;  %v4380_v11 = vmul.f32 %v10934_v44, %v10934_v44  ;;  %v12794_v34 = vld [vmem:[#allocation124_spill] sm:$0xff] }
 0x9e4   : > { %12786 = vst [vmem:[#allocation39_spill] sm:$0xff] %v10931_v49  ;;  %v4860_v24 = vmul.f32 0.0078125, %v4836_v56  ;;  %v5171_v47 = vmul.f32 %v10931_v49, %v10931_v49  ;;  %v4579_v48 = vmul.f32 0.0078125, %v12794_v34  ;;  %12796 = vst [vmem:[#allocation36_spill] sm:$0xff] %v10949_v4  ;;  %v12797_v46 = vld [vmem:[#allocation128_spill] sm:$0xff]  ;;  %v12803_v34 = vld [vmem:[#allocation126_spill] sm:$0xff] }
 0x9e5   : > { %v10945_v23 = vsub.f32 %v12792_v60, %v4596_v54  ;;  %4427 = vadd.xlane.f32.xlu0 %v4380_v11  ;;  %v4844_v45 = vmul.f32 0.0078125, %v12797_v46  ;;  %v12801_v60 = vld [vmem:[#allocation30_spill] sm:$0xff]  ;;  %v5107_v6 = vmul.f32 0.0078125, %v12803_v34 }
 0x9e6   : > { %v10942_v52 = vsub.f32 %v12790_v7, %v4860_v24  ;;  %5217 = vadd.xlane.f32.xlu1 %v5171_v47  ;;  %v12798_v24 = vld [vmem:[#allocation125_spill] sm:$0xff]  ;;  %v10961_v37 = vsub.f32 %v12801_v60, %v4579_v48  ;;  %v12804_v46 = vld [vmem:[#allocation58_spill] sm:$0xff]  ;;  %v12809_v48 = vld [vmem:[#allocation123_spill] sm:$0xff] }
 0x9e7   : > { %12793 = vst [vmem:[#allocation122_spill] sm:$0xff] %v10945_v23  ;;  %v5100_v56 = vpop.xlane.xlu1 %5099  ;;  %v4644_v7 = vmul.f32 %v10945_v23, %v10945_v23  ;;  %v12800_v47 = vld [vmem:[#allocation121_spill] sm:$0xff]  ;;  %v4364_v23 = vmul.f32 %v10949_v4, %v10949_v4  ;;  %v12813_v4 = vld [vmem:[#allocation75_spill] sm:$0xff] }
 0x9e8   : > { %12791 = vst [vmem:[#allocation127_spill] sm:$0xff] %v10942_v52  ;;  %v5124_v49 = vmul.f32 0.0078125, %v5100_v56  ;;  %v4908_v44 = vmul.f32 %v10942_v52, %v10942_v52  ;;  %v4315_v11 = vmul.f32 0.0078125, %v12800_v47  ;;  %12802 = vst [vmem:[#allocation73_spill] sm:$0xff] %v10961_v37  ;;  %v10965_v56 = vsub.f32 %v12804_v46, %v4844_v45  ;;  %v12810_v60 = vld [vmem:[#allocation41_spill] sm:$0xff] }
 0x9e9   : > { %4691 = vadd.xlane.f32.xlu0 %v4644_v7  ;;  %v12807_v7 = vld [vmem:[#allocation55_spill] sm:$0xff]  ;;  %v4843_v47 = vmul.f32 0.0078125, %v12809_v48  ;;  %v10977_v34 = vsub.f32 %v12810_v60, %v5107_v6  ;;  %v4627_v46 = vmul.f32 %v10961_v37, %v10961_v37 }
 0x9ea   : > { %v10957_v54 = vsub.f32 %v12798_v24, %v5124_v49  ;;  %4955 = vadd.xlane.f32.xlu1 %v4908_v44  ;;  %12805 = vst [vmem:[#allocation128_spill] sm:$0xff] %v10965_v56  ;;  %v12806_v49 = vld [vmem:[#allocation65_spill] sm:$0xff]  ;;  %v10973_v24 = vsub.f32 %v12807_v7, %v4315_v11  ;;  %v4892_v45 = vmul.f32 %v10965_v56, %v10965_v56  ;;  %v12815_v7 = vld [vmem:[#allocation120_spill] sm:$0xff] }
 0x9eb   : > { %v4578_v44 = vmul.f32 0.0078125, %v12806_v49  ;;  %12811 = vst [vmem:[#allocation121_spill] sm:$0xff] %v10977_v34  ;;  %v5106_v48 = vmul.f32 0.0078125, %v12815_v7  ;;  %v5155_v60 = vmul.f32 %v10977_v34, %v10977_v34  ;;  %v12821_v7 = vld [vmem:[#allocation35_spill] sm:$0xff] }
 0x9ec   : > { %12799 = vst [vmem:[#allocation124_spill] sm:$0xff] %v10957_v54  ;;  %v5172_v52 = vmul.f32 %v10957_v54, %v10957_v54  ;;  %12808 = vst [vmem:[#allocation125_spill] sm:$0xff] %v10973_v24  ;;  %v12816_v54 = vld [vmem:[#allocation22_spill] sm:$0xff]  ;;  %v4363_v56 = vmul.f32 %v10973_v24, %v10973_v24  ;;  %v4842_v63 = vmul.f32 0.0078125, %v12821_v7  ;;  %v12827_v7 = vld [vmem:[#allocation32_spill] sm:$0xff] }
 0x9ed   : > { %4395 = vadd.xlane.f32.xlu0 %v4364_v23  ;;  %v10985_v49 = vsub.f32 %v12813_v4, %v4578_v44  ;;  %v10991_v6 = vsub.f32 %v12816_v54, %v4843_v47  ;;  %v12822_v54 = vld [vmem:[#allocation79_spill] sm:$0xff]  ;;  %v5105_v15 = vmul.f32 0.0078125, %v12827_v7  ;;  %v12833_v7 = vld [vmem:[#allocation26_spill] sm:$0xff] }
 0x9ee   : > { %5219 = vadd.xlane.f32.xlu1 %v5172_v52  ;;  %v12812_v52 = vld [vmem:[#allocation56_spill] sm:$0xff]  ;;  %v11005_v47 = vsub.f32 %v12822_v54, %v5106_v48  ;;  %v12828_v48 = vld [vmem:[#allocation34_spill] sm:$0xff]  ;;  %v4841_v59 = vmul.f32 0.0078125, %v12833_v7  ;;  %v12839_v7 = vld [vmem:[#allocation63_spill] sm:$0xff] }
 0x9ef   : > { %v4314_v23 = vmul.f32 0.0078125, %v12812_v52  ;;  %12814 = vst [vmem:[#allocation30_spill] sm:$0xff] %v10985_v49  ;;  %12817 = vst [vmem:[#allocation126_spill] sm:$0xff] %v10991_v6  ;;  %v12819_v52 = vld [vmem:[#allocation62_spill] sm:$0xff]  ;;  %v4891_v34 = vmul.f32 %v10991_v6, %v10991_v6  ;;  %v11019_v54 = vsub.f32 %v12828_v48, %v4842_v63  ;;  %v12834_v63 = vld [vmem:[#allocation23_spill] sm:$0xff] }
 0x9f0   : > { %12823 = vst [vmem:[#allocation65_spill] sm:$0xff] %v11005_v47  ;;  %v5154_v6 = vmul.f32 %v11005_v47, %v11005_v47  ;;  %v11033_v48 = vsub.f32 %v12834_v63, %v5105_v15  ;;  %v5104_v15 = vmul.f32 0.0078125, %v12839_v7  ;;  %v12840_v63 = vld [vmem:[#allocation42_spill] sm:$0xff]  ;;  %v12845_v7 = vld [vmem:[#allocation12_spill] sm:$0xff] }
 0x9f1   : > { %4657 = vadd.xlane.f32.xlu0 %v4627_v46  ;;  %v10999_v4 = vsub.f32 %v12819_v52, %v4314_v23  ;;  %v12825_v23 = vld [vmem:[#allocation27_spill] sm:$0xff]  ;;  %12829 = vst [vmem:[#allocation123_spill] sm:$0xff] %v11019_v54  ;;  %v4890_v47 = vmul.f32 %v11019_v54, %v11019_v54  ;;  %v11049_v57 = vsub.f32 %v12840_v63, %v4841_v59  ;;  %v4840_v59 = vmul.f32 0.0078125, %v12845_v7  ;;  %v12851_v7 = vld [vmem:[#allocation17_spill] sm:$0xff] }
 0x9f2   : > { %4923 = vadd.xlane.f32.xlu1 %v4892_v45  ;;  %v10987_v11 = vpop.xlane.xlu0 %4659  ;;  %v12818_v45 = vld [vmem:[#allocation116_spill] sm:$0xff]  ;;  %12835 = vst [vmem:[#allocation56_spill] sm:$0xff] %v11033_v48  ;;  %v5153_v54 = vmul.f32 %v11033_v48, %v11033_v48  ;;  %v12846_v63 = vld [vmem:[#allocation83_spill] sm:$0xff] }
 0x9f3   : > { %v4577_v46 = vmul.f32 0.0078125, %v12818_v45  ;;  %12820 = vst [vmem:[#allocation58_spill] sm:$0xff] %v10999_v4  ;;  %12841 = vst [vmem:[#allocation120_spill] sm:$0xff] %v11049_v57  ;;  %v11065_v0 = vsub.f32 %v12846_v63, %v5104_v15  ;;  %v4889_v48 = vmul.f32 %v11049_v57, %v11049_v57  ;;  %v5103_v15 = vmul.f32 0.0078125, %v12851_v7  ;;  %v12852_v63 = vld [vmem:[#allocation43_spill] sm:$0xff] }
 0x9f4   : > { %v11081_v12 = vsub.f32 %v12852_v63, %v4840_v59  ;;  %v12858_v7 = vld [vmem:[#allocation31_spill] sm:$0xff] }
 0x9f5   : > { %4393 = vadd.xlane.f32.xlu0 %v4363_v56  ;;  %v12824_v56 = vld [vmem:[#allocation53_spill] sm:$0xff]  ;;  %v11013_v52 = vsub.f32 %v12825_v23, %v4577_v46  ;;  %v12831_v46 = vld [vmem:[#allocation87_spill] sm:$0xff]  ;;  %12847 = vst [vmem:[#allocation116_spill] sm:$0xff] %v11065_v0  ;;  %v5152_v57 = vmul.f32 %v11065_v0, %v11065_v0  ;;  %v4839_v59 = vmul.f32 0.0078125, %v12858_v7  ;;  %v12864_v7 = vld [vmem:[#allocation94_spill] sm:$0xff] }
 0x9f6   : > { %5185 = vadd.xlane.f32.xlu1 %v5155_v60  ;;  %v11001_v37 = vpop.xlane.xlu0 %4397  ;;  %v4626_v60 = vmul.f32 %v10985_v49, %v10985_v49  ;;  %v4313_v45 = vmul.f32 0.0078125, %v12824_v56  ;;  %12853 = vst [vmem:[#allocation35_spill] sm:$0xff] %v11081_v12 }
 0x9f7   : > { %v5188_v44 = vpop.xlane.xlu1 %5187  ;;  %12826 = vst [vmem:[#allocation55_spill] sm:$0xff] %v11013_v52 }
 0x9f8   : > { %v11027_v23 = vsub.f32 %v12831_v46, %v4313_v45  ;;  %v12837_v45 = vld [vmem:[#allocation44_spill] sm:$0xff]  ;;  %v5228_v63 = vmul.f32 0.0078125, %v5188_v44 }
 0x9f9   : > { %4655 = vadd.xlane.f32.xlu0 %v4626_v60  ;;  %v12830_v60 = vld [vmem:[#allocation59_spill] sm:$0xff] }
 0x9fa   : > { %4921 = vadd.xlane.f32.xlu1 %v4891_v34  ;;  %v11015_v22 = vpop.xlane.xlu0 %4661  ;;  %v4362_v34 = vmul.f32 %v10999_v4, %v10999_v4  ;;  %v4576_v56 = vmul.f32 0.0078125, %v12830_v60  ;;  %12832 = vst [vmem:[#allocation41_spill] sm:$0xff] %v11027_v23 }
 0x9fb   : > { %v4926_v24 = vpop.xlane.xlu1 %4925 }
 0x9fc   : > { %v11041_v46 = vsub.f32 %v12837_v45, %v4576_v56 }
 0x9fd   : > { %4391 = vadd.xlane.f32.xlu0 %v4362_v34  ;;  %v12836_v34 = vld [vmem:[#allocation60_spill] sm:$0xff] }
 0x9fe   : > { %5183 = vadd.xlane.f32.xlu1 %v5154_v6  ;;  %v11029_v26 = vpop.xlane.xlu0 %4399  ;;  %v4625_v6 = vmul.f32 %v11013_v52, %v11013_v52  ;;  %v4312_v60 = vmul.f32 0.0078125, %v12836_v34  ;;  %12838 = vst [vmem:[#allocation75_spill] sm:$0xff] %v11041_v46  ;;  %v12843_v34 = vld [vmem:[#allocation45_spill] sm:$0xff] }
 0x9ff   : > { %v5190_v49 = vpop.xlane.xlu1 %5189 }
 0xa00   : > { %v11057_v45 = vsub.f32 %v12843_v34, %v4312_v60  ;;  %v5229_v40 = vmul.f32 0.0078125, %v5190_v49 }
 0xa01   : > { %4653 = vadd.xlane.f32.xlu0 %v4625_v6  ;;  %v12842_v6 = vld [vmem:[#allocation24_spill] sm:$0xff] }
 0xa02   : > { %4919 = vadd.xlane.f32.xlu1 %v4890_v47  ;;  %v11045_v18 = vpop.xlane.xlu0 %4663  ;;  %v4361_v47 = vmul.f32 %v11027_v23, %v11027_v23  ;;  %v4575_v56 = vmul.f32 0.0078125, %v12842_v6  ;;  %12844 = vst [vmem:[#allocation22_spill] sm:$0xff] %v11057_v45  ;;  %v12849_v6 = vld [vmem:[#allocation81_spill] sm:$0xff] }
 0xa03   : > { %v11043_v4 = vpop.xlane.xlu1 %4927 }
 0xa04   : > { %v11073_v34 = vsub.f32 %v12849_v6, %v4575_v56  ;;  %v4700_v6 = vmul.f32 0.0078125, %v10987_v11  ;;  %v4888_v11 = vmul.f32 %v11081_v12, %v11081_v12  ;;  %v5252_v12 = vadd.f32 1e-05, %v5228_v63  ;;  %v12870_v63 = vld [vmem:[#allocation48_spill] sm:$0xff] }
 0xa05   : > { %4389 = vadd.xlane.f32.xlu0 %v4361_v47  ;;  %v12848_v47 = vld [vmem:[#allocation69_spill] sm:$0xff] }
 0xa06   : > { %5181 = vadd.xlane.f32.xlu1 %v5153_v54  ;;  %v11061_v20 = vpop.xlane.xlu0 %4401  ;;  %v4624_v54 = vmul.f32 %v11041_v46, %v11041_v46  ;;  %v4311_v60 = vmul.f32 0.0078125, %v12848_v47  ;;  %12850 = vst [vmem:[#allocation62_spill] sm:$0xff] %v11073_v34  ;;  %v12855_v46 = vld [vmem:[#allocation61_spill] sm:$0xff]  ;;  %v4724_v50 = vadd.f32 1e-05, %v4700_v6  ;;  %v4438_v6 = vmul.f32 0.0078125, %v11029_v26 }
 0xa07   : > { %v11059_v52 = vpop.xlane.xlu1 %5191  ;;  %v4574_v56 = vmul.f32 0.0078125, %v12855_v46 }
 0xa08   : > { %v11091_v53 = vsub.f32 %v12856_v1, %v4311_v60  ;;  %v12861_v1 = vld [vmem:[#allocation67_spill] sm:$0xff]  ;;  %v4965_v60 = vmul.f32 0.0078125, %v4926_v24  ;;  %6901 = vrsqrt.f32 %v4724_v50  ;;  %v4462_v50 = vadd.f32 1e-05, %v4438_v6 }
 0xa09   : > { %4651 = vadd.xlane.f32.xlu0 %v4624_v54  ;;  %v12854_v54 = vld [vmem:[#allocation29_spill] sm:$0xff]  ;;  %v4310_v46 = vmul.f32 0.0078125, %v12861_v1  ;;  %v11111_v25 = vsub.f32 %v12864_v7, %v4574_v56  ;;  %6903 = vrsqrt.f32 %v5252_v12  ;;  %v5230_v12 = vmul.f32 0.0078125, %v11059_v52 }
 0xa0a   : > { %4917 = vadd.xlane.f32.xlu1 %v4889_v48  ;;  %v11077_v2 = vpop.xlane.xlu0 %4665  ;;  %v4360_v48 = vmul.f32 %v11057_v45, %v11057_v45  ;;  %v4309_v47 = vmul.f32 0.0078125, %v12854_v54  ;;  %12857 = vst [vmem:[#allocation79_spill] sm:$0xff] %v11091_v53  ;;  %v11099_v45 = vsub.f32 %v12859_v35, %v5103_v15  ;;  %v4437_v54 = vmul.f32 0.0078125, %v11001_v37  ;;  %v12866_v37 = vld [vmem:[#allocation57_spill] sm:$0xff] }
 0xa0b   : > { %v11075_v23 = vpop.xlane.xlu1 %4929  ;;  %12865 = vst [vmem:[#allocation32_spill] sm:$0xff] %v11111_v25  ;;  %v4701_v35 = vmul.f32 0.0078125, %v11015_v22  ;;  %v5102_v15 = vmul.f32 0.0078125, %v12866_v37  ;;  %v4359_v24 = vmul.f32 %v11091_v53, %v11091_v53  ;;  %v11129_v49 = vsub.f32 %v12870_v63, %v4310_v46 }
 0xa0c   : > { %12860 = vst [vmem:[#allocation53_spill] sm:$0xff] %v11099_v45  ;;  %v4461_v56 = vadd.f32 1e-05, %v4437_v54  ;;  %v5151_v22 = vmul.f32 %v11099_v45, %v11099_v45  ;;  %v4989_v37 = vadd.f32 1e-05, %v4965_v60  ;;  %v4966_v53 = vmul.f32 0.0078125, %v11043_v4 }
 0xa0d   : > { %4387 = vadd.xlane.f32.xlu0 %v4360_v48  ;;  %v12862_v48 = vld [vmem:[#allocation13_spill] sm:$0xff]  ;;  %v4725_v5 = vadd.f32 1e-05, %v4701_v35  ;;  %v4622_v26 = vmul.f32 %v11111_v25, %v11111_v25  ;;  %v4702_v46 = vmul.f32 0.0078125, %v11045_v18 }
 0xa0e   : > { %5179 = vadd.xlane.f32.xlu1 %v5152_v57  ;;  %v11096_v0 = vpop.xlane.xlu0 %4403  ;;  %v4623_v57 = vmul.f32 %v11073_v34, %v11073_v34  ;;  %v11108_v44 = vsub.f32 %v12862_v48, %v4309_v47  ;;  %v12867_v47 = vld [vmem:[#allocation46_spill] sm:$0xff]  ;;  %v12871_v48 = vld [vmem:[#allocation11_spill] sm:$0xff]  ;;  %6905 = vrsqrt.f32 %v4461_v56  ;;  %v12874_v35 = vld [vmem:[#allocation89_spill] sm:$0xff] }
 0xa0f   : > { %v11094_v19 = vpop.xlane.xlu1 %5193  ;;  %v11122_v1 = vsub.f32 %v12867_v47, %v4839_v59  ;;  %v4838_v7 = vmul.f32 0.0078125, %v12871_v48  ;;  %v12872_v59 = vld [vmem:[#allocation47_spill] sm:$0xff]  ;;  %v5253_v47 = vadd.f32 1e-05, %v5229_v40  ;;  %6907 = vrsqrt.f32 %v4989_v37 }
 0xa10   : > { %12863 = vst [vmem:[#allocation27_spill] sm:$0xff] %v11108_v44  ;;  %v11136_v54 = vsub.f32 %v12872_v59, %v5102_v15  ;;  %6909 = vrsqrt.f32 %v4725_v5  ;;  %v4990_v40 = vadd.f32 1e-05, %v4966_v53  ;;  %v4358_v15 = vmul.f32 %v11129_v49, %v11129_v49  ;;  %v12877_v56 = vld [vmem:[#allocation91_spill] sm:$0xff]  ;;  %v12879_v53 = vld [vmem:[#allocation40_spill] sm:$0xff] }
 0xa11   : > { %4649 = vadd.xlane.f32.xlu0 %v4623_v57  ;;  %12868 = vst [vmem:[#allocation34_spill] sm:$0xff] %v11122_v1  ;;  %v4887_v4 = vmul.f32 %v11122_v1, %v11122_v1  ;;  %v11151_v6 = vsub.f32 %v12877_v56, %v4838_v7  ;;  %6911 = vrsqrt.f32 %v5253_v47  ;;  %v4726_v59 = vadd.f32 1e-05, %v4702_v46 }
 0xa12   : > { %4915 = vadd.xlane.f32.xlu1 %v4888_v11  ;;  %v11117_v34 = vpop.xlane.xlu0 %4667  ;;  %v12869_v11 = vld [vmem:[#allocation9_spill] sm:$0xff]  ;;  %12873 = vst [vmem:[#allocation59_spill] sm:$0xff] %v11136_v54  ;;  %6913 = vrsqrt.f32 %v4462_v50  ;;  %v5150_v5 = vmul.f32 %v11136_v54, %v11136_v54  ;;  %v4967_v47 = vmul.f32 0.0078125, %v11075_v23  ;;  %v12880_v50 = vld [vmem:[#allocation16_spill] sm:$0xff]  ;;  %v4703_v56 = vmul.f32 0.0078125, %v11077_v2 }
 0xa13   : > { %v11115_v27 = vpop.xlane.xlu1 %4931  ;;  %v4573_v57 = vmul.f32 0.0078125, %v12869_v11  ;;  %12878 = vst [vmem:[#allocation26_spill] sm:$0xff] %v11151_v6  ;;  %v5231_v23 = vmul.f32 0.0078125, %v11094_v19 }
 0xa15   : > { %4385 = vadd.xlane.f32.xlu0 %v4359_v24  ;;  %v11144_v24 = vsub.f32 %v12874_v35, %v4573_v57  ;;  %v4439_v57 = vmul.f32 0.0078125, %v11061_v20  ;;  %v11169_v2 = vpop.eup %6901 }
 0xa16   : > { %5177 = vadd.xlane.f32.xlu1 %v5151_v22  ;;  %v4406_v63 = vpop.xlane.xlu0 %4405  ;;  %v12876_v22 = vld [vmem:[#allocation25_spill] sm:$0xff] }
 0xa17   : > { %v11139_v11 = vpop.xlane.xlu1 %5195  ;;  %v4441_v60 = vmul.f32 0.0078125, %v4406_v63  ;;  %12875 = vst [vmem:[#allocation87_spill] sm:$0xff] %v11144_v24  ;;  %v5101_v48 = vmul.f32 0.0078125, %v12876_v22  ;;  %v4621_v7 = vmul.f32 %v11144_v24, %v11144_v24  ;;  %v4463_v22 = vadd.f32 1e-05, %v4439_v57 }
 0xa19   : > { %v4465_v18 = vadd.f32 1e-05, %v4441_v60  ;;  %4647 = vadd.xlane.f32.xlu0 %v4622_v26  ;;  %v4837_v26 = vmul.f32 0.0078125, %v12879_v53  ;;  %v5254_v60 = vadd.f32 1e-05, %v5230_v12  ;;  %v4440_v53 = vmul.f32 0.0078125, %v11096_v0 }
 0xa1a   : > { %4913 = vadd.xlane.f32.xlu1 %v4887_v4  ;;  %v4670_v35 = vpop.xlane.xlu0 %4669  ;;  %v11161_v4 = vsub.f32 %v12880_v50, %v5101_v48  ;;  %v4991_v48 = vadd.f32 1e-05, %v4967_v47 }
 0xa1b   : > { %v4934_v63 = vpop.xlane.xlu1 %4933  ;;  %v4705_v52 = vmul.f32 0.0078125, %v4670_v35  ;;  %6915 = vrsqrt.f32 %v4465_v18 }
 0xa1c   : > { %v4969_v37 = vmul.f32 0.0078125, %v4934_v63  ;;  %6917 = vrsqrt.f32 %v4990_v40  ;;  %12881 = vst [vmem:[#allocation23_spill] sm:$0xff] %v11161_v4  ;;  %v4886_v40 = vmul.f32 %v11151_v6, %v11151_v6  ;;  %v5149_v50 = vmul.f32 %v11161_v4, %v11161_v4 }
 0xa1d   : > { %v4729_v20 = vadd.f32 1e-05, %v4705_v52  ;;  %4383 = vadd.xlane.f32.xlu0 %v4358_v15  ;;  %6919 = vrsqrt.f32 %v4726_v59  ;;  %v4357_v15 = vmul.f32 %v11108_v44, %v11108_v44 }
 0xa1e   : > { %v4993_v46 = vadd.f32 1e-05, %v4969_v37  ;;  %5175 = vadd.xlane.f32.xlu1 %v5150_v5  ;;  %v4408_v12 = vpop.xlane.xlu0 %4407  ;;  %v12882_v37 = vld [vmem:[#allocation14_spill] sm:$0xff]  ;;  %v4727_v5 = vadd.f32 1e-05, %v4703_v56 }
 0xa1f   : > { %v5198_v63 = vpop.xlane.xlu1 %5197  ;;  %v4442_v35 = vmul.f32 0.0078125, %v4408_v12  ;;  %v11172_v52 = vsub.f32 %v12882_v37, %v4837_v26 }
 0xa20   : > { %6921 = vrsqrt.f32 %v4993_v46  ;;  %v5233_v18 = vmul.f32 0.0078125, %v5198_v63  ;;  %v5255_v63 = vadd.f32 1e-05, %v5231_v23 }
 0xa21   : > { %6923 = vrsqrt.f32 %v4729_v20  ;;  %v4466_v57 = vadd.f32 1e-05, %v4442_v35  ;;  %4645 = vadd.xlane.f32.xlu0 %v4621_v7  ;;  %12883 = vst [vmem:[#allocation60_spill] sm:$0xff] %v11172_v52  ;;  %v11175_v20 = vpop.eup %6903  ;;  %v4704_v35 = vmul.f32 0.0078125, %v11117_v34 }
 0xa22   : > { %6925 = vrsqrt.f32 %v5254_v60  ;;  %v5257_v59 = vadd.f32 1e-05, %v5233_v18  ;;  %4911 = vadd.xlane.f32.xlu1 %v4886_v40  ;;  %v4672_v46 = vpop.xlane.xlu0 %4671  ;;  %v11179_v7 = vpop.eup %6905  ;;  %v4464_v18 = vadd.f32 1e-05, %v4440_v53 }
 0xa23   : > { %6927 = vrsqrt.f32 %v4463_v22  ;;  %v4936_v19 = vpop.xlane.xlu1 %4935  ;;  %v4706_v47 = vmul.f32 0.0078125, %v4672_v46  ;;  %v11181_v26 = vpop.eup %6907  ;;  %v4968_v22 = vmul.f32 0.0078125, %v11115_v27  ;;  %v4885_v27 = vmul.f32 %v11172_v52, %v11172_v52  ;;  %v12905_v52 = vld [vmem:[#allocation135_spill] sm:$0xff] }
 0xa24   : > { %6929 = vrsqrt.f32 %v5257_v59  ;;  %v4970_v60 = vmul.f32 0.0078125, %v4936_v19  ;;  %v11184_v12 = vpop.eup %6909  ;;  %v4728_v46 = vadd.f32 1e-05, %v4704_v35 }
 0xa25   : > { %6931 = vrsqrt.f32 %v4466_v57  ;;  %v4730_v56 = vadd.f32 1e-05, %v4706_v47  ;;  %4381 = vadd.xlane.f32.xlu0 %v4357_v15  ;;  %v11187_v37 = vpop.eup %6911  ;;  %v4992_v19 = vadd.f32 1e-05, %v4968_v22 }
 0xa26   : > { %6933 = vrsqrt.f32 %v4991_v48  ;;  %v4994_v0 = vadd.f32 1e-05, %v4970_v60  ;;  %5173 = vadd.xlane.f32.xlu1 %v5149_v50  ;;  %v4410_v59 = vpop.xlane.xlu0 %4409  ;;  %v11191_v48 = vpop.eup %6913  ;;  %v5232_v60 = vmul.f32 0.0078125, %v11139_v11 }
 0xa27   : > { %6935 = vrsqrt.f32 %v4727_v5  ;;  %v5200_v40 = vpop.xlane.xlu1 %5199  ;;  %v4443_v57 = vmul.f32 0.0078125, %v4410_v59 }
 0xa28   : > { %6937 = vrsqrt.f32 %v4994_v0  ;;  %v5234_v23 = vmul.f32 0.0078125, %v5200_v40  ;;  %v6916_v15 = vpop.eup %6915 }
 0xa29   : > { %6939 = vrsqrt.f32 %v4730_v56  ;;  %v4467_v53 = vadd.f32 1e-05, %v4443_v57  ;;  %v11193_v34 = vpop.eup %6917  ;;  %v4513_v47 = vmul.f32 %v6916_v15, %v10714_v62  ;;  %v5256_v62 = vadd.f32 1e-05, %v5232_v60 }
 0xa2a   : > { %6941 = vrsqrt.f32 %v5255_v63  ;;  %v5258_v5 = vadd.f32 1e-05, %v5234_v23  ;;  %4909 = vadd.xlane.f32.xlu1 %v4885_v27  ;;  %v4674_v0 = vpop.xlane.xlu0 %4673  ;;  %v11197_v40 = vpop.eup %6919 }
 0xa2b   : > { %6943 = vrsqrt.f32 %v4464_v18  ;;  %v4938_v50 = vpop.xlane.xlu1 %4937  ;;  %v4707_v59 = vmul.f32 0.0078125, %v4674_v0  ;;  %v5317_v22 = vsub.f32 0.0, %v4513_v47 }
 0xa2c   : > { %6945 = vrsqrt.f32 %v5258_v5  ;;  %v4971_v56 = vmul.f32 0.0078125, %v4938_v50 }
 0xa2d   : > { %v6922_v63 = vpop.eup %6921  ;;  %6947 = vrsqrt.f32 %v4467_v53  ;;  %v4731_v35 = vadd.f32 1e-05, %v4707_v59  ;;  %v5365_v11 = vmul.f32 1.442695, %v5317_v22 }
 0xa2e   : > { %v6924_v23 = vpop.eup %6923  ;;  %6949 = vrsqrt.f32 %v4992_v19  ;;  %v5041_v57 = vmul.f32 %v6922_v63, %v10721_v31  ;;  %v4995_v18 = vadd.f32 1e-05, %v4971_v56  ;;  %v4412_v5 = vpop.xlane.xlu0 %4411 }
 0xa2f   : > { %v11200_v27 = vpop.eup %6925  ;;  %6951 = vrsqrt.f32 %v4728_v46  ;;  %v4777_v15 = vmul.f32 %v6924_v23, %v10724_v14  ;;  %v5202_v4 = vpop.xlane.xlu1 %5201  ;;  %v4444_v47 = vmul.f32 0.0078125, %v4412_v5 }
 0xa30   : > { %v11203_v50 = vpop.eup %6927  ;;  %v5319_v0 = vsub.f32 0.0, %v5041_v57  ;;  %6953 = vrsqrt.f32 %v4995_v18  ;;  %v5235_v53 = vmul.f32 0.0078125, %v5202_v4 }
 0xa31   : > { %v6930_v19 = vpop.eup %6929  ;;  %6955 = vpow2.f32 %v5365_v11  ;;  %v5318_v31 = vsub.f32 0.0, %v4777_v15  ;;  %v4468_v23 = vadd.f32 1e-05, %v4444_v47 }
 0xa32   : > { %v6932_v56 = vpop.eup %6931  ;;  %v5369_v59 = vmul.f32 1.442695, %v5319_v0  ;;  %v5305_v63 = vmul.f32 %v6930_v19, %v10731_v36  ;;  %6957 = vrsqrt.f32 %v4731_v35  ;;  %v5259_v46 = vadd.f32 1e-05, %v5235_v53  ;;  %v4676_v18 = vpop.xlane.xlu0 %4675 }
 0xa33   : > { %v11206_v60 = vpop.eup %6933  ;;  %6959 = vrsqrt.f32 %v5256_v62  ;;  %v5367_v14 = vmul.f32 1.442695, %v5318_v31  ;;  %v4514_v22 = vmul.f32 %v6932_v56, %v10734_v32  ;;  %v4940_v57 = vpop.xlane.xlu1 %4939  ;;  %v4708_v5 = vmul.f32 0.0078125, %v4676_v18 }
 0xa34   : > { %v11209_v4 = vpop.eup %6935  ;;  %6961 = vpow2.f32 %v5369_v59  ;;  %v5320_v11 = vsub.f32 0.0, %v5305_v63  ;;  %v4972_v15 = vmul.f32 0.0078125, %v4940_v57 }
 0xa35   : > { %v6938_v0 = vpop.eup %6937  ;;  %6963 = vpow2.f32 %v5367_v14  ;;  %v5321_v36 = vsub.f32 0.0, %v4514_v22  ;;  %v4732_v56 = vadd.f32 1e-05, %v4708_v5 }
 0xa36   : > { %v6940_v35 = vpop.eup %6939  ;;  %v5371_v53 = vmul.f32 1.442695, %v5320_v11  ;;  %v5042_v19 = vmul.f32 %v6938_v0, %v10741_v8  ;;  %6965 = vrsqrt.f32 %v5259_v46  ;;  %v4996_v62 = vadd.f32 1e-05, %v4972_v15  ;;  %v4414_v63 = vpop.xlane.xlu0 %4413 }
 0xa37   : > { %v11212_v31 = vpop.eup %6941  ;;  %v5373_v32 = vmul.f32 1.442695, %v5321_v36  ;;  %v4778_v47 = vmul.f32 %v6940_v35, %v10744_v43  ;;  %6967 = vrsqrt.f32 %v4468_v23  ;;  %v5204_v59 = vpop.xlane.xlu1 %5203  ;;  %v4445_v18 = vmul.f32 0.0078125, %v4414_v63 }
 0xa38   : > { %v11215_v57 = vpop.eup %6943  ;;  %6969 = vpow2.f32 %v5371_v53  ;;  %v5323_v14 = vsub.f32 0.0, %v5042_v19  ;;  %v5236_v22 = vmul.f32 0.0078125, %v5204_v59 }
 0xa39   : > { %v6946_v11 = vpop.eup %6945  ;;  %6971 = vpow2.f32 %v5373_v32  ;;  %v5322_v8 = vsub.f32 0.0, %v4778_v47  ;;  %v4469_v35 = vadd.f32 1e-05, %v4445_v18 }
 0xa3a   : > { %v6948_v46 = vpop.eup %6947  ;;  %v5377_v15 = vmul.f32 1.442695, %v5323_v14  ;;  %v5306_v0 = vmul.f32 %v6946_v11, %v10751_v29  ;;  %6973 = vrsqrt.f32 %v4996_v62  ;;  %v5260_v36 = vadd.f32 1e-05, %v5236_v22  ;;  %v4678_v19 = vpop.xlane.xlu0 %4677 }
 0xa3b   : > { %v11218_v43 = vpop.eup %6949  ;;  %v5375_v23 = vmul.f32 1.442695, %v5322_v8  ;;  %v4515_v5 = vmul.f32 %v6948_v46, %v10754_v16  ;;  %6975 = vrsqrt.f32 %v4732_v56  ;;  %v4942_v53 = vpop.xlane.xlu1 %4941  ;;  %v4709_v11 = vmul.f32 0.0078125, %v4678_v19 }
 0xa3c   : > { %v11221_v59 = vpop.eup %6951  ;;  %6977 = vpow2.f32 %v5377_v15  ;;  %v5324_v32 = vsub.f32 0.0, %v5306_v0  ;;  %v4973_v47 = vmul.f32 0.0078125, %v4942_v53 }
 0xa3d   : > { %v6954_v63 = vpop.eup %6953  ;;  %6979 = vpow2.f32 %v5375_v23  ;;  %v5325_v14 = vsub.f32 0.0, %v4515_v5 }
 0xa3e   : > { %v6956_v29 = vpop.eup %6955  ;;  %v5379_v62 = vmul.f32 1.442695, %v5324_v32  ;;  %v5043_v22 = vmul.f32 %v6954_v63, %v10761_v58  ;;  %6981 = vrsqrt.f32 %v5260_v36  ;;  %v4997_v18 = vadd.f32 1e-05, %v4973_v47  ;;  %v4416_v54 = vpop.xlane.xlu0 %4415 }
 0xa3f   : > { %v6958_v8 = vpop.eup %6957  ;;  %v5461_v16 = vadd.f32 1.0, %v6956_v29  ;;  %v5381_v56 = vmul.f32 1.442695, %v5325_v14  ;;  %6983 = vrsqrt.f32 %v4469_v35  ;;  %v5206_v46 = vpop.xlane.xlu1 %5205  ;;  %v4733_v35 = vadd.f32 1e-05, %v4709_v11 }
 0xa40   : > { %v11224_v45 = vpop.eup %6959  ;;  %6985 = vpow2.f32 %v5379_v62  ;;  %v5327_v15 = vsub.f32 0.0, %v5043_v22  ;;  %v4779_v0 = vmul.f32 %v6958_v8, %v10764_v55  ;;  %v5237_v23 = vmul.f32 0.0078125, %v5206_v46 }
 0xa41   : > { %v6962_v5 = vpop.eup %6961  ;;  %6987 = vrcp.f32 %v5461_v16  ;;  %v4446_v47 = vmul.f32 0.0078125, %v4416_v54 }
 0xa42   : > { %v11227_v53 = vpop.eup %6963  ;;  %v5463_v58 = vadd.f32 1.0, %v6962_v5  ;;  %6989 = vpow2.f32 %v5381_v56  ;;  %v5385_v36 = vmul.f32 1.442695, %v5327_v15  ;;  %v5326_v19 = vsub.f32 0.0, %v4779_v0  ;;  %v4680_v14 = vpop.xlane.xlu0 %4679 }
 0xa43   : > { %v6966_v32 = vpop.eup %6965  ;;  %6991 = vrsqrt.f32 %v4997_v18  ;;  %v4944_v63 = vpop.xlane.xlu1 %4943  ;;  %v5261_v22 = vadd.f32 1e-05, %v5237_v23  ;;  %v4470_v54 = vadd.f32 1e-05, %v4446_v47 }
 0xa44   : > { %v6968_v29 = vpop.eup %6967  ;;  %6993 = vrcp.f32 %v5463_v58  ;;  %v5383_v62 = vmul.f32 1.442695, %v5326_v19  ;;  %v5307_v55 = vmul.f32 %v6966_v32, %v10771_v42  ;;  %v4974_v23 = vmul.f32 0.0078125, %v4944_v63 }
 0xa45   : > { %v11230_v8 = vpop.eup %6969  ;;  %6995 = vpow2.f32 %v5385_v36  ;;  %v4516_v16 = vmul.f32 %v6968_v29, %v10774_v28  ;;  %v4710_v29 = vmul.f32 0.0078125, %v4680_v14 }
 0xa46   : > { %v6972_v56 = vpop.eup %6971  ;;  %6997 = vpow2.f32 %v5383_v62  ;;  %v5328_v46 = vsub.f32 0.0, %v5307_v55  ;;  %v4418_v5 = vpop.xlane.xlu0 %4417 }
 0xa47   : > { %v6974_v15 = vpop.eup %6973  ;;  %v5465_v18 = vadd.f32 1.0, %v6972_v56  ;;  %v5329_v11 = vsub.f32 0.0, %v4516_v16  ;;  %6999 = vrsqrt.f32 %v4733_v35  ;;  %v5208_v0 = vpop.xlane.xlu1 %5207 }
 0xa48   : > { %v6976_v58 = vpop.eup %6975  ;;  %v5387_v19 = vmul.f32 1.442695, %v5328_v46  ;;  %v5044_v42 = vmul.f32 %v6974_v15, %v10781_v41  ;;  %7001 = vrsqrt.f32 %v5261_v22  ;;  %v4998_v22 = vadd.f32 1e-05, %v4974_v23 }
 0xa49   : > { %v6978_v32 = vpop.eup %6977  ;;  %7003 = vrcp.f32 %v5465_v18  ;;  %v5389_v36 = vmul.f32 1.442695, %v5329_v11  ;;  %v4780_v28 = vmul.f32 %v6976_v58, %v10784_v30  ;;  %v4734_v18 = vadd.f32 1e-05, %v4710_v29 }
 0xa4a   : > { %v11235_v62 = vpop.eup %6979  ;;  %v5467_v55 = vadd.f32 1.0, %v6978_v32  ;;  %7005 = vpow2.f32 %v5387_v19  ;;  %v5331_v35 = vsub.f32 0.0, %v5044_v42  ;;  %v4682_v46 = vpop.xlane.xlu0 %4681  ;;  %v5238_v19 = vmul.f32 0.0078125, %v5208_v0 }
 0xa4b   : > { %v6982_v47 = vpop.eup %6981  ;;  %7007 = vpow2.f32 %v5389_v36  ;;  %v5330_v16 = vsub.f32 0.0, %v4780_v28  ;;  %v4946_v56 = vpop.xlane.xlu1 %4945 }
 0xa4c   : > { %v6984_v24 = vpop.eup %6983  ;;  %7009 = vrcp.f32 %v5467_v55  ;;  %v5393_v41 = vmul.f32 1.442695, %v5331_v35  ;;  %v5308_v63 = vmul.f32 %v6982_v47, %v10791_v33  ;;  %v4447_v35 = vmul.f32 0.0078125, %v4418_v5 }
 0xa4d   : > { %v11238_v15 = vpop.eup %6985  ;;  %v5391_v30 = vmul.f32 1.442695, %v5330_v16  ;;  %v4517_v14 = vmul.f32 %v6984_v24, %v10794_v10  ;;  %7011 = vrsqrt.f32 %v4470_v54  ;;  %v4975_v54 = vmul.f32 0.0078125, %v4946_v56 }
 0xa4e   : > { %v11241_v11 = vpop.eup %6987  ;;  %7013 = vpow2.f32 %v5393_v41  ;;  %v5332_v58 = vsub.f32 0.0, %v5308_v63  ;;  %v4420_v28 = vpop.xlane.xlu0 %4419  ;;  %v5262_v0 = vadd.f32 1e-05, %v5238_v19  ;;  %v4711_v16 = vmul.f32 0.0078125, %v4682_v46 }
 0xa4f   : > { %12884 = vst [vmem:[#allocation44_spill] sm:$0xff] %v11241_v11  ;;  %v6990_v42 = vpop.eup %6989  ;;  %7015 = vpow2.f32 %v5391_v30  ;;  %v5333_v32 = vsub.f32 0.0, %v4517_v14  ;;  %v5210_v36 = vpop.xlane.xlu1 %5209  ;;  %v4471_v5 = vadd.f32 1e-05, %v4447_v35  ;;  %v4999_v56 = vadd.f32 1e-05, %v4975_v54 }
 0xa50   : > { %v6992_v55 = vpop.eup %6991  ;;  %v5469_v33 = vadd.f32 1.0, %v6990_v42  ;;  %v5395_v23 = vmul.f32 1.442695, %v5332_v58  ;;  %7017 = vrsqrt.f32 %v4998_v22  ;;  %v4735_v19 = vadd.f32 1e-05, %v4711_v16 }
 0xa51   : > { %v11243_v47 = vpop.eup %6993  ;;  %v5397_v10 = vmul.f32 1.442695, %v5333_v32  ;;  %v5045_v24 = vmul.f32 %v6992_v55, %v10801_v3  ;;  %7019 = vrsqrt.f32 %v4734_v18 }
 0xa52   : > { %12885 = vst [vmem:[#allocation63_spill] sm:$0xff] %v11243_v47  ;;  %v6996_v29 = vpop.eup %6995  ;;  %7021 = vrcp.f32 %v5469_v33  ;;  %v4684_v58 = vpop.xlane.xlu0 %4683 }
 0xa53   : > { %v11246_v41 = vpop.eup %6997  ;;  %v5471_v63 = vadd.f32 1.0, %v6996_v29  ;;  %7023 = vpow2.f32 %v5395_v23  ;;  %v5335_v30 = vsub.f32 0.0, %v5045_v24  ;;  %v4948_v14 = vpop.xlane.xlu1 %4947  ;;  %v5239_v23 = vmul.f32 0.0078125, %v5210_v36 }
 0xa54   : > { %v7000_v22 = vpop.eup %6999  ;;  %7025 = vpow2.f32 %v5397_v10 }
 0xa55   : > { %v7002_v42 = vpop.eup %7001  ;;  %7027 = vrcp.f32 %v5471_v63  ;;  %v5401_v32 = vmul.f32 1.442695, %v5335_v30  ;;  %v4781_v3 = vmul.f32 %v7000_v22, %v10804_v38  ;;  %v4448_v63 = vmul.f32 0.0078125, %v4420_v28 }
 0xa56   : > { %v11249_v18 = vpop.eup %7003  ;;  %v5309_v46 = vmul.f32 %v7002_v42, %v10811_v39  ;;  %7029 = vrsqrt.f32 %v5262_v0  ;;  %v4422_v10 = vpop.xlane.xlu0 %4421  ;;  %v4976_v0 = vmul.f32 0.0078125, %v4948_v14  ;;  %v5263_v36 = vadd.f32 1e-05, %v5239_v23 }
 0xa57   : > { %12886 = vst [vmem:[#allocation42_spill] sm:$0xff] %v11249_v18  ;;  %v11252_v55 = vpop.eup %7005  ;;  %7031 = vpow2.f32 %v5401_v32  ;;  %v5334_v33 = vsub.f32 0.0, %v4781_v3  ;;  %v5212_v24 = vpop.xlane.xlu1 %5211  ;;  %v4712_v32 = vmul.f32 0.0078125, %v4684_v58 }
 0xa58   : > { %v7008_v35 = vpop.eup %7007  ;;  %v5336_v29 = vsub.f32 0.0, %v5309_v46  ;;  %7033 = vrsqrt.f32 %v4471_v5  ;;  %v4472_v5 = vadd.f32 1e-05, %v4448_v63 }
 0xa59   : > { %v11254_v30 = vpop.eup %7009  ;;  %v5473_v38 = vadd.f32 1.0, %v7008_v35  ;;  %v5399_v54 = vmul.f32 1.442695, %v5334_v33  ;;  %7035 = vrsqrt.f32 %v4999_v56  ;;  %v4736_v23 = vadd.f32 1e-05, %v4712_v32 }
 0xa5a   : > { %12887 = vst [vmem:[#allocation24_spill] sm:$0xff] %v11254_v30  ;;  %v7012_v22 = vpop.eup %7011  ;;  %v5403_v39 = vmul.f32 1.442695, %v5336_v29  ;;  %7037 = vrsqrt.f32 %v4735_v19  ;;  %v4686_v47 = vpop.xlane.xlu0 %4685  ;;  %v5000_v19 = vadd.f32 1e-05, %v4976_v0 }
 0xa5b   : > { %v7014_v16 = vpop.eup %7013  ;;  %7039 = vrcp.f32 %v5473_v38  ;;  %v4518_v42 = vmul.f32 %v7012_v22, %v10814_v13  ;;  %v4950_v3 = vpop.xlane.xlu1 %4949 }
 0xa5c   : > { %v11257_v46 = vpop.eup %7015  ;;  %v5475_v28 = vadd.f32 1.0, %v7014_v16  ;;  %7041 = vpow2.f32 %v5399_v54  ;;  %v5240_v54 = vmul.f32 0.0078125, %v5212_v24 }
 0xa5d   : > { %v7018_v35 = vpop.eup %7017  ;;  %7043 = vpow2.f32 %v5403_v39  ;;  %v5337_v56 = vsub.f32 0.0, %v4518_v42 }
 0xa5e   : > { %v7020_v33 = vpop.eup %7019  ;;  %7045 = vrcp.f32 %v5475_v28  ;;  %v5046_v14 = vmul.f32 %v7018_v35, %v10821_v9  ;;  %v4424_v22 = vpop.xlane.xlu0 %4423  ;;  %v4449_v28 = vmul.f32 0.0078125, %v4422_v10  ;;  %v11274_v10 = vmul.f32 %v11169_v2, %v10626_v17 }
 0xa5f   : > { %v11260_v29 = vpop.eup %7021  ;;  %v5405_v13 = vmul.f32 1.442695, %v5337_v56  ;;  %v4782_v58 = vmul.f32 %v7020_v33, %v10824_v51  ;;  %7047 = vrsqrt.f32 %v5263_v36  ;;  %v5214_v38 = vpop.xlane.xlu1 %5213  ;;  %v4977_v36 = vmul.f32 0.0078125, %v4950_v3 }
 0xa60   : > { %v11263_v16 = vpop.eup %7023  ;;  %v5339_v63 = vsub.f32 0.0, %v5046_v14  ;;  %7049 = vrsqrt.f32 %v4472_v5  ;;  %v5264_v5 = vadd.f32 1e-05, %v5240_v54  ;;  %12889 = vst [vmem:[#allocation12_spill] sm:$0xff] %v11274_v10  ;;  %v11278_v3 = vmul.f32 %v11175_v20, %v10631_v21  ;;  %v12892_v54 = vld [vmem:[#allocation146_spill] sm:$0xff]  ;;  %v12893_v20 = vld [vmem:[#allocation147_spill] sm:$0xff] }
 0xa61   : > { %v7026_v39 = vpop.eup %7025  ;;  %7051 = vpow2.f32 %v5405_v13  ;;  %v5338_v42 = vsub.f32 0.0, %v4782_v58  ;;  %v5001_v17 = vadd.f32 1e-05, %v4977_v36  ;;  %v5241_v2 = vmul.f32 0.0078125, %v5214_v38  ;;  %v12895_v36 = vld [vmem:[#allocation130_spill] sm:$0xff] }
 0xa62   : > { %v11265_v9 = vpop.eup %7027  ;;  %v5477_v0 = vadd.f32 1.0, %v7026_v39  ;;  %v5409_v35 = vmul.f32 1.442695, %v5339_v63  ;;  %7053 = vrsqrt.f32 %v5000_v19  ;;  %v11269_v33 = vpop.xlane.xlu0 %4687  ;;  %v4473_v19 = vadd.f32 1e-05, %v4449_v28  ;;  %12890 = vst [vmem:[#allocation83_spill] sm:$0xff] %v11278_v3 }
 0xa63   : > { %12888 = vst [vmem:[#allocation45_spill] sm:$0xff] %v11265_v9  ;;  %v7030_v56 = vpop.eup %7029  ;;  %v5407_v51 = vmul.f32 1.442695, %v5338_v42  ;;  %7055 = vrsqrt.f32 %v4736_v23  ;;  %v11267_v32 = vpop.xlane.xlu1 %4951  ;;  %v12891_v39 = vld [vmem:[#allocation145_spill] sm:$0xff]  ;;  %v11295_v38 = vmul.f32 %v11181_v26, %v12895_v36  ;;  %v12903_v36 = vld [vmem:[#allocation134_spill] sm:$0xff] }
 0xa64   : > { %v7032_v14 = vpop.eup %7031  ;;  %7057 = vrcp.f32 %v5477_v0  ;;  %v5310_v24 = vmul.f32 %v7030_v56, %v10831_v61  ;;  %v4713_v0 = vmul.f32 0.0078125, %v4686_v47  ;;  %v12894_v47 = vld [vmem:[#allocation129_spill] sm:$0xff] }
 0xa65   : > { %v7034_v13 = vpop.eup %7033  ;;  %v5479_v58 = vadd.f32 1.0, %v7032_v14  ;;  %7059 = vpow2.f32 %v5409_v35 }
 0xa66   : > { %v7036_v23 = vpop.eup %7035  ;;  %7061 = vpow2.f32 %v5407_v51  ;;  %v5340_v63 = vsub.f32 0.0, %v5310_v24  ;;  %v4519_v42 = vmul.f32 %v7034_v13, %v12891_v39  ;;  %v11282_v14 = vpop.xlane.xlu0 %4425  ;;  %v11291_v13 = vmul.f32 %v11179_v7, %v12894_v47  ;;  %v12897_v7 = vld [vmem:[#allocation131_spill] sm:$0xff] }
 0xa67   : > { %v7038_v61 = vpop.eup %7037  ;;  %7063 = vrcp.f32 %v5479_v58  ;;  %v5047_v56 = vmul.f32 %v7036_v23, %v12892_v54  ;;  %v5216_v30 = vpop.xlane.xlu1 %5215  ;;  %v4450_v39 = vmul.f32 0.0078125, %v4424_v22 }
 0xa68   : > { %v11284_v28 = vpop.eup %7039  ;;  %v5411_v35 = vmul.f32 1.442695, %v5340_v63  ;;  %v5341_v21 = vsub.f32 0.0, %v4519_v42  ;;  %v4783_v9 = vmul.f32 %v7038_v61, %v12893_v20  ;;  %7065 = vrsqrt.f32 %v5264_v5 }
 0xa69   : > { %v11287_v51 = vpop.eup %7041  ;;  %v5343_v24 = vsub.f32 0.0, %v5047_v56  ;;  %7067 = vrsqrt.f32 %v4473_v19  ;;  %v4737_v61 = vadd.f32 1e-05, %v4713_v0  ;;  %v11307_v56 = vmul.f32 %v11184_v12, %v12897_v7 }
 0xa6a   : > { %v11297_v58 = vpop.eup %7043  ;;  %7069 = vpow2.f32 %v5411_v35  ;;  %v5413_v23 = vmul.f32 1.442695, %v5341_v21  ;;  %v5342_v63 = vsub.f32 0.0, %v4783_v9  ;;  %v11303_v54 = vpop.xlane.xlu0 %4689  ;;  %v5265_v35 = vadd.f32 1e-05, %v5241_v2  ;;  %v12899_v21 = vld [vmem:[#allocation132_spill] sm:$0xff] }
 0xa6b   : > { %v11299_v42 = vpop.eup %7045  ;;  %v5417_v5 = vmul.f32 1.442695, %v5343_v24  ;;  %7071 = vrsqrt.f32 %v5001_v17  ;;  %v11301_v19 = vpop.xlane.xlu1 %4953  ;;  %12898 = vst [vmem:[#allocation81_spill] sm:$0xff] %v11307_v56  ;;  %v11311_v22 = vmul.f32 %v11187_v37, %v12899_v21  ;;  %v12901_v17 = vld [vmem:[#allocation148_spill] sm:$0xff]  ;;  %v12902_v24 = vld [vmem:[#allocation133_spill] sm:$0xff]  ;;  %v11320_v12 = vmul.f32 %v11193_v34, %v12903_v36 }
 0xa6c   : > { %12896 = vst [vmem:[#allocation69_spill] sm:$0xff] %v11299_v42  ;;  %v7048_v26 = vpop.eup %7047  ;;  %7073 = vpow2.f32 %v5413_v23  ;;  %v5415_v20 = vmul.f32 1.442695, %v5342_v63  ;;  %v11316_v47 = vmul.f32 %v11191_v48, %v12902_v24  ;;  %v12904_v23 = vld [vmem:[#allocation149_spill] sm:$0xff]  ;;  %v4474_v63 = vadd.f32 1e-05, %v4450_v39 }
 0xa6d   : > { %12900 = vst [vmem:[#allocation17_spill] sm:$0xff] %v11311_v22  ;;  %v7050_v9 = vpop.eup %7049  ;;  %7075 = vpow2.f32 %v5417_v5  ;;  %v5311_v0 = vmul.f32 %v7048_v26, %v12901_v17  ;;  %v11325_v37 = vmul.f32 %v11197_v40, %v12905_v52  ;;  %v12907_v24 = vld [vmem:[#allocation136_spill] sm:$0xff]  ;;  %v4978_v52 = vmul.f32 0.0078125, %v11267_v32 }
 0xa6e   : > { %v7052_v7 = vpop.eup %7051  ;;  %7077 = vpow2.f32 %v5415_v20  ;;  %v4520_v2 = vmul.f32 %v7050_v9, %v12904_v23  ;;  %v11329_v48 = vpop.xlane.xlu0 %4427  ;;  %v11333_v34 = vmul.f32 %v11200_v27, %v12907_v24  ;;  %v12909_v9 = vld [vmem:[#allocation150_spill] sm:$0xff]  ;;  %v4714_v23 = vmul.f32 0.0078125, %v11269_v33 }
 0xa6f   : > { %12906 = vst [vmem:[#allocation43_spill] sm:$0xff] %v11325_v37  ;;  %v7054_v5 = vpop.eup %7053  ;;  %v5481_v21 = vadd.f32 1.0, %v7052_v7  ;;  %v5344_v26 = vsub.f32 0.0, %v5311_v0  ;;  %7079 = vrsqrt.f32 %v4737_v61  ;;  %v11327_v17 = vpop.xlane.xlu1 %5217  ;;  %v12910_v61 = vld [vmem:[#allocation151_spill] sm:$0xff]  ;;  %v5242_v27 = vmul.f32 0.0078125, %v5216_v30 }
 0xa70   : > { %12908 = vst [vmem:[#allocation29_spill] sm:$0xff] %v11333_v34  ;;  %v7056_v20 = vpop.eup %7055  ;;  %v5345_v36 = vsub.f32 0.0, %v4520_v2  ;;  %v5048_v39 = vmul.f32 %v7054_v5, %v12909_v9  ;;  %7081 = vrsqrt.f32 %v5265_v35  ;;  %v4451_v32 = vmul.f32 0.0078125, %v11282_v14 }
 0xa71   : > { %v11337_v40 = vpop.eup %7057  ;;  %7083 = vrcp.f32 %v5481_v21  ;;  %v5419_v0 = vmul.f32 1.442695, %v5344_v26  ;;  %v4784_v7 = vmul.f32 %v7056_v20, %v12910_v61  ;;  %v5002_v20 = vadd.f32 1e-05, %v4978_v52  ;;  %v12913_v61 = vld [vmem:[#allocation152_spill] sm:$0xff] }
 0xa72   : > { %v7060_v6 = vpop.eup %7059  ;;  %v5421_v11 = vmul.f32 1.442695, %v5345_v36  ;;  %v5347_v1 = vsub.f32 0.0, %v5048_v39  ;;  %7085 = vrsqrt.f32 %v4474_v63  ;;  %v11346_v21 = vpop.xlane.xlu0 %4691  ;;  %v12911_v36 = vld [vmem:[#allocation137_spill] sm:$0xff]  ;;  %v4738_v9 = vadd.f32 1e-05, %v4714_v23 }
 0xa73   : > { %v11341_v24 = vpop.eup %7061  ;;  %v5483_v2 = vadd.f32 1.0, %v7060_v6  ;;  %7087 = vpow2.f32 %v5419_v0  ;;  %v5346_v35 = vsub.f32 0.0, %v4784_v7  ;;  %v11344_v5 = vpop.xlane.xlu1 %4955  ;;  %v11352_v63 = vmul.f32 %v11203_v50, %v12911_v36  ;;  %v12912_v39 = vld [vmem:[#allocation138_spill] sm:$0xff]  ;;  %v12916_v50 = vld [vmem:[#allocation153_spill] sm:$0xff] }
 0xa74   : > { %v11348_v26 = vpop.eup %7063  ;;  %7089 = vpow2.f32 %v5421_v11  ;;  %v5425_v33 = vmul.f32 1.442695, %v5347_v1  ;;  %v11356_v14 = vmul.f32 %v11206_v60, %v12912_v39  ;;  %v5266_v44 = vadd.f32 1e-05, %v5242_v27  ;;  %v12914_v11 = vld [vmem:[#allocation139_spill] sm:$0xff]  ;;  %v12917_v60 = vld [vmem:[#allocation140_spill] sm:$0xff] }
 0xa75   : > { %v7066_v30 = vpop.eup %7065  ;;  %7091 = vrcp.f32 %v5483_v2  ;;  %v5423_v6 = vmul.f32 1.442695, %v5346_v35  ;;  %v11361_v1 = vmul.f32 %v11209_v4, %v12914_v11  ;;  %v4475_v35 = vadd.f32 1e-05, %v4451_v32  ;;  %v12919_v39 = vld [vmem:[#allocation141_spill] sm:$0xff]  ;;  %v12921_v11 = vld [vmem:[#allocation52_spill] sm:$0xff] }
 0xa76   : > { %v7068_v0 = vpop.eup %7067  ;;  %7093 = vpow2.f32 %v5425_v33  ;;  %v5312_v7 = vmul.f32 %v7066_v30, %v12913_v61  ;;  %v11368_v36 = vpop.xlane.xlu0 %4395  ;;  %v11372_v33 = vmul.f32 %v11212_v31, %v12917_v60  ;;  %v11376_v4 = vmul.f32 %v11215_v57, %v12919_v39  ;;  %v12920_v61 = vld [vmem:[#allocation142_spill] sm:$0xff] }
 0xa77   : > { %12915 = vst [vmem:[#allocation61_spill] sm:$0xff] %v11361_v1  ;;  %v11363_v52 = vpop.eup %7069  ;;  %7095 = vpow2.f32 %v5423_v6  ;;  %v4521_v2 = vmul.f32 %v7068_v0, %v12916_v50  ;;  %v11366_v23 = vpop.xlane.xlu1 %5219  ;;  %v11380_v6 = vmul.f32 %v11218_v43, %v12920_v61  ;;  %v4979_v3 = vmul.f32 0.0078125, %v11301_v19  ;;  %v12923_v19 = vld [vmem:[#allocation143_spill] sm:$0xff] }
 0xa78   : > { %12918 = vst [vmem:[#allocation85_spill] sm:$0xff] %v11372_v33  ;;  %v7072_v30 = vpop.eup %7071  ;;  %v5348_v27 = vsub.f32 0.0, %v5312_v7  ;;  %7097 = vrsqrt.f32 %v5002_v20  ;;  %v4715_v20 = vmul.f32 0.0078125, %v11303_v54  ;;  %v12925_v54 = vld [vmem:[#allocation144_spill] sm:$0xff]  ;;  %v11454_v10 = vadd.f32 1.0, %v11287_v51  ;;  %v12942_v51 = vld [vmem:[#allocation33_spill] sm:$0xff] }
 0xa79   : > { %v7074_v32 = vpop.eup %7073  ;;  %v5349_v0 = vsub.f32 0.0, %v4521_v2  ;;  %v5049_v50 = vmul.f32 %v7072_v30, %v12921_v11  ;;  %7099 = vrsqrt.f32 %v4738_v9  ;;  %v11392_v9 = vadd.f32 1.0, %v11227_v53 }
 0xa7a   : > { %v7076_v31 = vpop.eup %7075  ;;  %v5485_v60 = vadd.f32 1.0, %v7074_v32  ;;  %v5427_v22 = vmul.f32 1.442695, %v5348_v27  ;;  %7101 = vrsqrt.f32 %v5266_v44  ;;  %v11389_v2 = vpop.xlane.xlu0 %4657  ;;  %v11396_v44 = vmul.f32 %v11221_v59, %v12923_v19  ;;  %v12927_v32 = vld [vmem:[#allocation37_spill] sm:$0xff]  ;;  %12938 = vst [vmem:[#allocation47_spill] sm:$0xff] %v11454_v10 }
 0xa7b   : > { %v11385_v7 = vpop.eup %7077  ;;  %v5487_v57 = vadd.f32 1.0, %v7076_v31  ;;  %v5429_v39 = vmul.f32 1.442695, %v5349_v0  ;;  %v5351_v34 = vsub.f32 0.0, %v5049_v50  ;;  %7103 = vrsqrt.f32 %v4475_v35  ;;  %v11387_v43 = vpop.xlane.xlu1 %4923  ;;  %12922 = vst [vmem:[#allocation31_spill] sm:$0xff] %v11392_v9  ;;  %v12929_v31 = vld [vmem:[#allocation54_spill] sm:$0xff] }
 0xa7c   : > { %v7080_v30 = vpop.eup %7079  ;;  %7105 = vrcp.f32 %v5485_v60  ;;  %12924 = vst [vmem:[#allocation77_spill] sm:$0xff] %v11396_v44  ;;  %v11400_v27 = vmul.f32 %v11224_v45, %v12925_v54  ;;  %v5003_v11 = vadd.f32 1e-05, %v4979_v3  ;;  %v11406_v53 = vadd.f32 1.0, %v11230_v8 }
 0xa7d   : > { %v7082_v61 = vpop.eup %7081  ;;  %7107 = vrcp.f32 %v5487_v57  ;;  %v5433_v35 = vmul.f32 1.442695, %v5351_v34  ;;  %v4785_v0 = vmul.f32 %v7080_v30, %v12927_v32  ;;  %v4739_v59 = vadd.f32 1e-05, %v4715_v20 }
 0xa7e   : > { %12926 = vst [vmem:[#allocation67_spill] sm:$0xff] %v11400_v27  ;;  %v11403_v50 = vpop.eup %7083  ;;  %12928 = vst [vmem:[#allocation13_spill] sm:$0xff] %v11406_v53  ;;  %7109 = vpow2.f32 %v5427_v22  ;;  %v5313_v60 = vmul.f32 %v7082_v61, %v12929_v31  ;;  %v11410_v9 = vadd.f32 1.0, %v11235_v62  ;;  %v11413_v45 = vadd.f32 1.0, %v11238_v15  ;;  %v11417_v3 = vpop.xlane.xlu0 %4393  ;;  %v12932_v22 = vld [vmem:[#allocation38_spill] sm:$0xff] }
 0xa7f   : > { %v7086_v19 = vpop.eup %7085  ;;  %7111 = vpow2.f32 %v5429_v39  ;;  %v5350_v34 = vsub.f32 0.0, %v4785_v0  ;;  %v11415_v57 = vpop.xlane.xlu1 %5185  ;;  %v5243_v20 = vmul.f32 0.0078125, %v11327_v17  ;;  %v4452_v15 = vmul.f32 0.0078125, %v11329_v48  ;;  %v5798_v17 = vld [vmem:[%s11910_s3 + $0x8] sm:$0xff] }
 0xa80   : > { %12930 = vst [vmem:[#allocation94_spill] sm:$0xff] %v11410_v9  ;;  %12931 = vst [vmem:[#allocation57_spill] sm:$0xff] %v11413_v45  ;;  %v11419_v30 = vpop.eup %7087  ;;  %7113 = vpow2.f32 %v5433_v35  ;;  %v5352_v8 = vsub.f32 0.0, %v5313_v60  ;;  %v4522_v54 = vmul.f32 %v7086_v19, %v12932_v22  ;;  %v4980_v39 = vmul.f32 0.0078125, %v11344_v5  ;;  %v5797_v35 = vld [vmem:[%s11910_s3] sm:$0xff]  ;;  %v12944_v9 = vld [vmem:[#allocation71_spill] sm:$0xff] }
 0xa81   : > { %v7090_v61 = vpop.eup %7089  ;;  %v5431_v62 = vmul.f32 1.442695, %v5350_v34  ;;  %7115 = vrsqrt.f32 %v5003_v11  ;;  %v11434_v11 = vadd.f32 1.0, %v11246_v41  ;;  %v4716_v48 = vmul.f32 0.0078125, %v11346_v21 }
 0xa82   : > { %v11425_v32 = vpop.eup %7091  ;;  %v5489_v0 = vadd.f32 1.0, %v7090_v61  ;;  %v5435_v31 = vmul.f32 1.442695, %v5352_v8  ;;  %v5353_v53 = vsub.f32 0.0, %v4522_v54  ;;  %7117 = vrsqrt.f32 %v4739_v59  ;;  %v11439_v19 = vpop.xlane.xlu0 %4655 }
 0xa83   : > { %v7094_v60 = vpop.eup %7093  ;;  %12933 = vst [vmem:[#allocation46_spill] sm:$0xff] %v11434_v11  ;;  %7119 = vpow2.f32 %v5431_v62  ;;  %v11437_v5 = vpop.xlane.xlu1 %4921  ;;  %v5267_v22 = vadd.f32 1e-05, %v5243_v20  ;;  %v7348_v54 = vmov 0   ;;  %v11444_v41 = vadd.f32 1.0, %v11252_v55  ;;  %v12939_v55 = vld [vmem:[#allocation7_spill] sm:$0xff] }
 0xa84   : > { %v11441_v59 = vpop.eup %7095  ;;  %7121 = vrcp.f32 %v5489_v0  ;;  %v5491_v34 = vadd.f32 1.0, %v7094_v60  ;;  %v5437_v8 = vmul.f32 1.442695, %v5353_v53  ;;  %6259 = vset.pattern.permute.xlu0 %v7348_v54  ;;  %6260 = vset.pattern.permute.xlu1 %v7348_v54  ;;  %v11447_v62 = vadd.f32 1.0, %v11257_v46  ;;  %v12937_v53 = vld [vmem:[#allocation15_spill] sm:$0xff] }
 0xa85   : > { %v7098_v61 = vpop.eup %7097  ;;  %12934 = vst [vmem:[#allocation9_spill] sm:$0xff] %v11444_v41  ;;  %7123 = vpow2.f32 %v5435_v31  ;;  %v4476_v21 = vadd.f32 1e-05, %v4452_v15  ;;  %5801 = vperm.xlu0 %6259, %v5797_v35   ;;  %5806 = vperm.xlu1 %6260, %v5798_v17   ;;  %v11450_v0 = vadd.f32 1.0, %v11263_v16  ;;  %v5004_v60 = vadd.f32 1e-05, %v4980_v39 }
 0xa86   : > { %12935 = vst [vmem:[#allocation48_spill] sm:$0xff] %v11447_v62  ;;  %v7100_v45 = vpop.eup %7099  ;;  %7125 = vrcp.f32 %v5491_v34  ;;  %v5050_v20 = vmul.f32 %v7098_v61, %v12937_v53  ;;  %v4740_v41 = vadd.f32 1e-05, %v4716_v48  ;;  %v11457_v15 = vpop.xlane.xlu0 %4391  ;;  %v11460_v17 = vadd.f32 1.0, %v11297_v58  ;;  %v12941_v34 = vld [vmem:[#allocation28_spill] sm:$0xff] }
 0xa87   : > { %12936 = vst [vmem:[#allocation11_spill] sm:$0xff] %v11450_v0  ;;  %v7102_v54 = vpop.eup %7101  ;;  %7127 = vpow2.f32 %v5437_v8  ;;  %v4786_v46 = vmul.f32 %v7100_v45, %v12939_v55  ;;  %v5184_v31 = vpop.xlane.xlu1 %5183  ;;  %v5244_v45 = vmul.f32 0.0078125, %v11366_v23  ;;  %v4436_v58 = vmul.f32 0.0078125, %v11368_v36 }
 0xa88   : > { %v7104_v35 = vpop.eup %7103  ;;  %12940 = vst [vmem:[#allocation89_spill] sm:$0xff] %v11460_v17  ;;  %v5355_v16 = vsub.f32 0.0, %v5050_v20  ;;  %v5314_v0 = vmul.f32 %v7102_v54, %v12941_v34  ;;  %7129 = vrsqrt.f32 %v5267_v22  ;;  %v4964_v22 = vmul.f32 0.0078125, %v11387_v43 }
 0xa89   : > { %v11463_v39 = vpop.eup %7105  ;;  %v5354_v61 = vsub.f32 0.0, %v4786_v46  ;;  %v4523_v53 = vmul.f32 %v7104_v35, %v12942_v51  ;;  %7131 = vrsqrt.f32 %v4476_v21  ;;  %v11478_v23 = vadd.f32 1.0, %v11341_v24 }
 0xa8a   : > { %v11467_v48 = vpop.eup %7107  ;;  %v5441_v8 = vmul.f32 1.442695, %v5355_v16  ;;  %v5356_v55 = vsub.f32 0.0, %v5314_v0  ;;  %7133 = vrsqrt.f32 %v5004_v60  ;;  %v11475_v35 = vpop.xlane.xlu0 %4653  ;;  %v11481_v0 = vadd.f32 1.0, %v11363_v52 }
 0xa8b   : > { %v11470_v33 = vpop.eup %7109  ;;  %v5439_v20 = vmul.f32 1.442695, %v5354_v61  ;;  %v5357_v54 = vsub.f32 0.0, %v4523_v53  ;;  %7135 = vrsqrt.f32 %v4740_v41  ;;  %v11473_v46 = vpop.xlane.xlu1 %4919  ;;  %v4699_v41 = vmul.f32 0.0078125, %v11389_v2  ;;  %v12945_v2 = vld [vmem:[#allocation18_spill] sm:$0xff] }
 0xa8c   : > { %v7112_v21 = vpop.eup %7111  ;;  %12943 = vst [vmem:[#allocation25_spill] sm:$0xff] %v11481_v0  ;;  %7137 = vpow2.f32 %v5441_v8  ;;  %v5443_v36 = vmul.f32 1.442695, %v5356_v55  ;;  %v11485_v61 = vadd.f32 1.0, %v11385_v7  ;;  %v5268_v53 = vadd.f32 1e-05, %v5244_v45 }
 0xa8d   : > { %v7114_v60 = vpop.eup %7113  ;;  %v5493_v16 = vadd.f32 1.0, %v7112_v21  ;;  %7139 = vpow2.f32 %v5439_v20  ;;  %v5445_v34 = vmul.f32 1.442695, %v5357_v54  ;;  %v4460_v56 = vadd.f32 1e-05, %v4436_v58  ;;  %v12949_v0 = vld [vmem:[#allocation127_spill] sm:$0xff] }
 0xa8e   : > { %v7116_v43 = vpop.eup %7115  ;;  %v5495_v51 = vadd.f32 1.0, %v7114_v60  ;;  %7141 = vpow2.f32 %v5443_v36  ;;  %v4988_v8 = vadd.f32 1e-05, %v4964_v22  ;;  %v11488_v17 = vpop.xlane.xlu0 %4389  ;;  %v5227_v7 = vmul.f32 0.0078125, %v11415_v57 }
 0xa8f   : > { %v7118_v24 = vpop.eup %7117  ;;  %7143 = vrcp.f32 %v5493_v16  ;;  %v5051_v52 = vmul.f32 %v7116_v43, %v12944_v9  ;;  %v5182_v55 = vpop.xlane.xlu1 %5181  ;;  %v4435_v21 = vmul.f32 0.0078125, %v11417_v3  ;;  %v4723_v60 = vadd.f32 1e-05, %v4699_v41 }
 0xa90   : > { %v11490_v20 = vpop.eup %7119  ;;  %7145 = vrcp.f32 %v5495_v51  ;;  %v4787_v54 = vmul.f32 %v7118_v24, %v12945_v2  ;;  %v4963_v9 = vmul.f32 0.0078125, %v11437_v5  ;;  %v4698_v16 = vmul.f32 0.0078125, %v11439_v19 }
 0xa91   : > { %v11495_v36 = vpop.eup %7121  ;;  %7147 = vpow2.f32 %v5445_v34  ;;  %v5359_v45 = vsub.f32 0.0, %v5051_v52  ;;  %v5226_v43 = vmul.f32 0.0078125, %v5184_v31  ;;  %v11504_v57 = vadd.f32 1.0, %v11419_v30 }
 0xa92   : > { %v11498_v58 = vpop.eup %7123  ;;  %v5358_v22 = vsub.f32 0.0, %v4787_v54  ;;  %7149 = vrsqrt.f32 %v5268_v53  ;;  %v4434_v34 = vmul.f32 0.0078125, %v11457_v15  ;;  %v4652_v41 = vpop.xlane.xlu0 %4651  ;;  %v5251_v2 = vadd.f32 1e-05, %v5227_v7 }
 0xa93   : > { %v11501_v51 = vpop.eup %7125  ;;  %12946 = vst [vmem:[#allocation91_spill] sm:$0xff] %v11504_v57  ;;  %v5449_v3 = vmul.f32 1.442695, %v5359_v45  ;;  %7151 = vrsqrt.f32 %v4460_v56  ;;  %v4918_v24 = vpop.xlane.xlu1 %4917  ;;  %v4459_v54 = vadd.f32 1e-05, %v4435_v21  ;;  %v11508_v19 = vadd.f32 1.0, %v11441_v59 }
 0xa94   : > { %v7128_v52 = vpop.eup %7127  ;;  %v5447_v5 = vmul.f32 1.442695, %v5358_v22  ;;  %7153 = vrsqrt.f32 %v4988_v8  ;;  %v4987_v27 = vadd.f32 1e-05, %v4963_v9  ;;  %v12947_v45 = vld [vmem:[#allocation39_spill] sm:$0xff]  ;;  %v12948_v8 = vld [vmem:[#allocation6_spill] sm:$0xff] }
 0xa95   : > { %v7130_v53 = vpop.eup %7129  ;;  %v5497_v31 = vadd.f32 1.0, %v7128_v52  ;;  %7155 = vpow2.f32 %v5449_v3  ;;  %v11511_v11 = vadd.f32 1e-05, %v4698_v16  ;;  %v11513_v15 = vadd.f32 1e-05, %v5226_v43 }
 0xa96   : > { %v7132_v30 = vpop.eup %7131  ;;  %7157 = vpow2.f32 %v5447_v5  ;;  %v5315_v56 = vmul.f32 %v7130_v53, %v12947_v45  ;;  %v11516_v21 = vadd.f32 1e-05, %v4434_v34  ;;  %v4962_v59 = vmul.f32 0.0078125, %v11473_v46  ;;  %v4388_v52 = vpop.xlane.xlu0 %4387  ;;  %v12950_v45 = vld [vmem:[#allocation122_spill] sm:$0xff] }
 0xa97   : > { %v7134_v37 = vpop.eup %7133  ;;  %7159 = vrcp.f32 %v5497_v31  ;;  %v4524_v7 = vmul.f32 %v7132_v30, %v12948_v8  ;;  %v5180_v22 = vpop.xlane.xlu1 %5179  ;;  %v4697_v16 = vmul.f32 0.0078125, %v11475_v35  ;;  %v5225_v31 = vmul.f32 0.0078125, %v5182_v55 }
 0xa98   : > { %v7136_v3 = vpop.eup %7135  ;;  %v5360_v9 = vsub.f32 0.0, %v5315_v56  ;;  %v5052_v5 = vmul.f32 %v7134_v37, %v12949_v0  ;;  %7161 = vrsqrt.f32 %v4723_v60  ;;  %v4433_v37 = vmul.f32 0.0078125, %v11488_v17 }
 0xa99   : > { %v7138_v53 = vpop.eup %7137  ;;  %v5361_v43 = vsub.f32 0.0, %v4524_v7  ;;  %v4788_v1 = vmul.f32 %v7136_v3, %v12950_v45  ;;  %7163 = vrsqrt.f32 %v5251_v2  ;;  %v11524_v56 = vadd.f32 1.0, %v11470_v33 }
 0xa9a   : > { %v7140_v30 = vpop.eup %7139  ;;  %v5499_v34 = vadd.f32 1.0, %v7138_v53  ;;  %v5451_v8 = vmul.f32 1.442695, %v5360_v9  ;;  %v5363_v42 = vsub.f32 0.0, %v5052_v5  ;;  %7165 = vrsqrt.f32 %v4459_v54  ;;  %v4650_v60 = vpop.xlane.xlu0 %4649 }
 0xa9b   : > { %v7142_v46 = vpop.eup %7141  ;;  %v5453_v25 = vmul.f32 1.442695, %v5361_v43  ;;  %v5362_v62 = vsub.f32 0.0, %v4788_v1  ;;  %7167 = vrsqrt.f32 %v4987_v27  ;;  %v4916_v0 = vpop.xlane.xlu1 %4915  ;;  %v4961_v55 = vmul.f32 0.0078125, %v4918_v24 }
 0xa9c   : > { %v7144_v35 = vpop.eup %7143  ;;  %7169 = vrcp.f32 %v5499_v34  ;;  %v5457_v2 = vmul.f32 1.442695, %v5363_v42  ;;  %v4986_v9 = vadd.f32 1e-05, %v4962_v59  ;;  %v4696_v54 = vmul.f32 0.0078125, %v4652_v41  ;;  %v12951_v41 = vld [vmem:[#allocation124_spill] sm:$0xff] }
 0xa9d   : > { %v7146_v7 = vpop.eup %7145  ;;  %7171 = vpow2.f32 %v5451_v8  ;;  %v5455_v3 = vmul.f32 1.442695, %v5362_v62  ;;  %v11527_v1 = vadd.f32 1.0, %v11490_v20  ;;  %v4721_v27 = vadd.f32 1e-05, %v4697_v16 }
 0xa9e   : > { %v7148_v5 = vpop.eup %7147  ;;  %7173 = vpow2.f32 %v5453_v25  ;;  %v5249_v17 = vadd.f32 1e-05, %v5225_v31  ;;  %v4457_v33 = vadd.f32 1e-05, %v4433_v37  ;;  %v4386_v34 = vpop.xlane.xlu0 %4385  ;;  %v5637_v42 = vmul.f32 %v7144_v35, %v11291_v13  ;;  %v12952_v13 = vld [vmem:[#allocation36_spill] sm:$0xff] }
 0xa9f   : > { %v7150_v53 = vpop.eup %7149  ;;  %v5501_v43 = vadd.f32 1.0, %v7148_v5  ;;  %7175 = vpow2.f32 %v5457_v2  ;;  %v5178_v45 = vpop.xlane.xlu1 %5177  ;;  %v11531_v62 = vadd.f32 1.0, %v11498_v58  ;;  %v4985_v20 = vadd.f32 1e-05, %v4961_v55 }
 0xaa0   : > { %v7152_v24 = vpop.eup %7151  ;;  %7177 = vpow2.f32 %v5455_v3  ;;  %v5316_v59 = vmul.f32 %v7150_v53, %v12951_v41  ;;  %v4720_v25 = vadd.f32 1e-05, %v4696_v54  ;;  %v5224_v16 = vmul.f32 0.0078125, %v5180_v22  ;;  %v12953_v53 = vld [vmem:[#allocation114_spill] sm:$0xff] }
 0xaa1   : > { %v11534_v8 = vpop.eup %7153  ;;  %7179 = vrcp.f32 %v5501_v43  ;;  %v4432_v31 = vmul.f32 0.0078125, %v4388_v52  ;;  %v11536_v37 = vadd.f32 1.0, %v7140_v30  ;;  %v4508_v35 = vmul.f32 %v7152_v24, %v12952_v13 }
 0xaa2   : > { %v7156_v2 = vpop.eup %7155  ;;  %v5364_v5 = vsub.f32 0.0, %v5316_v59  ;;  %7181 = vrsqrt.f32 %v11511_v11  ;;  %v4648_v55 = vpop.xlane.xlu0 %4647  ;;  %v5685_v41 = vadd.f32 %v5637_v42, %v12953_v53  ;;  %v5639_v54 = vmul.f32 %v7146_v7, %v11295_v38 }
 0xaa3   : > { %v7158_v58 = vpop.eup %7157  ;;  %v5503_v57 = vadd.f32 1.0, %v7156_v2  ;;  %7183 = vrsqrt.f32 %v11513_v15  ;;  %v4914_v3 = vpop.xlane.xlu1 %4913  ;;  %v4960_v30 = vmul.f32 0.0078125, %v4916_v0  ;;  %v4695_v43 = vmul.f32 0.0078125, %v4650_v60 }
 0xaa4   : > { %v7160_v22 = vpop.eup %7159  ;;  %v5459_v52 = vmul.f32 1.442695, %v5364_v5  ;;  %7185 = vrsqrt.f32 %v11516_v21  ;;  %v11544_v11 = vadd.f32 1.0, %v7142_v46  ;;  %v5223_v24 = vmul.f32 0.0078125, %v5178_v45  ;;  %v12954_v46 = vld [vmem:[#allocation96_spill] sm:$0xff] }
 0xaa5   : > { %v7162_v59 = vpop.eup %7161  ;;  %7187 = vrcp.f32 %v5503_v57  ;;  %v4431_v2 = vmul.f32 0.0078125, %v4386_v34  ;;  %v5248_v15 = vadd.f32 1e-05, %v5224_v16  ;;  %v5641_v42 = vmul.f32 %v7160_v22, %v11316_v47  ;;  %v12956_v22 = vld [vmem:[#allocation117_spill] sm:$0xff] }
 0xaa6   : > { %v11546_v13 = vpop.eup %7163  ;;  %7189 = vpow2.f32 %v5459_v52  ;;  %v5633_v38 = vmul.f32 %v11495_v36, %v4508_v35  ;;  %v4456_v5 = vadd.f32 1e-05, %v4432_v31  ;;  %v4384_v0 = vpop.xlane.xlu0 %4383  ;;  %v11550_v60 = vmul.f32 0.70710677, %v5685_v41  ;;  %v12955_v35 = vld [vmem:[#allocation115_spill] sm:$0xff] }
 0xaa7   : > { %v7166_v7 = vpop.eup %7165  ;;  %7191 = vrsqrt.f32 %v4986_v9  ;;  %v5176_v21 = vpop.xlane.xlu1 %5175  ;;  %v5687_v53 = vadd.f32 %v5639_v54, %v12954_v46  ;;  %v4984_v45 = vadd.f32 1e-05, %v4960_v30  ;;  %v4719_v34 = vadd.f32 1e-05, %v4695_v43 }
 0xaa8   : > { %v11553_v57 = vpop.eup %7167  ;;  %7193 = vrsqrt.f32 %v4721_v27  ;;  %v4959_v52 = vmul.f32 0.0078125, %v4914_v3  ;;  %v11555_v44 = vadd.f32 1.0, %v7158_v58  ;;  %v5247_v47 = vadd.f32 1e-05, %v5223_v24 }
 0xaa9   : > { %v7170_v16 = vpop.eup %7169  ;;  %7195 = vrsqrt.f32 %v5249_v17  ;;  %v4455_v36 = vadd.f32 1e-05, %v4431_v2  ;;  %v4694_v31 = vmul.f32 0.0078125, %v4648_v55  ;;  %v5689_v41 = vadd.f32 %v5641_v42, %v12955_v35  ;;  %v12958_v42 = vld [vmem:[#allocation73_spill] sm:$0xff] }
 0xaaa   : > { %v7172_v9 = vpop.eup %7171  ;;  %7197 = vrsqrt.f32 %v4457_v33  ;;  %v5681_v18 = vadd.f32 %v5633_v38, %v12956_v22  ;;  %v5222_v46 = vmul.f32 0.0078125, %v5176_v21  ;;  %v4646_v30 = vpop.xlane.xlu0 %4645  ;;  %v11560_v43 = vmul.f32 0.70710677, %v5687_v53  ;;  %v12959_v38 = vld [vmem:[#allocation125_spill] sm:$0xff] }
 0xaab   : > { %v7174_v54 = vpop.eup %7173  ;;  %7199 = vrsqrt.f32 %v4985_v20  ;;  %v4912_v27 = vpop.xlane.xlu1 %4911  ;;  %v4983_v24 = vadd.f32 1e-05, %v4959_v52  ;;  %v4430_v2 = vmul.f32 0.0078125, %v4384_v0  ;;  %v11563_v35 = vmul.f32 %v7162_v59, %v12958_v42  ;;  %v12960_v42 = vld [vmem:[#allocation58_spill] sm:$0xff] }
 0xaac   : > { %12957 = vst [vmem:[#allocation40_spill] sm:$0xff] %v11560_v43  ;;  %v7176_v58 = vpop.eup %7175  ;;  %v5505_v17 = vadd.f32 1.0, %v7174_v54  ;;  %7201 = vrsqrt.f32 %v4720_v25  ;;  %v4507_v20 = vmul.f32 %v7166_v7, %v12959_v38  ;;  %v4718_v22 = vadd.f32 1e-05, %v4694_v31  ;;  %v12963_v43 = vld [vmem:[#allocation97_spill] sm:$0xff] }
 0xaad   : > { %v7178_v33 = vpop.eup %7177  ;;  %v5507_v55 = vadd.f32 1.0, %v7176_v58  ;;  %7203 = vrsqrt.f32 %v5248_v15  ;;  %v11566_v10 = vmul.f32 0.70710677, %v5689_v41  ;;  %v11568_v53 = vmul.f32 0.70710677, %v5681_v18 }
 0xaae   : > { %v7180_v21 = vpop.eup %7179  ;;  %7205 = vrcp.f32 %v5505_v17  ;;  %v5246_v25 = vadd.f32 1e-05, %v5222_v46  ;;  %v5643_v0 = vmul.f32 %v7170_v16, %v11320_v12  ;;  %v4454_v59 = vadd.f32 1e-05, %v4430_v2  ;;  %v4382_v17 = vpop.xlane.xlu0 %4381 }
 0xaaf   : > { %v7182_v3 = vpop.eup %7181  ;;  %7207 = vrcp.f32 %v5507_v55  ;;  %v5174_v52 = vpop.xlane.xlu1 %5173  ;;  %v4958_v7 = vmul.f32 0.0078125, %v4912_v27  ;;  %v5645_v58 = vmul.f32 %v7180_v21, %v11352_v63  ;;  %v11575_v41 = vadd.f32 1.0, %v7172_v9  ;;  %v12961_v9 = vld [vmem:[#allocation118_spill] sm:$0xff] }
 0xab0   : > { %v11572_v54 = vpop.eup %7183  ;;  %7209 = vrsqrt.f32 %v4456_v5  ;;  %v4693_v18 = vmul.f32 0.0078125, %v4646_v30  ;;  %v5629_v46 = vmul.f32 %v11463_v39, %v4507_v20  ;;  %v5506_v27 = vadd.f32 1.0, %v7178_v33  ;;  %v12962_v39 = vld [vmem:[#allocation119_spill] sm:$0xff] }
 0xab1   : > { %v7186_v31 = vpop.eup %7185  ;;  %7211 = vrsqrt.f32 %v4984_v45  ;;  %v5221_v63 = vmul.f32 0.0078125, %v5174_v52  ;;  %v5691_v21 = vadd.f32 %v5643_v0, %v12961_v9  ;;  %v4982_v30 = vadd.f32 1e-05, %v4958_v7  ;;  %v12964_v52 = vld [vmem:[#allocation128_spill] sm:$0xff] }
 0xab2   : > { %v7188_v55 = vpop.eup %7187  ;;  %7213 = vrsqrt.f32 %v4719_v34  ;;  %v4506_v5 = vmul.f32 %v7186_v31, %v12960_v42  ;;  %v4429_v15 = vmul.f32 0.0078125, %v4382_v17  ;;  %v5693_v20 = vadd.f32 %v5645_v58, %v12962_v39 }
 0xab3   : > { %v7190_v2 = vpop.eup %7189  ;;  %7215 = vrsqrt.f32 %v5247_v47  ;;  %v4910_v38 = vpop.xlane.xlu1 %4909  ;;  %v4717_v12 = vadd.f32 1e-05, %v4693_v18  ;;  %v5647_v16 = vmul.f32 %v7188_v55, %v11356_v14  ;;  %v5677_v31 = vadd.f32 %v5629_v46, %v12963_v43 }
 0xab4   : > { %v7192_v45 = vpop.eup %7191  ;;  %7217 = vrsqrt.f32 %v4455_v36  ;;  %v4957_v47 = vmul.f32 0.0078125, %v4910_v38  ;;  %v5625_v33 = vmul.f32 %v11403_v50, %v4506_v5  ;;  %v5036_v36 = vmul.f32 %v11534_v8, %v12964_v52  ;;  %v12967_v8 = vld [vmem:[#allocation99_spill] sm:$0xff]  ;;  %v12968_v5 = vld [vmem:[#allocation126_spill] sm:$0xff] }
 0xab5   : > { %v7194_v34 = vpop.eup %7193  ;;  %7219 = vrsqrt.f32 %v4983_v24  ;;  %v5245_v7 = vadd.f32 1e-05, %v5221_v63  ;;  %v11590_v58 = vmul.f32 0.70710677, %v5691_v21  ;;  %v12965_v24 = vld [vmem:[#allocation30_spill] sm:$0xff]  ;;  %v5695_v55 = vadd.f32 %v5647_v16, %v12967_v8  ;;  %v12970_v16 = vld [vmem:[#allocation123_spill] sm:$0xff] }
 0xab6   : > { %v11585_v42 = vpop.eup %7195  ;;  %7221 = vrsqrt.f32 %v4718_v22  ;;  %v11593_v18 = vmul.f32 %v7182_v3, %v12965_v24  ;;  %v4453_v43 = vadd.f32 1e-05, %v4429_v15  ;;  %v11597_v17 = vmul.f32 0.70710677, %v5693_v20  ;;  %v12966_v22 = vld [vmem:[#allocation41_spill] sm:$0xff] }
 0xab7   : > { %v7198_v0 = vpop.eup %7197  ;;  %7223 = vrsqrt.f32 %v5246_v25  ;;  %v11603_v25 = vmul.f32 0.70710677, %v5677_v31  ;;  %v5035_v63 = vmul.f32 %v11553_v57, %v12968_v5  ;;  %v4981_v38 = vadd.f32 1e-05, %v4957_v47 }
 0xab8   : > { %v11595_v14 = vpop.eup %7199  ;;  %7225 = vrsqrt.f32 %v4454_v59  ;;  %v4505_v46 = vmul.f32 %v7198_v0, %v12966_v22  ;;  %v12969_v59 = vld [vmem:[#allocation64_spill] sm:$0xff]  ;;  %v5635_v9 = vmul.f32 %v11501_v51, %v5036_v36  ;;  %v5034_v20 = vmul.f32 %v7192_v45, %v12970_v16  ;;  %v12979_v16 = vld [vmem:[#allocation65_spill] sm:$0xff] }
 0xab9   : > { %v11600_v50 = vpop.eup %7201  ;;  %7227 = vrsqrt.f32 %v4982_v30  ;;  %v5673_v15 = vadd.f32 %v5625_v33, %v12969_v59  ;;  %v5508_v52 = vadd.f32 1.0, %v7190_v2  ;;  %v5789_v33 = vmax.f32 %v11597_v17, 0.0  ;;  %v12971_v2 = vld [vmem:[#allocation98_spill] sm:$0xff] }
 0xaba   : > { %v11607_v3 = vpop.eup %7203  ;;  %7229 = vrsqrt.f32 %v4717_v12  ;;  %v5621_v30 = vmul.f32 %v11337_v40, %v4505_v46  ;;  %v5631_v12 = vmul.f32 %v11467_v48, %v5035_v63  ;;  %v11618_v36 = vmul.f32 0.70710677, %v5695_v55  ;;  %v12974_v46 = vld [vmem:[#allocation101_spill] sm:$0xff]  ;;  %v12975_v55 = vld [vmem:[#allocation55_spill] sm:$0xff]  ;;  %v12976_v63 = vld [vmem:[#allocation100_spill] sm:$0xff] }
 0xabb   : > { %v7206_v21 = vpop.eup %7205  ;;  %7231 = vrsqrt.f32 %v5245_v7  ;;  %v11621_v45 = vmul.f32 0.70710677, %v5673_v15  ;;  %v5683_v7 = vadd.f32 %v5635_v9, %v12971_v2  ;;  %v5627_v22 = vmul.f32 %v11425_v32, %v5034_v20  ;;  %v12981_v2 = vld [vmem:[#allocation79_spill] sm:$0xff]  ;;  %v13014_v9 = vld [vmem:[#allocation12_spill] sm:$0xff] }
 0xabc   : > { %v7208_v31 = vpop.eup %7207  ;;  %7233 = vrsqrt.f32 %v4453_v43  ;;  %v5649_v57 = vmul.f32 %v7206_v21, %v11376_v4  ;;  %v12972_v4 = vld [vmem:[#allocation107_spill] sm:$0xff]  ;;  %v11633_v5 = vmul.f32 %v7194_v34, %v12975_v55  ;;  %v12978_v21 = vld [vmem:[#allocation121_spill] sm:$0xff]  ;;  %v11650_v20 = vmul.f32 %v11572_v54, %v12979_v16 }
 0xabd   : > { %v7210_v47 = vpop.eup %7209  ;;  %7235 = vrcp.f32 %v5506_v27  ;;  %v5651_v51 = vmul.f32 %v7208_v31, %v11380_v6  ;;  %v5669_v48 = vadd.f32 %v5621_v30, %v12972_v4  ;;  %v12973_v27 = vld [vmem:[#allocation22_spill] sm:$0xff]  ;;  %v11640_v32 = vmul.f32 %v11546_v13, %v12978_v21 }
 0xabe   : > { %v7212_v0 = vpop.eup %7211  ;;  %7237 = vrsqrt.f32 %v4981_v38  ;;  %v4504_v43 = vmul.f32 %v7210_v47, %v12973_v27  ;;  %v5697_v8 = vadd.f32 %v5649_v57, %v12974_v46  ;;  %v5679_v38 = vadd.f32 %v5631_v12, %v12976_v63  ;;  %v12980_v57 = vld [vmem:[#allocation105_spill] sm:$0xff] }
 0xabf   : > { %v7214_v24 = vpop.eup %7213  ;;  %7239 = vrcp.f32 %v11555_v44  ;;  %v12977_v44 = vld [vmem:[#allocation102_spill] sm:$0xff]  ;;  %v11646_v34 = vmul.f32 0.70710677, %v5683_v7  ;;  %v5675_v12 = vadd.f32 %v5627_v22, %v12980_v57  ;;  %v12988_v57 = vld [vmem:[#allocation56_spill] sm:$0xff] }
 0xac0   : > { %v11628_v6 = vpop.eup %7215  ;;  %7241 = vrcp.f32 %v11536_v37  ;;  %v5699_v15 = vadd.f32 %v5651_v51, %v12977_v44  ;;  %v5617_v13 = vmul.f32 %v11284_v28, %v4504_v43  ;;  %v11662_v51 = vmul.f32 0.70710677, %v5679_v38  ;;  %v12985_v38 = vld [vmem:[#allocation35_spill] sm:$0xff]  ;;  %v12986_v44 = vld [vmem:[#allocation62_spill] sm:$0xff] }
 0xac1   : > { %v7218_v59 = vpop.eup %7217  ;;  %7243 = vrcp.f32 %v5508_v52  ;;  %v11653_v52 = vmul.f32 0.70710677, %v5669_v48  ;;  %v12983_v48 = vld [vmem:[#allocation120_spill] sm:$0xff]  ;;  %v11685_v63 = vmul.f32 0.70710677, %v5675_v12  ;;  %v12989_v12 = vld [vmem:[#allocation86_spill] sm:$0xff] }
 0xac2   : > { %v11642_v30 = vpop.eup %7219  ;;  %7245 = vrcp.f32 %v11527_v1  ;;  %v11659_v1 = vmul.f32 0.70710677, %v5697_v8  ;;  %v4503_v54 = vmul.f32 %v7218_v59, %v12981_v2  ;;  %v11665_v4 = vmul.f32 0.70710677, %v5699_v15 }
 0xac3   : > { %v7222_v31 = vpop.eup %7221  ;;  %7247 = vrcp.f32 %v11575_v41  ;;  %v12982_v41 = vld [vmem:[#allocation75_spill] sm:$0xff]  ;;  %v5033_v27 = vmul.f32 %v11595_v14, %v12983_v48  ;;  %v11698_v15 = vmul.f32 %v7214_v24, %v12986_v44 }
 0xac4   : > { %v11657_v47 = vpop.eup %7223  ;;  %7249 = vrcp.f32 %v11508_v19  ;;  %v11670_v28 = vmul.f32 %v11600_v50, %v12982_v41  ;;  %v5613_v22 = vmul.f32 %v11260_v29, %v4503_v54  ;;  %v12984_v50 = vld [vmem:[#allocation112_spill] sm:$0xff]  ;;  %v12992_v41 = vld [vmem:[#allocation91_spill] sm:$0xff]  ;;  %v13008_v19 = vld [vmem:[#allocation81_spill] sm:$0xff]  ;;  %v13025_v17 = vmax.f32 %v11665_v4, 0.0 }
 0xac5   : > { %v7226_v7 = vpop.eup %7225  ;;  %7251 = vrcp.f32 %v11544_v11  ;;  %v5665_v55 = vadd.f32 %v5617_v13, %v12984_v50  ;;  %v5623_v21 = vmul.f32 %v11348_v26, %v5033_v27  ;;  %v12987_v13 = vld [vmem:[#allocation47_spill] sm:$0xff]  ;;  %v12993_v27 = vld [vmem:[#allocation48_spill] sm:$0xff]  ;;  %v13029_v4 = vmax.f32 %v11618_v36, 0.0 }
 0xac6   : > { %v11674_v43 = vpop.eup %7227  ;;  %7253 = vrcp.f32 %v11485_v61  ;;  %v4502_v46 = vmul.f32 %v7226_v7, %v11129_v49  ;;  %v5793_v61 = vmax.f32 %v11659_v1, 0.0  ;;  %v5032_v49 = vmul.f32 %v7212_v0, %v12985_v38  ;;  %v12990_v1 = vld [vmem:[#allocation42_spill] sm:$0xff]  ;;  %v12991_v7 = vld [vmem:[#allocation77_spill] sm:$0xff]  ;;  %v12994_v50 = vld [vmem:[#allocation32_spill] sm:$0xff] }
 0xac7   : > { %v11680_v8 = vpop.eup %7229  ;;  %7255 = vrcp.f32 %v11531_v62  ;;  %v5661_v0 = vadd.f32 %v5613_v22, %v12989_v12  ;;  %v11712_v24 = vmul.f32 0.70710677, %v5665_v55  ;;  %v12995_v38 = vld [vmem:[#allocation116_spill] sm:$0xff]  ;;  %v12998_v12 = vld [vmem:[#allocation61_spill] sm:$0xff]  ;;  %v13001_v26 = vld [vmem:[#allocation43_spill] sm:$0xff]  ;;  %v13033_v36 = vmax.f32 %v11590_v58, 0.0 }
 0xac8   : > { %v11687_v14 = vpop.eup %7231  ;;  %7257 = vrcp.f32 %v11478_v23  ;;  %v11704_v23 = vmul.f32 %v11585_v42, %v12988_v57  ;;  %v5609_v2 = vmul.f32 %v12990_v1, %v4502_v46  ;;  %v11717_v42 = vmul.f32 %v7222_v31, %v12994_v50  ;;  %v12996_v46 = vld [vmem:[#allocation69_spill] sm:$0xff]  ;;  %v13002_v50 = vld [vmem:[#allocation46_spill] sm:$0xff]  ;;  %v13037_v58 = vld [vmem:[#allocation40_spill] sm:$0xff] }
 0xac9   : > { %v11693_v59 = vpop.eup %7233  ;;  %7259 = vrcp.f32 %v11524_v56  ;;  %v11721_v22 = vmul.f32 %v11607_v3, %v12995_v38  ;;  %v5619_v44 = vmul.f32 %v12996_v46, %v5032_v49  ;;  %v12999_v1 = vld [vmem:[#allocation25_spill] sm:$0xff]  ;;  %v11732_v29 = vmul.f32 0.70710677, %v5661_v0  ;;  %v13003_v3 = vld [vmem:[#allocation90_spill] sm:$0xff]  ;;  %v13010_v0 = vld [vmem:[#allocation80_spill] sm:$0xff] }
 0xaca   : > { %v7236_v16 = vpop.eup %7235  ;;  %7261 = vrcp.f32 %v12987_v13  ;;  %v11735_v38 = vadd.f32 %v5609_v2, %v13003_v3 }
 0xacb   : > { %v11708_v54 = vpop.eup %7237  ;;  %v5650_v56 = vmul.f32 %v7236_v16, %v12991_v7  ;;  %7263 = vrcp.f32 %v12992_v41  ;;  %v12997_v16 = vld [vmem:[#allocation66_spill] sm:$0xff] }
 0xacc   : > { %v7240_v48 = vpop.eup %7239  ;;  %7265 = vrcp.f32 %v12993_v27  ;;  %v13000_v7 = vld [vmem:[#allocation74_spill] sm:$0xff] }
 0xacd   : > { %v7242_v13 = vpop.eup %7241  ;;  %v5698_v57 = vadd.f32 %v5650_v56, %v12997_v16  ;;  %v5646_v55 = vmul.f32 %v7240_v48, %v12998_v12  ;;  %7267 = vrcp.f32 %v12999_v1  ;;  %v11728_v41 = vadd.f32 %v5623_v21, %v13000_v7  ;;  %v13004_v56 = vld [vmem:[#allocation68_spill] sm:$0xff]  ;;  %v13005_v48 = vld [vmem:[#allocation67_spill] sm:$0xff]  ;;  %v13006_v1 = vld [vmem:[#allocation89_spill] sm:$0xff] }
 0xace   : > { %v7244_v27 = vpop.eup %7243  ;;  %v5642_v31 = vmul.f32 %v7242_v13, %v13001_v26  ;;  %7269 = vrcp.f32 %v13002_v50  ;;  %v13007_v7 = vld [vmem:[#allocation70_spill] sm:$0xff]  ;;  %v11744_v50 = vadd.f32 %v5619_v44, %v13010_v0 }
 0xacf   : > { %v7246_v49 = vpop.eup %7245  ;;  %v5746_v46 = vmul.f32 0.70710677, %v5698_v57  ;;  %v5694_v16 = vadd.f32 %v5646_v55, %v13004_v56  ;;  %v5652_v12 = vmul.f32 %v7244_v27, %v13005_v48  ;;  %7271 = vrcp.f32 %v13006_v1  ;;  %v13009_v13 = vld [vmem:[#allocation94_spill] sm:$0xff]  ;;  %v13011_v57 = vld [vmem:[#allocation103_spill] sm:$0xff]  ;;  %v13012_v55 = vld [vmem:[#allocation85_spill] sm:$0xff] }
 0xad0   : > { %v7248_v21 = vpop.eup %7247  ;;  %v5690_v11 = vadd.f32 %v5642_v31, %v13007_v7  ;;  %v5638_v26 = vmul.f32 %v7246_v49, %v13008_v19  ;;  %7273 = vrcp.f32 %v13009_v13  ;;  %v13013_v1 = vld [vmem:[#allocation72_spill] sm:$0xff]  ;;  %v13015_v7 = vld [vmem:[#allocation11_spill] sm:$0xff] }
 0xad1   : > { %v7250_v2 = vpop.eup %7249  ;;  %v5794_v3 = vmax.f32 %v5746_v46, 0.0  ;;  %v5742_v37 = vmul.f32 0.70710677, %v5694_v16  ;;  %v5700_v40 = vadd.f32 %v5652_v12, %v13011_v57  ;;  %v5648_v56 = vmul.f32 %v7248_v21, %v13012_v55  ;;  %v13016_v13 = vld [vmem:[#allocation104_spill] sm:$0xff]  ;;  %v13017_v46 = vld [vmem:[#allocation29_spill] sm:$0xff]  ;;  %v13018_v57 = vld [vmem:[#allocation106_spill] sm:$0xff] }
 0xad2   : > { %v7252_v27 = vpop.eup %7251  ;;  %v5738_v48 = vmul.f32 0.70710677, %v5690_v11  ;;  %v5686_v39 = vadd.f32 %v5638_v26, %v13013_v1  ;;  %v5634_v31 = vmul.f32 %v7250_v2, %v13014_v9  ;;  %7275 = vrcp.f32 %v13015_v7  ;;  %v13019_v1 = vld [vmem:[#allocation108_spill] sm:$0xff] }
 0xad3   : > { %v7254_v19 = vpop.eup %7253  ;;  %5823 = vmatprep.subr.mxu0 %v5794_v3  ;;  %v5790_v49 = vmax.f32 %v5742_v37, 0.0  ;;  %v5748_v44 = vmul.f32 0.70710677, %v5700_v40  ;;  %v5696_v0 = vadd.f32 %v5648_v56, %v13016_v13  ;;  %v5644_v16 = vmul.f32 %v7252_v27, %v13017_v46  ;;  %v13020_v37 = vld [vmem:[#allocation17_spill] sm:$0xff]  ;;  %v13021_v27 = vld [vmem:[#allocation110_spill] sm:$0xff]  ;;  %v13023_v13 = vld [vmem:[#allocation83_spill] sm:$0xff] }
 0xad4   : > { %v7256_v62 = vpop.eup %7255  ;;  %5824 = vmatpush1.msra.mxu0 %v5793_v61  ;;  %v5786_v12 = vmax.f32 %v5738_v48, 0.0  ;;  %v5734_v21 = vmul.f32 0.70710677, %v5686_v39  ;;  %v5682_v11 = vadd.f32 %v5634_v31, %v13018_v57  ;;  %v5630_v26 = vmul.f32 %v7254_v19, %v11563_v35 }
 0xad5   : > { %v7258_v55 = vpop.eup %7257  ;;  %5825 = vmatprep.subr.mxu0 %v5790_v49  ;;  %v5796_v9 = vmax.f32 %v5748_v44, 0.0  ;;  %v5744_v2 = vmul.f32 0.70710677, %v5696_v0  ;;  %v5692_v3 = vadd.f32 %v5644_v16, %v13019_v1  ;;  %v5640_v40 = vmul.f32 %v7256_v62, %v13020_v37  ;;  %v13022_v49 = vld [vmem:[#allocation109_spill] sm:$0xff] }
 0xad6   : > { %v7260_v7 = vpop.eup %7259  ;;  %5826 = vmatpush1.msra.mxu0 %v5789_v33  ;;  %v5782_v56 = vmax.f32 %v5734_v21, 0.0  ;;  %v5730_v61 = vmul.f32 0.70710677, %v5682_v11  ;;  %v5678_v39 = vadd.f32 %v5630_v26, %v13021_v27  ;;  %v5626_v48 = vmul.f32 %v7258_v55, %v11593_v18  ;;  %v13026_v21 = vld [vmem:[#allocation111_spill] sm:$0xff]  ;;  %v13027_v55 = vld [vmem:[#allocation76_spill] sm:$0xff] }
 0xad7   : > { %v7262_v31 = vpop.eup %7261  ;;  %5827 = vmatprep.subr.mxu0 %v5786_v12  ;;  %5900 = vmatprep.subr.mxu1 %v5796_v9  ;;  %v5792_v35 = vmax.f32 %v5744_v2, 0.0  ;;  %v5740_v19 = vmul.f32 0.70710677, %v5692_v3  ;;  %v5688_v44 = vadd.f32 %v5640_v40, %v13022_v49  ;;  %v5636_v0 = vmul.f32 %v7260_v7, %v13023_v13  ;;  %v13030_v40 = vld [vmem:[#allocation113_spill] sm:$0xff]  ;;  %v13034_v49 = vld [vmem:[#allocation82_spill] sm:$0xff] }
 0xad8   : > { %v7264_v62 = vpop.eup %7263  ;;  %v13024_v46 = vmax.f32 %v11566_v10, 0.0  ;;  %5901 = vmatpush1.msra.mxu1 %v13025_v17  ;;  %v5778_v33 = vmax.f32 %v5730_v61, 0.0  ;;  %v5726_v16 = vmul.f32 0.70710677, %v5678_v39  ;;  %v5674_v18 = vadd.f32 %v5626_v48, %v13026_v21  ;;  %v13031_v39 = vld [vmem:[#allocation78_spill] sm:$0xff] }
 0xad9   : > { %v5622_v12 = vmul.f32 %v7262_v31, %v11633_v5  ;;  %v7266_v57 = vpop.eup %7265  ;;  %5902 = vmatprep.subr.mxu1 %v5792_v35  ;;  %v5788_v11 = vmax.f32 %v5740_v19, 0.0  ;;  %v5736_v26 = vmul.f32 0.70710677, %v5688_v44  ;;  %v5684_v9 = vadd.f32 %v5636_v0, %v13027_v55  ;;  %v13040_v55 = vld [vmem:[#allocation95_spill] sm:$0xff] }
 0xada   : > { %5828 = vmatpush1.msra.mxu0 %v13024_v46  ;;  %v5632_v2 = vmul.f32 %v7264_v62, %v11640_v32  ;;  %v7268_v10 = vpop.eup %7267  ;;  %v13028_v1 = vmax.f32 %v11550_v60, 0.0  ;;  %5903 = vmatpush1.msra.mxu1 %v13029_v4  ;;  %v5774_v3 = vmax.f32 %v5726_v16, 0.0  ;;  %v5722_v37 = vmul.f32 0.70710677, %v5674_v18  ;;  %v13035_v46 = vld [vmem:[#allocation84_spill] sm:$0xff] }
 0xadb   : > { %5829 = vmatprep.subr.mxu0 %v5782_v56  ;;  %v5670_v5 = vadd.f32 %v5622_v12, %v13030_v40  ;;  %v5618_v7 = vmul.f32 %v7266_v57, %v11670_v28  ;;  %v7270_v56 = vpop.eup %7269  ;;  %5904 = vmatprep.subr.mxu1 %v5788_v11  ;;  %v5784_v61 = vmax.f32 %v5736_v26, 0.0  ;;  %v5732_v27 = vmul.f32 0.70710677, %v5684_v9  ;;  %v13039_v18 = vld [vmem:[#allocation88_spill] sm:$0xff] }
 0xadc   : > { %5830 = vmatpush1.msra.mxu0 %v13028_v1  ;;  %v5680_v32 = vadd.f32 %v5632_v2, %v13031_v39  ;;  %v5628_v48 = vmul.f32 %v7268_v10, %v11650_v20  ;;  %v7272_v60 = vpop.eup %7271  ;;  %v13032_v31 = vmax.f32 %v11568_v53, 0.0  ;;  %5905 = vmatpush1.msra.mxu1 %v13033_v36  ;;  %v5770_v35 = vmax.f32 %v5722_v37, 0.0  ;;  %v13044_v4 = vld [vmem:[#allocation92_spill] sm:$0xff]  ;;  %v13051_v36 = vld [vmem:[#allocation27_spill] sm:$0xff] }
 0xadd   : > { %5831 = vmatprep.subr.mxu0 %v5778_v33  ;;  %v5718_v19 = vmul.f32 0.70710677, %v5670_v5  ;;  %v5666_v28 = vadd.f32 %v5618_v7, %v13034_v49  ;;  %v5614_v44 = vmul.f32 %v7270_v56, %v11698_v15  ;;  %v7274_v13 = vpop.eup %7273  ;;  %5906 = vmatprep.subr.mxu1 %v5784_v61  ;;  %v5780_v0 = vmax.f32 %v5732_v27, 0.0  ;;  %v13045_v7 = vld [vmem:[#allocation9_spill] sm:$0xff]  ;;  %v13048_v61 = vld [vmem:[#allocation8_spill] sm:$0xff] }
 0xade   : > { %5832 = vmatpush1.msra.mxu0 %v13032_v31  ;;  %v5728_v62 = vmul.f32 0.70710677, %v5680_v32  ;;  %v5676_v20 = vadd.f32 %v5628_v48, %v13035_v46  ;;  %v5624_v17 = vmul.f32 %v7272_v60, %v11704_v23  ;;  %v13036_v53 = vmax.f32 %v11603_v25, 0.0  ;;  %v13041_v23 = vld [vmem:[#allocation31_spill] sm:$0xff]  ;;  %v13049_v60 = vld [vmem:[#allocation57_spill] sm:$0xff] }
 0xadf   : > { %5833 = vmatprep.subr.mxu0 %v5774_v3  ;;  %v13038_v33 = vmax.f32 %v13037_v58, 0.0  ;;  %v5766_v16 = vmax.f32 %v5718_v19, 0.0  ;;  %v5714_v21 = vmul.f32 0.70710677, %v5666_v28  ;;  %v5662_v12 = vadd.f32 %v5614_v44, %v13039_v18  ;;  %v7276_v57 = vpop.eup %7275  ;;  %v13052_v19 = vld [vmem:[#allocation13_spill] sm:$0xff]  ;;  %v13053_v28 = vld [vmem:[#allocation34_spill] sm:$0xff] }
 0xae0   : > { %5834 = vmatpush1.msra.mxu0 %v13036_v53  ;;  %v5610_v15 = vmul.f32 %v7274_v13, %v11717_v42  ;;  %v5776_v11 = vmax.f32 %v5728_v62, 0.0  ;;  %v5724_v26 = vmul.f32 0.70710677, %v5676_v20  ;;  %v5672_v9 = vadd.f32 %v5624_v17, %v13040_v55  ;;  %v13054_v44 = vld [vmem:[#allocation44_spill] sm:$0xff]  ;;  %v13057_v20 = vld [vmem:[#allocation87_spill] sm:$0xff]  ;;  %v13058_v53 = vld [vmem:[#allocation45_spill] sm:$0xff] }
 0xae1   : > { %5907 = vmatpush1.msra.mxu1 %v13038_v33  ;;  %5835 = vmatprep.subr.mxu0 %v5770_v35  ;;  %7277 = vrcp.f32 %v13041_v23  ;;  %v13042_v25 = vmax.f32 %v11621_v45, 0.0  ;;  %v13043_v2 = vmax.f32 %v11646_v34, 0.0  ;;  %v5710_v10 = vmul.f32 0.70710677, %v5662_v12  ;;  %v13056_v62 = vld [vmem:[#allocation60_spill] sm:$0xff]  ;;  %v13059_v33 = vld [vmem:[#allocation51_spill] sm:$0xff] }
 0xae2   : > { %5908 = vmatprep.subr.mxu1 %v5780_v0  ;;  %v5719_v1 = vmul.f32 0.70710677, %v11728_v41  ;;  %v5658_v42 = vadd.f32 %v5610_v15, %v13044_v4  ;;  %v5620_v3 = vmul.f32 %v7276_v57, %v11721_v22  ;;  %v5762_v37 = vmax.f32 %v5714_v21, 0.0  ;;  %v13055_v0 = vld [vmem:[#allocation26_spill] sm:$0xff]  ;;  %v13061_v12 = vld [vmem:[#allocation24_spill] sm:$0xff]  ;;  %v13062_v57 = vld [vmem:[#allocation63_spill] sm:$0xff] }
 0xae3   : > { %5836 = vmatpush1.msra.mxu0 %v13042_v25  ;;  %5909 = vmatpush1.msra.mxu1 %v13043_v2  ;;  %v5772_v40 = vmax.f32 %v5724_v26, 0.0  ;;  %v5720_v5 = vmul.f32 0.70710677, %v5672_v9  ;;  %7279 = vrcp.f32 %v13045_v7  ;;  %v13046_v45 = vmax.f32 %v11653_v52, 0.0  ;;  %v13063_v26 = vld [vmem:[#allocation59_spill] sm:$0xff]  ;;  %v13064_v9 = vld [vmem:[#allocation20_spill] sm:$0xff] }
 0xae4   : > { %5837 = vmatprep.subr.mxu0 %v5766_v16  ;;  %5910 = vmatprep.subr.mxu1 %v5776_v11  ;;  %v13047_v34 = vmax.f32 %v11662_v51, 0.0  ;;  %v5761_v56 = vmax.f32 %v11712_v24, 0.0  ;;  %v5706_v41 = vmul.f32 0.70710677, %v5658_v42  ;;  %v5668_v27 = vadd.f32 %v5620_v3, %v13048_v61  ;;  %v13060_v16 = vld [vmem:[#allocation53_spill] sm:$0xff]  ;;  %v13065_v25 = vld [vmem:[#allocation19_spill] sm:$0xff] }
 0xae5   : > { %5838 = vmatpush1.msra.mxu0 %v13046_v45  ;;  %v5705_v22 = vmul.f32 0.70710677, %v11735_v38  ;;  %v5758_v39 = vmax.f32 %v5710_v10, 0.0  ;;  %v5768_v32 = vmax.f32 %v5720_v5, 0.0  ;;  %v5715_v48 = vmul.f32 0.70710677, %v11744_v50 }
 0xae6   : > { %5911 = vmatpush1.msra.mxu1 %v13047_v34  ;;  %5839 = vmatprep.subr.mxu0 %v5762_v37  ;;  %7281 = vrcp.f32 %v13049_v60  ;;  %v13050_v52 = vmax.f32 %v11685_v63, 0.0  ;;  %v5757_v51 = vmax.f32 %v11732_v29, 0.0  ;;  %v5767_v24 = vmax.f32 %v5719_v1, 0.0  ;;  %v13066_v1 = vld [vmem:[#allocation23_spill] sm:$0xff]  ;;  %v13067_v42 = vld [vmem:[#allocation21_spill] sm:$0xff]  ;;  %v13069_v7 = vld [vmem:[#allocation10_spill] sm:$0xff] }
 0xae7   : > { %5912 = vmatprep.subr.mxu1 %v5772_v40  ;;  %5840 = vmatpush1.msra.mxu0 %v5761_v56  ;;  %v5716_v31 = vmul.f32 0.70710677, %v5668_v27  ;;  %v4501_v35 = vmul.f32 %v11693_v59, %v13051_v36  ;;  %v5754_v38 = vmax.f32 %v5706_v41, 0.0  ;;  %7283 = vrcp.f32 %v13052_v19  ;;  %v13068_v37 = vld [vmem:[#allocation49_spill] sm:$0xff] }
 0xae8   : > { %5913 = vmatpush1.msra.mxu1 %v13050_v52  ;;  %5841 = vmatprep.subr.mxu0 %v5758_v39  ;;  %v5753_v49 = vmax.f32 %v5705_v22, 0.0  ;;  %v5031_v63 = vmul.f32 %v11642_v30, %v13053_v28  ;;  %v5763_v29 = vmax.f32 %v5715_v48, 0.0  ;;  %v5030_v59 = vmul.f32 %v11674_v43, %v13055_v0  ;;  %v13070_v22 = vld [vmem:[#allocation50_spill] sm:$0xff]  ;;  %v329_v28 = vld [vmem:[%s11909_s2 + $0xc8] sm:$0xff] }
 0xae9   : > { %5914 = vmatprep.subr.mxu1 %v5768_v32  ;;  %5842 = vmatpush1.msra.mxu0 %v5757_v51  ;;  %v5764_v50 = vmax.f32 %v5716_v31, 0.0  ;;  %v5605_v13 = vmul.f32 %v13054_v44, %v4501_v35  ;;  %v5029_v46 = vmul.f32 %v11708_v54, %v13056_v62  ;;  %v4765_v17 = vmul.f32 %v11680_v8, %v13057_v20 }
 0xaea   : > { %5915 = vmatpush1.msra.mxu1 %v5767_v24  ;;  %5843 = vmatprep.subr.mxu0 %v5754_v38  ;;  %v5615_v58 = vmul.f32 %v13058_v53, %v5031_v63  ;;  %v5295_v21 = vmul.f32 %v11628_v6, %v13060_v16  ;;  %v5611_v15 = vmul.f32 %v13061_v12, %v5030_v59  ;;  %v13071_v24 = vld [vmem:[#allocation93_spill] sm:$0xff] }
 0xaeb   : > { %5916 = vmatprep.subr.mxu1 %v5764_v50  ;;  %5844 = vmatpush1.msra.mxu0 %v5753_v49  ;;  %v5653_v30 = vadd.f32 %v5605_v13, %v13059_v33  ;;  %v5607_v11 = vmul.f32 %v13062_v57, %v5029_v46  ;;  %v5294_v54 = vmul.f32 %v11657_v47, %v13063_v26  ;;  %v13072_v49 = vmov 0.0  }
 0xaec   : > { %5917 = vmatpush1.msra.mxu1 %v5763_v29  ;;  %v5663_v23 = vadd.f32 %v5615_v58, %v13064_v9  ;;  %v5293_v4 = vmul.f32 %v11687_v14, %v13066_v1  ;;  %v5659_v3 = vadd.f32 %v5611_v15, %v13067_v42  ;;  %v328_v14 = vld [vmem:[%s11909_s2 + $0xc0] sm:$0xff] }
 0xaed   : > { %v5701_v8 = vmul.f32 0.70710677, %v5653_v30  ;;  %v5655_v40 = vadd.f32 %v5607_v11, %v13068_v37 }
 0xaee   : > { %v7278_v18 = vpop.eup %7277  ;;  %v5711_v56 = vmul.f32 0.70710677, %v5663_v23  ;;  %v5707_v48 = vmul.f32 0.70710677, %v5659_v3 }
 0xaef   : > { %v5606_v43 = vmul.f32 %v7278_v18, %v4765_v17  ;;  %v5749_v41 = vmax.f32 %v5701_v8, 0.0  ;;  %v5703_v60 = vmul.f32 0.70710677, %v5655_v40 }
 0xaf0   : > { %v7280_v55 = vpop.eup %7279  ;;  %v5759_v36 = vmax.f32 %v5711_v56, 0.0  ;;  %v5755_v19 = vmax.f32 %v5707_v48, 0.0 }
 0xaf1   : > { %v5654_v2 = vadd.f32 %v5606_v43, %v13065_v25  ;;  %v5616_v10 = vmul.f32 %v7280_v55, %v5295_v21  ;;  %v5751_v50 = vmax.f32 %v5703_v60, 0.0 }
 0xaf3   : > { %v7282_v6 = vpop.eup %7281  ;;  %v5702_v5 = vmul.f32 0.70710677, %v5654_v2  ;;  %v5664_v45 = vadd.f32 %v5616_v10, %v13069_v7 }
 0xaf4   : > { %v5612_v34 = vmul.f32 %v7282_v6, %v5294_v54  ;;  %v7284_v47 = vpop.eup %7283 }
 0xaf5   : > { %v5750_v61 = vmax.f32 %v5702_v5, 0.0  ;;  %v5712_v27 = vmul.f32 0.70710677, %v5664_v45  ;;  %v5608_v32 = vmul.f32 %v7284_v47, %v5293_v4 }
 0xaf6   : > { %v5660_v39 = vadd.f32 %v5612_v34, %v13070_v22 }
 0xaf7   : > { %5845 = vmatprep.subr.mxu0 %v5750_v61  ;;  %v5760_v52 = vmax.f32 %v5712_v27, 0.0  ;;  %v5656_v31 = vadd.f32 %v5608_v32, %v13071_v24 }
 0xaf8   : > { %v5708_v51 = vmul.f32 0.70710677, %v5660_v39  ;;  %5846 = vmatpush1.msra.mxu0 %v5749_v41 }
 0xaf9   : > { %5918 = vmatprep.subr.mxu1 %v5760_v52  ;;  %v5704_v38 = vmul.f32 0.70710677, %v5656_v31  ;;  %6204 = vmatmul.mubr.msk.f32.vlgmr.msra.gmra.mxu0 %vm3770_vm1, %v328_v14 }
 0xafa   : > { %v5756_v35 = vmax.f32 %v5708_v51, 0.0  ;;  %5919 = vmatpush1.msra.mxu1 %v5759_v36  ;;  %5885 = vmatprep.mubr.f32.mxu0 %v13072_v49 }
 0xafb   : > { %v5752_v63 = vmax.f32 %v5704_v38, 0.0 }
 0xafc   : > { %5920 = vmatprep.subr.mxu1 %v5756_v35 }
 0xafd   : > { %5921 = vmatpush1.msra.mxu1 %v5755_v19  ;;  %6205 = vmatmul.mubr.msk.f32.gmra.mxu0 %vm3770_vm1, %v329_v28 }
 0xafe   : > { %5922 = vmatprep.subr.mxu1 %v5752_v63 }
 0xaff   : > { %5923 = vmatpush1.msra.mxu1 %v5751_v50 }
 0xb00   : > { %6206 = vmatmul.mubr.msk.f32.vlgmr.msra.gmra.mxu1 %vm3770_vm1, %v328_v14  ;;  %v5802_v44 = vpop.permute.xlu0 %5801  ;;  %v5807_v59 = vpop.permute.xlu1 %5806 }
 0xb01   : > { %5962 = vmatprep.mubr.f32.mxu1 %v13072_v49 }
 0xb04   : > { %6207 = vmatmul.mubr.msk.f32.gmra.mxu1 %vm3770_vm1, %v329_v28 }
 0xbb9   : > { %v5881_v13 = vpop.f32.mrf.mxu0 }
 0xbba   : > { %v5882_v29 = vadd.f32 %v5881_v13, %v5802_v44 }
 0xbbb   : > { %v5883_v0 = vpop.f32.mrf.mxu0 }
 0xbbc   : > { %v5884_v62 = vadd.f32 %v5883_v0, %v5802_v44  ;;  %v5969_v46 = vmax.f32 %v5882_v29, 0.0 }
 0xbbd   : > { %v5887_v20 = vpop.f32.mrf.mxu0 }
 0xbbe   : > { %v5970_v17 = vmax.f32 %v5884_v62, 0.0  ;;  %5977 = vst [vmem:[%s245_s29] sm:$0xff] %v5969_v46  ;;  %v5888_v53 = vadd.f32 %v5887_v20, %v5807_v59 }
 0xbbf   : > { %v5889_v33 = vpop.f32.mrf.mxu0 }
 0xbc0   : > { %v5958_v58 = vpop.f32.mrf.mxu1  ;;  %5978 = vst [vmem:[%s245_s29 + $0x8] sm:$0xff] %v5970_v17  ;;  %v5973_v16 = vmax.f32 %v5888_v53, 0.0  ;;  %v5890_v21 = vadd.f32 %v5889_v33, %v5807_v59 }
 0xbc1   : > { %v5959_v30 = vadd.f32 %v5958_v58, %v5802_v44 }
 0xbc2   : > { %v5960_v18 = vpop.f32.mrf.mxu1  ;;  %5981 = vst [vmem:[%s245_s29 + $0x20] sm:$0xff] %v5973_v16  ;;  %v5974_v57 = vmax.f32 %v5890_v21, 0.0 }
 0xbc3   : > { %v5961_v12 = vadd.f32 %v5960_v18, %v5802_v44  ;;  %v5971_v15 = vmax.f32 %v5959_v30, 0.0 }
 0xbc4   : > { %v5964_v11 = vpop.f32.mrf.mxu1  ;;  %5982 = vst [vmem:[%s245_s29 + $0x28] sm:$0xff] %v5974_v57 }
 0xbc5   : > { %v5972_v43 = vmax.f32 %v5961_v12, 0.0  ;;  %5979 = vst [vmem:[%s245_s29 + $0x10] sm:$0xff] %v5971_v15  ;;  %v5965_v26 = vadd.f32 %v5964_v11, %v5807_v59 }
 0xbc6   : > { %v5966_v54 = vpop.f32.mrf.mxu1 }
 0xbc7   : > { %5980 = vst [vmem:[%s245_s29 + $0x18] sm:$0xff] %v5972_v43  ;;  %v5967_v55 = vadd.f32 %v5966_v54, %v5807_v59  ;;  %v5975_v9 = vmax.f32 %v5965_v26, 0.0 }
 0xbc9   : > { %v5976_v23 = vmax.f32 %v5967_v55, 0.0  ;;  %5983 = vst [vmem:[%s245_s29 + $0x30] sm:$0xff] %v5975_v9 }
 0xbcb   : > { %5984 = vst [vmem:[%s245_s29 + $0x38] sm:$0xff] %v5976_v23 }
 0xbcc   : > { %7298 = shalt.err (!%p7295_p5)
}
 0xbcd   : > { %s7299_s14 = scalar_lea.hbm %s11864_s9, 1024  ;;  %s7303_s23 = scalar_lea.hbm %s11911_s4, 2048 }
 0xbce   : > { %p7300_p7 = scmp.ne.s32.totalorder %s11864_s9, %s7299_s14  ;;  %p7304_p12 = scmp.lt.s32.totalorder %s11864_s9, %s11911_s4 }
 0xbcf   : > { %p7305_p13 = scmp.lt.s32.totalorder %s7303_s23, %s7299_s14 }
 0xbd0   : > { %p7301_p10 = pnand %p7300_p7, %p7416_p6 }
 0xbd1   : > { %p7306_p0 = por %p7305_p13, %p7304_p12 }
 0xbd2   : > { %p7302_p11 = pneg %p7301_p10 }
 0xbd4   : > { %p7307_p1 = pnand %p7306_p0, %p7302_p11 }
 0xbd6   : > { %7310 = shalt.err (!%p7307_p1)
}
 0xbd7   : > { %s7350_s29 = smov 512   ;;  %s7351_s5 = smov 1024  }
 0xbd8   : > { %s7352_s6 = smov 32  }
 0xbd9   : > { %6215 = dma.vmem_to_hbm [thread:$0]  (%p7416_p6), %s11859_s30, 1024, %s11864_s9, %s5986_s10, %s7350_s29, %s7351_s5, %s7352_s6  }
 0xbda PF: > { %s6014_s7 = sand.u32 1, %s7333_s15   ;;  %p6218_p2 = pnand %p6069_p9, %p7420_p8 }
 0xbdb   : > { %s6015_s11 = scalar_lea.sflag [#allocation4], %s6014_s7 }
 0xbdc   : > { %p6219_p3 = pneg %p6218_p2 }
 0xbde   : > { %7328 = dma.done.wait (%p6219_p3), %s6015_s11, 1024  }
 0xbdf   : > { %7330 = vsyncadd (%p6219_p3), %s6015_s11, 4294966272  ;;  %p14_p4 = scmp.ge.s32.totalorder %s7401_s21, 4   ;;  %s13073_s15 = smov %s7337_s16 }
 0xbe0   : > { %s13074_s16 = smov %s7341_s17  ;;  %s13075_s17 = smov %s7414_s24 }
 0xbe1   : > { %s13076_s18 = smov %s7401_s21  ;;  %16 = sbr.rel (!%p14_p4) target bundleno = 3 (0x3), region = 99 }
 0xbe6   :  { %6020 = vsyncpa [#allocation4], 1 }
 0xbe7   :  { %6022 = vsyncpa [#allocation4 + $0x1], 1 }

</bundles_post_ra>
